<compile_context>
chip_gen: v7x
topology: tpu7x:2x2x1
jax: 0.10.0
libtpu: 0.0.40
codegen_flags: <defaults>
</compile_context>

<pallas_src>
import jax
import jax.numpy as jnp
import numpy as np
from jax.experimental import pallas as pl
from jax.experimental.pallas import tpu as pltpu


# ------------------------------ fused kernel --------------------------------

def _make_stem_kernel(L, Wp, Q0, C1, C2, C3):
    """Fused stem kernel for fixed static geometry.

    L  : flattened padded-frame length (Hp * Wp)
    Wp : padded frame width
    Q0 : sublane-aligned halo margin of the frame inside the scratch refs
    C1, C2, C3 : output channels of conv1 / conv2 / conv3 (+bn1)
    """
    F = L + 2 * Q0
    taps = [(kh - 1) * Wp + (kw - 1) for kh in range(3) for kw in range(3)]
    # Aligned start for the trailing-margin clear; it may overlap the last few
    # interior rows, which are rewritten later in the same invocation.
    tail_start = Q0 + (L // 8) * 8
    tail_len = F - tail_start

    def zero_margins(f, C):
        # The halo margins are only read by "wide" shifted taps whose output
        # rows are ring rows (masked to zero anyway), so they merely need to
        # hold finite values.  Clearing just these 2*Q0-ish rows replaces the
        # full-frame zeroing of the previous version.
        f[pl.ds(0, Q0), :] = jnp.zeros((Q0, C), jnp.float32)
        f[pl.ds(tail_start, tail_len), :] = jnp.zeros((tail_len, C),
                                                      jnp.float32)

    def kernel(p1_ref, mask_ref, w1_ref, b1_ref, w2_ref, b2_ref,
               w3_ref, b3_ref, sel_ref, o_ref, f1, f2, f3):
        mask = mask_ref[...]                                    # (L, 1) f32

        zero_margins(f1, C1)
        zero_margins(f2, C2)
        zero_margins(f3, C3)

        # ---- conv1 (stride 2, prebuilt tap frame) + folded BN + ReLU
        acc = jnp.dot(p1_ref[0], w1_ref[...],
                      preferred_element_type=jnp.float32)       # (L, C1)
        f1[pl.ds(Q0, L), :] = jnp.maximum(acc + b1_ref[...], 0.0) * mask

        # ---- conv2 (stride 1): 9 shifted-slice accumulated dots, all in VMEM
        acc = jnp.zeros((L, C2), jnp.float32)
        for t, d in enumerate(taps):
            x = f1[pl.ds(Q0 + d, L), :].astype(jnp.bfloat16)
            acc = acc + jnp.dot(x, w2_ref[pl.ds(t * C1, C1), :],
                                preferred_element_type=jnp.float32)
        f2[pl.ds(Q0, L), :] = jnp.maximum(acc + b2_ref[...], 0.0) * mask

        # ---- conv3 (stride 1) + bn1 + act1 (ReLU)
        acc = jnp.zeros((L, C3), jnp.float32)
        for t, d in enumerate(taps):
            x = f2[pl.ds(Q0 + d, L), :].astype(jnp.bfloat16)
            acc = acc + jnp.dot(x, w3_ref[pl.ds(t * C2, C2), :],
                                preferred_element_type=jnp.float32)
        f3[pl.ds(Q0, L), :] = jnp.maximum(acc + b3_ref[...], 0.0) * mask

        # ---- maxpool 3x3 / s2 / p1: 9-tap running max over the frame
        # (ring zeros act as -inf because activations are post-ReLU), then a
        # one-hot selection matmul does the stride-2 subsample (exact).
        m = f3[pl.ds(Q0 + taps[0], L), :]
        for d in taps[1:]:
            m = jnp.maximum(m, f3[pl.ds(Q0 + d, L), :])
        o_ref[0] = jnp.dot(sel_ref[...], m, preferred_element_type=jnp.float32)

    return kernel


# ------------------------------- front module -------------------------------

def fold_bn(gamma, beta, mean, var, eps=1e-5):
    scale = gamma / jnp.sqrt(var + eps)
    bias = beta - mean * scale
    return scale, bias


def init_front_params(key):
    """Deterministic synthetic parameters with resnet50d stem shapes."""
    ks = jax.random.split(key, 16)

    def conv_w(k, cout, cin):
        return (jax.random.normal(k, (cout, cin, 3, 3), jnp.float32)
                * (2.0 / (9 * cin)) ** 0.5)

    def bn(k, c):
        k1, k2, k3, k4 = jax.random.split(k, 4)
        gamma = 1.0 + 0.1 * jax.random.normal(k1, (c,), jnp.float32)
        beta = 0.1 * jax.random.normal(k2, (c,), jnp.float32)
        mean = 0.1 * jax.random.normal(k3, (c,), jnp.float32)
        var = jnp.abs(jax.random.normal(k4, (c,), jnp.float32)) + 0.5
        return fold_bn(gamma, beta, mean, var)

    p = {}
    p["w1"] = conv_w(ks[0], 32, 3)
    p["s1"], p["b1"] = bn(ks[1], 32)
    p["w2"] = conv_w(ks[2], 32, 32)
    p["s2"], p["b2"] = bn(ks[3], 32)
    p["w3"] = conv_w(ks[4], 64, 32)
    p["s3"], p["b3"] = bn(ks[5], 64)   # this is bn1 of the model
    return p


@jax.jit
def front_forward(x_nchw, params):
    # TODO(synk): BN is implemented in eval mode (running stats folded); the
    # training-mode batch-statistic path is not implemented.
    x = jnp.transpose(x_nchw, (0, 2, 3, 1))                 # NCHW -> NHWC
    N, H, W, Cin = x.shape
    H1, W1 = (H - 1) // 2 + 1, (W - 1) // 2 + 1             # conv1 (s2) out
    Hp, Wp = H1 + 2, W1 + 2                                  # padded frame
    L = Hp * Wp
    Q0 = ((Wp + 1 + 7) // 8) * 8                             # aligned halo
    F = L + 2 * Q0
    H2, W2 = (H1 - 1) // 2 + 1, (W1 - 1) // 2 + 1            # maxpool out
    C1, C2, C3 = 32, 32, 64
    K1 = ((9 * Cin + 7) // 8) * 8                            # pad im2col depth

    # conv1 taps (tiny, Cin=3): stride-2 gathered patches -> zero-padded frame
    xp = jnp.pad(x, ((0, 0), (1, 1), (1, 1), (0, 0)))
    views = [xp[:, kh:kh + 2 * (H1 - 1) + 1:2, kw:kw + 2 * (W1 - 1) + 1:2, :]
             for kh in range(3) for kw in range(3)]
    p1 = jnp.concatenate(views, axis=-1)                     # (N, H1, W1, 9Cin)
    p1 = jnp.pad(p1, ((0, 0), (1, 1), (1, 1), (0, 0)))       # frame halo ring
    p1 = p1.reshape(N, L, 9 * Cin)
    p1 = jnp.pad(p1, ((0, 0), (0, 0), (0, K1 - 9 * Cin))).astype(jnp.bfloat16)

    # interior mask of the flattened frame (zeros the halo ring each layer)
    mask = jnp.pad(jnp.ones((H1, W1), jnp.float32), ((1, 1), (1, 1)))
    mask = mask.reshape(L, 1)

    # weights: rows ordered (kh, kw, cin), BN scale folded in, bf16 for MXU
    def wmat(w, scale):
        kkic = jnp.transpose(w, (2, 3, 1, 0)).reshape(-1, w.shape[0])
        return (kkic * scale[None, :]).astype(jnp.bfloat16)

    w1 = jnp.pad(wmat(params["w1"], params["s1"]), ((0, K1 - 9 * Cin), (0, 0)))
    w2 = wmat(params["w2"], params["s2"])                    # (9*C1, C2)
    w3 = wmat(params["w3"], params["s3"])                    # (9*C2, C3)
    b1 = params["b1"].reshape(1, C1).astype(jnp.float32)
    b2 = params["b2"].reshape(1, C2).astype(jnp.float32)
    b3 = params["b3"].reshape(1, C3).astype(jnp.float32)

    # stride-2 maxpool subsample expressed as a one-hot selection matrix
    po, qo = jnp.meshgrid(jnp.arange(H2), jnp.arange(W2), indexing="ij")
    centers = ((2 * po + 1) * Wp + (2 * qo + 1)).reshape(-1)
    sel = jax.nn.one_hot(centers, L, dtype=jnp.float32)      # (H2*W2, L)

    # advisory cost for the XLA scheduler
    flops_per_img = (2 * L * K1 * C1 + 2 * 9 * L * C1 * C2
                     + 2 * 9 * L * C2 * C3 + 2 * (H2 * W2) * L * C3)
    bytes_accessed = (p1.size * 2 + w1.size * 2 + w2.size * 2 + w3.size * 2
                      + (b1.size + b2.size + b3.size) * 4
                      + mask.size * 4 + sel.size * 4 + N * H2 * W2 * C3 * 4)
    cost = pl.CostEstimate(flops=N * flops_per_img, transcendentals=0,
                           bytes_accessed=bytes_accessed)

    kernel = _make_stem_kernel(L, Wp, Q0, C1, C2, C3)
    out = pl.pallas_call(
        kernel,
        out_shape=jax.ShapeDtypeStruct((N, H2 * W2, C3), jnp.float32),
        grid=(N,),
        in_specs=[
            pl.BlockSpec((1, L, K1), lambda n: (n, 0, 0)),   # conv1 tap frame
            pl.BlockSpec((L, 1), lambda n: (0, 0)),          # interior mask
            pl.BlockSpec((K1, C1), lambda n: (0, 0)),
            pl.BlockSpec((1, C1), lambda n: (0, 0)),
            pl.BlockSpec((9 * C1, C2), lambda n: (0, 0)),
            pl.BlockSpec((1, C2), lambda n: (0, 0)),
            pl.BlockSpec((9 * C2, C3), lambda n: (0, 0)),
            pl.BlockSpec((1, C3), lambda n: (0, 0)),
            pl.BlockSpec((H2 * W2, L), lambda n: (0, 0)),    # maxpool select
        ],
        out_specs=pl.BlockSpec((1, H2 * W2, C3), lambda n: (n, 0, 0)),
        scratch_shapes=[
            pltpu.VMEM((F, C1), jnp.float32),                # conv1 frame
            pltpu.VMEM((F, C2), jnp.float32),                # conv2 frame
            pltpu.VMEM((F, C3), jnp.float32),                # conv3 frame
        ],
        compiler_params=pltpu.CompilerParams(
            dimension_semantics=("parallel",)),
        cost_estimate=cost,
    )(p1, mask, w1, b1, w2, b2, w3, b3, sel)

    out = out.reshape(N, H2, W2, C3)
    return jnp.transpose(out, (0, 3, 1, 2))                  # NHWC -> NCHW


# ------------------------------ pure-JAX reference ---------------------------

def ref_forward(x, p):
    def cbr(x, w, s, b, stride):
        y = jax.lax.conv_general_dilated(
            x, w, (stride, stride), ((1, 1), (1, 1)),
            dimension_numbers=("NCHW", "OIHW", "NCHW"))
        y = y * s[None, :, None, None] + b[None, :, None, None]
        return jnp.maximum(y, 0.0)
    x = cbr(x, p["w1"], p["s1"], p["b1"], 2)
    x = cbr(x, p["w2"], p["s2"], p["b2"], 1)
    x = cbr(x, p["w3"], p["s3"], p["b3"], 1)
    x = jax.lax.reduce_window(
        x, -jnp.inf, jax.lax.max, (1, 1, 3, 3), (1, 1, 2, 2),
        padding=((0, 0), (0, 0), (1, 1), (1, 1)))
    return x


if __name__ == "__main__":
    key = jax.random.PRNGKey(0)
    kx, kp = jax.random.split(key)
    x = jax.random.normal(kx, (2, 3, 32, 32), jnp.float32)   # NCHW like PyTorch
    params = init_front_params(kp)

    out = jax.block_until_ready(front_forward(x, params))
    expected = jax.block_until_ready(ref_forward(x, params))

    assert out.shape == (2, 64, 8, 8), out.shape
    np.testing.assert_allclose(np.asarray(out), np.asarray(expected),
                               rtol=2e-2, atol=2e-2)
    print("KERNEL_OK")
</pallas_src>

<mosaic_0001>
module attributes {stable_mosaic.version = 11 : i64} {
  func.func @kernel(%arg0: i32, %arg1: memref<1x324x32xbf16, #tpu.memory_space<vmem>>, %arg2: memref<324x1xf32, #tpu.memory_space<vmem>>, %arg3: memref<32x32xbf16, #tpu.memory_space<vmem>>, %arg4: memref<1x32xf32, #tpu.memory_space<vmem>>, %arg5: memref<288x32xbf16, #tpu.memory_space<vmem>>, %arg6: memref<1x32xf32, #tpu.memory_space<vmem>>, %arg7: memref<288x64xbf16, #tpu.memory_space<vmem>>, %arg8: memref<1x64xf32, #tpu.memory_space<vmem>>, %arg9: memref<64x324xf32, #tpu.memory_space<vmem>>, %arg10: memref<1x64x64xf32, #tpu.memory_space<vmem>>, %arg11: memref<372x32xf32, #tpu.memory_space<vmem>>, %arg12: memref<372x32xf32, #tpu.memory_space<vmem>>, %arg13: memref<372x64xf32, #tpu.memory_space<vmem>>) attributes {dimension_semantics = [#tpu.dimension_semantics<parallel>], iteration_bounds = array<i64: 2>, scalar_prefetch = 0 : i64, scratch_operands = 3 : i64, tpu.core_type = #tpu.core_type<tc>, window_params = [{transform_indices = @transform_0, window_bounds = array<i64: 1, 324, 32>}, {pipeline_mode = #tpu.pipeline_mode<synchronous>, transform_indices = @transform_1, window_bounds = array<i64: 324, 1>}, {pipeline_mode = #tpu.pipeline_mode<synchronous>, transform_indices = @transform_2, window_bounds = array<i64: 32, 32>}, {pipeline_mode = #tpu.pipeline_mode<synchronous>, transform_indices = @transform_3, window_bounds = array<i64: 1, 32>}, {pipeline_mode = #tpu.pipeline_mode<synchronous>, transform_indices = @transform_4, window_bounds = array<i64: 288, 32>}, {pipeline_mode = #tpu.pipeline_mode<synchronous>, transform_indices = @transform_5, window_bounds = array<i64: 1, 32>}, {pipeline_mode = #tpu.pipeline_mode<synchronous>, transform_indices = @transform_6, window_bounds = array<i64: 288, 64>}, {pipeline_mode = #tpu.pipeline_mode<synchronous>, transform_indices = @transform_7, window_bounds = array<i64: 1, 64>}, {pipeline_mode = #tpu.pipeline_mode<synchronous>, transform_indices = @transform_8, window_bounds = array<i64: 64, 324>}, {transform_indices = @transform_9, window_bounds = array<i64: 1, 64, 64>}]} {
    %c0 = arith.constant 0 : index
    %c0_0 = arith.constant 0 : index
    %0 = vector.load %arg2[%c0, %c0_0] : memref<324x1xf32, #tpu.memory_space<vmem>>, vector<324x1xf32>
    %cst = arith.constant 0.000000e+00 : f32
    %1 = vector.broadcast %cst : f32 to vector<24x32xf32>
    %c0_1 = arith.constant 0 : index
    %c0_2 = arith.constant 0 : index
    %2 = vector.load %arg11[%c0_1, %c0_2] : memref<372x32xf32, #tpu.memory_space<vmem>>, vector<24x32xf32>
    tpu.vector_store %arg11[%c0_1, %c0_2], %1 {strides = array<i32>} : memref<372x32xf32, #tpu.memory_space<vmem>>, vector<24x32xf32>,
    %cst_3 = arith.constant 0.000000e+00 : f32
    %3 = vector.broadcast %cst_3 : f32 to vector<28x32xf32>
    %c344 = arith.constant 344 : index
    %c0_4 = arith.constant 0 : index
    %4 = vector.load %arg11[%c344, %c0_4] : memref<372x32xf32, #tpu.memory_space<vmem>>, vector<28x32xf32>
    tpu.vector_store %arg11[%c344, %c0_4], %3 {strides = array<i32>} : memref<372x32xf32, #tpu.memory_space<vmem>>, vector<28x32xf32>,
    %cst_5 = arith.constant 0.000000e+00 : f32
    %5 = vector.broadcast %cst_5 : f32 to vector<24x32xf32>
    %c0_6 = arith.constant 0 : index
    %c0_7 = arith.constant 0 : index
    %6 = vector.load %arg12[%c0_6, %c0_7] : memref<372x32xf32, #tpu.memory_space<vmem>>, vector<24x32xf32>
    tpu.vector_store %arg12[%c0_6, %c0_7], %5 {strides = array<i32>} : memref<372x32xf32, #tpu.memory_space<vmem>>, vector<24x32xf32>,
    %cst_8 = arith.constant 0.000000e+00 : f32
    %7 = vector.broadcast %cst_8 : f32 to vector<28x32xf32>
    %c344_9 = arith.constant 344 : index
    %c0_10 = arith.constant 0 : index
    %8 = vector.load %arg12[%c344_9, %c0_10] : memref<372x32xf32, #tpu.memory_space<vmem>>, vector<28x32xf32>
    tpu.vector_store %arg12[%c344_9, %c0_10], %7 {strides = array<i32>} : memref<372x32xf32, #tpu.memory_space<vmem>>, vector<28x32xf32>,
    %cst_11 = arith.constant 0.000000e+00 : f32
    %9 = vector.broadcast %cst_11 : f32 to vector<24x64xf32>
    %c0_12 = arith.constant 0 : index
    %c0_13 = arith.constant 0 : index
    %10 = vector.load %arg13[%c0_12, %c0_13] : memref<372x64xf32, #tpu.memory_space<vmem>>, vector<24x64xf32>
    tpu.vector_store %arg13[%c0_12, %c0_13], %9 {strides = array<i32>} : memref<372x64xf32, #tpu.memory_space<vmem>>, vector<24x64xf32>,
    %cst_14 = arith.constant 0.000000e+00 : f32
    %11 = vector.broadcast %cst_14 : f32 to vector<28x64xf32>
    %c344_15 = arith.constant 344 : index
    %c0_16 = arith.constant 0 : index
    %12 = vector.load %arg13[%c344_15, %c0_16] : memref<372x64xf32, #tpu.memory_space<vmem>>, vector<28x64xf32>
    tpu.vector_store %arg13[%c344_15, %c0_16], %11 {strides = array<i32>} : memref<372x64xf32, #tpu.memory_space<vmem>>, vector<28x64xf32>,
    %c0_17 = arith.constant 0 : index
    %c0_18 = arith.constant 0 : index
    %c0_19 = arith.constant 0 : index
    %13 = vector.load %arg1[%c0_17, %c0_18, %c0_19] : memref<1x324x32xbf16, #tpu.memory_space<vmem>>, vector<1x324x32xbf16>
    %14 = vector.shape_cast %13 : vector<1x324x32xbf16> to vector<324x32xbf16>
    %c0_20 = arith.constant 0 : index
    %c0_21 = arith.constant 0 : index
    %15 = vector.load %arg3[%c0_20, %c0_21] : memref<32x32xbf16, #tpu.memory_space<vmem>>, vector<32x32xbf16>
    %cst_22 = arith.constant dense<0.000000e+00> : vector<324x32xf32>
    %16 = tpu.matmul %14, %15, %cst_22 {dimension_numbers = #tpu.dot_dimension_numbers<[1], [0], [0], [1], [0, 0, 1, 1], [], []>} : vector<324x32xbf16>, vector<32x32xbf16>, vector<324x32xf32> -> vector<324x32xf32>
    %c0_23 = arith.constant 0 : index
    %c0_24 = arith.constant 0 : index
    %17 = vector.load %arg4[%c0_23, %c0_24] : memref<1x32xf32, #tpu.memory_space<vmem>>, vector<1x32xf32>
    %18 = vector.broadcast %17 : vector<1x32xf32> to vector<324x32xf32>
    %19 = arith.addf %16, %18 : vector<324x32xf32>
    %cst_25 = arith.constant 0.000000e+00 : f32
    %20 = vector.broadcast %cst_25 : f32 to vector<324x32xf32>
    %21 = arith.maximumf %19, %20 : vector<324x32xf32>
    %22 = vector.broadcast %0 : vector<324x1xf32> to vector<324x32xf32>
    %23 = arith.mulf %21, %22 : vector<324x32xf32>
    %c24 = arith.constant 24 : index
    %c0_26 = arith.constant 0 : index
    %24 = vector.load %arg11[%c24, %c0_26] : memref<372x32xf32, #tpu.memory_space<vmem>>, vector<324x32xf32>
    tpu.vector_store %arg11[%c24, %c0_26], %23 {strides = array<i32>} : memref<372x32xf32, #tpu.memory_space<vmem>>, vector<324x32xf32>,
    %cst_27 = arith.constant 0.000000e+00 : f32
    %25 = vector.broadcast %cst_27 : f32 to vector<324x32xf32>
    %c5 = arith.constant 5 : index
    %c0_28 = arith.constant 0 : index
    %26 = vector.load %arg11[%c5, %c0_28] : memref<372x32xf32, #tpu.memory_space<vmem>>, vector<324x32xf32>
    %27 = arith.truncf %26 : vector<324x32xf32> to vector<324x32xbf16>
    %c0_29 = arith.constant 0 : index
    %c0_30 = arith.constant 0 : index
    %28 = vector.load %arg5[%c0_29, %c0_30] : memref<288x32xbf16, #tpu.memory_space<vmem>>, vector<32x32xbf16>
    %cst_31 = arith.constant dense<0.000000e+00> : vector<324x32xf32>
    %29 = tpu.matmul %27, %28, %cst_31 {dimension_numbers = #tpu.dot_dimension_numbers<[1], [0], [0], [1], [0, 0, 1, 1], [], []>} : vector<324x32xbf16>, vector<32x32xbf16>, vector<324x32xf32> -> vector<324x32xf32>
    %30 = arith.addf %25, %29 : vector<324x32xf32>
    %c6 = arith.constant 6 : index
    %c0_32 = arith.constant 0 : index
    %31 = vector.load %arg11[%c6, %c0_32] : memref<372x32xf32, #tpu.memory_space<vmem>>, vector<324x32xf32>
    %32 = arith.truncf %31 : vector<324x32xf32> to vector<324x32xbf16>
    %c32 = arith.constant 32 : index
    %c0_33 = arith.constant 0 : index
    %33 = vector.load %arg5[%c32, %c0_33] : memref<288x32xbf16, #tpu.memory_space<vmem>>, vector<32x32xbf16>
    %cst_34 = arith.constant dense<0.000000e+00> : vector<324x32xf32>
    %34 = tpu.matmul %32, %33, %cst_34 {dimension_numbers = #tpu.dot_dimension_numbers<[1], [0], [0], [1], [0, 0, 1, 1], [], []>} : vector<324x32xbf16>, vector<32x32xbf16>, vector<324x32xf32> -> vector<324x32xf32>
    %35 = arith.addf %30, %34 : vector<324x32xf32>
    %c7 = arith.constant 7 : index
    %c0_35 = arith.constant 0 : index
    %36 = vector.load %arg11[%c7, %c0_35] : memref<372x32xf32, #tpu.memory_space<vmem>>, vector<324x32xf32>
    %37 = arith.truncf %36 : vector<324x32xf32> to vector<324x32xbf16>
    %c64 = arith.constant 64 : index
    %c0_36 = arith.constant 0 : index
    %38 = vector.load %arg5[%c64, %c0_36] : memref<288x32xbf16, #tpu.memory_space<vmem>>, vector<32x32xbf16>
    %cst_37 = arith.constant dense<0.000000e+00> : vector<324x32xf32>
    %39 = tpu.matmul %37, %38, %cst_37 {dimension_numbers = #tpu.dot_dimension_numbers<[1], [0], [0], [1], [0, 0, 1, 1], [], []>} : vector<324x32xbf16>, vector<32x32xbf16>, vector<324x32xf32> -> vector<324x32xf32>
    %40 = arith.addf %35, %39 : vector<324x32xf32>
    %c23 = arith.constant 23 : index
    %c0_38 = arith.constant 0 : index
    %41 = vector.load %arg11[%c23, %c0_38] : memref<372x32xf32, #tpu.memory_space<vmem>>, vector<324x32xf32>
    %42 = arith.truncf %41 : vector<324x32xf32> to vector<324x32xbf16>
    %c96 = arith.constant 96 : index
    %c0_39 = arith.constant 0 : index
    %43 = vector.load %arg5[%c96, %c0_39] : memref<288x32xbf16, #tpu.memory_space<vmem>>, vector<32x32xbf16>
    %cst_40 = arith.constant dense<0.000000e+00> : vector<324x32xf32>
    %44 = tpu.matmul %42, %43, %cst_40 {dimension_numbers = #tpu.dot_dimension_numbers<[1], [0], [0], [1], [0, 0, 1, 1], [], []>} : vector<324x32xbf16>, vector<32x32xbf16>, vector<324x32xf32> -> vector<324x32xf32>
    %45 = arith.addf %40, %44 : vector<324x32xf32>
    %c24_41 = arith.constant 24 : index
    %c0_42 = arith.constant 0 : index
    %46 = vector.load %arg11[%c24_41, %c0_42] : memref<372x32xf32, #tpu.memory_space<vmem>>, vector<324x32xf32>
    %47 = arith.truncf %46 : vector<324x32xf32> to vector<324x32xbf16>
    %c128 = arith.constant 128 : index
    %c0_43 = arith.constant 0 : index
    %48 = vector.load %arg5[%c128, %c0_43] : memref<288x32xbf16, #tpu.memory_space<vmem>>, vector<32x32xbf16>
    %cst_44 = arith.constant dense<0.000000e+00> : vector<324x32xf32>
    %49 = tpu.matmul %47, %48, %cst_44 {dimension_numbers = #tpu.dot_dimension_numbers<[1], [0], [0], [1], [0, 0, 1, 1], [], []>} : vector<324x32xbf16>, vector<32x32xbf16>, vector<324x32xf32> -> vector<324x32xf32>
    %50 = arith.addf %45, %49 : vector<324x32xf32>
    %c25 = arith.constant 25 : index
    %c0_45 = arith.constant 0 : index
    %51 = vector.load %arg11[%c25, %c0_45] : memref<372x32xf32, #tpu.memory_space<vmem>>, vector<324x32xf32>
    %52 = arith.truncf %51 : vector<324x32xf32> to vector<324x32xbf16>
    %c160 = arith.constant 160 : index
    %c0_46 = arith.constant 0 : index
    %53 = vector.load %arg5[%c160, %c0_46] : memref<288x32xbf16, #tpu.memory_space<vmem>>, vector<32x32xbf16>
    %cst_47 = arith.constant dense<0.000000e+00> : vector<324x32xf32>
    %54 = tpu.matmul %52, %53, %cst_47 {dimension_numbers = #tpu.dot_dimension_numbers<[1], [0], [0], [1], [0, 0, 1, 1], [], []>} : vector<324x32xbf16>, vector<32x32xbf16>, vector<324x32xf32> -> vector<324x32xf32>
    %55 = arith.addf %50, %54 : vector<324x32xf32>
    %c41 = arith.constant 41 : index
    %c0_48 = arith.constant 0 : index
    %56 = vector.load %arg11[%c41, %c0_48] : memref<372x32xf32, #tpu.memory_space<vmem>>, vector<324x32xf32>
    %57 = arith.truncf %56 : vector<324x32xf32> to vector<324x32xbf16>
    %c192 = arith.constant 192 : index
    %c0_49 = arith.constant 0 : index
    %58 = vector.load %arg5[%c192, %c0_49] : memref<288x32xbf16, #tpu.memory_space<vmem>>, vector<32x32xbf16>
    %cst_50 = arith.constant dense<0.000000e+00> : vector<324x32xf32>
    %59 = tpu.matmul %57, %58, %cst_50 {dimension_numbers = #tpu.dot_dimension_numbers<[1], [0], [0], [1], [0, 0, 1, 1], [], []>} : vector<324x32xbf16>, vector<32x32xbf16>, vector<324x32xf32> -> vector<324x32xf32>
    %60 = arith.addf %55, %59 : vector<324x32xf32>
    %c42 = arith.constant 42 : index
    %c0_51 = arith.constant 0 : index
    %61 = vector.load %arg11[%c42, %c0_51] : memref<372x32xf32, #tpu.memory_space<vmem>>, vector<324x32xf32>
    %62 = arith.truncf %61 : vector<324x32xf32> to vector<324x32xbf16>
    %c224 = arith.constant 224 : index
    %c0_52 = arith.constant 0 : index
    %63 = vector.load %arg5[%c224, %c0_52] : memref<288x32xbf16, #tpu.memory_space<vmem>>, vector<32x32xbf16>
    %cst_53 = arith.constant dense<0.000000e+00> : vector<324x32xf32>
    %64 = tpu.matmul %62, %63, %cst_53 {dimension_numbers = #tpu.dot_dimension_numbers<[1], [0], [0], [1], [0, 0, 1, 1], [], []>} : vector<324x32xbf16>, vector<32x32xbf16>, vector<324x32xf32> -> vector<324x32xf32>
    %65 = arith.addf %60, %64 : vector<324x32xf32>
    %c43 = arith.constant 43 : index
    %c0_54 = arith.constant 0 : index
    %66 = vector.load %arg11[%c43, %c0_54] : memref<372x32xf32, #tpu.memory_space<vmem>>, vector<324x32xf32>
    %67 = arith.truncf %66 : vector<324x32xf32> to vector<324x32xbf16>
    %c256 = arith.constant 256 : index
    %c0_55 = arith.constant 0 : index
    %68 = vector.load %arg5[%c256, %c0_55] : memref<288x32xbf16, #tpu.memory_space<vmem>>, vector<32x32xbf16>
    %cst_56 = arith.constant dense<0.000000e+00> : vector<324x32xf32>
    %69 = tpu.matmul %67, %68, %cst_56 {dimension_numbers = #tpu.dot_dimension_numbers<[1], [0], [0], [1], [0, 0, 1, 1], [], []>} : vector<324x32xbf16>, vector<32x32xbf16>, vector<324x32xf32> -> vector<324x32xf32>
    %70 = arith.addf %65, %69 : vector<324x32xf32>
    %c0_57 = arith.constant 0 : index
    %c0_58 = arith.constant 0 : index
    %71 = vector.load %arg6[%c0_57, %c0_58] : memref<1x32xf32, #tpu.memory_space<vmem>>, vector<1x32xf32>
    %72 = vector.broadcast %71 : vector<1x32xf32> to vector<324x32xf32>
    %73 = arith.addf %70, %72 : vector<324x32xf32>
    %cst_59 = arith.constant 0.000000e+00 : f32
    %74 = vector.broadcast %cst_59 : f32 to vector<324x32xf32>
    %75 = arith.maximumf %73, %74 : vector<324x32xf32>
    %76 = vector.broadcast %0 : vector<324x1xf32> to vector<324x32xf32>
    %77 = arith.mulf %75, %76 : vector<324x32xf32>
    %c24_60 = arith.constant 24 : index
    %c0_61 = arith.constant 0 : index
    %78 = vector.load %arg12[%c24_60, %c0_61] : memref<372x32xf32, #tpu.memory_space<vmem>>, vector<324x32xf32>
    tpu.vector_store %arg12[%c24_60, %c0_61], %77 {strides = array<i32>} : memref<372x32xf32, #tpu.memory_space<vmem>>, vector<324x32xf32>,
    %cst_62 = arith.constant 0.000000e+00 : f32
    %79 = vector.broadcast %cst_62 : f32 to vector<324x64xf32>
    %c5_63 = arith.constant 5 : index
    %c0_64 = arith.constant 0 : index
    %80 = vector.load %arg12[%c5_63, %c0_64] : memref<372x32xf32, #tpu.memory_space<vmem>>, vector<324x32xf32>
    %81 = arith.truncf %80 : vector<324x32xf32> to vector<324x32xbf16>
    %c0_65 = arith.constant 0 : index
    %c0_66 = arith.constant 0 : index
    %82 = vector.load %arg7[%c0_65, %c0_66] : memref<288x64xbf16, #tpu.memory_space<vmem>>, vector<32x64xbf16>
    %cst_67 = arith.constant dense<0.000000e+00> : vector<324x64xf32>
    %83 = tpu.matmul %81, %82, %cst_67 {dimension_numbers = #tpu.dot_dimension_numbers<[1], [0], [0], [1], [0, 0, 1, 1], [], []>} : vector<324x32xbf16>, vector<32x64xbf16>, vector<324x64xf32> -> vector<324x64xf32>
    %84 = arith.addf %79, %83 : vector<324x64xf32>
    %c6_68 = arith.constant 6 : index
    %c0_69 = arith.constant 0 : index
    %85 = vector.load %arg12[%c6_68, %c0_69] : memref<372x32xf32, #tpu.memory_space<vmem>>, vector<324x32xf32>
    %86 = arith.truncf %85 : vector<324x32xf32> to vector<324x32xbf16>
    %c32_70 = arith.constant 32 : index
    %c0_71 = arith.constant 0 : index
    %87 = vector.load %arg7[%c32_70, %c0_71] : memref<288x64xbf16, #tpu.memory_space<vmem>>, vector<32x64xbf16>
    %cst_72 = arith.constant dense<0.000000e+00> : vector<324x64xf32>
    %88 = tpu.matmul %86, %87, %cst_72 {dimension_numbers = #tpu.dot_dimension_numbers<[1], [0], [0], [1], [0, 0, 1, 1], [], []>} : vector<324x32xbf16>, vector<32x64xbf16>, vector<324x64xf32> -> vector<324x64xf32>
    %89 = arith.addf %84, %88 : vector<324x64xf32>
    %c7_73 = arith.constant 7 : index
    %c0_74 = arith.constant 0 : index
    %90 = vector.load %arg12[%c7_73, %c0_74] : memref<372x32xf32, #tpu.memory_space<vmem>>, vector<324x32xf32>
    %91 = arith.truncf %90 : vector<324x32xf32> to vector<324x32xbf16>
    %c64_75 = arith.constant 64 : index
    %c0_76 = arith.constant 0 : index
    %92 = vector.load %arg7[%c64_75, %c0_76] : memref<288x64xbf16, #tpu.memory_space<vmem>>, vector<32x64xbf16>
    %cst_77 = arith.constant dense<0.000000e+00> : vector<324x64xf32>
    %93 = tpu.matmul %91, %92, %cst_77 {dimension_numbers = #tpu.dot_dimension_numbers<[1], [0], [0], [1], [0, 0, 1, 1], [], []>} : vector<324x32xbf16>, vector<32x64xbf16>, vector<324x64xf32> -> vector<324x64xf32>
    %94 = arith.addf %89, %93 : vector<324x64xf32>
    %c23_78 = arith.constant 23 : index
    %c0_79 = arith.constant 0 : index
    %95 = vector.load %arg12[%c23_78, %c0_79] : memref<372x32xf32, #tpu.memory_space<vmem>>, vector<324x32xf32>
    %96 = arith.truncf %95 : vector<324x32xf32> to vector<324x32xbf16>
    %c96_80 = arith.constant 96 : index
    %c0_81 = arith.constant 0 : index
    %97 = vector.load %arg7[%c96_80, %c0_81] : memref<288x64xbf16, #tpu.memory_space<vmem>>, vector<32x64xbf16>
    %cst_82 = arith.constant dense<0.000000e+00> : vector<324x64xf32>
    %98 = tpu.matmul %96, %97, %cst_82 {dimension_numbers = #tpu.dot_dimension_numbers<[1], [0], [0], [1], [0, 0, 1, 1], [], []>} : vector<324x32xbf16>, vector<32x64xbf16>, vector<324x64xf32> -> vector<324x64xf32>
    %99 = arith.addf %94, %98 : vector<324x64xf32>
    %c24_83 = arith.constant 24 : index
    %c0_84 = arith.constant 0 : index
    %100 = vector.load %arg12[%c24_83, %c0_84] : memref<372x32xf32, #tpu.memory_space<vmem>>, vector<324x32xf32>
    %101 = arith.truncf %100 : vector<324x32xf32> to vector<324x32xbf16>
    %c128_85 = arith.constant 128 : index
    %c0_86 = arith.constant 0 : index
    %102 = vector.load %arg7[%c128_85, %c0_86] : memref<288x64xbf16, #tpu.memory_space<vmem>>, vector<32x64xbf16>
    %cst_87 = arith.constant dense<0.000000e+00> : vector<324x64xf32>
    %103 = tpu.matmul %101, %102, %cst_87 {dimension_numbers = #tpu.dot_dimension_numbers<[1], [0], [0], [1], [0, 0, 1, 1], [], []>} : vector<324x32xbf16>, vector<32x64xbf16>, vector<324x64xf32> -> vector<324x64xf32>
    %104 = arith.addf %99, %103 : vector<324x64xf32>
    %c25_88 = arith.constant 25 : index
    %c0_89 = arith.constant 0 : index
    %105 = vector.load %arg12[%c25_88, %c0_89] : memref<372x32xf32, #tpu.memory_space<vmem>>, vector<324x32xf32>
    %106 = arith.truncf %105 : vector<324x32xf32> to vector<324x32xbf16>
    %c160_90 = arith.constant 160 : index
    %c0_91 = arith.constant 0 : index
    %107 = vector.load %arg7[%c160_90, %c0_91] : memref<288x64xbf16, #tpu.memory_space<vmem>>, vector<32x64xbf16>
    %cst_92 = arith.constant dense<0.000000e+00> : vector<324x64xf32>
    %108 = tpu.matmul %106, %107, %cst_92 {dimension_numbers = #tpu.dot_dimension_numbers<[1], [0], [0], [1], [0, 0, 1, 1], [], []>} : vector<324x32xbf16>, vector<32x64xbf16>, vector<324x64xf32> -> vector<324x64xf32>
    %109 = arith.addf %104, %108 : vector<324x64xf32>
    %c41_93 = arith.constant 41 : index
    %c0_94 = arith.constant 0 : index
    %110 = vector.load %arg12[%c41_93, %c0_94] : memref<372x32xf32, #tpu.memory_space<vmem>>, vector<324x32xf32>
    %111 = arith.truncf %110 : vector<324x32xf32> to vector<324x32xbf16>
    %c192_95 = arith.constant 192 : index
    %c0_96 = arith.constant 0 : index
    %112 = vector.load %arg7[%c192_95, %c0_96] : memref<288x64xbf16, #tpu.memory_space<vmem>>, vector<32x64xbf16>
    %cst_97 = arith.constant dense<0.000000e+00> : vector<324x64xf32>
    %113 = tpu.matmul %111, %112, %cst_97 {dimension_numbers = #tpu.dot_dimension_numbers<[1], [0], [0], [1], [0, 0, 1, 1], [], []>} : vector<324x32xbf16>, vector<32x64xbf16>, vector<324x64xf32> -> vector<324x64xf32>
    %114 = arith.addf %109, %113 : vector<324x64xf32>
    %c42_98 = arith.constant 42 : index
    %c0_99 = arith.constant 0 : index
    %115 = vector.load %arg12[%c42_98, %c0_99] : memref<372x32xf32, #tpu.memory_space<vmem>>, vector<324x32xf32>
    %116 = arith.truncf %115 : vector<324x32xf32> to vector<324x32xbf16>
    %c224_100 = arith.constant 224 : index
    %c0_101 = arith.constant 0 : index
    %117 = vector.load %arg7[%c224_100, %c0_101] : memref<288x64xbf16, #tpu.memory_space<vmem>>, vector<32x64xbf16>
    %cst_102 = arith.constant dense<0.000000e+00> : vector<324x64xf32>
    %118 = tpu.matmul %116, %117, %cst_102 {dimension_numbers = #tpu.dot_dimension_numbers<[1], [0], [0], [1], [0, 0, 1, 1], [], []>} : vector<324x32xbf16>, vector<32x64xbf16>, vector<324x64xf32> -> vector<324x64xf32>
    %119 = arith.addf %114, %118 : vector<324x64xf32>
    %c43_103 = arith.constant 43 : index
    %c0_104 = arith.constant 0 : index
    %120 = vector.load %arg12[%c43_103, %c0_104] : memref<372x32xf32, #tpu.memory_space<vmem>>, vector<324x32xf32>
    %121 = arith.truncf %120 : vector<324x32xf32> to vector<324x32xbf16>
    %c256_105 = arith.constant 256 : index
    %c0_106 = arith.constant 0 : index
    %122 = vector.load %arg7[%c256_105, %c0_106] : memref<288x64xbf16, #tpu.memory_space<vmem>>, vector<32x64xbf16>
    %cst_107 = arith.constant dense<0.000000e+00> : vector<324x64xf32>
    %123 = tpu.matmul %121, %122, %cst_107 {dimension_numbers = #tpu.dot_dimension_numbers<[1], [0], [0], [1], [0, 0, 1, 1], [], []>} : vector<324x32xbf16>, vector<32x64xbf16>, vector<324x64xf32> -> vector<324x64xf32>
    %124 = arith.addf %119, %123 : vector<324x64xf32>
    %c0_108 = arith.constant 0 : index
    %c0_109 = arith.constant 0 : index
    %125 = vector.load %arg8[%c0_108, %c0_109] : memref<1x64xf32, #tpu.memory_space<vmem>>, vector<1x64xf32>
    %126 = vector.broadcast %125 : vector<1x64xf32> to vector<324x64xf32>
    %127 = arith.addf %124, %126 : vector<324x64xf32>
    %cst_110 = arith.constant 0.000000e+00 : f32
    %128 = vector.broadcast %cst_110 : f32 to vector<324x64xf32>
    %129 = arith.maximumf %127, %128 : vector<324x64xf32>
    %130 = vector.broadcast %0 : vector<324x1xf32> to vector<324x64xf32>
    %131 = arith.mulf %129, %130 : vector<324x64xf32>
    %c24_111 = arith.constant 24 : index
    %c0_112 = arith.constant 0 : index
    %132 = vector.load %arg13[%c24_111, %c0_112] : memref<372x64xf32, #tpu.memory_space<vmem>>, vector<324x64xf32>
    tpu.vector_store %arg13[%c24_111, %c0_112], %131 {strides = array<i32>} : memref<372x64xf32, #tpu.memory_space<vmem>>, vector<324x64xf32>,
    %c5_113 = arith.constant 5 : index
    %c0_114 = arith.constant 0 : index
    %133 = vector.load %arg13[%c5_113, %c0_114] : memref<372x64xf32, #tpu.memory_space<vmem>>, vector<324x64xf32>
    %c6_115 = arith.constant 6 : index
    %c0_116 = arith.constant 0 : index
    %134 = vector.load %arg13[%c6_115, %c0_116] : memref<372x64xf32, #tpu.memory_space<vmem>>, vector<324x64xf32>
    %135 = arith.maximumf %133, %134 : vector<324x64xf32>
    %c7_117 = arith.constant 7 : index
    %c0_118 = arith.constant 0 : index
    %136 = vector.load %arg13[%c7_117, %c0_118] : memref<372x64xf32, #tpu.memory_space<vmem>>, vector<324x64xf32>
    %137 = arith.maximumf %135, %136 : vector<324x64xf32>
    %c23_119 = arith.constant 23 : index
    %c0_120 = arith.constant 0 : index
    %138 = vector.load %arg13[%c23_119, %c0_120] : memref<372x64xf32, #tpu.memory_space<vmem>>, vector<324x64xf32>
    %139 = arith.maximumf %137, %138 : vector<324x64xf32>
    %c24_121 = arith.constant 24 : index
    %c0_122 = arith.constant 0 : index
    %140 = vector.load %arg13[%c24_121, %c0_122] : memref<372x64xf32, #tpu.memory_space<vmem>>, vector<324x64xf32>
    %141 = arith.maximumf %139, %140 : vector<324x64xf32>
    %c25_123 = arith.constant 25 : index
    %c0_124 = arith.constant 0 : index
    %142 = vector.load %arg13[%c25_123, %c0_124] : memref<372x64xf32, #tpu.memory_space<vmem>>, vector<324x64xf32>
    %143 = arith.maximumf %141, %142 : vector<324x64xf32>
    %c41_125 = arith.constant 41 : index
    %c0_126 = arith.constant 0 : index
    %144 = vector.load %arg13[%c41_125, %c0_126] : memref<372x64xf32, #tpu.memory_space<vmem>>, vector<324x64xf32>
    %145 = arith.maximumf %143, %144 : vector<324x64xf32>
    %c42_127 = arith.constant 42 : index
    %c0_128 = arith.constant 0 : index
    %146 = vector.load %arg13[%c42_127, %c0_128] : memref<372x64xf32, #tpu.memory_space<vmem>>, vector<324x64xf32>
    %147 = arith.maximumf %145, %146 : vector<324x64xf32>
    %c43_129 = arith.constant 43 : index
    %c0_130 = arith.constant 0 : index
    %148 = vector.load %arg13[%c43_129, %c0_130] : memref<372x64xf32, #tpu.memory_space<vmem>>, vector<324x64xf32>
    %149 = arith.maximumf %147, %148 : vector<324x64xf32>
    %c0_131 = arith.constant 0 : index
    %c0_132 = arith.constant 0 : index
    %150 = vector.load %arg9[%c0_131, %c0_132] : memref<64x324xf32, #tpu.memory_space<vmem>>, vector<64x324xf32>
    %cst_133 = arith.constant dense<0.000000e+00> : vector<64x64xf32>
    %151 = tpu.matmul %150, %149, %cst_133 {dimension_numbers = #tpu.dot_dimension_numbers<[1], [0], [0], [1], [0, 0, 1, 1], [], []>} : vector<64x324xf32>, vector<324x64xf32>, vector<64x64xf32> -> vector<64x64xf32>
    %c0_134 = arith.constant 0 : index
    %c0_135 = arith.constant 0 : index
    %c0_136 = arith.constant 0 : index
    %152 = vector.load %arg10[%c0_134, %c0_135, %c0_136] : memref<1x64x64xf32, #tpu.memory_space<vmem>>, vector<1x64x64xf32>
    %153 = vector.shape_cast %152 : vector<1x64x64xf32> to vector<64x64xf32>
    %154 = vector.shape_cast %151 : vector<64x64xf32> to vector<1x64x64xf32>
    tpu.vector_store %arg10[%c0_134, %c0_135, %c0_136], %154 {strides = array<i32>} : memref<1x64x64xf32, #tpu.memory_space<vmem>>, vector<1x64x64xf32>,
    return
  }
  func.func @transform_0(%arg0: i32) -> (i32, i32, i32) {
    %c0_i32 = arith.constant 0 : i32
    %c0_i32_0 = arith.constant 0 : i32
    %c0_i32_1 = arith.constant 0 : i32
    return %arg0, %c0_i32, %c0_i32_0 : i32, i32, i32
  }
  func.func @transform_1(%arg0: i32) -> (i32, i32) {
    %c0_i32 = arith.constant 0 : i32
    %c0_i32_0 = arith.constant 0 : i32
    %c0_i32_1 = arith.constant 0 : i32
    return %c0_i32, %c0_i32_0 : i32, i32
  }
  func.func @transform_2(%arg0: i32) -> (i32, i32) {
    %c0_i32 = arith.constant 0 : i32
    %c0_i32_0 = arith.constant 0 : i32
    %c0_i32_1 = arith.constant 0 : i32
    return %c0_i32, %c0_i32_0 : i32, i32
  }
  func.func @transform_3(%arg0: i32) -> (i32, i32) {
    %c0_i32 = arith.constant 0 : i32
    %c0_i32_0 = arith.constant 0 : i32
    %c0_i32_1 = arith.constant 0 : i32
    return %c0_i32, %c0_i32_0 : i32, i32
  }
  func.func @transform_4(%arg0: i32) -> (i32, i32) {
    %c0_i32 = arith.constant 0 : i32
    %c0_i32_0 = arith.constant 0 : i32
    %c0_i32_1 = arith.constant 0 : i32
    return %c0_i32, %c0_i32_0 : i32, i32
  }
  func.func @transform_5(%arg0: i32) -> (i32, i32) {
    %c0_i32 = arith.constant 0 : i32
    %c0_i32_0 = arith.constant 0 : i32
    %c0_i32_1 = arith.constant 0 : i32
    return %c0_i32, %c0_i32_0 : i32, i32
  }
  func.func @transform_6(%arg0: i32) -> (i32, i32) {
    %c0_i32 = arith.constant 0 : i32
    %c0_i32_0 = arith.constant 0 : i32
    %c0_i32_1 = arith.constant 0 : i32
    return %c0_i32, %c0_i32_0 : i32, i32
  }
  func.func @transform_7(%arg0: i32) -> (i32, i32) {
    %c0_i32 = arith.constant 0 : i32
    %c0_i32_0 = arith.constant 0 : i32
    %c0_i32_1 = arith.constant 0 : i32
    return %c0_i32, %c0_i32_0 : i32, i32
  }
  func.func @transform_8(%arg0: i32) -> (i32, i32) {
    %c0_i32 = arith.constant 0 : i32
    %c0_i32_0 = arith.constant 0 : i32
    %c0_i32_1 = arith.constant 0 : i32
    return %c0_i32, %c0_i32_0 : i32, i32
  }
  func.func @transform_9(%arg0: i32) -> (i32, i32, i32) {
    %c0_i32 = arith.constant 0 : i32
    %c0_i32_0 = arith.constant 0 : i32
    %c0_i32_1 = arith.constant 0 : i32
    return %arg0, %c0_i32, %c0_i32_0 : i32, i32, i32
  }
}

</mosaic_0001>

<bundles_post_ra>
// kernel: front_forward.1
= control target key start
LH: loop header
LB: loop body
LE: loop exit
PB: predicated region body
PF: predicated region fallthrough
CT: control target
= control target key end

     0   :  { %14 = vsyncpa [#allocation6], 0  ;;  %s15798_s0 = inlined_call_operand.vmem [shape: bf16[2,324,32], index: 0, kind: input, shape index: {}]   ;;  %s15799_s1 = inlined_call_operand.vmem [shape: f32[324,1], index: 1, kind: input, shape index: {}]   ;;  %s15800_s2 = inlined_call_operand.vmem [shape: bf16[32,32], index: 2, kind: input, shape index: {}]   ;;  %s15801_s3 = inlined_call_operand.vmem [shape: f32[1,32], index: 3, kind: input, shape index: {}]   ;;  %s15802_s4 = inlined_call_operand.vmem [shape: bf16[288,32], index: 4, kind: input, shape index: {}]   ;;  %s15803_s5 = inlined_call_operand.vmem [shape: f32[1,32], index: 5, kind: input, shape index: {}]   ;;  %s15804_s6 = inlined_call_operand.vmem [shape: bf16[288,64], index: 6, kind: input, shape index: {}]   ;;  %s15805_s7 = inlined_call_operand.vmem [shape: f32[1,64], index: 7, kind: input, shape index: {}]   ;;  %s15806_s8 = inlined_call_operand.vmem [shape: f32[64,324], index: 8, kind: input, shape index: {}]   ;;  %s15807_s9 = inlined_call_operand.hbm [shape: f32[2,64,64], index: 9, kind: output, shape index: {}]  }
   0x1   :  { %16 = vsyncpa [#allocation6 + $0x1], 0  ;;  %s12151_s30 = smov 0   ;;  %s12153_s10 = smov 0  }
   0x2   :  { %s12155_s11 = smov 0   ;;  %s12157_s12 = smov 0  }
   0x3 LB: > { %s12172_s13 = sadd.s32 4294967295, %s12093_s12   ;;  %s9178_s14 = sadd.s32 4294967294, %s12093_s12   ;;  %s12093_s12 = sphi %s12157_s12, %s16103_s12   ;;  %s12089_s11 = sphi %s12155_s11, %s16102_s11   ;;  %s12085_s10 = sphi %s12153_s10, %s16101_s10   ;;  %s12081_s30 = sphi %s12151_s30, %s16100_s30  }
   0x4   : > { %s12176_s15 = sadd.s32 1, %s12093_s12   ;;  %s223_s16 = sadd.s32 1, %s12089_s11 }
   0x5   : > { %s220_s17 = ssub.s32 %s12093_s12, %s12176_s15  ;;  %p233_p0 = scmp.ne.s32.totalorder %s12089_s11, %s12085_s10 }
   0x6   : > { %p221_p1 = scmp.eq.s32.totalorder %s220_s17, 0  ;;  %p234_p2 = scmp.eq.s32.totalorder %s12172_s13, 1 }
   0x7   : > { %p239_p3 = scmp.ne.s32.totalorder %s12085_s10, %s12081_s30  ;;  %p240_p4 = scmp.eq.s32.totalorder %s9178_s14, 1 }
   0x8   : > { %s12187_s18 = scalar_select %p221_p1, %s12089_s11, %s223_s16  }
   0x9   : > { %p12189_p5 = por %p234_p2, %p233_p0  ;;  %p12193_p6 = por %p240_p4, %p239_p3 }
   0xa   : > { %p9181_p7 = scmp.ge.s32.totalorder %s12093_s12, 1  ;;  %p290_p8 = scmp.lt.s32.totalorder %s12093_s12, 3 }
   0xc   : > { %p291_p9 = pnand %p9181_p7, %p290_p8 }
   0xe   : > { %294 = sbr.rel (%p291_p9) target bundleno = 2480 (0x9b0), region = 56 }
  0x15   : > { %v11971_v0 = vld [vmem:[%s15800_s2] sm:$0xff]   ;;  %v15856_v1 = vmov 0.0   ;;  %v11972_v2 = vld [vmem:[%s15800_s2 + $0x8] sm:$0xff]   ;;  %p326_p10 = scmp.lt.s32.totalorder %s12172_s13, 1  ;;  %vm373_vm0 = vcmask 261120   ;;  %vm12096_vm1 = vmmov 0  }
  0x16   : > { %10170 = vmatprep.subr.bf16.mxu0 %v15856_v1  ;;  %11920 = vmatprep.subr.bf16.mxu1 %v15856_v1  ;;  %374 = vst.msk [vmem:[#allocation2] sm:$0xff] %vm373_vm0, %v15856_v1  ;;  %375 = vst.msk [vmem:[#allocation2 + $0x8] sm:$0xff] %vm373_vm0, %v15856_v1  ;;  %v332_v3 = vld [vmem:[%s15799_s1] sm:$0xff]  ;;  %v334_v4 = vld [vmem:[%s15799_s1 + $0x10] sm:$0xff]  ;;  %v12097_v5 = vmov 0   ;;  %vm380_vm2 = vcmask 257024  }
  0x17   : > { %10171 = vmatpush3.bf16.msra.mxu0 %v11971_v0  ;;  %11922 = vmatpush3.bf16.msra.mxu1 %v11971_v0  ;;  %376 = vst.msk [vmem:[#allocation2 + $0x10] sm:$0xff] %vm373_vm0, %v15856_v1  ;;  %377 = vst.msk [vmem:[#allocation2 + $0x158] sm:$0xff] %vm373_vm0, %v15856_v1  ;;  %s327_s25 = scalar_select %p326_p10, %s12172_s13, 1  ;;  %v333_v6 = vld [vmem:[%s15799_s1 + $0x8] sm:$0xff]  ;;  %v335_v7 = vld [vmem:[%s15799_s1 + $0x18] sm:$0xff]  ;;  %vm389_vm3 = vcmask 523264  }
  0x18   : > { %10172 = vmatprep.subr.bf16.mxu0 %v15856_v1  ;;  %11921 = vmatprep.subr.bf16.mxu1 %v15856_v1  ;;  %378 = vst.msk [vmem:[#allocation2 + $0x160] sm:$0xff] %vm373_vm0, %v15856_v1  ;;  %379 = vst.msk [vmem:[#allocation2 + $0x168] sm:$0xff] %vm373_vm0, %v15856_v1  ;;  %v336_v10 = vld [vmem:[%s15799_s1 + $0x20] sm:$0xff]  ;;  %v338_v11 = vld [vmem:[%s15799_s1 + $0x30] sm:$0xff]  ;;  %vm396_vm4 = vcmask 519168   ;;  %vm8880_vm5 = vcmask 1043456  }
  0x19   : > { %382 = vst.msk [vmem:[#allocation3] sm:$0xff] %vm373_vm0, %v15856_v1  ;;  %383 = vst.msk [vmem:[#allocation3 + $0x8] sm:$0xff] %vm373_vm0, %v15856_v1  ;;  %10174 = vmatprep.mubr.msk.bf16.mxu0 %vm12096_vm1, %v15856_v1  ;;  %10230 = vmatprep.mubr.msk.bf16.mxu1 %vm12096_vm1, %v15856_v1  ;;  %s11924_s14 = smul.u32 164, %s327_s25  ;;  %v337_v12 = vld [vmem:[%s15799_s1 + $0x28] sm:$0xff]  ;;  %v339_v15 = vld [vmem:[%s15799_s1 + $0x38] sm:$0xff]  ;;  %vm8855_vm6 = vcmask 556032  }
  0x1a   : > { %384 = vst.msk [vmem:[#allocation3 + $0x10] sm:$0xff] %vm373_vm0, %v15856_v1  ;;  %385 = vst.msk [vmem:[#allocation3 + $0x158] sm:$0xff] %vm373_vm0, %v15856_v1  ;;  %11969 = vset.pattern.permute.xlu0 %v12097_v5  ;;  %11970 = vset.pattern.permute.xlu1 %v12097_v5  ;;  %v340_v16 = vld [vmem:[%s15799_s1 + $0x40] sm:$0xff]  ;;  %v341_v17 = vld [vmem:[%s15799_s1 + $0x48] sm:$0xff]  ;;  %s9659_s22 = sshll.u32 %s12172_s13, 10  ;;  %s12098_s28 = smov [#allocation5]  }
  0x1b   : > { %386 = vst.msk [vmem:[#allocation3 + $0x160] sm:$0xff] %vm373_vm0, %v15856_v1  ;;  %387 = vst.msk [vmem:[#allocation3 + $0x168] sm:$0xff] %vm373_vm0, %v15856_v1  ;;  %10173 = vmatpush3.bf16.msra.mxu0 %v11972_v2  ;;  %11923 = vmatpush3.bf16.msra.mxu1 %v11972_v2  ;;  %s12250_s21 = scalar_lea.vmem %s15798_s0, %s11924_s14  ;;  %v342_v20 = vld [vmem:[%s15799_s1 + $0x50] sm:$0xff]  ;;  %v343_v21 = vld [vmem:[%s15799_s1 + $0x58] sm:$0xff]  ;;  %s15749_s25 = scalar_lea.hbm %s15807_s9, %s9659_s22 }
  0x1c   : > { %871 = vperm.xlu0 %11969, %v332_v3   ;;  %881 = vperm.xlu1 %11970, %v334_v4   ;;  %v11973_v8 = vld [vmem:[%s12250_s21] sm:$0xff]   ;;  %v11974_v9 = vld [vmem:[%s12250_s21 + $0x70] sm:$0xff]   ;;  %v11975_v13 = vld [vmem:[%s12250_s21 + $0x8] sm:$0xff]   ;;  %s12035_s29 = sshll.u32 %s12098_s28, 4  ;;  %s12036_s29 = int_to_ptr.vmem [resolvable:$false] %s12035_s29 }
  0x1d   : > { %10258 = vmatprep.subr.bf16.mxu1 %v15856_v1  ;;  %10346 = vmatprep.subr.bf16.mxu0 %v15856_v1  ;;  %v11976_v14 = vld [vmem:[%s12250_s21 + $0x78] sm:$0xff]   ;;  %v11977_v18 = vld [vmem:[%s12250_s21 + $0x10] sm:$0xff]   ;;  %v11978_v19 = vld [vmem:[%s12250_s21 + $0x80] sm:$0xff]   ;;  %s12037_s14 = scalar_lea.vmem %s12036_s29, 2048 }
  0x1e   : > { %10175 = vmatmul.mubr.msk.bf16.vlgmr.msra.gmra.mrb[0].mxu0 %vm373_vm0, %v11973_v8  ;;  %10231 = vmatmul.mubr.msk.bf16.vlgmr.msra.gmra.mrb[0].mxu1 %vm373_vm0, %v11974_v9  ;;  %v344_v22 = vld [vmem:[%s15799_s1 + $0x60] sm:$0xff]  ;;  %v345_v23 = vld [vmem:[%s15799_s1 + $0x68] sm:$0xff]  ;;  %v11979_v24 = vld [vmem:[%s12250_s21 + $0x18] sm:$0xff]  }
  0x1f   : > { %10178 = vmatprep.mubr.msk.bf16.mxu0 %vm12096_vm1, %v15856_v1  ;;  %10234 = vmatprep.mubr.msk.bf16.mxu1 %vm12096_vm1, %v15856_v1  ;;  %v11980_v25 = vld [vmem:[%s12250_s21 + $0x88] sm:$0xff]   ;;  %v346_v26 = vld [vmem:[%s15799_s1 + $0x70] sm:$0xff]  ;;  %v347_v27 = vld [vmem:[%s15799_s1 + $0x78] sm:$0xff] }
  0x20   : > { %876 = vperm.xlu0 %11969, %v333_v6   ;;  %886 = vperm.xlu1 %11970, %v335_v7   ;;  %v348_v28 = vld [vmem:[%s15799_s1 + $0x80] sm:$0xff]  ;;  %v349_v29 = vld [vmem:[%s15799_s1 + $0x88] sm:$0xff]  ;;  %v11982_v31 = vld [vmem:[%s12250_s21 + $0x90] sm:$0xff]  }
  0x21   : > { %v11981_v30 = vld [vmem:[%s12250_s21 + $0x20] sm:$0xff]   ;;  %v350_v32 = vld [vmem:[%s15799_s1 + $0x90] sm:$0xff]  ;;  %v351_v33 = vld [vmem:[%s15799_s1 + $0x98] sm:$0xff] }
  0x22   : > { %v352_v34 = vld [vmem:[%s15799_s1 + $0xa0] sm:$0xff]  ;;  %v353_v35 = vld [vmem:[%s15799_s1 + $0xa8] sm:$0xff]  ;;  %v11984_v37 = vld [vmem:[%s12250_s21 + $0x98] sm:$0xff]  }
  0x23   : > { %v11983_v36 = vld [vmem:[%s12250_s21 + $0x28] sm:$0xff]   ;;  %v354_v38 = vld [vmem:[%s15799_s1 + $0xb0] sm:$0xff]  ;;  %v355_v39 = vld [vmem:[%s15799_s1 + $0xb8] sm:$0xff] }
  0x24   : > { %891 = vperm.xlu0 %11969, %v336_v10   ;;  %896 = vperm.xlu1 %11970, %v337_v12   ;;  %v356_v40 = vld [vmem:[%s15799_s1 + $0xc0] sm:$0xff]  ;;  %v357_v41 = vld [vmem:[%s15799_s1 + $0xc8] sm:$0xff]  ;;  %v11985_v42 = vld [vmem:[%s12250_s21 + $0x30] sm:$0xff]  }
  0x25   : > { %v11986_v43 = vld [vmem:[%s12250_s21 + $0xa0] ss:$0 sps:$4 sm:$0x33]   ;;  %v358_v44 = vld [vmem:[%s15799_s1 + $0xd0] sm:$0xff]  ;;  %v359_v45 = vld [vmem:[%s15799_s1 + $0xd8] sm:$0xff] }
  0x26   : > { %10179 = vmatmul.mubr.msk.bf16.gmra.mrb[4].mxu0 %vm373_vm0, %v11975_v13  ;;  %10235 = vmatmul.mubr.msk.bf16.gmra.mrb[4].mxu1 %vm373_vm0, %v11976_v14  ;;  %v360_v46 = vld [vmem:[%s15799_s1 + $0xe0] sm:$0xff]  ;;  %v361_v47 = vld [vmem:[%s15799_s1 + $0xe8] sm:$0xff]  ;;  %v11987_v48 = vld [vmem:[%s12250_s21 + $0x38] sm:$0xff]  }
  0x27   : > { %10182 = vmatprep.mubr.msk.bf16.mxu0 %vm12096_vm1, %v15856_v1  ;;  %10238 = vmatprep.mubr.msk.bf16.mxu1 %vm12096_vm1, %v15856_v1  ;;  %v362_v49 = vld [vmem:[%s15799_s1 + $0xf0] sm:$0xff]  ;;  %v363_v50 = vld [vmem:[%s15799_s1 + $0xf8] sm:$0xff]  ;;  %v364_v51 = vld [vmem:[%s15799_s1 + $0x100] sm:$0xff] }
  0x28   : > { %901 = vperm.xlu0 %11969, %v338_v11   ;;  %906 = vperm.xlu1 %11970, %v339_v15   ;;  %v365_v52 = vld [vmem:[%s15799_s1 + $0x108] sm:$0xff]  ;;  %v11988_v53 = vld [vmem:[%s12250_s21 + $0x40] sm:$0xff]   ;;  %v366_v54 = vld [vmem:[%s15799_s1 + $0x110] sm:$0xff] }
  0x29   : > { %v367_v55 = vld [vmem:[%s15799_s1 + $0x118] sm:$0xff]  ;;  %v368_v56 = vld [vmem:[%s15799_s1 + $0x120] sm:$0xff]  ;;  %v369_v57 = vld [vmem:[%s15799_s1 + $0x128] sm:$0xff] }
  0x2a   : > { %v11989_v58 = vld [vmem:[%s12250_s21 + $0x48] sm:$0xff]   ;;  %v370_v59 = vld [vmem:[%s15799_s1 + $0x130] sm:$0xff]  ;;  %v371_v60 = vld [vmem:[%s15799_s1 + $0x138] sm:$0xff] }
  0x2b   : > { %v372_v61 = vld [vmem:[%s15799_s1 + $0x140] sm:$0xf]  ;;  %v11990_v62 = vld [vmem:[%s12250_s21 + $0x50] sm:$0xff]   ;;  %v11991_v0 = vld [vmem:[%s12250_s21 + $0x58] sm:$0xff]  }
  0x2c   : > { %911 = vperm.xlu0 %11969, %v340_v16   ;;  %916 = vperm.xlu1 %11970, %v341_v17   ;;  %v11994_v63 = vld [vmem:[%s15802_s4 + $0x10] sm:$0xff]   ;;  %v11995_v2 = vld [vmem:[%s15802_s4] sm:$0xff]   ;;  %v11996_v3 = vld [vmem:[%s15802_s4 + $0x18] sm:$0xff]  }
  0x2d   : > { %10259 = vmatpush3.bf16.msra.mxu1 %v11994_v63  ;;  %10347 = vmatpush3.bf16.msra.mxu0 %v11995_v2  ;;  %v11997_v4 = vld [vmem:[%s15802_s4 + $0x8] sm:$0xff]   ;;  %v11992_v8 = vld [vmem:[%s12250_s21 + $0x60] sm:$0xff]  }
  0x2e   : > { %10183 = vmatmul.mubr.msk.bf16.gmra.mrb[8].mxu0 %vm373_vm0, %v11977_v18  ;;  %10239 = vmatmul.mubr.msk.bf16.gmra.mrb[8].mxu1 %vm373_vm0, %v11978_v19  ;;  %v1222_v5 = vld [vmem:[#allocation2 + $0x6] sm:$0xff]  ;;  %v1223_v6 = vld [vmem:[#allocation2 + $0xe] sm:$0xff] }
  0x2f   : > { %10186 = vmatprep.mubr.msk.bf16.mxu0 %vm12096_vm1, %v15856_v1  ;;  %10242 = vmatprep.mubr.msk.bf16.mxu1 %vm12096_vm1, %v15856_v1  ;;  %v1263_v7 = vpack.c.bf16 %v1223_v6, %v1222_v5  ;;  %v11993_v9 = vld [vmem:[%s12250_s21 + $0x68] sm:$0xff]   ;;  %s323_s21 = sand.u32 1, %s12085_s10  }
  0x30   : > { %921 = vperm.xlu0 %11969, %v342_v20   ;;  %926 = vperm.xlu1 %11970, %v343_v21   ;;  %v1156_v10 = vld [vmem:[#allocation2 + $0x5] sm:$0xff]  ;;  %v1157_v11 = vld [vmem:[#allocation2 + $0xd] sm:$0xff]  ;;  %s9182_s16 = sshll.u32 %s323_s21, 6  ;;  %s15757_s13 = scalar_lea.sflag [#allocation6], %s323_s21 }
  0x31   : > { %10260 = vmatprep.subr.bf16.mxu1 %v15856_v1  ;;  %10348 = vmatprep.subr.bf16.mxu0 %v15856_v1  ;;  %v1197_v12 = vpack.c.bf16 %v1157_v11, %v1156_v10  ;;  %s325_s17 = scalar_lea.vmem [#allocation5], %s9182_s16 }
  0x32   : > { %10261 = vmatpush3.bf16.msra.mxu1 %v11996_v3  ;;  %10349 = vmatpush3.bf16.msra.mxu0 %v11997_v4  ;;  %s9116_s23 = sshll.u32 %s325_s17, 4  ;;  %s15751_s23 = int_to_ptr.vmem [resolvable:$true] %s9116_s23 }
  0x33   : > { %10434 = vmatprep.subr.bf16.mxu1 %v15856_v1  ;;  %10522 = vmatprep.subr.bf16.mxu0 %v15856_v1  ;;  %s12031_s27 = scalar_lea.vmem %s15751_s23, 1024  ;;  %p12038_p0 = scmp.lt.s32.totalorder %s15751_s23, %s12036_s29 }
  0x34   : > { %931 = vperm.xlu0 %11969, %v344_v22   ;;  %936 = vperm.xlu1 %11970, %v345_v23   ;;  %p12032_p11 = scmp.ne.s32.totalorder %s15751_s23, %s12031_s27  ;;  %p12039_p1 = scmp.lt.s32.totalorder %s12037_s14, %s12031_s27 }
  0x36   : > { %10187 = vmatmul.mubr.msk.bf16.gmra.mrb[12].mxu0 %vm373_vm0, %v11979_v24  ;;  %10243 = vmatmul.mubr.msk.bf16.gmra.mrb[12].mxu1 %vm373_vm0, %v11980_v25  ;;  %p12033_p12 = pnand %p12032_p11, %p12189_p5  ;;  %p12040_p2 = por %p12039_p1, %p12038_p0 }
  0x37   : > { %10190 = vmatprep.mubr.msk.bf16.mxu0 %vm12096_vm1, %v15856_v1  ;;  %10246 = vmatprep.mubr.msk.bf16.mxu1 %vm12096_vm1, %v15856_v1 }
  0x38   : > { %941 = vperm.xlu0 %11969, %v346_v26   ;;  %946 = vperm.xlu1 %11970, %v347_v27   ;;  %p12034_p13 = pneg %p12033_p12 }
  0x3a   : > { %p12041_p3 = pnand %p12040_p2, %p12034_p13 }
  0x3c   : > { %951 = vperm.xlu0 %11969, %v348_v28   ;;  %956 = vperm.xlu1 %11970, %v349_v29  }
  0x3e   : > { %10191 = vmatmul.mubr.msk.bf16.gmra.mrb[16].mxu0 %vm373_vm0, %v11981_v30  ;;  %10247 = vmatmul.mubr.msk.bf16.gmra.mrb[16].mxu1 %vm373_vm0, %v11982_v31 }
  0x3f   : > { %10194 = vmatprep.mubr.msk.bf16.mxu0 %vm12096_vm1, %v15856_v1  ;;  %10250 = vmatprep.mubr.msk.bf16.mxu1 %vm12096_vm1, %v15856_v1 }
  0x40   : > { %961 = vperm.xlu0 %11969, %v350_v32   ;;  %966 = vperm.xlu1 %11970, %v351_v33  }
  0x44   : > { %971 = vperm.xlu0 %11969, %v352_v34   ;;  %976 = vperm.xlu1 %11970, %v353_v35  }
  0x46   : > { %10195 = vmatmul.mubr.msk.bf16.gmra.mrb[20].mxu0 %vm373_vm0, %v11983_v36  ;;  %10251 = vmatmul.mubr.msk.bf16.gmra.mrb[20].mxu1 %vm373_vm0, %v11984_v37  ;;  %v11998_v37 = vld [vmem:[%s15802_s4 + $0x20] sm:$0xff]  }
  0x47   : > { %10198 = vmatprep.mubr.msk.bf16.mxu0 %vm12096_vm1, %v15856_v1  ;;  %10254 = vmatprep.mubr.msk.bf16.mxu1 %vm12096_vm1, %v15856_v1 }
  0x48   : > { %981 = vperm.xlu0 %11969, %v354_v38   ;;  %986 = vperm.xlu1 %11970, %v355_v39  }
  0x4c   : > { %991 = vperm.xlu0 %11969, %v356_v40   ;;  %996 = vperm.xlu1 %11970, %v357_v41   ;;  %v12536_v40 = vld [vmem:[%s15801_s3] ss:$0 sm:$0xff] }
  0x4e   : > { %10199 = vmatmul.mubr.msk.bf16.gmra.mrb[24].mxu0 %vm373_vm0, %v11985_v42  ;;  %10255 = vmatmul.mubr.msk.bf16.gmra.mrb[24].mxu1 %vm373_vm0, %v11986_v43 }
  0x4f   : > { %10202 = vmatprep.mubr.msk.bf16.mxu0 %vm12096_vm1, %v15856_v1  ;;  %10262 = vmatprep.mubr.msk.bf16.mxu1 %vm12096_vm1, %v15856_v1 }
  0x50   : > { %1001 = vperm.xlu0 %11969, %v358_v44   ;;  %1006 = vperm.xlu1 %11970, %v359_v45  }
  0x54   : > { %1011 = vperm.xlu0 %11969, %v360_v46   ;;  %1016 = vperm.xlu1 %11970, %v361_v47  }
  0x56   : > { %10203 = vmatmul.mubr.msk.bf16.gmra.mrb[28].mxu0 %vm373_vm0, %v11987_v48  ;;  %10263 = vmatmul.mubr.msk.bf16.vlgmr.msra.gmra.mrb[28].mxu1 %vm373_vm0, %v1263_v7 }
  0x57   : > { %10206 = vmatprep.mubr.msk.bf16.mxu0 %vm12096_vm1, %v15856_v1  ;;  %10266 = vmatprep.mubr.msk.bf16.mxu1 %vm12096_vm1, %v15856_v1 }
  0x58   : > { %1021 = vperm.xlu0 %11969, %v362_v49   ;;  %1026 = vperm.xlu1 %11970, %v363_v50  }
  0x59   : > { %10435 = vmatpush3.bf16.msra.mxu1 %v11998_v37 }
  0x5a   : > { %10436 = vmatprep.subr.bf16.mxu1 %v15856_v1 }
  0x5c   : > { %1031 = vperm.xlu0 %11969, %v364_v51   ;;  %1036 = vperm.xlu1 %11970, %v365_v52  }
  0x5e   : > { %10207 = vmatmul.mubr.msk.bf16.gmra.mrb[32].mxu0 %vm373_vm0, %v11988_v53 }
  0x5f   : > { %10210 = vmatprep.mubr.msk.bf16.mxu0 %vm12096_vm1, %v15856_v1 }
  0x60   : > { %1041 = vperm.xlu0 %11969, %v366_v54   ;;  %1046 = vperm.xlu1 %11970, %v367_v55  }
  0x64   : > { %1051 = vperm.xlu0 %11969, %v368_v56   ;;  %1056 = vperm.xlu1 %11970, %v369_v57  }
  0x66   : > { %10211 = vmatmul.mubr.msk.bf16.gmra.mrb[36].mxu0 %vm373_vm0, %v11989_v58 }
  0x67   : > { %10214 = vmatprep.mubr.msk.bf16.mxu0 %vm12096_vm1, %v15856_v1 }
  0x68   : > { %1061 = vperm.xlu0 %11969, %v370_v59   ;;  %1066 = vperm.xlu1 %11970, %v371_v60  }
  0x6c   : > { %1071 = vperm.xlu0 %11969, %v372_v61  }
  0x6e   : > { %10215 = vmatmul.mubr.msk.bf16.gmra.mrb[40].mxu0 %vm373_vm0, %v11990_v62 }
  0x6f   : > { %10218 = vmatprep.mubr.msk.bf16.mxu0 %vm12096_vm1, %v15856_v1 }
  0x76   : > { %10219 = vmatmul.mubr.msk.bf16.gmra.mrb[44].mxu0 %vm373_vm0, %v11991_v0 }
  0x77   : > { %10222 = vmatprep.mubr.msk.bf16.mxu0 %vm12096_vm1, %v15856_v1 }
  0x7e   : > { %10223 = vmatmul.mubr.msk.bf16.gmra.mrb[48].mxu0 %vm373_vm0, %v11992_v8 }
  0x7f   : > { %10226 = vmatprep.mubr.msk.bf16.mxu0 %vm12096_vm1, %v15856_v1 }
  0x86   : > { %10227 = vmatmul.mubr.msk.bf16.gmra.mrb[52].mxu0 %vm373_vm0, %v11993_v9 }
  0x87   : > { %10350 = vmatprep.mubr.msk.bf16.mxu0 %vm12096_vm1, %v15856_v1 }
  0x8e   : > { %10351 = vmatmul.mubr.msk.bf16.vlgmr.msra.gmra.mrb[56].mxu0 %vm373_vm0, %v1197_v12 }
  0x8f   : > { %10354 = vmatprep.mubr.msk.bf16.mxu0 %vm12096_vm1, %v15856_v1 }
  0x9b   : > { %v12477_v13 = vpop.permute.xlu0 %871  ;;  %v12479_v14 = vpop.permute.xlu1 %881 }
  0x9c   : > { %15896 = vst [vmem:[#allocation8_spill] sm:$0xff] %v12477_v13  ;;  %15897 = vst [vmem:[#allocation9_spill] sm:$0xff] %v12479_v14 }
  0x9f   : > { %v12481_v15 = vpop.permute.xlu0 %876  ;;  %v12483_v16 = vpop.permute.xlu1 %886 }
  0xa0   : > { %15898 = vst [vmem:[#allocation10_spill] sm:$0xff] %v12481_v15  ;;  %15899 = vst [vmem:[#allocation11_spill] sm:$0xff] %v12483_v16 }
  0xa3   : > { %v12485_v17 = vpop.permute.xlu0 %891  ;;  %v12487_v18 = vpop.permute.xlu1 %896 }
  0xa4   : > { %15900 = vst [vmem:[#allocation12_spill] sm:$0xff] %v12485_v17  ;;  %15901 = vst [vmem:[#allocation13_spill] sm:$0xff] %v12487_v18 }
  0xa7   : > { %v12489_v19 = vpop.permute.xlu0 %901  ;;  %v12491_v20 = vpop.permute.xlu1 %906 }
  0xa8   : > { %15902 = vst [vmem:[#allocation14_spill] sm:$0xff] %v12489_v19  ;;  %15903 = vst [vmem:[#allocation15_spill] sm:$0xff] %v12491_v20 }
  0xab   : > { %v12493_v21 = vpop.permute.xlu0 %911  ;;  %v12495_v22 = vpop.permute.xlu1 %916 }
  0xac   : > { %15904 = vst [vmem:[#allocation16_spill] sm:$0xff] %v12493_v21  ;;  %15905 = vst [vmem:[#allocation17_spill] sm:$0xff] %v12495_v22 }
  0xaf   : > { %v12497_v23 = vpop.permute.xlu0 %921  ;;  %v12499_v24 = vpop.permute.xlu1 %926 }
  0xb0   : > { %15906 = vst [vmem:[#allocation18_spill] sm:$0xff] %v12497_v23  ;;  %15907 = vst [vmem:[#allocation19_spill] sm:$0xff] %v12499_v24 }
  0xb3   : > { %v12501_v25 = vpop.permute.xlu0 %931  ;;  %v12503_v26 = vpop.permute.xlu1 %936 }
  0xb4   : > { %15908 = vst [vmem:[#allocation20_spill] sm:$0xff] %v12501_v25  ;;  %15909 = vst [vmem:[#allocation21_spill] sm:$0xff] %v12503_v26 }
  0xb7   : > { %v12505_v27 = vpop.permute.xlu0 %941  ;;  %v12507_v28 = vpop.permute.xlu1 %946 }
  0xb8   : > { %15910 = vst [vmem:[#allocation22_spill] sm:$0xff] %v12505_v27  ;;  %15911 = vst [vmem:[#allocation23_spill] sm:$0xff] %v12507_v28 }
  0xbb   : > { %v12509_v29 = vpop.permute.xlu0 %951  ;;  %v12511_v30 = vpop.permute.xlu1 %956 }
  0xbc   : > { %15912 = vst [vmem:[#allocation24_spill] sm:$0xff] %v12509_v29  ;;  %15913 = vst [vmem:[#allocation25_spill] sm:$0xff] %v12511_v30 }
  0xbf   : > { %v12513_v31 = vpop.permute.xlu0 %961  ;;  %v12515_v32 = vpop.permute.xlu1 %966 }
  0xc0   : > { %15914 = vst [vmem:[#allocation26_spill] sm:$0xff] %v12513_v31  ;;  %15915 = vst [vmem:[#allocation27_spill] sm:$0xff] %v12515_v32 }
  0xc3   : > { %v12517_v33 = vpop.permute.xlu0 %971  ;;  %v12519_v34 = vpop.permute.xlu1 %976 }
  0xc4   : > { %15916 = vst [vmem:[#allocation28_spill] sm:$0xff] %v12517_v33  ;;  %15917 = vst [vmem:[#allocation29_spill] sm:$0xff] %v12519_v34 }
  0xc7   : > { %v12521_v35 = vpop.permute.xlu0 %981  ;;  %v12523_v36 = vpop.permute.xlu1 %986 }
  0xc8   : > { %15918 = vst [vmem:[#allocation30_spill] sm:$0xff] %v12521_v35  ;;  %15919 = vst [vmem:[#allocation31_spill] sm:$0xff] %v12523_v36 }
  0xcb   : > { %v12529_v38 = vpop.permute.xlu0 %991  ;;  %v12531_v39 = vpop.permute.xlu1 %996 }
  0xcc   : > { %15920 = vst [vmem:[#allocation32_spill] sm:$0xff] %v12529_v38  ;;  %15921 = vst [vmem:[#allocation33_spill] sm:$0xff] %v12531_v39 }
  0xcf   : > { %v12538_v41 = vpop.permute.xlu0 %1001  ;;  %v12540_v42 = vpop.permute.xlu1 %1006 }
  0xd0   : > { %15922 = vst [vmem:[#allocation34_spill] sm:$0xff] %v12538_v41  ;;  %15923 = vst [vmem:[#allocation35_spill] sm:$0xff] %v12540_v42 }
  0xd3   : > { %v12546_v57 = vpop.permute.xlu0 %1011  ;;  %v12550_v62 = vpop.permute.xlu1 %1016 }
  0xd4   : > { %15924 = vst [vmem:[#allocation36_spill] sm:$0xff] %v12546_v57  ;;  %15925 = vst [vmem:[#allocation37_spill] sm:$0xff] %v12550_v62 }
  0xf1   : > { %v662_v43 = vpop.f32.mrb[0].mxu0  ;;  %v774_v45 = vpop.f32.mrb[0].mxu1 }
  0xf2   : > { %v663_v44 = vadd.f32 %v12536_v40, %v662_v43  ;;  %v10176_v46 = vpop.f32.mrb[1].mxu0  ;;  %v775_v47 = vadd.f32 %v12536_v40, %v774_v45  ;;  %v10232_v48 = vpop.f32.mrb[1].mxu1 }
  0xf3   : > { %v665_v49 = vpop.f32.mrb[2].mxu0  ;;  %v777_v52 = vpop.f32.mrb[2].mxu1 }
  0xf4   : > { %v828_v50 = vmax.f32 %v663_v44, 0.0  ;;  %v666_v51 = vadd.f32 %v12536_v40, %v665_v49  ;;  %v10177_v53 = vpop.f32.mrb[3].mxu0  ;;  %v856_v54 = vmax.f32 %v775_v47, 0.0  ;;  %v778_v55 = vadd.f32 %v12536_v40, %v777_v52  ;;  %v10233_v56 = vpop.f32.mrb[3].mxu1 }
  0xf5   : > { %v12562_v45 = vpop.permute.xlu0 %1021 }
  0xf6   : > { %v1074_v58 = vmul.f32 %v12477_v13, %v828_v50  ;;  %v829_v59 = vmax.f32 %v666_v51, 0.0  ;;  %v1102_v60 = vmul.f32 %v12546_v57, %v856_v54  ;;  %v857_v61 = vmax.f32 %v778_v55, 0.0  ;;  %15926 = vst [vmem:[#allocation38_spill] sm:$0xff] %v12562_v45  ;;  %v12566_v50 = vpop.permute.xlu1 %1026 }
  0xf7   : > { %15927 = vst [vmem:[#allocation39_spill] sm:$0xff] %v12566_v50 }
  0xf8   : > { %1115 = vst.msk [vmem:[#allocation2 + $0x18] sm:$0xff] %vm373_vm0, %v1074_v58  ;;  %v1075_v63 = vmul.f32 %v12481_v15, %v829_v59  ;;  %1143 = vst.msk [vmem:[#allocation2 + $0xf8] sm:$0xff] %vm373_vm0, %v1102_v60  ;;  %v1103_v0 = vmul.f32 %v12550_v62, %v857_v61 }
  0xf9   : > { %v670_v2 = vpop.f32.mrb[4].mxu0  ;;  %v782_v4 = vpop.f32.mrb[4].mxu1 }
  0xfa   : > { %1116 = vst.msk [vmem:[#allocation2 + $0x20] sm:$0xff] %vm373_vm0, %v1075_v63  ;;  %v671_v3 = vadd.f32 %v12536_v40, %v670_v2  ;;  %v10180_v5 = vpop.f32.mrb[5].mxu0  ;;  %1144 = vst.msk [vmem:[#allocation2 + $0x100] sm:$0xff] %vm373_vm0, %v1103_v0  ;;  %v783_v6 = vadd.f32 %v12536_v40, %v782_v4  ;;  %v10236_v7 = vpop.f32.mrb[5].mxu1 }
  0xfb   : > { %v673_v8 = vpop.f32.mrb[6].mxu0  ;;  %v785_v11 = vpop.f32.mrb[6].mxu1 }
  0xfc   : > { %v830_v9 = vmax.f32 %v671_v3, 0.0  ;;  %v674_v10 = vadd.f32 %v12536_v40, %v673_v8  ;;  %v10181_v12 = vpop.f32.mrb[7].mxu0  ;;  %v858_v37 = vmax.f32 %v783_v6, 0.0  ;;  %v786_v43 = vadd.f32 %v12536_v40, %v785_v11  ;;  %v10237_v44 = vpop.f32.mrb[7].mxu1 }
  0xfd   : > { %v12584_v12 = vpop.permute.xlu0 %1031 }
  0xfe   : > { %v1076_v46 = vmul.f32 %v12479_v14, %v830_v9  ;;  %v831_v47 = vmax.f32 %v674_v10, 0.0  ;;  %v1104_v48 = vmul.f32 %v12562_v45, %v858_v37  ;;  %v859_v49 = vmax.f32 %v786_v43, 0.0  ;;  %15928 = vst [vmem:[#allocation40_spill] sm:$0xff] %v12584_v12 }
  0xff   : > { %v1224_v52 = vld [vmem:[#allocation2 + $0x16] sm:$0xff] }
 0x100   : > { %1117 = vst.msk [vmem:[#allocation2 + $0x28] sm:$0xff] %vm373_vm0, %v1076_v46  ;;  %v1077_v51 = vmul.f32 %v12483_v16, %v831_v47  ;;  %1145 = vst.msk [vmem:[#allocation2 + $0x108] sm:$0xff] %vm373_vm0, %v1104_v48  ;;  %v1105_v53 = vmul.f32 %v12566_v50, %v859_v49  ;;  %v1158_v56 = vld [vmem:[#allocation2 + $0x15] sm:$0xff]  ;;  %v12588_v47 = vpop.permute.xlu1 %1036 }
 0x101   : > { %v678_v54 = vpop.f32.mrb[8].mxu0  ;;  %v1225_v55 = vld [vmem:[#allocation2 + $0x1e] sm:$0xff]  ;;  %v790_v60 = vpop.f32.mrb[8].mxu1  ;;  %15929 = vst [vmem:[#allocation41_spill] sm:$0xff] %v12588_v47 }
 0x102   : > { %v1159_v58 = vld [vmem:[#allocation2 + $0x1d] sm:$0xff]  ;;  %1118 = vst.msk [vmem:[#allocation2 + $0x30] sm:$0xff] %vm373_vm0, %v1077_v51  ;;  %v679_v59 = vadd.f32 %v12536_v40, %v678_v54  ;;  %v10184_v61 = vpop.f32.mrb[9].mxu0  ;;  %v1264_v63 = vpack.c.bf16 %v1225_v55, %v1224_v52  ;;  %1146 = vst.msk [vmem:[#allocation2 + $0x110] sm:$0xff] %vm373_vm0, %v1105_v53  ;;  %v791_v2 = vadd.f32 %v12536_v40, %v790_v60  ;;  %v10240_v3 = vpop.f32.mrb[9].mxu1 }
 0x103   : > { %v1198_v0 = vpack.c.bf16 %v1159_v58, %v1158_v56  ;;  %v681_v4 = vpop.f32.mrb[10].mxu0  ;;  %v793_v7 = vpop.f32.mrb[10].mxu1 }
 0x104   : > { %v832_v5 = vmax.f32 %v679_v59, 0.0  ;;  %v682_v6 = vadd.f32 %v12536_v40, %v681_v4  ;;  %v10185_v8 = vpop.f32.mrb[11].mxu0  ;;  %10267 = vmatmul.mubr.msk.bf16.gmra.mrb[32].mxu1 %vm373_vm0, %v1264_v63  ;;  %v860_v9 = vmax.f32 %v791_v2, 0.0  ;;  %v794_v10 = vadd.f32 %v12536_v40, %v793_v7  ;;  %v10241_v11 = vpop.f32.mrb[11].mxu1 }
 0x105   : > { %10355 = vmatmul.mubr.msk.bf16.gmra.mrb[60].mxu0 %vm373_vm0, %v1198_v0  ;;  %10270 = vmatprep.mubr.msk.bf16.mxu1 %vm12096_vm1, %v15856_v1 }
 0x106   : > { %10358 = vmatprep.mubr.msk.bf16.mxu0 %vm12096_vm1, %v15856_v1  ;;  %v1078_v37 = vmul.f32 %v12485_v17, %v832_v5  ;;  %v833_v43 = vmax.f32 %v682_v6, 0.0  ;;  %v1106_v44 = vmul.f32 %v12584_v12, %v860_v9  ;;  %v861_v46 = vmax.f32 %v794_v10, 0.0  ;;  %v12602_v10 = vpop.permute.xlu0 %1041 }
 0x107   : > { %v1226_v52 = vld [vmem:[#allocation2 + $0x26] sm:$0xff]  ;;  %15930 = vst [vmem:[#allocation42_spill] sm:$0xff] %v12602_v10 }
 0x108   : > { %1119 = vst.msk [vmem:[#allocation2 + $0x38] sm:$0xff] %vm373_vm0, %v1078_v37  ;;  %v1079_v48 = vmul.f32 %v12487_v18, %v833_v43  ;;  %1147 = vst.msk [vmem:[#allocation2 + $0x118] sm:$0xff] %vm373_vm0, %v1106_v44  ;;  %v1107_v49 = vmul.f32 %v12588_v47, %v861_v46  ;;  %v1160_v58 = vld [vmem:[#allocation2 + $0x25] sm:$0xff]  ;;  %v12610_v46 = vpop.permute.xlu1 %1046 }
 0x109   : > { %v686_v51 = vpop.f32.mrb[12].mxu0  ;;  %v798_v54 = vpop.f32.mrb[12].mxu1  ;;  %v1227_v56 = vld [vmem:[#allocation2 + $0x2e] sm:$0xff]  ;;  %15931 = vst [vmem:[#allocation43_spill] sm:$0xff] %v12610_v46 }
 0x10a   : > { %1120 = vst.msk [vmem:[#allocation2 + $0x40] sm:$0xff] %vm373_vm0, %v1079_v48  ;;  %v687_v53 = vadd.f32 %v12536_v40, %v686_v51  ;;  %v10188_v55 = vpop.f32.mrb[13].mxu0  ;;  %v1161_v59 = vld [vmem:[#allocation2 + $0x2d] sm:$0xff]  ;;  %1148 = vst.msk [vmem:[#allocation2 + $0x120] sm:$0xff] %vm373_vm0, %v1107_v49  ;;  %v799_v60 = vadd.f32 %v12536_v40, %v798_v54  ;;  %v10244_v61 = vpop.f32.mrb[13].mxu1  ;;  %v1265_v0 = vpack.c.bf16 %v1227_v56, %v1226_v52 }
 0x10b   : > { %v689_v63 = vpop.f32.mrb[14].mxu0  ;;  %v1199_v2 = vpack.c.bf16 %v1161_v59, %v1160_v58  ;;  %v801_v5 = vpop.f32.mrb[14].mxu1 }
 0x10c   : > { %v834_v3 = vmax.f32 %v687_v53, 0.0  ;;  %v690_v4 = vadd.f32 %v12536_v40, %v689_v63  ;;  %v10189_v6 = vpop.f32.mrb[15].mxu0  ;;  %v862_v7 = vmax.f32 %v799_v60, 0.0  ;;  %v802_v8 = vadd.f32 %v12536_v40, %v801_v5  ;;  %10271 = vmatmul.mubr.msk.bf16.gmra.mrb[36].mxu1 %vm373_vm0, %v1265_v0  ;;  %v10245_v9 = vpop.f32.mrb[15].mxu1 }
 0x10d   : > { %10359 = vmatmul.mubr.msk.bf16.gmra.mrb[64].mxu0 %vm373_vm0, %v1199_v2  ;;  %10274 = vmatprep.mubr.msk.bf16.mxu1 %vm12096_vm1, %v15856_v1 }
 0x10e   : > { %v1080_v11 = vmul.f32 %v12489_v19, %v834_v3  ;;  %v835_v37 = vmax.f32 %v690_v4, 0.0  ;;  %10362 = vmatprep.mubr.msk.bf16.mxu0 %vm12096_vm1, %v15856_v1  ;;  %v1108_v43 = vmul.f32 %v12602_v10, %v862_v7  ;;  %v863_v44 = vmax.f32 %v802_v8, 0.0 }
 0x10f   : > { %v1228_v49 = vld [vmem:[#allocation2 + $0x36] sm:$0xff] }
 0x110   : > { %1121 = vst.msk [vmem:[#allocation2 + $0x48] sm:$0xff] %vm373_vm0, %v1080_v11  ;;  %v1081_v48 = vmul.f32 %v12491_v20, %v835_v37  ;;  %1149 = vst.msk [vmem:[#allocation2 + $0x128] sm:$0xff] %vm373_vm0, %v1108_v43  ;;  %v1109_v51 = vmul.f32 %v12610_v46, %v863_v44  ;;  %v1162_v54 = vld [vmem:[#allocation2 + $0x35] sm:$0xff]  ;;  %v12624_v11 = vpop.permute.xlu0 %1051 }
 0x111   : > { %v694_v52 = vpop.f32.mrb[16].mxu0  ;;  %v1229_v53 = vld [vmem:[#allocation2 + $0x3e] sm:$0xff]  ;;  %v806_v58 = vpop.f32.mrb[16].mxu1  ;;  %15932 = vst [vmem:[#allocation44_spill] sm:$0xff] %v12624_v11 }
 0x112   : > { %v1163_v55 = vld [vmem:[#allocation2 + $0x3d] sm:$0xff]  ;;  %1122 = vst.msk [vmem:[#allocation2 + $0x50] sm:$0xff] %vm373_vm0, %v1081_v48  ;;  %v695_v56 = vadd.f32 %v12536_v40, %v694_v52  ;;  %v10192_v59 = vpop.f32.mrb[17].mxu0  ;;  %v1266_v60 = vpack.c.bf16 %v1229_v53, %v1228_v49  ;;  %1150 = vst.msk [vmem:[#allocation2 + $0x130] sm:$0xff] %vm373_vm0, %v1109_v51  ;;  %v807_v63 = vadd.f32 %v12536_v40, %v806_v58  ;;  %v10248_v0 = vpop.f32.mrb[17].mxu1 }
 0x113   : > { %v1200_v61 = vpack.c.bf16 %v1163_v55, %v1162_v54  ;;  %v697_v2 = vpop.f32.mrb[18].mxu0  ;;  %v809_v5 = vpop.f32.mrb[18].mxu1 }
 0x114   : > { %v836_v3 = vmax.f32 %v695_v56, 0.0  ;;  %v698_v4 = vadd.f32 %v12536_v40, %v697_v2  ;;  %v10193_v6 = vpop.f32.mrb[19].mxu0  ;;  %v864_v7 = vmax.f32 %v807_v63, 0.0  ;;  %v810_v8 = vadd.f32 %v12536_v40, %v809_v5  ;;  %10275 = vmatmul.mubr.msk.bf16.gmra.mrb[40].mxu1 %vm373_vm0, %v1266_v60  ;;  %v10249_v9 = vpop.f32.mrb[19].mxu1 }
 0x115   : > { %10363 = vmatmul.mubr.msk.bf16.gmra.mrb[68].mxu0 %vm373_vm0, %v1200_v61  ;;  %10278 = vmatprep.mubr.msk.bf16.mxu1 %vm12096_vm1, %v15856_v1  ;;  %v12632_v49 = vpop.permute.xlu1 %1056 }
 0x116   : > { %v1082_v37 = vmul.f32 %v12493_v21, %v836_v3  ;;  %v837_v43 = vmax.f32 %v698_v4, 0.0  ;;  %10366 = vmatprep.mubr.msk.bf16.mxu0 %vm12096_vm1, %v15856_v1  ;;  %v1110_v44 = vmul.f32 %v12624_v11, %v864_v7  ;;  %v865_v48 = vmax.f32 %v810_v8, 0.0  ;;  %15933 = vst [vmem:[#allocation45_spill] sm:$0xff] %v12632_v49 }
 0x117   : > { %v1230_v52 = vld [vmem:[#allocation2 + $0x46] sm:$0xff] }
 0x118   : > { %1123 = vst.msk [vmem:[#allocation2 + $0x58] sm:$0xff] %vm373_vm0, %v1082_v37  ;;  %v1083_v51 = vmul.f32 %v12495_v22, %v837_v43  ;;  %1151 = vst.msk [vmem:[#allocation2 + $0x138] sm:$0xff] %vm373_vm0, %v1110_v44  ;;  %v1111_v53 = vmul.f32 %v12632_v49, %v865_v48  ;;  %v1164_v56 = vld [vmem:[#allocation2 + $0x45] sm:$0xff]  ;;  %v11999_v44 = vld [vmem:[%s15802_s4 + $0x30] sm:$0xff]  }
 0x119   : > { %v702_v54 = vpop.f32.mrb[20].mxu0  ;;  %v1231_v55 = vld [vmem:[#allocation2 + $0x4e] sm:$0xff]  ;;  %v814_v60 = vpop.f32.mrb[20].mxu1  ;;  %10523 = vmatpush3.bf16.msra.mxu0 %v11999_v44 }
 0x11a   : > { %v1165_v58 = vld [vmem:[#allocation2 + $0x4d] sm:$0xff]  ;;  %1124 = vst.msk [vmem:[#allocation2 + $0x60] sm:$0xff] %vm373_vm0, %v1083_v51  ;;  %v703_v59 = vadd.f32 %v12536_v40, %v702_v54  ;;  %v10196_v61 = vpop.f32.mrb[21].mxu0  ;;  %v1267_v63 = vpack.c.bf16 %v1231_v55, %v1230_v52  ;;  %1152 = vst.msk [vmem:[#allocation2 + $0x140] sm:$0xff] %vm373_vm0, %v1111_v53  ;;  %v815_v2 = vadd.f32 %v12536_v40, %v814_v60  ;;  %v10252_v3 = vpop.f32.mrb[21].mxu1  ;;  %10524 = vmatprep.subr.bf16.mxu0 %v15856_v1 }
 0x11b   : > { %v1201_v0 = vpack.c.bf16 %v1165_v58, %v1164_v56  ;;  %v705_v4 = vpop.f32.mrb[22].mxu0  ;;  %v817_v7 = vpop.f32.mrb[22].mxu1  ;;  %v12000_v48 = vld [vmem:[%s15802_s4 + $0x28] sm:$0xff]   ;;  %v12001_v56 = vld [vmem:[%s15802_s4 + $0x38] sm:$0xff]  }
 0x11c   : > { %v838_v5 = vmax.f32 %v703_v59, 0.0  ;;  %v706_v6 = vadd.f32 %v12536_v40, %v705_v4  ;;  %v10197_v8 = vpop.f32.mrb[23].mxu0  ;;  %v866_v9 = vmax.f32 %v815_v2, 0.0  ;;  %v818_v37 = vadd.f32 %v12536_v40, %v817_v7  ;;  %10279 = vmatmul.mubr.msk.bf16.gmra.mrb[44].mxu1 %vm373_vm0, %v1267_v63  ;;  %v10253_v43 = vpop.f32.mrb[23].mxu1 }
 0x11d   : > { %10367 = vmatmul.mubr.msk.bf16.gmra.mrb[72].mxu0 %vm373_vm0, %v1201_v0  ;;  %v12652_v51 = vpop.permute.xlu0 %1061  ;;  %10282 = vmatprep.mubr.msk.bf16.mxu1 %vm12096_vm1, %v15856_v1  ;;  %v12663_v58 = vpop.permute.xlu1 %1066 }
 0x11e   : > { %15934 = vst [vmem:[#allocation46_spill] sm:$0xff] %v12652_v51  ;;  %v1084_v52 = vmul.f32 %v12497_v23, %v838_v5  ;;  %v839_v53 = vmax.f32 %v706_v6, 0.0  ;;  %10370 = vmatprep.mubr.msk.bf16.mxu0 %vm12096_vm1, %v15856_v1  ;;  %v1112_v54 = vmul.f32 %v12652_v51, %v866_v9  ;;  %v867_v55 = vmax.f32 %v818_v37, 0.0  ;;  %10437 = vmatpush3.bf16.msra.mxu1 %v12000_v48 }
 0x11f   : > { %15935 = vst [vmem:[#allocation47_spill] sm:$0xff] %v12663_v58  ;;  %v1232_v60 = vld [vmem:[#allocation2 + $0x56] sm:$0xff]  ;;  %10610 = vmatprep.subr.bf16.mxu1 %v15856_v1  ;;  %10525 = vmatpush3.bf16.msra.mxu0 %v12001_v56 }
 0x120   : > { %1125 = vst.msk [vmem:[#allocation2 + $0x68] sm:$0xff] %vm373_vm0, %v1084_v52  ;;  %v1085_v59 = vmul.f32 %v12499_v24, %v839_v53  ;;  %1153 = vst.msk [vmem:[#allocation2 + $0x148] sm:$0xff] %vm373_vm0, %v1112_v54  ;;  %v1113_v61 = vmul.f32 %v12663_v58, %v867_v55  ;;  %v1166_v2 = vld [vmem:[#allocation2 + $0x55] sm:$0xff]  ;;  %10698 = vmatprep.subr.bf16.mxu0 %v15856_v1 }
 0x121   : > { %v710_v63 = vpop.f32.mrb[24].mxu0  ;;  %v1233_v0 = vld [vmem:[#allocation2 + $0x5e] sm:$0xff]  ;;  %v822_v5 = vpop.f32.mrb[24].mxu1 }
 0x122   : > { %v1167_v3 = vld [vmem:[#allocation2 + $0x5d] sm:$0xff]  ;;  %1126 = vst.msk [vmem:[#allocation2 + $0x70] sm:$0xff] %vm373_vm0, %v1085_v59  ;;  %v711_v4 = vadd.f32 %v12536_v40, %v710_v63  ;;  %v10200_v6 = vpop.f32.mrb[25].mxu0  ;;  %v1268_v7 = vpack.c.bf16 %v1233_v0, %v1232_v60  ;;  %1154 = vst.msk [vmem:[#allocation2 + $0x150] sm:$0xff] %vm373_vm0, %v1113_v61  ;;  %v823_v9 = vadd.f32 %v12536_v40, %v822_v5  ;;  %v10256_v43 = vpop.f32.mrb[25].mxu1 }
 0x123   : > { %v1202_v8 = vpack.c.bf16 %v1167_v3, %v1166_v2  ;;  %v713_v37 = vpop.f32.mrb[26].mxu0  ;;  %v825_v53 = vpop.f32.mrb[26].mxu1 }
 0x124   : > { %v840_v44 = vmax.f32 %v711_v4, 0.0  ;;  %v714_v48 = vadd.f32 %v12536_v40, %v713_v37  ;;  %v10201_v52 = vpop.f32.mrb[27].mxu0  ;;  %v868_v54 = vmax.f32 %v823_v9, 0.0  ;;  %10283 = vmatmul.mubr.msk.bf16.gmra.mrb[48].mxu1 %vm373_vm0, %v1268_v7  ;;  %v10257_v55 = vpop.f32.mrb[27].mxu1 }
 0x125   : > { %10371 = vmatmul.mubr.msk.bf16.gmra.mrb[76].mxu0 %vm373_vm0, %v1202_v8  ;;  %v12679_v59 = vpop.permute.xlu0 %1071  ;;  %10286 = vmatprep.mubr.msk.bf16.mxu1 %vm12096_vm1, %v15856_v1 }
 0x126   : > { %15936 = vst [vmem:[#allocation48_spill] sm:$0xff] %v12679_v59  ;;  %v1086_v60 = vmul.f32 %v12501_v25, %v840_v44  ;;  %v841_v61 = vmax.f32 %v714_v48, 0.0  ;;  %10374 = vmatprep.mubr.msk.bf16.mxu0 %vm12096_vm1, %v15856_v1  ;;  %v1114_v56 = vmul.f32 %v12679_v59, %v868_v54 }
 0x127   : > { %v1234_v0 = vld [vmem:[#allocation2 + $0x66] sm:$0xff] }
 0x128   : > { %1127 = vst.msk [vmem:[#allocation2 + $0x78] sm:$0xff] %vm373_vm0, %v1086_v60  ;;  %v1087_v63 = vmul.f32 %v12503_v26, %v841_v61  ;;  %v1168_v4 = vld [vmem:[#allocation2 + $0x65] sm:$0xff] }
 0x129   : > { %1155 = vst.msk [vmem:[#allocation2 + $0x158] sm:$0xf] %vm380_vm2, %v1114_v56  ;;  %v718_v2 = vpop.f32.mrb[28].mxu0  ;;  %v1235_v3 = vld [vmem:[#allocation2 + $0x6e] sm:$0xff] }
 0x12a   : > { %v1169_v5 = vld [vmem:[#allocation2 + $0x6d] sm:$0xff]  ;;  %1128 = vst.msk [vmem:[#allocation2 + $0x80] sm:$0xff] %vm373_vm0, %v1087_v63  ;;  %v719_v6 = vadd.f32 %v12536_v40, %v718_v2  ;;  %v10204_v7 = vpop.f32.mrb[29].mxu0  ;;  %v1269_v8 = vpack.c.bf16 %v1235_v3, %v1234_v0 }
 0x12b   : > { %v1203_v9 = vpack.c.bf16 %v1169_v5, %v1168_v4  ;;  %v721_v37 = vpop.f32.mrb[30].mxu0 }
 0x12c   : > { %v842_v43 = vmax.f32 %v719_v6, 0.0  ;;  %v722_v44 = vadd.f32 %v12536_v40, %v721_v37  ;;  %v10205_v48 = vpop.f32.mrb[31].mxu0  ;;  %10287 = vmatmul.mubr.msk.bf16.gmra.mrb[52].mxu1 %vm373_vm0, %v1269_v8 }
 0x12d   : > { %10375 = vmatmul.mubr.msk.bf16.gmra.mrb[80].mxu0 %vm373_vm0, %v1203_v9  ;;  %10290 = vmatprep.mubr.msk.bf16.mxu1 %vm12096_vm1, %v15856_v1 }
 0x12e   : > { %v1088_v52 = vmul.f32 %v12505_v27, %v842_v43  ;;  %v843_v53 = vmax.f32 %v722_v44, 0.0  ;;  %10378 = vmatprep.mubr.msk.bf16.mxu0 %vm12096_vm1, %v15856_v1 }
 0x12f   : > { %v1236_v55 = vld [vmem:[#allocation2 + $0x76] sm:$0xff] }
 0x130   : > { %1129 = vst.msk [vmem:[#allocation2 + $0x88] sm:$0xff] %vm373_vm0, %v1088_v52  ;;  %v1089_v54 = vmul.f32 %v12507_v28, %v843_v53  ;;  %v1170_v56 = vld [vmem:[#allocation2 + $0x75] sm:$0xff] }
 0x131   : > { %v726_v60 = vpop.f32.mrb[32].mxu0  ;;  %v1237_v61 = vld [vmem:[#allocation2 + $0x7e] sm:$0xff] }
 0x132   : > { %v1171_v63 = vld [vmem:[#allocation2 + $0x7d] sm:$0xff]  ;;  %1130 = vst.msk [vmem:[#allocation2 + $0x90] sm:$0xff] %vm373_vm0, %v1089_v54  ;;  %v727_v0 = vadd.f32 %v12536_v40, %v726_v60  ;;  %v10208_v2 = vpop.f32.mrb[33].mxu0  ;;  %v1270_v3 = vpack.c.bf16 %v1237_v61, %v1236_v55 }
 0x133   : > { %v1204_v4 = vpack.c.bf16 %v1171_v63, %v1170_v56  ;;  %v729_v5 = vpop.f32.mrb[34].mxu0 }
 0x134   : > { %v844_v6 = vmax.f32 %v727_v0, 0.0  ;;  %v730_v7 = vadd.f32 %v12536_v40, %v729_v5  ;;  %v10209_v8 = vpop.f32.mrb[35].mxu0  ;;  %10291 = vmatmul.mubr.msk.bf16.gmra.mrb[56].mxu1 %vm373_vm0, %v1270_v3 }
 0x135   : > { %10379 = vmatmul.mubr.msk.bf16.gmra.mrb[84].mxu0 %vm373_vm0, %v1204_v4  ;;  %10294 = vmatprep.mubr.msk.bf16.mxu1 %vm12096_vm1, %v15856_v1 }
 0x136   : > { %v1090_v9 = vmul.f32 %v12509_v29, %v844_v6  ;;  %v845_v37 = vmax.f32 %v730_v7, 0.0  ;;  %10382 = vmatprep.mubr.msk.bf16.mxu0 %vm12096_vm1, %v15856_v1 }
 0x137   : > { %v1238_v44 = vld [vmem:[#allocation2 + $0x86] sm:$0xff] }
 0x138   : > { %1131 = vst.msk [vmem:[#allocation2 + $0x98] sm:$0xff] %vm373_vm0, %v1090_v9  ;;  %v1091_v43 = vmul.f32 %v12511_v30, %v845_v37  ;;  %v1172_v53 = vld [vmem:[#allocation2 + $0x85] sm:$0xff] }
 0x139   : > { %v734_v48 = vpop.f32.mrb[36].mxu0  ;;  %v1239_v52 = vld [vmem:[#allocation2 + $0x8e] sm:$0xff] }
 0x13a   : > { %v1173_v54 = vld [vmem:[#allocation2 + $0x8d] sm:$0xff]  ;;  %1132 = vst.msk [vmem:[#allocation2 + $0xa0] sm:$0xff] %vm373_vm0, %v1091_v43  ;;  %v735_v55 = vadd.f32 %v12536_v40, %v734_v48  ;;  %v10212_v60 = vpop.f32.mrb[37].mxu0  ;;  %v1271_v61 = vpack.c.bf16 %v1239_v52, %v1238_v44 }
 0x13b   : > { %v1205_v56 = vpack.c.bf16 %v1173_v54, %v1172_v53  ;;  %v737_v63 = vpop.f32.mrb[38].mxu0 }
 0x13c   : > { %v846_v0 = vmax.f32 %v735_v55, 0.0  ;;  %v738_v2 = vadd.f32 %v12536_v40, %v737_v63  ;;  %v10213_v3 = vpop.f32.mrb[39].mxu0  ;;  %10295 = vmatmul.mubr.msk.bf16.gmra.mrb[60].mxu1 %vm373_vm0, %v1271_v61 }
 0x13d   : > { %10383 = vmatmul.mubr.msk.bf16.gmra.mrb[88].mxu0 %vm373_vm0, %v1205_v56  ;;  %10298 = vmatprep.mubr.msk.bf16.mxu1 %vm12096_vm1, %v15856_v1 }
 0x13e   : > { %v1092_v4 = vmul.f32 %v12513_v31, %v846_v0  ;;  %v847_v5 = vmax.f32 %v738_v2, 0.0  ;;  %10386 = vmatprep.mubr.msk.bf16.mxu0 %vm12096_vm1, %v15856_v1 }
 0x13f   : > { %v1240_v7 = vld [vmem:[#allocation2 + $0x96] sm:$0xff] }
 0x140   : > { %1133 = vst.msk [vmem:[#allocation2 + $0xa8] sm:$0xff] %vm373_vm0, %v1092_v4  ;;  %v1093_v6 = vmul.f32 %v12515_v32, %v847_v5  ;;  %v1174_v37 = vld [vmem:[#allocation2 + $0x95] sm:$0xff] }
 0x141   : > { %v742_v8 = vpop.f32.mrb[40].mxu0  ;;  %v1241_v9 = vld [vmem:[#allocation2 + $0x9e] sm:$0xff] }
 0x142   : > { %v1175_v43 = vld [vmem:[#allocation2 + $0x9d] sm:$0xff]  ;;  %1134 = vst.msk [vmem:[#allocation2 + $0xb0] sm:$0xff] %vm373_vm0, %v1093_v6  ;;  %v743_v44 = vadd.f32 %v12536_v40, %v742_v8  ;;  %v10216_v48 = vpop.f32.mrb[41].mxu0  ;;  %v1272_v52 = vpack.c.bf16 %v1241_v9, %v1240_v7 }
 0x143   : > { %v1206_v53 = vpack.c.bf16 %v1175_v43, %v1174_v37  ;;  %v745_v54 = vpop.f32.mrb[42].mxu0 }
 0x144   : > { %v848_v55 = vmax.f32 %v743_v44, 0.0  ;;  %v746_v60 = vadd.f32 %v12536_v40, %v745_v54  ;;  %v10217_v61 = vpop.f32.mrb[43].mxu0  ;;  %10299 = vmatmul.mubr.msk.bf16.gmra.mrb[64].mxu1 %vm373_vm0, %v1272_v52 }
 0x145   : > { %10387 = vmatmul.mubr.msk.bf16.gmra.mrb[92].mxu0 %vm373_vm0, %v1206_v53  ;;  %10302 = vmatprep.mubr.msk.bf16.mxu1 %vm12096_vm1, %v15856_v1  ;;  %v1397_v53 = vpop.f32.mrb[28].mxu1 }
 0x146   : > { %v1094_v56 = vmul.f32 %v12517_v33, %v848_v55  ;;  %v849_v63 = vmax.f32 %v746_v60, 0.0  ;;  %10390 = vmatprep.mubr.msk.bf16.mxu0 %vm12096_vm1, %v15856_v1  ;;  %v10264_v60 = vpop.f32.mrb[29].mxu1 }
 0x147   : > { %v1242_v2 = vld [vmem:[#allocation2 + $0xa6] sm:$0xff]  ;;  %v1400_v61 = vpop.f32.mrb[30].mxu1 }
 0x148   : > { %1135 = vst.msk [vmem:[#allocation2 + $0xb8] sm:$0xff] %vm373_vm0, %v1094_v56  ;;  %v1095_v0 = vmul.f32 %v12519_v34, %v849_v63  ;;  %v1176_v5 = vld [vmem:[#allocation2 + $0xa5] sm:$0xff] }
 0x149   : > { %v750_v3 = vpop.f32.mrb[44].mxu0  ;;  %v1243_v4 = vld [vmem:[#allocation2 + $0xae] sm:$0xff] }
 0x14a   : > { %v1177_v6 = vld [vmem:[#allocation2 + $0xad] sm:$0xff]  ;;  %1136 = vst.msk [vmem:[#allocation2 + $0xc0] sm:$0xff] %vm373_vm0, %v1095_v0  ;;  %v751_v7 = vadd.f32 %v12536_v40, %v750_v3  ;;  %v10220_v8 = vpop.f32.mrb[45].mxu0  ;;  %v1273_v9 = vpack.c.bf16 %v1243_v4, %v1242_v2  ;;  %v10265_v0 = vpop.f32.mrb[31].mxu1 }
 0x14b   : > { %v1207_v37 = vpack.c.bf16 %v1177_v6, %v1176_v5  ;;  %v753_v43 = vpop.f32.mrb[46].mxu0 }
 0x14c   : > { %v850_v44 = vmax.f32 %v751_v7, 0.0  ;;  %v754_v48 = vadd.f32 %v12536_v40, %v753_v43  ;;  %v10221_v52 = vpop.f32.mrb[47].mxu0  ;;  %10303 = vmatmul.mubr.msk.bf16.gmra.mrb[68].mxu1 %vm373_vm0, %v1273_v9 }
 0x14d   : > { %10391 = vmatmul.mubr.msk.bf16.gmra.mrb[96].mxu0 %vm373_vm0, %v1207_v37  ;;  %10306 = vmatprep.mubr.msk.bf16.mxu1 %vm12096_vm1, %v15856_v1 }
 0x14e   : > { %v1096_v54 = vmul.f32 %v12521_v35, %v850_v44  ;;  %v851_v55 = vmax.f32 %v754_v48, 0.0  ;;  %10394 = vmatprep.mubr.msk.bf16.mxu0 %vm12096_vm1, %v15856_v1 }
 0x14f   : > { %v1244_v63 = vld [vmem:[#allocation2 + $0xb6] sm:$0xff] }
 0x150   : > { %1137 = vst.msk [vmem:[#allocation2 + $0xc8] sm:$0xff] %vm373_vm0, %v1096_v54  ;;  %v1097_v56 = vmul.f32 %v12523_v36, %v851_v55  ;;  %v1178_v4 = vld [vmem:[#allocation2 + $0xb5] sm:$0xff] }
 0x151   : > { %v758_v2 = vpop.f32.mrb[48].mxu0  ;;  %v1245_v3 = vld [vmem:[#allocation2 + $0xbe] sm:$0xff] }
 0x152   : > { %v1179_v5 = vld [vmem:[#allocation2 + $0xbd] sm:$0xff]  ;;  %1138 = vst.msk [vmem:[#allocation2 + $0xd0] sm:$0xff] %vm373_vm0, %v1097_v56  ;;  %v759_v6 = vadd.f32 %v12536_v40, %v758_v2  ;;  %v10224_v7 = vpop.f32.mrb[49].mxu0  ;;  %v1274_v8 = vpack.c.bf16 %v1245_v3, %v1244_v63 }
 0x153   : > { %v1208_v9 = vpack.c.bf16 %v1179_v5, %v1178_v4  ;;  %v761_v37 = vpop.f32.mrb[50].mxu0 }
 0x154   : > { %v852_v43 = vmax.f32 %v759_v6, 0.0  ;;  %v762_v44 = vadd.f32 %v12536_v40, %v761_v37  ;;  %v10225_v48 = vpop.f32.mrb[51].mxu0  ;;  %10307 = vmatmul.mubr.msk.bf16.gmra.mrb[72].mxu1 %vm373_vm0, %v1274_v8 }
 0x155   : > { %10395 = vmatmul.mubr.msk.bf16.gmra.mrb[100].mxu0 %vm373_vm0, %v1208_v9  ;;  %10310 = vmatprep.mubr.msk.bf16.mxu1 %vm12096_vm1, %v15856_v1 }
 0x156   : > { %v1098_v52 = vmul.f32 %v12529_v38, %v852_v43  ;;  %v853_v54 = vmax.f32 %v762_v44, 0.0  ;;  %10398 = vmatprep.mubr.msk.bf16.mxu0 %vm12096_vm1, %v15856_v1 }
 0x157   : > { %v1246_v60 = vld [vmem:[#allocation2 + $0xc6] sm:$0xff] }
 0x158   : > { %1139 = vst.msk [vmem:[#allocation2 + $0xd8] sm:$0xff] %vm373_vm0, %v1098_v52  ;;  %v1099_v55 = vmul.f32 %v12531_v39, %v853_v54  ;;  %v1180_v0 = vld [vmem:[#allocation2 + $0xc5] sm:$0xff] }
 0x159   : > { %v766_v56 = vpop.f32.mrb[52].mxu0  ;;  %v1247_v63 = vld [vmem:[#allocation2 + $0xce] sm:$0xff] }
 0x15a   : > { %v1181_v2 = vld [vmem:[#allocation2 + $0xcd] sm:$0xff]  ;;  %1140 = vst.msk [vmem:[#allocation2 + $0xe0] sm:$0xff] %vm373_vm0, %v1099_v55  ;;  %v767_v3 = vadd.f32 %v12536_v40, %v766_v56  ;;  %v10228_v4 = vpop.f32.mrb[53].mxu0  ;;  %v1275_v5 = vpack.c.bf16 %v1247_v63, %v1246_v60 }
 0x15b   : > { %v1209_v6 = vpack.c.bf16 %v1181_v2, %v1180_v0  ;;  %v769_v7 = vpop.f32.mrb[54].mxu0 }
 0x15c   : > { %v854_v8 = vmax.f32 %v767_v3, 0.0  ;;  %v770_v9 = vadd.f32 %v12536_v40, %v769_v7  ;;  %v10229_v37 = vpop.f32.mrb[55].mxu0  ;;  %10311 = vmatmul.mubr.msk.bf16.gmra.mrb[76].mxu1 %vm373_vm0, %v1275_v5 }
 0x15d   : > { %10399 = vmatmul.mubr.msk.bf16.gmra.mrb[104].mxu0 %vm373_vm0, %v1209_v6  ;;  %10314 = vmatprep.mubr.msk.bf16.mxu1 %vm12096_vm1, %v15856_v1 }
 0x15e   : > { %v1100_v43 = vmul.f32 %v12538_v41, %v854_v8  ;;  %v855_v44 = vmax.f32 %v770_v9, 0.0  ;;  %10402 = vmatprep.mubr.msk.bf16.mxu0 %vm12096_vm1, %v15856_v1 }
 0x15f   : > { %v1248_v52 = vld [vmem:[#allocation2 + $0xd6] sm:$0xff] }
 0x160   : > { %1141 = vst.msk [vmem:[#allocation2 + $0xe8] sm:$0xff] %vm373_vm0, %v1100_v43  ;;  %v1101_v48 = vmul.f32 %v12540_v42, %v855_v44  ;;  %v1182_v54 = vld [vmem:[#allocation2 + $0xd5] sm:$0xff]  ;;  %v1253_v44 = vld [vmem:[#allocation2 + $0xfe] sm:$0xff] }
 0x161   : > { %v1249_v40 = vld [vmem:[#allocation2 + $0xde] sm:$0xff]  ;;  %v1672_v60 = vpop.f32.mrb[56].mxu0 }
 0x162   : > { %v1183_v55 = vld [vmem:[#allocation2 + $0xdd] sm:$0xff]  ;;  %1142 = vst.msk [vmem:[#allocation2 + $0xf0] sm:$0xff] %vm373_vm0, %v1101_v48  ;;  %v1276_v56 = vpack.c.bf16 %v1249_v40, %v1248_v52  ;;  %v12775_v0 = vadd.f32 %v1672_v60, %v1397_v53  ;;  %v10352_v2 = vpop.f32.mrb[57].mxu0  ;;  %v1254_v60 = vld [vmem:[#allocation2 + $0x106] sm:$0xff] }
 0x163   : > { %v1210_v63 = vpack.c.bf16 %v1183_v55, %v1182_v54  ;;  %v1675_v3 = vpop.f32.mrb[58].mxu0  ;;  %v1187_v48 = vld [vmem:[#allocation2 + $0xfd] sm:$0xff]  ;;  %v1255_v54 = vld [vmem:[#allocation2 + $0x10e] sm:$0xff] }
 0x164   : > { %v12777_v4 = vadd.f32 %v1675_v3, %v1400_v61  ;;  %v10353_v5 = vpop.f32.mrb[59].mxu0  ;;  %10315 = vmatmul.mubr.msk.bf16.gmra.mrb[80].mxu1 %vm373_vm0, %v1276_v56  ;;  %v1189_v55 = vld [vmem:[#allocation2 + $0x10d] sm:$0xff]  ;;  %v1188_v56 = vld [vmem:[#allocation2 + $0x105] sm:$0xff] }
 0x165   : > { %10403 = vmatmul.mubr.msk.bf16.gmra.mrb[108].mxu0 %vm373_vm0, %v1210_v63  ;;  %10318 = vmatprep.mubr.msk.bf16.mxu1 %vm12096_vm1, %v15856_v1  ;;  %v1279_v63 = vpack.c.bf16 %v1255_v54, %v1254_v60  ;;  %v1213_v2 = vpack.c.bf16 %v1189_v55, %v1188_v56  ;;  %v1257_v3 = vld [vmem:[#allocation2 + $0x11e] sm:$0xff]  ;;  %v1260_v54 = vld [vmem:[#allocation2 + $0x136] sm:$0xff] }
 0x166   : > { %10406 = vmatprep.mubr.msk.bf16.mxu0 %vm12096_vm1, %v15856_v1  ;;  %v1191_v5 = vld [vmem:[#allocation2 + $0x11d] sm:$0xff]  ;;  %v1194_v55 = vld [vmem:[#allocation2 + $0x135] sm:$0xff] }
 0x167   : > { %v1250_v6 = vld [vmem:[#allocation2 + $0xe6] sm:$0xff] }
 0x168   : > { %v1184_v8 = vld [vmem:[#allocation2 + $0xe5] sm:$0xff] }
 0x169   : > { %v1251_v7 = vld [vmem:[#allocation2 + $0xee] sm:$0xff]  ;;  %v1252_v61 = vld [vmem:[#allocation2 + $0xf6] sm:$0xff] }
 0x16a   : > { %v1185_v53 = vld [vmem:[#allocation2 + $0xed] sm:$0xff]  ;;  %v1277_v9 = vpack.c.bf16 %v1251_v7, %v1250_v6  ;;  %v1186_v43 = vld [vmem:[#allocation2 + $0xf5] sm:$0xff]  ;;  %v1278_v52 = vpack.c.bf16 %v1253_v44, %v1252_v61 }
 0x16b   : > { %v1211_v37 = vpack.c.bf16 %v1185_v53, %v1184_v8  ;;  %v1212_v40 = vpack.c.bf16 %v1187_v48, %v1186_v43  ;;  %v1256_v6 = vld [vmem:[#allocation2 + $0x116] sm:$0xff]  ;;  %v1258_v61 = vld [vmem:[#allocation2 + $0x126] sm:$0xff] }
 0x16c   : > { %10319 = vmatmul.mubr.msk.bf16.gmra.mrb[84].mxu1 %vm373_vm0, %v1277_v9  ;;  %v1190_v7 = vld [vmem:[#allocation2 + $0x115] sm:$0xff]  ;;  %v1280_v8 = vpack.c.bf16 %v1257_v3, %v1256_v6  ;;  %v1192_v43 = vld [vmem:[#allocation2 + $0x125] sm:$0xff] }
 0x16d   : > { %10407 = vmatmul.mubr.msk.bf16.gmra.mrb[112].mxu0 %vm373_vm0, %v1211_v37  ;;  %10322 = vmatprep.mubr.msk.bf16.mxu1 %vm12096_vm1, %v15856_v1  ;;  %v1214_v53 = vpack.c.bf16 %v1191_v5, %v1190_v7  ;;  %v1259_v9 = vld [vmem:[#allocation2 + $0x12e] sm:$0xff] }
 0x16e   : > { %10410 = vmatprep.mubr.msk.bf16.mxu0 %vm12096_vm1, %v15856_v1  ;;  %v1193_v37 = vld [vmem:[#allocation2 + $0x12d] sm:$0xff]  ;;  %v1281_v44 = vpack.c.bf16 %v1259_v9, %v1258_v61  ;;  %v2220_v9 = vld [vmem:[#allocation2 + $0x17] sm:$0xff]  ;;  %v12002_v61 = vld [vmem:[%s15802_s4 + $0x40] sm:$0xff]  }
 0x16f   : > { %v1215_v48 = vpack.c.bf16 %v1193_v37, %v1192_v43  ;;  %v1838_v6 = vld [vmem:[#allocation2 + $0x7] sm:$0xff]  ;;  %v1839_v7 = vld [vmem:[#allocation2 + $0xf] sm:$0xff] }
 0x170   : > { %v2223_v43 = vld [vmem:[#allocation2 + $0x2f] sm:$0xff] }
 0x174   : > { %10323 = vmatmul.mubr.msk.bf16.gmra.mrb[88].mxu1 %vm373_vm0, %v1278_v52  ;;  %v1261_v52 = vld [vmem:[#allocation2 + $0x13e] sm:$0xff] }
 0x175   : > { %10411 = vmatmul.mubr.msk.bf16.gmra.mrb[116].mxu0 %vm373_vm0, %v1212_v40  ;;  %10326 = vmatprep.mubr.msk.bf16.mxu1 %vm12096_vm1, %v15856_v1  ;;  %v1195_v40 = vld [vmem:[#allocation2 + $0x13d] sm:$0xff]  ;;  %v1282_v60 = vpack.c.bf16 %v1261_v52, %v1260_v54 }
 0x176   : > { %10414 = vmatprep.mubr.msk.bf16.mxu0 %vm12096_vm1, %v15856_v1  ;;  %v1216_v56 = vpack.c.bf16 %v1195_v40, %v1194_v55  ;;  %v2225_v52 = vld [vmem:[#allocation2 + $0x3f] sm:$0xff]  ;;  %v2224_v40 = vld [vmem:[#allocation2 + $0x37] sm:$0xff]  ;;  %v2227_v55 = vld [vmem:[#allocation2 + $0x4f] sm:$0xff] }
 0x177   : > { %v2263_v54 = vpack.c.bf16 %v2225_v52, %v2224_v40 }
 0x17c   : > { %10327 = vmatmul.mubr.msk.bf16.gmra.mrb[92].mxu1 %vm373_vm0, %v1279_v63  ;;  %v1262_v63 = vld [vmem:[#allocation2 + $0x146] sm:$0xf] }
 0x17d   : > { %10415 = vmatmul.mubr.msk.bf16.gmra.mrb[120].mxu0 %vm373_vm0, %v1213_v2  ;;  %10330 = vmatprep.mubr.msk.bf16.mxu1 %vm12096_vm1, %v15856_v1  ;;  %v1196_v2 = vld [vmem:[#allocation2 + $0x145] sm:$0xf]  ;;  %v1283_v3 = vpack.c.bf16 %v1262_v63, %v1262_v63 }
 0x17e   : > { %10418 = vmatprep.mubr.msk.bf16.mxu0 %vm12096_vm1, %v15856_v1  ;;  %v1217_v5 = vpack.c.bf16 %v1196_v2, %v1196_v2  ;;  %v2229_v63 = vld [vmem:[#allocation2 + $0x5f] sm:$0xff]  ;;  %v2228_v2 = vld [vmem:[#allocation2 + $0x57] sm:$0xff] }
 0x184   : > { %10331 = vmatmul.mubr.msk.bf16.gmra.mrb[96].mxu1 %vm373_vm0, %v1280_v8  ;;  %v2221_v8 = vld [vmem:[#allocation2 + $0x1f] sm:$0xff] }
 0x185   : > { %10419 = vmatmul.mubr.msk.bf16.gmra.mrb[124].mxu0 %vm373_vm0, %v1214_v53  ;;  %10334 = vmatprep.mubr.msk.bf16.mxu1 %vm12096_vm1, %v15856_v1  ;;  %v1879_v53 = vpack.c.bf16 %v1839_v7, %v1838_v6  ;;  %v2261_v37 = vpack.c.bf16 %v2221_v8, %v2220_v9  ;;  %v2231_v6 = vld [vmem:[#allocation2 + $0x6f] sm:$0xff]  ;;  %v2230_v7 = vld [vmem:[#allocation2 + $0x67] sm:$0xff]  ;;  %v12005_v9 = vld [vmem:[%s15802_s4 + $0x58] sm:$0xff]  }
 0x186   : > { %10422 = vmatprep.mubr.msk.bf16.mxu0 %vm12096_vm1, %v15856_v1  ;;  %v2266_v8 = vpack.c.bf16 %v2231_v6, %v2230_v7 }
 0x18c   : > { %10335 = vmatmul.mubr.msk.bf16.gmra.mrb[100].mxu1 %vm373_vm0, %v1281_v44  ;;  %v2222_v44 = vld [vmem:[#allocation2 + $0x27] sm:$0xff] }
 0x18d   : > { %10423 = vmatmul.mubr.msk.bf16.gmra.mrb[128].mxu0 %vm373_vm0, %v1215_v48  ;;  %10338 = vmatprep.mubr.msk.bf16.mxu1 %vm12096_vm1, %v15856_v1  ;;  %v2262_v48 = vpack.c.bf16 %v2223_v43, %v2222_v44 }
 0x18e   : > { %10426 = vmatprep.mubr.msk.bf16.mxu0 %vm12096_vm1, %v15856_v1 }
 0x194   : > { %10339 = vmatmul.mubr.msk.bf16.gmra.mrb[104].mxu1 %vm373_vm0, %v1282_v60  ;;  %v2226_v60 = vld [vmem:[#allocation2 + $0x47] sm:$0xff] }
 0x195   : > { %10427 = vmatmul.mubr.msk.bf16.gmra.mrb[132].mxu0 %vm373_vm0, %v1216_v56  ;;  %10342 = vmatprep.mubr.msk.bf16.mxu1 %vm12096_vm1, %v15856_v1  ;;  %v2264_v56 = vpack.c.bf16 %v2227_v55, %v2226_v60  ;;  %v2235_v55 = vld [vmem:[#allocation2 + $0x8f] sm:$0xff] }
 0x196   : > { %10430 = vmatprep.mubr.msk.bf16.mxu0 %vm12096_vm1, %v15856_v1 }
 0x19c   : > { %10343 = vmatmul.mubr.msk.bf16.gmra.mrb[108].mxu1 %vm373_vm0, %v1283_v3  ;;  %v2265_v3 = vpack.c.bf16 %v2229_v63, %v2228_v2 }
 0x19d   : > { %10431 = vmatmul.mubr.msk.bf16.gmra.mrb[136].mxu0 %vm373_vm0, %v1217_v5  ;;  %10438 = vmatprep.mubr.msk.bf16.mxu1 %vm12096_vm1, %v15856_v1  ;;  %v12003_v5 = vld [vmem:[%s15802_s4 + $0x50] sm:$0xff]  }
 0x19e   : > { %10526 = vmatprep.mubr.msk.bf16.mxu0 %vm12096_vm1, %v15856_v1 }
 0x1a4   : > { %10439 = vmatmul.mubr.msk.bf16.vlgmr.msra.gmra.mrb[112].mxu1 %vm373_vm0, %v1879_v53  ;;  %v12004_v53 = vld [vmem:[%s15802_s4 + $0x48] sm:$0xff]  }
 0x1a5   : > { %10527 = vmatmul.mubr.msk.bf16.vlgmr.msra.gmra.mrb[140].mxu0 %vm373_vm0, %v2261_v37  ;;  %10442 = vmatprep.mubr.msk.bf16.mxu1 %vm12096_vm1, %v15856_v1 }
 0x1a6   : > { %10530 = vmatprep.mubr.msk.bf16.mxu0 %vm12096_vm1, %v15856_v1  ;;  %10611 = vmatpush3.bf16.msra.mxu1 %v12002_v61  ;;  %v2232_v61 = vld [vmem:[#allocation2 + $0x77] sm:$0xff] }
 0x1a7   : > { %10612 = vmatprep.subr.bf16.mxu1 %v15856_v1  ;;  %10699 = vmatpush3.bf16.msra.mxu0 %v12003_v5  ;;  %v2234_v5 = vld [vmem:[#allocation2 + $0x87] sm:$0xff] }
 0x1a8   : > { %10700 = vmatprep.subr.bf16.mxu0 %v15856_v1  ;;  %v2268_v6 = vpack.c.bf16 %v2235_v55, %v2234_v5 }
 0x1aa   : > { %10613 = vmatpush3.bf16.msra.mxu1 %v12004_v53  ;;  %v2237_v53 = vld [vmem:[#allocation2 + $0x9f] sm:$0xff] }
 0x1ab   : > { %10701 = vmatpush3.bf16.msra.mxu0 %v12005_v9  ;;  %10786 = vmatprep.subr.bf16.mxu1 %v15856_v1 }
 0x1ac   : > { %10443 = vmatmul.mubr.msk.bf16.gmra.mrb[116].mxu1 %vm373_vm0, %v2261_v37  ;;  %v2233_v37 = vld [vmem:[#allocation2 + $0x7f] sm:$0xff]  ;;  %10874 = vmatprep.subr.bf16.mxu0 %v15856_v1 }
 0x1ad   : > { %10531 = vmatmul.mubr.msk.bf16.gmra.mrb[144].mxu0 %vm373_vm0, %v2262_v48  ;;  %10446 = vmatprep.mubr.msk.bf16.mxu1 %vm12096_vm1, %v15856_v1  ;;  %v2267_v43 = vpack.c.bf16 %v2233_v37, %v2232_v61 }
 0x1ae   : > { %10534 = vmatprep.mubr.msk.bf16.mxu0 %vm12096_vm1, %v15856_v1 }
 0x1b4   : > { %10447 = vmatmul.mubr.msk.bf16.gmra.mrb[120].mxu1 %vm373_vm0, %v2262_v48 }
 0x1b5   : > { %10535 = vmatmul.mubr.msk.bf16.gmra.mrb[148].mxu0 %vm373_vm0, %v2263_v54  ;;  %10450 = vmatprep.mubr.msk.bf16.mxu1 %vm12096_vm1, %v15856_v1 }
 0x1b6   : > { %10538 = vmatprep.mubr.msk.bf16.mxu0 %vm12096_vm1, %v15856_v1 }
 0x1bc   : > { %10451 = vmatmul.mubr.msk.bf16.gmra.mrb[124].mxu1 %vm373_vm0, %v2263_v54 }
 0x1bd   : > { %10539 = vmatmul.mubr.msk.bf16.gmra.mrb[152].mxu0 %vm373_vm0, %v2264_v56  ;;  %10454 = vmatprep.mubr.msk.bf16.mxu1 %vm12096_vm1, %v15856_v1 }
 0x1be   : > { %10542 = vmatprep.mubr.msk.bf16.mxu0 %vm12096_vm1, %v15856_v1 }
 0x1c4   : > { %10455 = vmatmul.mubr.msk.bf16.gmra.mrb[128].mxu1 %vm373_vm0, %v2264_v56 }
 0x1c5   : > { %10543 = vmatmul.mubr.msk.bf16.gmra.mrb[156].mxu0 %vm373_vm0, %v2265_v3  ;;  %10458 = vmatprep.mubr.msk.bf16.mxu1 %vm12096_vm1, %v15856_v1 }
 0x1c6   : > { %10546 = vmatprep.mubr.msk.bf16.mxu0 %vm12096_vm1, %v15856_v1 }
 0x1cc   : > { %10459 = vmatmul.mubr.msk.bf16.gmra.mrb[132].mxu1 %vm373_vm0, %v2265_v3 }
 0x1cd   : > { %10547 = vmatmul.mubr.msk.bf16.gmra.mrb[160].mxu0 %vm373_vm0, %v2266_v8  ;;  %10462 = vmatprep.mubr.msk.bf16.mxu1 %vm12096_vm1, %v15856_v1 }
 0x1ce   : > { %10550 = vmatprep.mubr.msk.bf16.mxu0 %vm12096_vm1, %v15856_v1 }
 0x1d4   : > { %10463 = vmatmul.mubr.msk.bf16.gmra.mrb[136].mxu1 %vm373_vm0, %v2266_v8 }
 0x1d5   : > { %10551 = vmatmul.mubr.msk.bf16.gmra.mrb[164].mxu0 %vm373_vm0, %v2267_v43  ;;  %10466 = vmatprep.mubr.msk.bf16.mxu1 %vm12096_vm1, %v15856_v1 }
 0x1d6   : > { %10554 = vmatprep.mubr.msk.bf16.mxu0 %vm12096_vm1, %v15856_v1 }
 0x1d7   : > { %v1405_v44 = vpop.f32.mrb[32].mxu1 }
 0x1d8   : > { %v1680_v48 = vpop.f32.mrb[60].mxu0  ;;  %v10268_v40 = vpop.f32.mrb[33].mxu1 }
 0x1d9   : > { %v12885_v52 = vadd.f32 %v1680_v48, %v1405_v44  ;;  %v10356_v54 = vpop.f32.mrb[61].mxu0  ;;  %v1408_v60 = vpop.f32.mrb[34].mxu1  ;;  %v2236_v40 = vld [vmem:[#allocation2 + $0x97] sm:$0xff] }
 0x1da   : > { %v1683_v56 = vpop.f32.mrb[62].mxu0  ;;  %v10269_v2 = vpop.f32.mrb[35].mxu1 }
 0x1db   : > { %v12887_v63 = vadd.f32 %v1683_v56, %v1408_v60  ;;  %v10357_v3 = vpop.f32.mrb[63].mxu0  ;;  %v2269_v60 = vpack.c.bf16 %v2237_v53, %v2236_v40  ;;  %v2238_v53 = vld [vmem:[#allocation2 + $0xa7] sm:$0xff] }
 0x1dc   : > { %10467 = vmatmul.mubr.msk.bf16.gmra.mrb[140].mxu1 %vm373_vm0, %v2267_v43  ;;  %v2239_v3 = vld [vmem:[#allocation2 + $0xaf] sm:$0xff] }
 0x1dd   : > { %10555 = vmatmul.mubr.msk.bf16.gmra.mrb[168].mxu0 %vm373_vm0, %v2268_v6  ;;  %10470 = vmatprep.mubr.msk.bf16.mxu1 %vm12096_vm1, %v15856_v1  ;;  %v2270_v40 = vpack.c.bf16 %v2239_v3, %v2238_v53  ;;  %v2240_v3 = vld [vmem:[#allocation2 + $0xb7] sm:$0xff] }
 0x1de   : > { %10558 = vmatprep.mubr.msk.bf16.mxu0 %vm12096_vm1, %v15856_v1 }
 0x1df   : > { %v1413_v7 = vpop.f32.mrb[36].mxu1 }
 0x1e0   : > { %v1688_v8 = vpop.f32.mrb[64].mxu0  ;;  %v10272_v37 = vpop.f32.mrb[37].mxu1 }
 0x1e1   : > { %v12895_v9 = vadd.f32 %v1688_v8, %v1413_v7  ;;  %v10360_v61 = vpop.f32.mrb[65].mxu0  ;;  %v1416_v44 = vpop.f32.mrb[38].mxu1 }
 0x1e2   : > { %v1691_v48 = vpop.f32.mrb[66].mxu0  ;;  %v10273_v43 = vpop.f32.mrb[39].mxu1 }
 0x1e3   : > { %v12897_v54 = vadd.f32 %v1691_v48, %v1416_v44  ;;  %v10361_v55 = vpop.f32.mrb[67].mxu0 }
 0x1e4   : > { %10471 = vmatmul.mubr.msk.bf16.gmra.mrb[144].mxu1 %vm373_vm0, %v2268_v6 }
 0x1e5   : > { %10559 = vmatmul.mubr.msk.bf16.gmra.mrb[172].mxu0 %vm373_vm0, %v2269_v60  ;;  %10474 = vmatprep.mubr.msk.bf16.mxu1 %vm12096_vm1, %v15856_v1 }
 0x1e6   : > { %10562 = vmatprep.mubr.msk.bf16.mxu0 %vm12096_vm1, %v15856_v1 }
 0x1e7   : > { %v1421_v56 = vpop.f32.mrb[40].mxu1 }
 0x1e8   : > { %v1696_v2 = vpop.f32.mrb[68].mxu0  ;;  %v10276_v7 = vpop.f32.mrb[41].mxu1 }
 0x1e9   : > { %v12905_v5 = vadd.f32 %v1696_v2, %v1421_v56  ;;  %v10364_v8 = vpop.f32.mrb[69].mxu0  ;;  %v1424_v37 = vpop.f32.mrb[42].mxu1  ;;  %v2241_v56 = vld [vmem:[#allocation2 + $0xbf] sm:$0xff] }
 0x1ea   : > { %v1699_v61 = vpop.f32.mrb[70].mxu0  ;;  %v10277_v6 = vpop.f32.mrb[43].mxu1 }
 0x1eb   : > { %v12907_v44 = vadd.f32 %v1699_v61, %v1424_v37  ;;  %v10365_v48 = vpop.f32.mrb[71].mxu0 }
 0x1ec   : > { %10475 = vmatmul.mubr.msk.bf16.gmra.mrb[148].mxu1 %vm373_vm0, %v2269_v60  ;;  %v2271_v48 = vpack.c.bf16 %v2241_v56, %v2240_v3  ;;  %v2242_v56 = vld [vmem:[#allocation2 + $0xc7] sm:$0xff] }
 0x1ed   : > { %10563 = vmatmul.mubr.msk.bf16.gmra.mrb[176].mxu0 %vm373_vm0, %v2270_v40  ;;  %10478 = vmatprep.mubr.msk.bf16.mxu1 %vm12096_vm1, %v15856_v1 }
 0x1ee   : > { %10566 = vmatprep.mubr.msk.bf16.mxu0 %vm12096_vm1, %v15856_v1 }
 0x1ef   : > { %v1429_v43 = vpop.f32.mrb[44].mxu1 }
 0x1f0   : > { %v1704_v55 = vpop.f32.mrb[72].mxu0  ;;  %v10280_v7 = vpop.f32.mrb[45].mxu1 }
 0x1f1   : > { %v12915_v2 = vadd.f32 %v1704_v55, %v1429_v43  ;;  %v10368_v8 = vpop.f32.mrb[73].mxu0  ;;  %v1432_v37 = vpop.f32.mrb[46].mxu1  ;;  %v2243_v7 = vld [vmem:[#allocation2 + $0xcf] sm:$0xff] }
 0x1f2   : > { %v1707_v61 = vpop.f32.mrb[74].mxu0  ;;  %v10281_v60 = vpop.f32.mrb[47].mxu1  ;;  %v2272_v58 = vpack.c.bf16 %v2243_v7, %v2242_v56  ;;  %v2244_v7 = vld [vmem:[#allocation2 + $0xd7] sm:$0xff] }
 0x1f3   : > { %v12917_v53 = vadd.f32 %v1707_v61, %v1432_v37  ;;  %v10369_v6 = vpop.f32.mrb[75].mxu0 }
 0x1f4   : > { %10479 = vmatmul.mubr.msk.bf16.gmra.mrb[152].mxu1 %vm373_vm0, %v2270_v40 }
 0x1f5   : > { %10567 = vmatmul.mubr.msk.bf16.gmra.mrb[180].mxu0 %vm373_vm0, %v2271_v48  ;;  %10482 = vmatprep.mubr.msk.bf16.mxu1 %vm12096_vm1, %v15856_v1 }
 0x1f6   : > { %10570 = vmatprep.mubr.msk.bf16.mxu0 %vm12096_vm1, %v15856_v1 }
 0x1f7   : > { %v1437_v43 = vpop.f32.mrb[48].mxu1 }
 0x1f8   : > { %v1712_v55 = vpop.f32.mrb[76].mxu0  ;;  %v10284_v37 = vpop.f32.mrb[49].mxu1 }
 0x1f9   : > { %v12925_v8 = vadd.f32 %v1712_v55, %v1437_v43  ;;  %v10372_v61 = vpop.f32.mrb[77].mxu0  ;;  %v1440_v60 = vpop.f32.mrb[50].mxu1  ;;  %v2245_v37 = vld [vmem:[#allocation2 + $0xdf] sm:$0xff] }
 0x1fa   : > { %v1715_v6 = vpop.f32.mrb[78].mxu0  ;;  %v10285_v40 = vpop.f32.mrb[51].mxu1  ;;  %v2273_v49 = vpack.c.bf16 %v2245_v37, %v2244_v7  ;;  %v2246_v37 = vld [vmem:[#allocation2 + $0xe7] sm:$0xff] }
 0x1fb   : > { %v12927_v3 = vadd.f32 %v1715_v6, %v1440_v60  ;;  %v10373_v59 = vpop.f32.mrb[79].mxu0 }
 0x1fc   : > { %10483 = vmatmul.mubr.msk.bf16.gmra.mrb[156].mxu1 %vm373_vm0, %v2271_v48 }
 0x1fd   : > { %10571 = vmatmul.mubr.msk.bf16.gmra.mrb[184].mxu0 %vm373_vm0, %v2272_v58  ;;  %10486 = vmatprep.mubr.msk.bf16.mxu1 %vm12096_vm1, %v15856_v1 }
 0x1fe   : > { %10574 = vmatprep.mubr.msk.bf16.mxu0 %vm12096_vm1, %v15856_v1 }
 0x1ff   : > { %v1445_v43 = vpop.f32.mrb[52].mxu1 }
 0x200   : > { %v1720_v55 = vpop.f32.mrb[80].mxu0  ;;  %v10288_v60 = vpop.f32.mrb[53].mxu1 }
 0x201   : > { %v12935_v61 = vadd.f32 %v1720_v55, %v1445_v43  ;;  %v10376_v6 = vpop.f32.mrb[81].mxu0  ;;  %v1448_v40 = vpop.f32.mrb[54].mxu1  ;;  %v2247_v60 = vld [vmem:[#allocation2 + $0xef] sm:$0xff] }
 0x202   : > { %v1723_v59 = vpop.f32.mrb[82].mxu0  ;;  %v10289_v48 = vpop.f32.mrb[55].mxu1  ;;  %v2274_v46 = vpack.c.bf16 %v2247_v60, %v2246_v37  ;;  %v2249_v60 = vld [vmem:[#allocation2 + $0xff] sm:$0xff] }
 0x203   : > { %v12937_v56 = vadd.f32 %v1723_v59, %v1448_v40  ;;  %v10377_v51 = vpop.f32.mrb[83].mxu0 }
 0x204   : > { %10487 = vmatmul.mubr.msk.bf16.gmra.mrb[160].mxu1 %vm373_vm0, %v2272_v58 }
 0x205   : > { %10575 = vmatmul.mubr.msk.bf16.gmra.mrb[188].mxu0 %vm373_vm0, %v2273_v49  ;;  %10490 = vmatprep.mubr.msk.bf16.mxu1 %vm12096_vm1, %v15856_v1 }
 0x206   : > { %10578 = vmatprep.mubr.msk.bf16.mxu0 %vm12096_vm1, %v15856_v1 }
 0x207   : > { %v1453_v43 = vpop.f32.mrb[56].mxu1 }
 0x208   : > { %v1728_v55 = vpop.f32.mrb[84].mxu0  ;;  %v10292_v40 = vpop.f32.mrb[57].mxu1 }
 0x209   : > { %v12945_v6 = vadd.f32 %v1728_v55, %v1453_v43  ;;  %v10380_v59 = vpop.f32.mrb[85].mxu0  ;;  %v1456_v48 = vpop.f32.mrb[58].mxu1  ;;  %v2248_v40 = vld [vmem:[#allocation2 + $0xf7] sm:$0xff] }
 0x20a   : > { %v1731_v51 = vpop.f32.mrb[86].mxu0  ;;  %v10293_v58 = vpop.f32.mrb[59].mxu1  ;;  %v2275_v47 = vpack.c.bf16 %v2249_v60, %v2248_v40  ;;  %v2250_v40 = vld [vmem:[#allocation2 + $0x107] sm:$0xff] }
 0x20b   : > { %v12947_v7 = vadd.f32 %v1731_v51, %v1456_v48  ;;  %v10381_v11 = vpop.f32.mrb[87].mxu0 }
 0x20c   : > { %10491 = vmatmul.mubr.msk.bf16.gmra.mrb[164].mxu1 %vm373_vm0, %v2273_v49 }
 0x20d   : > { %10579 = vmatmul.mubr.msk.bf16.gmra.mrb[192].mxu0 %vm373_vm0, %v2274_v46  ;;  %10494 = vmatprep.mubr.msk.bf16.mxu1 %vm12096_vm1, %v15856_v1 }
 0x20e   : > { %10582 = vmatprep.mubr.msk.bf16.mxu0 %vm12096_vm1, %v15856_v1 }
 0x20f   : > { %v1461_v43 = vpop.f32.mrb[60].mxu1 }
 0x210   : > { %v1736_v55 = vpop.f32.mrb[88].mxu0  ;;  %v10296_v48 = vpop.f32.mrb[61].mxu1 }
 0x211   : > { %v12955_v59 = vadd.f32 %v1736_v55, %v1461_v43  ;;  %v10384_v51 = vpop.f32.mrb[89].mxu0  ;;  %v1464_v58 = vpop.f32.mrb[62].mxu1  ;;  %v2251_v48 = vld [vmem:[#allocation2 + $0x10f] sm:$0xff] }
 0x212   : > { %v1739_v11 = vpop.f32.mrb[90].mxu0  ;;  %v10297_v49 = vpop.f32.mrb[63].mxu1  ;;  %v2276_v50 = vpack.c.bf16 %v2251_v48, %v2250_v40  ;;  %v2252_v48 = vld [vmem:[#allocation2 + $0x117] sm:$0xff] }
 0x213   : > { %v12957_v37 = vadd.f32 %v1739_v11, %v1464_v58  ;;  %v10385_v10 = vpop.f32.mrb[91].mxu0 }
 0x214   : > { %10495 = vmatmul.mubr.msk.bf16.gmra.mrb[168].mxu1 %vm373_vm0, %v2274_v46 }
 0x215   : > { %10583 = vmatmul.mubr.msk.bf16.gmra.mrb[196].mxu0 %vm373_vm0, %v2275_v47  ;;  %10498 = vmatprep.mubr.msk.bf16.mxu1 %vm12096_vm1, %v15856_v1 }
 0x216   : > { %10586 = vmatprep.mubr.msk.bf16.mxu0 %vm12096_vm1, %v15856_v1 }
 0x217   : > { %v1469_v43 = vpop.f32.mrb[64].mxu1 }
 0x218   : > { %v1744_v55 = vpop.f32.mrb[92].mxu0  ;;  %v10300_v58 = vpop.f32.mrb[65].mxu1 }
 0x219   : > { %v12965_v51 = vadd.f32 %v1744_v55, %v1469_v43  ;;  %v10388_v11 = vpop.f32.mrb[93].mxu0  ;;  %v1472_v49 = vpop.f32.mrb[66].mxu1  ;;  %v2253_v58 = vld [vmem:[#allocation2 + $0x11f] sm:$0xff] }
 0x21a   : > { %v1747_v10 = vpop.f32.mrb[94].mxu0  ;;  %v10301_v46 = vpop.f32.mrb[67].mxu1  ;;  %v2277_v62 = vpack.c.bf16 %v2253_v58, %v2252_v48  ;;  %v2254_v58 = vld [vmem:[#allocation2 + $0x127] sm:$0xff] }
 0x21b   : > { %v12967_v60 = vadd.f32 %v1747_v10, %v1472_v49  ;;  %v10389_v12 = vpop.f32.mrb[95].mxu0 }
 0x21c   : > { %10499 = vmatmul.mubr.msk.bf16.gmra.mrb[172].mxu1 %vm373_vm0, %v2275_v47 }
 0x21d   : > { %10587 = vmatmul.mubr.msk.bf16.gmra.mrb[200].mxu0 %vm373_vm0, %v2276_v50  ;;  %10502 = vmatprep.mubr.msk.bf16.mxu1 %vm12096_vm1, %v15856_v1 }
 0x21e   : > { %10590 = vmatprep.mubr.msk.bf16.mxu0 %vm12096_vm1, %v15856_v1 }
 0x21f   : > { %v1477_v43 = vpop.f32.mrb[68].mxu1 }
 0x220   : > { %v1752_v55 = vpop.f32.mrb[96].mxu0  ;;  %v10304_v49 = vpop.f32.mrb[69].mxu1 }
 0x221   : > { %v12975_v11 = vadd.f32 %v1752_v55, %v1477_v43  ;;  %v10392_v10 = vpop.f32.mrb[97].mxu0  ;;  %v1480_v46 = vpop.f32.mrb[70].mxu1  ;;  %v2255_v49 = vld [vmem:[#allocation2 + $0x12f] sm:$0xff] }
 0x222   : > { %v1755_v12 = vpop.f32.mrb[98].mxu0  ;;  %v10305_v47 = vpop.f32.mrb[71].mxu1  ;;  %v2278_v42 = vpack.c.bf16 %v2255_v49, %v2254_v58  ;;  %v2256_v49 = vld [vmem:[#allocation2 + $0x137] sm:$0xff] }
 0x223   : > { %v12977_v40 = vadd.f32 %v1755_v12, %v1480_v46  ;;  %v10393_v45 = vpop.f32.mrb[99].mxu0 }
 0x224   : > { %10503 = vmatmul.mubr.msk.bf16.gmra.mrb[176].mxu1 %vm373_vm0, %v2276_v50 }
 0x225   : > { %10591 = vmatmul.mubr.msk.bf16.gmra.mrb[204].mxu0 %vm373_vm0, %v2277_v62  ;;  %10506 = vmatprep.mubr.msk.bf16.mxu1 %vm12096_vm1, %v15856_v1 }
 0x226   : > { %10594 = vmatprep.mubr.msk.bf16.mxu0 %vm12096_vm1, %v15856_v1 }
 0x227   : > { %v1485_v43 = vpop.f32.mrb[72].mxu1 }
 0x228   : > { %v1760_v55 = vpop.f32.mrb[100].mxu0  ;;  %v10308_v46 = vpop.f32.mrb[73].mxu1 }
 0x229   : > { %v12985_v10 = vadd.f32 %v1760_v55, %v1485_v43  ;;  %v10396_v12 = vpop.f32.mrb[101].mxu0  ;;  %v1488_v47 = vpop.f32.mrb[74].mxu1  ;;  %v2257_v46 = vld [vmem:[#allocation2 + $0x13f] sm:$0xff] }
 0x22a   : > { %v1763_v45 = vpop.f32.mrb[102].mxu0  ;;  %v10309_v50 = vpop.f32.mrb[75].mxu1  ;;  %v2279_v39 = vpack.c.bf16 %v2257_v46, %v2256_v49  ;;  %v2258_v46 = vld [vmem:[#allocation2 + $0x147] sm:$0xff] }
 0x22b   : > { %v12987_v48 = vadd.f32 %v1763_v45, %v1488_v47  ;;  %v10397_v57 = vpop.f32.mrb[103].mxu0 }
 0x22c   : > { %10507 = vmatmul.mubr.msk.bf16.gmra.mrb[180].mxu1 %vm373_vm0, %v2277_v62 }
 0x22d   : > { %10595 = vmatmul.mubr.msk.bf16.gmra.mrb[208].mxu0 %vm373_vm0, %v2278_v42  ;;  %10510 = vmatprep.mubr.msk.bf16.mxu1 %vm12096_vm1, %v15856_v1 }
 0x22e   : > { %10598 = vmatprep.mubr.msk.bf16.mxu0 %vm12096_vm1, %v15856_v1 }
 0x22f   : > { %v1493_v43 = vpop.f32.mrb[76].mxu1 }
 0x230   : > { %v1768_v55 = vpop.f32.mrb[104].mxu0  ;;  %v10312_v47 = vpop.f32.mrb[77].mxu1 }
 0x231   : > { %v12995_v12 = vadd.f32 %v1768_v55, %v1493_v43  ;;  %v10400_v45 = vpop.f32.mrb[105].mxu0  ;;  %v1496_v50 = vpop.f32.mrb[78].mxu1  ;;  %v2259_v47 = vld [vmem:[#allocation2 + $0x14f] sm:$0xff] }
 0x232   : > { %v1771_v57 = vpop.f32.mrb[106].mxu0  ;;  %v10313_v62 = vpop.f32.mrb[79].mxu1  ;;  %v2280_v36 = vpack.c.bf16 %v2259_v47, %v2258_v46 }
 0x233   : > { %v12997_v58 = vadd.f32 %v1771_v57, %v1496_v50  ;;  %v10401_v41 = vpop.f32.mrb[107].mxu0 }
 0x234   : > { %10511 = vmatmul.mubr.msk.bf16.gmra.mrb[184].mxu1 %vm373_vm0, %v2278_v42 }
 0x235   : > { %10599 = vmatmul.mubr.msk.bf16.gmra.mrb[212].mxu0 %vm373_vm0, %v2279_v39  ;;  %10514 = vmatprep.mubr.msk.bf16.mxu1 %vm12096_vm1, %v15856_v1 }
 0x236   : > { %10602 = vmatprep.mubr.msk.bf16.mxu0 %vm12096_vm1, %v15856_v1 }
 0x237   : > { %v1501_v43 = vpop.f32.mrb[80].mxu1 }
 0x238   : > { %v1776_v55 = vpop.f32.mrb[108].mxu0  ;;  %v10316_v50 = vpop.f32.mrb[81].mxu1 }
 0x239   : > { %v13005_v45 = vadd.f32 %v1776_v55, %v1501_v43  ;;  %v10404_v57 = vpop.f32.mrb[109].mxu0  ;;  %v1504_v62 = vpop.f32.mrb[82].mxu1  ;;  %v1878_v50 = vld [vmem:[#allocation2 + $0x147] sm:$0xf] }
 0x23a   : > { %v1779_v41 = vpop.f32.mrb[110].mxu0  ;;  %v10317_v42 = vpop.f32.mrb[83].mxu1  ;;  %v2260_v57 = vld [vmem:[#allocation2 + $0x157] sm:$0xf] }
 0x23b   : > { %v13007_v49 = vadd.f32 %v1779_v41, %v1504_v62  ;;  %v10405_v38 = vpop.f32.mrb[111].mxu0  ;;  %v1899_v42 = vpack.c.bf16 %v1878_v50, %v1878_v50  ;;  %v2281_v34 = vpack.c.bf16 %v2260_v57, %v2260_v57 }
 0x23c   : > { %10515 = vmatmul.mubr.msk.bf16.gmra.mrb[188].mxu1 %vm373_vm0, %v2279_v39 }
 0x23d   : > { %10603 = vmatmul.mubr.msk.bf16.gmra.mrb[216].mxu0 %vm373_vm0, %v2280_v36  ;;  %10518 = vmatprep.mubr.msk.bf16.mxu1 %vm12096_vm1, %v15856_v1 }
 0x23e   : > { %10606 = vmatprep.mubr.msk.bf16.mxu0 %vm12096_vm1, %v15856_v1 }
 0x23f   : > { %v1509_v43 = vpop.f32.mrb[84].mxu1 }
 0x240   : > { %v1784_v55 = vpop.f32.mrb[112].mxu0  ;;  %v10320_v62 = vpop.f32.mrb[85].mxu1 }
 0x241   : > { %v13015_v35 = vadd.f32 %v1784_v55, %v1509_v43  ;;  %v10408_v41 = vpop.f32.mrb[113].mxu0  ;;  %v1512_v38 = vpop.f32.mrb[86].mxu1  ;;  %v2603_v62 = vld [vmem:[#allocation2 + $0x20] sm:$0xff] }
 0x242   : > { %v1787_v47 = vpop.f32.mrb[114].mxu0  ;;  %v10321_v39 = vpop.f32.mrb[87].mxu1  ;;  %v2985_v41 = vld [vmem:[#allocation2 + $0x21] sm:$0xff] }
 0x243   : > { %v13017_v46 = vadd.f32 %v1787_v47, %v1512_v38  ;;  %v10409_v36 = vpop.f32.mrb[115].mxu0 }
 0x244   : > { %10519 = vmatmul.mubr.msk.bf16.gmra.mrb[192].mxu1 %vm373_vm0, %v1899_v42  ;;  %v2602_v36 = vld [vmem:[#allocation2 + $0x18] sm:$0xff] }
 0x245   : > { %10607 = vmatmul.mubr.msk.bf16.gmra.mrb[220].mxu0 %vm373_vm0, %v2281_v34  ;;  %10614 = vmatprep.mubr.msk.bf16.mxu1 %vm12096_vm1, %v15856_v1  ;;  %v2984_v42 = vld [vmem:[#allocation2 + $0x19] sm:$0xff]  ;;  %v2643_v31 = vpack.c.bf16 %v2603_v62, %v2602_v36  ;;  %v2987_v62 = vld [vmem:[#allocation2 + $0x31] sm:$0xff]  ;;  %v2986_v36 = vld [vmem:[#allocation2 + $0x29] sm:$0xff] }
 0x246   : > { %10702 = vmatprep.mubr.msk.bf16.mxu0 %vm12096_vm1, %v15856_v1  ;;  %v3025_v30 = vpack.c.bf16 %v2985_v41, %v2984_v42  ;;  %v12006_v1 = vld [vmem:[%s15802_s4 + $0x60] sm:$0xff]  }
 0x247   : > { %v1517_v43 = vpop.f32.mrb[88].mxu1 }
 0x248   : > { %v1792_v55 = vpop.f32.mrb[116].mxu0  ;;  %v10324_v47 = vpop.f32.mrb[89].mxu1 }
 0x249   : > { %v13025_v38 = vadd.f32 %v1792_v55, %v1517_v43  ;;  %v10412_v39 = vpop.f32.mrb[117].mxu0  ;;  %v1520_v50 = vpop.f32.mrb[90].mxu1  ;;  %v15937_v43 = vmov 0.0  }
 0x24a   : > { %v1795_v57 = vpop.f32.mrb[118].mxu0  ;;  %v10325_v34 = vpop.f32.mrb[91].mxu1  ;;  %390 = vst.msk [vmem:[#allocation4] sm:$0xff] %vm389_vm3, %v15937_v43  ;;  %391 = vst.msk [vmem:[#allocation4 + $0x8] sm:$0xff] %vm389_vm3, %v15937_v43 }
 0x24b   : > { %v13027_v33 = vadd.f32 %v1795_v57, %v1520_v50  ;;  %v10413_v32 = vpop.f32.mrb[119].mxu0  ;;  %392 = vst.msk [vmem:[#allocation4 + $0x10] sm:$0xff] %vm389_vm3, %v15937_v43  ;;  %393 = vst.msk [vmem:[#allocation4 + $0x158] sm:$0xff] %vm389_vm3, %v15937_v43 }
 0x24c   : > { %10615 = vmatmul.mubr.msk.bf16.vlgmr.msra.gmra.mrb[196].mxu1 %vm373_vm0, %v2643_v31  ;;  %v2605_v32 = vld [vmem:[#allocation2 + $0x30] sm:$0xff]  ;;  %394 = vst.msk [vmem:[#allocation4 + $0x160] sm:$0xff] %vm389_vm3, %v15937_v43  ;;  %395 = vst.msk [vmem:[#allocation4 + $0x168] sm:$0xff] %vm389_vm3, %v15937_v43 }
 0x24d   : > { %10703 = vmatmul.mubr.msk.bf16.vlgmr.msra.gmra.mrb[224].mxu0 %vm373_vm0, %v3025_v30  ;;  %10618 = vmatprep.mubr.msk.bf16.mxu1 %vm12096_vm1, %v15937_v43  ;;  %v2604_v30 = vld [vmem:[#allocation2 + $0x28] sm:$0xff] }
 0x24e   : > { %10706 = vmatprep.mubr.msk.bf16.mxu0 %vm12096_vm1, %v15937_v43  ;;  %10787 = vmatpush3.bf16.msra.mxu1 %v12006_v1  ;;  %v2644_v28 = vpack.c.bf16 %v2605_v32, %v2604_v30  ;;  %v3026_v1 = vpack.c.bf16 %v2987_v62, %v2986_v36  ;;  %v2606_v30 = vld [vmem:[#allocation2 + $0x38] sm:$0xff] }
 0x24f   : > { %v1525_v55 = vpop.f32.mrb[92].mxu1  ;;  %10788 = vmatprep.subr.bf16.mxu1 %v15937_v43 }
 0x250   : > { %v1800_v47 = vpop.f32.mrb[120].mxu0  ;;  %v10328_v39 = vpop.f32.mrb[93].mxu1 }
 0x251   : > { %v13039_v41 = vadd.f32 %v1800_v47, %v1525_v55  ;;  %v10416_v50 = vpop.f32.mrb[121].mxu0  ;;  %v1528_v31 = vpop.f32.mrb[94].mxu1  ;;  %v2607_v39 = vld [vmem:[#allocation2 + $0x40] sm:$0xff] }
 0x252   : > { %v1803_v57 = vpop.f32.mrb[122].mxu0  ;;  %v10329_v34 = vpop.f32.mrb[95].mxu1  ;;  %v2989_v50 = vld [vmem:[#allocation2 + $0x41] sm:$0xff]  ;;  %v2645_v27 = vpack.c.bf16 %v2607_v39, %v2606_v30 }
 0x253   : > { %v13041_v42 = vadd.f32 %v1803_v57, %v1528_v31  ;;  %v10417_v29 = vpop.f32.mrb[123].mxu0 }
 0x254   : > { %10619 = vmatmul.mubr.msk.bf16.gmra.mrb[200].mxu1 %vm373_vm0, %v2644_v28  ;;  %v2988_v28 = vld [vmem:[#allocation2 + $0x39] sm:$0xff] }
 0x255   : > { %10707 = vmatmul.mubr.msk.bf16.gmra.mrb[228].mxu0 %vm373_vm0, %v3026_v1  ;;  %10622 = vmatprep.mubr.msk.bf16.mxu1 %vm12096_vm1, %v15937_v43  ;;  %v13053_v26 = vpack.c.bf16 %v2989_v50, %v2988_v28  ;;  %v2990_v28 = vld [vmem:[#allocation2 + $0x49] sm:$0xff] }
 0x256   : > { %10710 = vmatprep.mubr.msk.bf16.mxu0 %vm12096_vm1, %v15937_v43 }
 0x257   : > { %v1533_v55 = vpop.f32.mrb[96].mxu1 }
 0x258   : > { %v1808_v47 = vpop.f32.mrb[124].mxu0  ;;  %v10332_v57 = vpop.f32.mrb[97].mxu1 }
 0x259   : > { %v13049_v31 = vadd.f32 %v1808_v47, %v1533_v55  ;;  %v10420_v29 = vpop.f32.mrb[125].mxu0  ;;  %v1536_v32 = vpop.f32.mrb[98].mxu1  ;;  %v2609_v57 = vld [vmem:[#allocation2 + $0x50] sm:$0xff] }
 0x25a   : > { %v1811_v62 = vpop.f32.mrb[126].mxu0  ;;  %v10333_v34 = vpop.f32.mrb[99].mxu1  ;;  %v2991_v29 = vld [vmem:[#allocation2 + $0x51] sm:$0xff] }
 0x25b   : > { %v13051_v36 = vadd.f32 %v1811_v62, %v1536_v32  ;;  %v10421_v1 = vpop.f32.mrb[127].mxu0  ;;  %v13066_v23 = vpack.c.bf16 %v2991_v29, %v2990_v28 }
 0x25c   : > { %10623 = vmatmul.mubr.msk.bf16.gmra.mrb[204].mxu1 %vm373_vm0, %v2645_v27  ;;  %v2608_v27 = vld [vmem:[#allocation2 + $0x48] sm:$0xff] }
 0x25d   : > { %10711 = vmatmul.mubr.msk.bf16.gmra.mrb[232].mxu0 %vm373_vm0, %v13053_v26  ;;  %10626 = vmatprep.mubr.msk.bf16.mxu1 %vm12096_vm1, %v15937_v43  ;;  %v2646_v24 = vpack.c.bf16 %v2609_v57, %v2608_v27  ;;  %v2992_v27 = vld [vmem:[#allocation2 + $0x59] sm:$0xff] }
 0x25e   : > { %10714 = vmatprep.mubr.msk.bf16.mxu0 %vm12096_vm1, %v15937_v43 }
 0x25f   : > { %v1541_v55 = vpop.f32.mrb[100].mxu1 }
 0x260   : > { %v1816_v47 = vpop.f32.mrb[128].mxu0  ;;  %v10336_v39 = vpop.f32.mrb[101].mxu1 }
 0x261   : > { %v13062_v32 = vadd.f32 %v1816_v47, %v1541_v55  ;;  %v10424_v50 = vpop.f32.mrb[129].mxu0  ;;  %v1544_v62 = vpop.f32.mrb[102].mxu1  ;;  %v2611_v39 = vld [vmem:[#allocation2 + $0x60] sm:$0xff] }
 0x262   : > { %v1819_v30 = vpop.f32.mrb[130].mxu0  ;;  %v10337_v1 = vpop.f32.mrb[103].mxu1  ;;  %v2993_v50 = vld [vmem:[#allocation2 + $0x61] sm:$0xff] }
 0x263   : > { %v13064_v34 = vadd.f32 %v1819_v30, %v1544_v62  ;;  %v10425_v25 = vpop.f32.mrb[131].mxu0  ;;  %v13079_v20 = vpack.c.bf16 %v2993_v50, %v2992_v27  ;;  %v2995_v50 = vld [vmem:[#allocation2 + $0x71] sm:$0xff]  ;;  %v2994_v27 = vld [vmem:[#allocation2 + $0x69] sm:$0xff] }
 0x264   : > { %10627 = vmatmul.mubr.msk.bf16.gmra.mrb[208].mxu1 %vm373_vm0, %v2646_v24  ;;  %v2610_v24 = vld [vmem:[#allocation2 + $0x58] sm:$0xff]  ;;  %v13094_v17 = vpack.c.bf16 %v2995_v50, %v2994_v27 }
 0x265   : > { %10715 = vmatmul.mubr.msk.bf16.gmra.mrb[236].mxu0 %vm373_vm0, %v13066_v23  ;;  %10630 = vmatprep.mubr.msk.bf16.mxu1 %vm12096_vm1, %v15937_v43  ;;  %v2647_v21 = vpack.c.bf16 %v2611_v39, %v2610_v24  ;;  %v2613_v39 = vld [vmem:[#allocation2 + $0x70] sm:$0xff]  ;;  %v2612_v24 = vld [vmem:[#allocation2 + $0x68] sm:$0xff]  ;;  %v2996_v27 = vld [vmem:[#allocation2 + $0x79] sm:$0xff] }
 0x266   : > { %10718 = vmatprep.mubr.msk.bf16.mxu0 %vm12096_vm1, %v15937_v43  ;;  %v2648_v18 = vpack.c.bf16 %v2613_v39, %v2612_v24  ;;  %v2997_v39 = vld [vmem:[#allocation2 + $0x81] sm:$0xff]  ;;  %v2614_v24 = vld [vmem:[#allocation2 + $0x78] sm:$0xff] }
 0x267   : > { %v1549_v55 = vpop.f32.mrb[104].mxu1  ;;  %v13115_v15 = vpack.c.bf16 %v2997_v39, %v2996_v27 }
 0x268   : > { %v1824_v47 = vpop.f32.mrb[132].mxu0  ;;  %v10340_v25 = vpop.f32.mrb[105].mxu1 }
 0x269   : > { %v13075_v62 = vadd.f32 %v1824_v47, %v1549_v55  ;;  %v10428_v57 = vpop.f32.mrb[133].mxu0  ;;  %v1552_v29 = vpop.f32.mrb[106].mxu1  ;;  %v12007_v55 = vld [vmem:[%s15802_s4 + $0x70] sm:$0xff]  }
 0x26a   : > { %v1827_v30 = vpop.f32.mrb[134].mxu0  ;;  %v10341_v1 = vpop.f32.mrb[107].mxu1  ;;  %10875 = vmatpush3.bf16.msra.mxu0 %v12007_v55  ;;  %v12008_v55 = vld [vmem:[%s15802_s4 + $0x68] sm:$0xff]  }
 0x26b   : > { %v13077_v28 = vadd.f32 %v1827_v30, %v1552_v29  ;;  %v10429_v22 = vpop.f32.mrb[135].mxu0  ;;  %10876 = vmatprep.subr.bf16.mxu0 %v15937_v43  ;;  %10789 = vmatpush3.bf16.msra.mxu1 %v12008_v55 }
 0x26c   : > { %10631 = vmatmul.mubr.msk.bf16.gmra.mrb[212].mxu1 %vm373_vm0, %v2647_v21  ;;  %10962 = vmatprep.subr.bf16.mxu1 %v15937_v43 }
 0x26d   : > { %10719 = vmatmul.mubr.msk.bf16.gmra.mrb[240].mxu0 %vm373_vm0, %v13079_v20  ;;  %10634 = vmatprep.mubr.msk.bf16.mxu1 %vm12096_vm1, %v15937_v43 }
 0x26e   : > { %10722 = vmatprep.mubr.msk.bf16.mxu0 %vm12096_vm1, %v15937_v43 }
 0x26f   : > { %v1557_v22 = vpop.f32.mrb[108].mxu1 }
 0x270   : > { %v1832_v47 = vpop.f32.mrb[136].mxu0  ;;  %v10344_v25 = vpop.f32.mrb[109].mxu1 }
 0x271   : > { %v13092_v21 = vadd.f32 %v1832_v47, %v1557_v22  ;;  %v10432_v57 = vpop.f32.mrb[137].mxu0  ;;  %v1560_v29 = vpop.f32.mrb[110].mxu1  ;;  %v12009_v22 = vld [vmem:[%s15802_s4 + $0x78] sm:$0xff]   ;;  %v2615_v47 = vld [vmem:[#allocation2 + $0x80] sm:$0xff] }
 0x272   : > { %v1835_v30 = vpop.f32.mrb[138].mxu0  ;;  %v10345_v1 = vpop.f32.mrb[111].mxu1  ;;  %10877 = vmatpush3.bf16.msra.mxu0 %v12009_v22  ;;  %v2649_v14 = vpack.c.bf16 %v2615_v47, %v2614_v24 }
 0x273   : > { %v10433_v19 = vpop.f32.mrb[139].mxu0  ;;  %11050 = vmatprep.subr.bf16.mxu0 %v15937_v43 }
 0x274   : > { %10635 = vmatmul.mubr.msk.bf16.gmra.mrb[216].mxu1 %vm373_vm0, %v2648_v18 }
 0x275   : > { %10723 = vmatmul.mubr.msk.bf16.gmra.mrb[244].mxu0 %vm373_vm0, %v13094_v17  ;;  %10638 = vmatprep.mubr.msk.bf16.mxu1 %vm12096_vm1, %v15937_v43 }
 0x276   : > { %10726 = vmatprep.mubr.msk.bf16.mxu0 %vm12096_vm1, %v15937_v43 }
 0x277   : > { %v2013_v18 = vpop.f32.mrb[112].mxu1 }
 0x278   : > { %v2395_v19 = vpop.f32.mrb[140].mxu0  ;;  %v2179_v50 = vadd.f32 %v2013_v18, %v12775_v0  ;;  %v10440_v25 = vpop.f32.mrb[113].mxu1  ;;  %v2617_v18 = vld [vmem:[#allocation2 + $0x90] sm:$0xff] }
 0x279   : > { %v10528_v57 = vpop.f32.mrb[141].mxu0  ;;  %v2016_v29 = vpop.f32.mrb[114].mxu1 }
 0x27a   : > { %v2398_v30 = vpop.f32.mrb[142].mxu0  ;;  %v13112_v1 = vadd.f32 %v2395_v19, %v2179_v50  ;;  %v2180_v55 = vadd.f32 %v2016_v29, %v12777_v4  ;;  %v10441_v22 = vpop.f32.mrb[115].mxu1  ;;  %v2998_v57 = vld [vmem:[#allocation2 + $0x89] sm:$0xff] }
 0x27b   : > { %v10529_v16 = vpop.f32.mrb[143].mxu0 }
 0x27c   : > { %v13117_v13 = vadd.f32 %v2398_v30, %v2180_v55  ;;  %10639 = vmatmul.mubr.msk.bf16.gmra.mrb[220].mxu1 %vm373_vm0, %v2649_v14  ;;  %v2999_v16 = vld [vmem:[#allocation2 + $0x91] sm:$0xff]  ;;  %v2616_v14 = vld [vmem:[#allocation2 + $0x88] sm:$0xff] }
 0x27d   : > { %10727 = vmatmul.mubr.msk.bf16.gmra.mrb[248].mxu0 %vm373_vm0, %v13115_v15  ;;  %10642 = vmatprep.mubr.msk.bf16.mxu1 %vm12096_vm1, %v15937_v43  ;;  %v2650_v55 = vpack.c.bf16 %v2617_v18, %v2616_v14  ;;  %v13130_v22 = vpack.c.bf16 %v2999_v16, %v2998_v57 }
 0x27e   : > { %15938 = vst [vmem:[#allocation49_spill] sm:$0xff] %v13117_v13  ;;  %10730 = vmatprep.mubr.msk.bf16.mxu0 %vm12096_vm1, %v15937_v43 }
 0x27f   : > { %v2021_v0 = vpop.f32.mrb[116].mxu1 }
 0x280   : > { %v2403_v4 = vpop.f32.mrb[144].mxu0  ;;  %v2181_v19 = vadd.f32 %v2021_v0, %v12885_v52  ;;  %v10444_v47 = vpop.f32.mrb[117].mxu1  ;;  %v2619_v0 = vld [vmem:[#allocation2 + $0xa0] sm:$0xff] }
 0x281   : > { %v10532_v39 = vpop.f32.mrb[145].mxu0  ;;  %v2024_v50 = vpop.f32.mrb[118].mxu1 }
 0x282   : > { %v2406_v25 = vpop.f32.mrb[146].mxu0  ;;  %v13127_v29 = vadd.f32 %v2403_v4, %v2181_v19  ;;  %v2182_v30 = vadd.f32 %v2024_v50, %v12887_v63  ;;  %v10445_v24 = vpop.f32.mrb[119].mxu1  ;;  %v3001_v4 = vld [vmem:[#allocation2 + $0xa1] sm:$0xff]  ;;  %v2618_v50 = vld [vmem:[#allocation2 + $0x98] sm:$0xff] }
 0x283   : > { %v10533_v27 = vpop.f32.mrb[147].mxu0 }
 0x284   : > { %v13132_v13 = vadd.f32 %v2406_v25, %v2182_v30  ;;  %10643 = vmatmul.mubr.msk.bf16.gmra.mrb[224].mxu1 %vm373_vm0, %v2650_v55  ;;  %v3000_v25 = vld [vmem:[#allocation2 + $0x99] sm:$0xff]  ;;  %v2651_v27 = vpack.c.bf16 %v2619_v0, %v2618_v50 }
 0x285   : > { %10731 = vmatmul.mubr.msk.bf16.gmra.mrb[252].mxu0 %vm373_vm0, %v13130_v22  ;;  %10646 = vmatprep.mubr.msk.bf16.mxu1 %vm12096_vm1, %v15937_v43  ;;  %v13145_v55 = vpack.c.bf16 %v3001_v4, %v3000_v25 }
 0x286   : > { %15939 = vst [vmem:[#allocation50_spill] sm:$0xff] %v13132_v13  ;;  %10734 = vmatprep.mubr.msk.bf16.mxu0 %vm12096_vm1, %v15937_v43 }
 0x287   : > { %v2029_v52 = vpop.f32.mrb[120].mxu1 }
 0x288   : > { %v2411_v63 = vpop.f32.mrb[148].mxu0  ;;  %v2183_v18 = vadd.f32 %v2029_v52, %v12895_v9  ;;  %v10448_v16 = vpop.f32.mrb[121].mxu1  ;;  %v2621_v52 = vld [vmem:[#allocation2 + $0xb0] sm:$0xff] }
 0x289   : > { %v10536_v19 = vpop.f32.mrb[149].mxu0  ;;  %v2032_v47 = vpop.f32.mrb[122].mxu1 }
 0x28a   : > { %v2414_v39 = vpop.f32.mrb[150].mxu0  ;;  %v13142_v14 = vadd.f32 %v2411_v63, %v2183_v18  ;;  %v2184_v57 = vadd.f32 %v2032_v47, %v12897_v54  ;;  %v10449_v30 = vpop.f32.mrb[123].mxu1  ;;  %v3003_v63 = vld [vmem:[#allocation2 + $0xb1] sm:$0xff]  ;;  %v2620_v47 = vld [vmem:[#allocation2 + $0xa8] sm:$0xff] }
 0x28b   : > { %v10537_v24 = vpop.f32.mrb[151].mxu0 }
 0x28c   : > { %v13147_v13 = vadd.f32 %v2414_v39, %v2184_v57  ;;  %10647 = vmatmul.mubr.msk.bf16.gmra.mrb[228].mxu1 %vm373_vm0, %v2651_v27  ;;  %v3002_v39 = vld [vmem:[#allocation2 + $0xa9] sm:$0xff]  ;;  %v2652_v24 = vpack.c.bf16 %v2621_v52, %v2620_v47 }
 0x28d   : > { %10735 = vmatmul.mubr.msk.bf16.gmra.mrb[0].mxu0 %vm373_vm0, %v13145_v55  ;;  %10650 = vmatprep.mubr.msk.bf16.mxu1 %vm12096_vm1, %v15937_v43  ;;  %v13160_v27 = vpack.c.bf16 %v3003_v63, %v3002_v39 }
 0x28e   : > { %15940 = vst [vmem:[#allocation51_spill] sm:$0xff] %v13147_v13  ;;  %10738 = vmatprep.mubr.msk.bf16.mxu0 %vm12096_vm1, %v15937_v43 }
 0x28f   : > { %v2037_v9 = vpop.f32.mrb[124].mxu1 }
 0x290   : > { %v2419_v54 = vpop.f32.mrb[152].mxu0  ;;  %v2185_v0 = vadd.f32 %v2037_v9, %v12905_v5  ;;  %v10452_v4 = vpop.f32.mrb[125].mxu1  ;;  %v2623_v9 = vld [vmem:[#allocation2 + $0xc0] sm:$0xff] }
 0x291   : > { %v10540_v18 = vpop.f32.mrb[153].mxu0  ;;  %v2040_v16 = vpop.f32.mrb[126].mxu1 }
 0x292   : > { %v2422_v19 = vpop.f32.mrb[154].mxu0  ;;  %v13157_v50 = vadd.f32 %v2419_v54, %v2185_v0  ;;  %v2186_v25 = vadd.f32 %v2040_v16, %v12907_v44  ;;  %v10453_v57 = vpop.f32.mrb[127].mxu1  ;;  %v3005_v54 = vld [vmem:[#allocation2 + $0xc1] sm:$0xff]  ;;  %v2622_v16 = vld [vmem:[#allocation2 + $0xb8] sm:$0xff] }
 0x293   : > { %v10541_v30 = vpop.f32.mrb[155].mxu0 }
 0x294   : > { %v13162_v13 = vadd.f32 %v2422_v19, %v2186_v25  ;;  %10651 = vmatmul.mubr.msk.bf16.gmra.mrb[232].mxu1 %vm373_vm0, %v2652_v24  ;;  %v3004_v19 = vld [vmem:[#allocation2 + $0xb9] sm:$0xff]  ;;  %v2653_v30 = vpack.c.bf16 %v2623_v9, %v2622_v16 }
 0x295   : > { %10739 = vmatmul.mubr.msk.bf16.gmra.mrb[4].mxu0 %vm373_vm0, %v13160_v27  ;;  %10654 = vmatprep.mubr.msk.bf16.mxu1 %vm12096_vm1, %v15937_v43  ;;  %v13175_v24 = vpack.c.bf16 %v3005_v54, %v3004_v19 }
 0x296   : > { %15941 = vst [vmem:[#allocation52_spill] sm:$0xff] %v13162_v13  ;;  %10742 = vmatprep.mubr.msk.bf16.mxu0 %vm12096_vm1, %v15937_v43 }
 0x297   : > { %v2045_v5 = vpop.f32.mrb[128].mxu1 }
 0x298   : > { %v2427_v44 = vpop.f32.mrb[156].mxu0  ;;  %v2187_v52 = vadd.f32 %v2045_v5, %v12915_v2  ;;  %v10456_v63 = vpop.f32.mrb[129].mxu1  ;;  %v2625_v5 = vld [vmem:[#allocation2 + $0xd0] sm:$0xff] }
 0x299   : > { %v10544_v0 = vpop.f32.mrb[157].mxu0  ;;  %v2048_v4 = vpop.f32.mrb[130].mxu1 }
 0x29a   : > { %v2430_v18 = vpop.f32.mrb[158].mxu0  ;;  %v13172_v47 = vadd.f32 %v2427_v44, %v2187_v52  ;;  %v2188_v39 = vadd.f32 %v2048_v4, %v12917_v53  ;;  %v10457_v25 = vpop.f32.mrb[131].mxu1  ;;  %v3007_v44 = vld [vmem:[#allocation2 + $0xd1] sm:$0xff]  ;;  %v2624_v4 = vld [vmem:[#allocation2 + $0xc8] sm:$0xff] }
 0x29b   : > { %v10545_v57 = vpop.f32.mrb[159].mxu0 }
 0x29c   : > { %v13177_v13 = vadd.f32 %v2430_v18, %v2188_v39  ;;  %10655 = vmatmul.mubr.msk.bf16.gmra.mrb[236].mxu1 %vm373_vm0, %v2653_v30  ;;  %v3006_v18 = vld [vmem:[#allocation2 + $0xc9] sm:$0xff]  ;;  %v2654_v57 = vpack.c.bf16 %v2625_v5, %v2624_v4 }
 0x29d   : > { %10743 = vmatmul.mubr.msk.bf16.gmra.mrb[8].mxu0 %vm373_vm0, %v13175_v24  ;;  %10658 = vmatprep.mubr.msk.bf16.mxu1 %vm12096_vm1, %v15937_v43  ;;  %v13190_v30 = vpack.c.bf16 %v3007_v44, %v3006_v18 }
 0x29e   : > { %15942 = vst [vmem:[#allocation53_spill] sm:$0xff] %v13177_v13  ;;  %10746 = vmatprep.mubr.msk.bf16.mxu0 %vm12096_vm1, %v15937_v43 }
 0x29f   : > { %v2053_v2 = vpop.f32.mrb[132].mxu1 }
 0x2a0   : > { %v2435_v53 = vpop.f32.mrb[160].mxu0  ;;  %v2189_v9 = vadd.f32 %v2053_v2, %v12925_v8  ;;  %v10460_v54 = vpop.f32.mrb[133].mxu1  ;;  %v2627_v2 = vld [vmem:[#allocation2 + $0xe0] sm:$0xff] }
 0x2a1   : > { %v10548_v52 = vpop.f32.mrb[161].mxu0  ;;  %v2056_v63 = vpop.f32.mrb[134].mxu1 }
 0x2a2   : > { %v2438_v0 = vpop.f32.mrb[162].mxu0  ;;  %v13187_v16 = vadd.f32 %v2435_v53, %v2189_v9  ;;  %v2190_v19 = vadd.f32 %v2056_v63, %v12927_v3  ;;  %v10461_v39 = vpop.f32.mrb[135].mxu1  ;;  %v3009_v53 = vld [vmem:[#allocation2 + $0xe1] sm:$0xff]  ;;  %v2626_v63 = vld [vmem:[#allocation2 + $0xd8] sm:$0xff] }
 0x2a3   : > { %v10549_v25 = vpop.f32.mrb[163].mxu0 }
 0x2a4   : > { %v13192_v13 = vadd.f32 %v2438_v0, %v2190_v19  ;;  %10659 = vmatmul.mubr.msk.bf16.gmra.mrb[240].mxu1 %vm373_vm0, %v2654_v57  ;;  %v3008_v0 = vld [vmem:[#allocation2 + $0xd9] sm:$0xff]  ;;  %v2655_v25 = vpack.c.bf16 %v2627_v2, %v2626_v63  ;;  %v3011_v2 = vld [vmem:[#allocation2 + $0xf1] sm:$0xff] }
 0x2a5   : > { %10747 = vmatmul.mubr.msk.bf16.gmra.mrb[12].mxu0 %vm373_vm0, %v13190_v30  ;;  %10662 = vmatprep.mubr.msk.bf16.mxu1 %vm12096_vm1, %v15937_v43  ;;  %v13205_v57 = vpack.c.bf16 %v3009_v53, %v3008_v0 }
 0x2a6   : > { %15943 = vst [vmem:[#allocation54_spill] sm:$0xff] %v13192_v13  ;;  %10750 = vmatprep.mubr.msk.bf16.mxu0 %vm12096_vm1, %v15937_v43 }
 0x2a7   : > { %v2061_v8 = vpop.f32.mrb[136].mxu1 }
 0x2a8   : > { %v2443_v3 = vpop.f32.mrb[164].mxu0  ;;  %v2191_v5 = vadd.f32 %v2061_v8, %v12935_v61  ;;  %v10464_v44 = vpop.f32.mrb[137].mxu1  ;;  %v2629_v8 = vld [vmem:[#allocation2 + $0xf0] sm:$0xff] }
 0x2a9   : > { %v10552_v9 = vpop.f32.mrb[165].mxu0  ;;  %v2064_v54 = vpop.f32.mrb[138].mxu1 }
 0x2aa   : > { %v2446_v52 = vpop.f32.mrb[166].mxu0  ;;  %v13202_v4 = vadd.f32 %v2443_v3, %v2191_v5  ;;  %v2192_v18 = vadd.f32 %v2064_v54, %v12937_v56  ;;  %v10465_v19 = vpop.f32.mrb[139].mxu1  ;;  %v3010_v3 = vld [vmem:[#allocation2 + $0xe9] sm:$0xff] }
 0x2ab   : > { %v10553_v39 = vpop.f32.mrb[167].mxu0 }
 0x2ac   : > { %v13207_v13 = vadd.f32 %v2446_v52, %v2192_v18  ;;  %10663 = vmatmul.mubr.msk.bf16.gmra.mrb[244].mxu1 %vm373_vm0, %v2655_v25  ;;  %v2628_v52 = vld [vmem:[#allocation2 + $0xe8] sm:$0xff]  ;;  %v13220_v25 = vpack.c.bf16 %v3011_v2, %v3010_v3 }
 0x2ad   : > { %10751 = vmatmul.mubr.msk.bf16.gmra.mrb[16].mxu0 %vm373_vm0, %v13205_v57  ;;  %10666 = vmatprep.mubr.msk.bf16.mxu1 %vm12096_vm1, %v15937_v43  ;;  %v2656_v39 = vpack.c.bf16 %v2629_v8, %v2628_v52 }
 0x2ae   : > { %15944 = vst [vmem:[#allocation55_spill] sm:$0xff] %v13207_v13  ;;  %10754 = vmatprep.mubr.msk.bf16.mxu0 %vm12096_vm1, %v15937_v43 }
 0x2af   : > { %v2069_v61 = vpop.f32.mrb[140].mxu1 }
 0x2b0   : > { %v2451_v56 = vpop.f32.mrb[168].mxu0  ;;  %v2193_v53 = vadd.f32 %v2069_v61, %v12945_v6  ;;  %v10468_v5 = vpop.f32.mrb[141].mxu1  ;;  %v2631_v61 = vld [vmem:[#allocation2 + $0x100] sm:$0xff] }
 0x2b1   : > { %v10556_v44 = vpop.f32.mrb[169].mxu0  ;;  %v2072_v9 = vpop.f32.mrb[142].mxu1 }
 0x2b2   : > { %v2454_v54 = vpop.f32.mrb[170].mxu0  ;;  %v13217_v63 = vadd.f32 %v2451_v56, %v2193_v53  ;;  %v2194_v0 = vadd.f32 %v2072_v9, %v12947_v7  ;;  %v10469_v18 = vpop.f32.mrb[143].mxu1  ;;  %v3013_v56 = vld [vmem:[#allocation2 + $0x101] sm:$0xff]  ;;  %v2630_v44 = vld [vmem:[#allocation2 + $0xf8] sm:$0xff] }
 0x2b3   : > { %v10557_v19 = vpop.f32.mrb[171].mxu0  ;;  %v3012_v9 = vld [vmem:[#allocation2 + $0xf9] sm:$0xff] }
 0x2b4   : > { %v13222_v13 = vadd.f32 %v2454_v54, %v2194_v0  ;;  %10667 = vmatmul.mubr.msk.bf16.gmra.mrb[248].mxu1 %vm373_vm0, %v2656_v39  ;;  %v2657_v19 = vpack.c.bf16 %v2631_v61, %v2630_v44  ;;  %v13235_v39 = vpack.c.bf16 %v3013_v56, %v3012_v9 }
 0x2b5   : > { %10755 = vmatmul.mubr.msk.bf16.gmra.mrb[20].mxu0 %vm373_vm0, %v13220_v25  ;;  %10670 = vmatprep.mubr.msk.bf16.mxu1 %vm12096_vm1, %v15937_v43 }
 0x2b6   : > { %15945 = vst [vmem:[#allocation56_spill] sm:$0xff] %v13222_v13  ;;  %10758 = vmatprep.mubr.msk.bf16.mxu0 %vm12096_vm1, %v15937_v43 }
 0x2b7   : > { %v2077_v6 = vpop.f32.mrb[144].mxu1 }
 0x2b8   : > { %v2459_v7 = vpop.f32.mrb[172].mxu0  ;;  %v2195_v8 = vadd.f32 %v2077_v6, %v12955_v59  ;;  %v10472_v3 = vpop.f32.mrb[145].mxu1  ;;  %v2633_v6 = vld [vmem:[#allocation2 + $0x110] sm:$0xff] }
 0x2b9   : > { %v10560_v2 = vpop.f32.mrb[173].mxu0  ;;  %v2080_v53 = vpop.f32.mrb[146].mxu1 }
 0x2ba   : > { %v2462_v5 = vpop.f32.mrb[174].mxu0  ;;  %v13232_v54 = vadd.f32 %v2459_v7, %v2195_v8  ;;  %v2196_v52 = vadd.f32 %v2080_v53, %v12957_v37  ;;  %v10473_v0 = vpop.f32.mrb[147].mxu1  ;;  %v3015_v7 = vld [vmem:[#allocation2 + $0x111] sm:$0xff]  ;;  %v2632_v53 = vld [vmem:[#allocation2 + $0x108] sm:$0xff] }
 0x2bb   : > { %v10561_v18 = vpop.f32.mrb[175].mxu0 }
 0x2bc   : > { %v13237_v13 = vadd.f32 %v2462_v5, %v2196_v52  ;;  %10671 = vmatmul.mubr.msk.bf16.gmra.mrb[252].mxu1 %vm373_vm0, %v2657_v19  ;;  %v3014_v5 = vld [vmem:[#allocation2 + $0x109] sm:$0xff]  ;;  %v2658_v18 = vpack.c.bf16 %v2633_v6, %v2632_v53 }
 0x2bd   : > { %10759 = vmatmul.mubr.msk.bf16.gmra.mrb[24].mxu0 %vm373_vm0, %v13235_v39  ;;  %10674 = vmatprep.mubr.msk.bf16.mxu1 %vm12096_vm1, %v15937_v43  ;;  %v13250_v19 = vpack.c.bf16 %v3015_v7, %v3014_v5 }
 0x2be   : > { %15946 = vst [vmem:[#allocation57_spill] sm:$0xff] %v13237_v13  ;;  %10762 = vmatprep.mubr.msk.bf16.mxu0 %vm12096_vm1, %v15937_v43 }
 0x2bf   : > { %v2085_v59 = vpop.f32.mrb[148].mxu1 }
 0x2c0   : > { %v2467_v37 = vpop.f32.mrb[176].mxu0  ;;  %v2197_v61 = vadd.f32 %v2085_v59, %v12965_v51  ;;  %v10476_v56 = vpop.f32.mrb[149].mxu1  ;;  %v2635_v59 = vld [vmem:[#allocation2 + $0x120] sm:$0xff] }
 0x2c1   : > { %v10564_v8 = vpop.f32.mrb[177].mxu0  ;;  %v2088_v3 = vpop.f32.mrb[150].mxu1 }
 0x2c2   : > { %v2470_v2 = vpop.f32.mrb[178].mxu0  ;;  %v13247_v44 = vadd.f32 %v2467_v37, %v2197_v61  ;;  %v2198_v9 = vadd.f32 %v2088_v3, %v12967_v60  ;;  %v10477_v52 = vpop.f32.mrb[151].mxu1  ;;  %v3017_v37 = vld [vmem:[#allocation2 + $0x121] sm:$0xff]  ;;  %v2634_v3 = vld [vmem:[#allocation2 + $0x118] sm:$0xff] }
 0x2c3   : > { %v10565_v0 = vpop.f32.mrb[179].mxu0 }
 0x2c4   : > { %v13252_v13 = vadd.f32 %v2470_v2, %v2198_v9  ;;  %10675 = vmatmul.mubr.msk.bf16.gmra.mrb[0].mxu1 %vm373_vm0, %v2658_v18  ;;  %v3016_v2 = vld [vmem:[#allocation2 + $0x119] sm:$0xff]  ;;  %v2659_v0 = vpack.c.bf16 %v2635_v59, %v2634_v3 }
 0x2c5   : > { %10763 = vmatmul.mubr.msk.bf16.gmra.mrb[28].mxu0 %vm373_vm0, %v13250_v19  ;;  %10678 = vmatprep.mubr.msk.bf16.mxu1 %vm12096_vm1, %v15937_v43  ;;  %v13265_v18 = vpack.c.bf16 %v3017_v37, %v3016_v2 }
 0x2c6   : > { %15947 = vst [vmem:[#allocation58_spill] sm:$0xff] %v13252_v13  ;;  %10766 = vmatprep.mubr.msk.bf16.mxu0 %vm12096_vm1, %v15937_v43 }
 0x2c7   : > { %v2093_v51 = vpop.f32.mrb[152].mxu1 }
 0x2c8   : > { %v2475_v60 = vpop.f32.mrb[180].mxu0  ;;  %v2199_v6 = vadd.f32 %v2093_v51, %v12975_v11  ;;  %v10480_v7 = vpop.f32.mrb[153].mxu1  ;;  %v2637_v51 = vld [vmem:[#allocation2 + $0x130] sm:$0xff] }
 0x2c9   : > { %v10568_v61 = vpop.f32.mrb[181].mxu0  ;;  %v2096_v56 = vpop.f32.mrb[154].mxu1 }
 0x2ca   : > { %v2478_v8 = vpop.f32.mrb[182].mxu0  ;;  %v13262_v53 = vadd.f32 %v2475_v60, %v2199_v6  ;;  %v2200_v5 = vadd.f32 %v2096_v56, %v12977_v40  ;;  %v10481_v9 = vpop.f32.mrb[155].mxu1  ;;  %v3019_v60 = vld [vmem:[#allocation2 + $0x131] sm:$0xff]  ;;  %v2636_v56 = vld [vmem:[#allocation2 + $0x128] sm:$0xff] }
 0x2cb   : > { %v10569_v52 = vpop.f32.mrb[183].mxu0 }
 0x2cc   : > { %v13267_v13 = vadd.f32 %v2478_v8, %v2200_v5  ;;  %10679 = vmatmul.mubr.msk.bf16.gmra.mrb[4].mxu1 %vm373_vm0, %v2659_v0  ;;  %v3018_v8 = vld [vmem:[#allocation2 + $0x129] sm:$0xff]  ;;  %v2660_v52 = vpack.c.bf16 %v2637_v51, %v2636_v56 }
 0x2cd   : > { %10767 = vmatmul.mubr.msk.bf16.gmra.mrb[32].mxu0 %vm373_vm0, %v13265_v18  ;;  %10682 = vmatprep.mubr.msk.bf16.mxu1 %vm12096_vm1, %v15937_v43  ;;  %v13280_v0 = vpack.c.bf16 %v3019_v60, %v3018_v8 }
 0x2ce   : > { %15948 = vst [vmem:[#allocation59_spill] sm:$0xff] %v13267_v13  ;;  %10770 = vmatprep.mubr.msk.bf16.mxu0 %vm12096_vm1, %v15937_v43 }
 0x2cf   : > { %v2101_v11 = vpop.f32.mrb[156].mxu1 }
 0x2d0   : > { %v2483_v40 = vpop.f32.mrb[184].mxu0  ;;  %v2201_v59 = vadd.f32 %v2101_v11, %v12985_v10  ;;  %v10484_v37 = vpop.f32.mrb[157].mxu1  ;;  %v2639_v11 = vld [vmem:[#allocation2 + $0x140] sm:$0xff] }
 0x2d1   : > { %v10572_v6 = vpop.f32.mrb[185].mxu0  ;;  %v2104_v7 = vpop.f32.mrb[158].mxu1 }
 0x2d2   : > { %v2486_v61 = vpop.f32.mrb[186].mxu0  ;;  %v13277_v3 = vadd.f32 %v2483_v40, %v2201_v59  ;;  %v2202_v2 = vadd.f32 %v2104_v7, %v12987_v48  ;;  %v10485_v5 = vpop.f32.mrb[159].mxu1  ;;  %v3021_v40 = vld [vmem:[#allocation2 + $0x141] sm:$0xff]  ;;  %v2638_v7 = vld [vmem:[#allocation2 + $0x138] sm:$0xff] }
 0x2d3   : > { %v10573_v9 = vpop.f32.mrb[187].mxu0 }
 0x2d4   : > { %v13282_v13 = vadd.f32 %v2486_v61, %v2202_v2  ;;  %10683 = vmatmul.mubr.msk.bf16.gmra.mrb[8].mxu1 %vm373_vm0, %v2660_v52  ;;  %v3020_v61 = vld [vmem:[#allocation2 + $0x139] sm:$0xff]  ;;  %v2661_v9 = vpack.c.bf16 %v2639_v11, %v2638_v7 }
 0x2d5   : > { %10771 = vmatmul.mubr.msk.bf16.gmra.mrb[36].mxu0 %vm373_vm0, %v13280_v0  ;;  %10686 = vmatprep.mubr.msk.bf16.mxu1 %vm12096_vm1, %v15937_v43  ;;  %v13295_v52 = vpack.c.bf16 %v3021_v40, %v3020_v61 }
 0x2d6   : > { %15949 = vst [vmem:[#allocation60_spill] sm:$0xff] %v13282_v13  ;;  %10774 = vmatprep.mubr.msk.bf16.mxu0 %vm12096_vm1, %v15937_v43 }
 0x2d7   : > { %v2109_v10 = vpop.f32.mrb[160].mxu1 }
 0x2d8   : > { %v2491_v48 = vpop.f32.mrb[188].mxu0  ;;  %v2203_v51 = vadd.f32 %v2109_v10, %v12995_v12  ;;  %v10488_v60 = vpop.f32.mrb[161].mxu1  ;;  %v2641_v10 = vld [vmem:[#allocation2 + $0x150] sm:$0xff] }
 0x2d9   : > { %v10576_v59 = vpop.f32.mrb[189].mxu0  ;;  %v2112_v37 = vpop.f32.mrb[162].mxu1 }
 0x2da   : > { %v2494_v6 = vpop.f32.mrb[190].mxu0  ;;  %v13292_v56 = vadd.f32 %v2491_v48, %v2203_v51  ;;  %v2204_v8 = vadd.f32 %v2112_v37, %v12997_v58  ;;  %v10489_v2 = vpop.f32.mrb[163].mxu1  ;;  %v3023_v48 = vld [vmem:[#allocation2 + $0x151] sm:$0xff]  ;;  %v2640_v37 = vld [vmem:[#allocation2 + $0x148] sm:$0xff] }
 0x2db   : > { %v10577_v5 = vpop.f32.mrb[191].mxu0 }
 0x2dc   : > { %v13297_v13 = vadd.f32 %v2494_v6, %v2204_v8  ;;  %10687 = vmatmul.mubr.msk.bf16.gmra.mrb[12].mxu1 %vm373_vm0, %v2661_v9  ;;  %v3022_v6 = vld [vmem:[#allocation2 + $0x149] sm:$0xff]  ;;  %v2662_v5 = vpack.c.bf16 %v2641_v10, %v2640_v37 }
 0x2dd   : > { %10775 = vmatmul.mubr.msk.bf16.gmra.mrb[40].mxu0 %vm373_vm0, %v13295_v52  ;;  %10690 = vmatprep.mubr.msk.bf16.mxu1 %vm12096_vm1, %v15937_v43  ;;  %v13310_v9 = vpack.c.bf16 %v3023_v48, %v3022_v6 }
 0x2de   : > { %15950 = vst [vmem:[#allocation61_spill] sm:$0xff] %v13297_v13  ;;  %10778 = vmatprep.mubr.msk.bf16.mxu0 %vm12096_vm1, %v15937_v43 }
 0x2df   : > { %v2117_v12 = vpop.f32.mrb[164].mxu1 }
 0x2e0   : > { %v2499_v58 = vpop.f32.mrb[192].mxu0  ;;  %v2205_v11 = vadd.f32 %v2117_v12, %v13005_v45  ;;  %v10492_v40 = vpop.f32.mrb[165].mxu1  ;;  %v2642_v12 = vld [vmem:[#allocation2 + $0x158] sm:$0xf] }
 0x2e1   : > { %v10580_v51 = vpop.f32.mrb[193].mxu0  ;;  %v2120_v60 = vpop.f32.mrb[166].mxu1 }
 0x2e2   : > { %v2502_v59 = vpop.f32.mrb[194].mxu0  ;;  %v13307_v7 = vadd.f32 %v2499_v58, %v2205_v11  ;;  %v2206_v61 = vadd.f32 %v2120_v60, %v13007_v49  ;;  %v10493_v8 = vpop.f32.mrb[167].mxu1  ;;  %v3024_v58 = vld [vmem:[#allocation2 + $0x159] sm:$0xf] }
 0x2e3   : > { %v10581_v2 = vpop.f32.mrb[195].mxu0  ;;  %v3045_v8 = vpack.c.bf16 %v3024_v58, %v3024_v58 }
 0x2e4   : > { %v13312_v13 = vadd.f32 %v2502_v59, %v2206_v61  ;;  %10691 = vmatmul.mubr.msk.bf16.gmra.mrb[16].mxu1 %vm373_vm0, %v2662_v5  ;;  %v2663_v61 = vpack.c.bf16 %v2642_v12, %v2642_v12  ;;  %v3749_v5 = vld [vmem:[#allocation2 + $0x32] sm:$0xff] }
 0x2e5   : > { %10779 = vmatmul.mubr.msk.bf16.gmra.mrb[44].mxu0 %vm373_vm0, %v13310_v9  ;;  %10694 = vmatprep.mubr.msk.bf16.mxu1 %vm12096_vm1, %v15937_v43 }
 0x2e6   : > { %10782 = vmatprep.mubr.msk.bf16.mxu0 %vm12096_vm1, %v15937_v43 }
 0x2e7   : > { %v2125_v45 = vpop.f32.mrb[168].mxu1 }
 0x2e8   : > { %v2507_v49 = vpop.f32.mrb[196].mxu0  ;;  %v2207_v10 = vadd.f32 %v2125_v45, %v13015_v35  ;;  %v10496_v48 = vpop.f32.mrb[169].mxu1  ;;  %v3367_v35 = vld [vmem:[#allocation2 + $0x31] sm:$0xff] }
 0x2e9   : > { %v10584_v11 = vpop.f32.mrb[197].mxu0  ;;  %v2128_v40 = vpop.f32.mrb[170].mxu1  ;;  %v3748_v48 = vld [vmem:[#allocation2 + $0x2a] sm:$0xff] }
 0x2ea   : > { %v2510_v51 = vpop.f32.mrb[198].mxu0  ;;  %v13322_v60 = vadd.f32 %v2507_v49, %v2207_v10  ;;  %v2208_v59 = vadd.f32 %v2128_v40, %v13017_v46  ;;  %v10497_v37 = vpop.f32.mrb[171].mxu1  ;;  %v3366_v10 = vld [vmem:[#allocation2 + $0x29] sm:$0xff] }
 0x2eb   : > { %v10585_v6 = vpop.f32.mrb[199].mxu0 }
 0x2ec   : > { %15951 = vst [vmem:[#allocation62_spill] sm:$0xff] %v13322_v60  ;;  %v13325_v2 = vadd.f32 %v2510_v51, %v2208_v59  ;;  %10695 = vmatmul.mubr.msk.bf16.gmra.mrb[20].mxu1 %vm373_vm0, %v2663_v61  ;;  %v3407_v51 = vpack.c.bf16 %v3367_v35, %v3366_v10  ;;  %v3789_v59 = vpack.c.bf16 %v3749_v5, %v3748_v48  ;;  %v3751_v35 = vld [vmem:[#allocation2 + $0x42] sm:$0xff] }
 0x2ed   : > { %10783 = vmatmul.mubr.msk.bf16.gmra.mrb[48].mxu0 %vm373_vm0, %v3045_v8  ;;  %10790 = vmatprep.mubr.msk.bf16.mxu1 %vm12096_vm1, %v15937_v43 }
 0x2ee   : > { %15952 = vst [vmem:[#allocation63_spill] sm:$0xff] %v13325_v2  ;;  %10878 = vmatprep.mubr.msk.bf16.mxu0 %vm12096_vm1, %v15937_v43  ;;  %v12010_v2 = vld [vmem:[%s15802_s4 + $0x80] sm:$0xff]  }
 0x2ef   : > { %v2133_v45 = vpop.f32.mrb[172].mxu1 }
 0x2f0   : > { %v2515_v46 = vpop.f32.mrb[200].mxu0  ;;  %v2209_v49 = vadd.f32 %v2133_v45, %v13025_v38  ;;  %v10500_v12 = vpop.f32.mrb[173].mxu1 }
 0x2f1   : > { %v10588_v58 = vpop.f32.mrb[201].mxu0  ;;  %v2136_v11 = vpop.f32.mrb[174].mxu1 }
 0x2f2   : > { %v2518_v40 = vpop.f32.mrb[202].mxu0  ;;  %v13334_v37 = vadd.f32 %v2515_v46, %v2209_v49  ;;  %v2210_v6 = vadd.f32 %v2136_v11, %v13027_v33  ;;  %v10501_v61 = vpop.f32.mrb[175].mxu1  ;;  %v3750_v58 = vld [vmem:[#allocation2 + $0x3a] sm:$0xff] }
 0x2f3   : > { %v10589_v8 = vpop.f32.mrb[203].mxu0 }
 0x2f4   : > { %v13340_v60 = vadd.f32 %v2518_v40, %v2210_v6  ;;  %10791 = vmatmul.mubr.msk.bf16.vlgmr.msra.gmra.mrb[24].mxu1 %vm373_vm0, %v3407_v51  ;;  %v3790_v51 = vpack.c.bf16 %v3751_v35, %v3750_v58  ;;  %v3753_v6 = vld [vmem:[#allocation2 + $0x52] sm:$0xff]  ;;  %v3752_v35 = vld [vmem:[#allocation2 + $0x4a] sm:$0xff] }
 0x2f5   : > { %10879 = vmatmul.mubr.msk.bf16.vlgmr.msra.gmra.mrb[52].mxu0 %vm373_vm0, %v3789_v59  ;;  %10794 = vmatprep.mubr.msk.bf16.mxu1 %vm12096_vm1, %v15937_v43 }
 0x2f6   : > { %10882 = vmatprep.mubr.msk.bf16.mxu0 %vm12096_vm1, %v15937_v43  ;;  %10963 = vmatpush3.bf16.msra.mxu1 %v12010_v2 }
 0x2f7   : > { %v2141_v33 = vpop.f32.mrb[176].mxu1  ;;  %10964 = vmatprep.subr.bf16.mxu1 %v15937_v43 }
 0x2f8   : > { %v2523_v38 = vpop.f32.mrb[204].mxu0  ;;  %v2211_v5 = vadd.f32 %v2141_v33, %v13039_v41  ;;  %v10504_v45 = vpop.f32.mrb[177].mxu1 }
 0x2f9   : > { %v10592_v46 = vpop.f32.mrb[205].mxu0  ;;  %v2144_v49 = vpop.f32.mrb[178].mxu1 }
 0x2fa   : > { %v2526_v12 = vpop.f32.mrb[206].mxu0  ;;  %v13350_v10 = vadd.f32 %v2523_v38, %v2211_v5  ;;  %v2212_v48 = vadd.f32 %v2144_v49, %v13041_v42  ;;  %v10505_v11 = vpop.f32.mrb[179].mxu1  ;;  %v3791_v49 = vpack.c.bf16 %v3753_v6, %v3752_v35  ;;  %v3757_v35 = vld [vmem:[#allocation2 + $0x72] sm:$0xff] }
 0x2fb   : > { %v10593_v40 = vpop.f32.mrb[207].mxu0 }
 0x2fc   : > { %v13353_v2 = vadd.f32 %v2526_v12, %v2212_v48  ;;  %10795 = vmatmul.mubr.msk.bf16.gmra.mrb[28].mxu1 %vm373_vm0, %v13053_v26  ;;  %v3755_v48 = vld [vmem:[#allocation2 + $0x62] sm:$0xff] }
 0x2fd   : > { %10883 = vmatmul.mubr.msk.bf16.gmra.mrb[56].mxu0 %vm373_vm0, %v3790_v51  ;;  %10798 = vmatprep.mubr.msk.bf16.mxu1 %vm12096_vm1, %v15937_v43 }
 0x2fe   : > { %10886 = vmatprep.mubr.msk.bf16.mxu0 %vm12096_vm1, %v15937_v43 }
 0x2ff   : > { %v2149_v41 = vpop.f32.mrb[180].mxu1 }
 0x300   : > { %v2531_v59 = vpop.f32.mrb[208].mxu0  ;;  %v2213_v42 = vadd.f32 %v2149_v41, %v13049_v31  ;;  %v10508_v61 = vpop.f32.mrb[181].mxu1 }
 0x301   : > { %v10596_v8 = vpop.f32.mrb[209].mxu0  ;;  %v2152_v33 = vpop.f32.mrb[182].mxu1 }
 0x302   : > { %v2534_v38 = vpop.f32.mrb[210].mxu0  ;;  %v13363_v5 = vadd.f32 %v2531_v59, %v2213_v42  ;;  %v2214_v26 = vadd.f32 %v2152_v33, %v13051_v36  ;;  %v10509_v45 = vpop.f32.mrb[183].mxu1  ;;  %v3754_v59 = vld [vmem:[#allocation2 + $0x5a] sm:$0xff] }
 0x303   : > { %v10597_v46 = vpop.f32.mrb[211].mxu0  ;;  %v3792_v8 = vpack.c.bf16 %v3755_v48, %v3754_v59 }
 0x304   : > { %v13366_v12 = vadd.f32 %v2534_v38, %v2214_v26  ;;  %10799 = vmatmul.mubr.msk.bf16.gmra.mrb[32].mxu1 %vm373_vm0, %v13066_v23 }
 0x305   : > { %10887 = vmatmul.mubr.msk.bf16.gmra.mrb[60].mxu0 %vm373_vm0, %v3791_v49  ;;  %10802 = vmatprep.mubr.msk.bf16.mxu1 %vm12096_vm1, %v15937_v43 }
 0x306   : > { %10890 = vmatprep.mubr.msk.bf16.mxu0 %vm12096_vm1, %v15937_v43 }
 0x307   : > { %v2157_v31 = vpop.f32.mrb[184].mxu1 }
 0x308   : > { %v2539_v58 = vpop.f32.mrb[212].mxu0  ;;  %v2215_v36 = vadd.f32 %v2157_v31, %v13062_v32  ;;  %v10512_v11 = vpop.f32.mrb[185].mxu1  ;;  %v3756_v31 = vld [vmem:[#allocation2 + $0x6a] sm:$0xff] }
 0x309   : > { %v10600_v40 = vpop.f32.mrb[213].mxu0  ;;  %v2160_v51 = vpop.f32.mrb[186].mxu1  ;;  %v3793_v11 = vpack.c.bf16 %v3757_v35, %v3756_v31 }
 0x30a   : > { %v2542_v41 = vpop.f32.mrb[214].mxu0  ;;  %v13376_v6 = vadd.f32 %v2539_v58, %v2215_v36  ;;  %v2216_v23 = vadd.f32 %v2160_v51, %v13064_v34  ;;  %v10513_v42 = vpop.f32.mrb[187].mxu1 }
 0x30b   : > { %v10601_v61 = vpop.f32.mrb[215].mxu0 }
 0x30c   : > { %v13379_v33 = vadd.f32 %v2542_v41, %v2216_v23  ;;  %10803 = vmatmul.mubr.msk.bf16.gmra.mrb[36].mxu1 %vm373_vm0, %v13079_v20  ;;  %v3759_v41 = vld [vmem:[#allocation2 + $0x82] sm:$0xff] }
 0x30d   : > { %10891 = vmatmul.mubr.msk.bf16.gmra.mrb[64].mxu0 %vm373_vm0, %v3792_v8  ;;  %10806 = vmatprep.mubr.msk.bf16.mxu1 %vm12096_vm1, %v15937_v43  ;;  %v3758_v8 = vld [vmem:[#allocation2 + $0x7a] sm:$0xff] }
 0x30e   : > { %10894 = vmatprep.mubr.msk.bf16.mxu0 %vm12096_vm1, %v15937_v43  ;;  %v3794_v35 = vpack.c.bf16 %v3759_v41, %v3758_v8 }
 0x30f   : > { %v2165_v32 = vpop.f32.mrb[188].mxu1 }
 0x310   : > { %v2547_v38 = vpop.f32.mrb[216].mxu0  ;;  %v2217_v34 = vadd.f32 %v2165_v32, %v13075_v62  ;;  %v10516_v26 = vpop.f32.mrb[189].mxu1 }
 0x311   : > { %v10604_v45 = vpop.f32.mrb[217].mxu0  ;;  %v2168_v46 = vpop.f32.mrb[190].mxu1 }
 0x312   : > { %v2550_v49 = vpop.f32.mrb[218].mxu0  ;;  %v13389_v58 = vadd.f32 %v2547_v38, %v2217_v34  ;;  %v2218_v20 = vadd.f32 %v2168_v46, %v13077_v28  ;;  %v10517_v48 = vpop.f32.mrb[191].mxu1  ;;  %v12011_v34 = vld [vmem:[%s15802_s4 + $0x88] sm:$0xff]   ;;  %v3761_v45 = vld [vmem:[#allocation2 + $0x92] sm:$0xff] }
 0x313   : > { %v10605_v36 = vpop.f32.mrb[219].mxu0  ;;  %10965 = vmatpush3.bf16.msra.mxu1 %v12011_v34  ;;  %v3760_v48 = vld [vmem:[#allocation2 + $0x8a] sm:$0xff]  ;;  %v3762_v34 = vld [vmem:[#allocation2 + $0x9a] sm:$0xff] }
 0x314   : > { %v13392_v40 = vadd.f32 %v2550_v49, %v2218_v20  ;;  %10807 = vmatmul.mubr.msk.bf16.gmra.mrb[40].mxu1 %vm373_vm0, %v13094_v17  ;;  %11138 = vmatprep.subr.bf16.mxu1 %v15937_v43 }
 0x315   : > { %10895 = vmatmul.mubr.msk.bf16.gmra.mrb[68].mxu0 %vm373_vm0, %v3793_v11  ;;  %10810 = vmatprep.mubr.msk.bf16.mxu1 %vm12096_vm1, %v15937_v43  ;;  %v15953_v11 = vld [vmem:[#allocation49_spill] sm:$0xff] }
 0x316   : > { %10898 = vmatprep.mubr.msk.bf16.mxu0 %vm12096_vm1, %v15937_v43 }
 0x317   : > { %v2173_v62 = vpop.f32.mrb[192].mxu1 }
 0x318   : > { %v2555_v51 = vpop.f32.mrb[220].mxu0  ;;  %v2219_v28 = vadd.f32 %v2173_v62, %v13092_v21  ;;  %v10520_v59 = vpop.f32.mrb[193].mxu1 }
 0x319   : > { %v10608_v23 = vpop.f32.mrb[221].mxu0  ;;  %v2176_v42 = vpop.f32.mrb[194].mxu1 }
 0x31a   : > { %v2558_v61 = vpop.f32.mrb[222].mxu0  ;;  %v13402_v32 = vadd.f32 %v2555_v51, %v2219_v28  ;;  %v10521_v17 = vpop.f32.mrb[195].mxu1  ;;  %v3795_v28 = vpack.c.bf16 %v3761_v45, %v3760_v48  ;;  %v3763_v42 = vld [vmem:[#allocation2 + $0xa2] sm:$0xff] }
 0x31b   : > { %v10609_v38 = vpop.f32.mrb[223].mxu0 }
 0x31c   : > { %10811 = vmatmul.mubr.msk.bf16.gmra.mrb[44].mxu1 %vm373_vm0, %v13115_v15 }
 0x31d   : > { %10899 = vmatmul.mubr.msk.bf16.gmra.mrb[72].mxu0 %vm373_vm0, %v3794_v35  ;;  %10814 = vmatprep.mubr.msk.bf16.mxu1 %vm12096_vm1, %v15937_v43 }
 0x31e   : > { %10902 = vmatprep.mubr.msk.bf16.mxu0 %vm12096_vm1, %v15937_v43 }
 0x31f   : > { %v2777_v21 = vpop.f32.mrb[196].mxu1 }
 0x320   : > { %v3159_v26 = vpop.f32.mrb[224].mxu0  ;;  %v2943_v15 = vadd.f32 %v2777_v21, %v13112_v1  ;;  %v10616_v46 = vpop.f32.mrb[197].mxu1 }
 0x321   : > { %v10704_v49 = vpop.f32.mrb[225].mxu0  ;;  %v2780_v31 = vpop.f32.mrb[198].mxu1  ;;  %v3796_v46 = vpack.c.bf16 %v3763_v42, %v3762_v34 }
 0x322   : > { %v3162_v20 = vpop.f32.mrb[226].mxu0  ;;  %v13416_v36 = vadd.f32 %v3159_v26, %v2943_v15  ;;  %v2944_v62 = vadd.f32 %v2780_v31, %v15953_v11  ;;  %v10617_v51 = vpop.f32.mrb[199].mxu1 }
 0x323   : > { %v10705_v41 = vpop.f32.mrb[227].mxu0 }
 0x324   : > { %v13419_v59 = vadd.f32 %v3162_v20, %v2944_v62  ;;  %10815 = vmatmul.mubr.msk.bf16.gmra.mrb[48].mxu1 %vm373_vm0, %v13130_v22  ;;  %v15954_v22 = vld [vmem:[#allocation50_spill] sm:$0xff] }
 0x325   : > { %10903 = vmatmul.mubr.msk.bf16.gmra.mrb[76].mxu0 %vm373_vm0, %v3795_v28  ;;  %10818 = vmatprep.mubr.msk.bf16.mxu1 %vm12096_vm1, %v15937_v43  ;;  %v3765_v20 = vld [vmem:[#allocation2 + $0xb2] sm:$0xff]  ;;  %v3764_v28 = vld [vmem:[#allocation2 + $0xaa] sm:$0xff] }
 0x326   : > { %10906 = vmatprep.mubr.msk.bf16.mxu0 %vm12096_vm1, %v15937_v43 }
 0x327   : > { %v2785_v1 = vpop.f32.mrb[200].mxu1 }
 0x328   : > { %v3167_v23 = vpop.f32.mrb[228].mxu0  ;;  %v2945_v61 = vadd.f32 %v2785_v1, %v13127_v29  ;;  %v10620_v8 = vpop.f32.mrb[201].mxu1 }
 0x329   : > { %v10708_v17 = vpop.f32.mrb[229].mxu0  ;;  %v2788_v38 = vpop.f32.mrb[202].mxu1  ;;  %v3797_v8 = vpack.c.bf16 %v3765_v20, %v3764_v28 }
 0x32a   : > { %v3170_v35 = vpop.f32.mrb[230].mxu0  ;;  %v13429_v21 = vadd.f32 %v3167_v23, %v2945_v61  ;;  %v2946_v26 = vadd.f32 %v2788_v38, %v15954_v22  ;;  %v10621_v45 = vpop.f32.mrb[203].mxu1 }
 0x32b   : > { %v10709_v15 = vpop.f32.mrb[231].mxu0 }
 0x32c   : > { %v13432_v49 = vadd.f32 %v3170_v35, %v2946_v26  ;;  %10819 = vmatmul.mubr.msk.bf16.gmra.mrb[52].mxu1 %vm373_vm0, %v13145_v55  ;;  %v15955_v55 = vld [vmem:[#allocation51_spill] sm:$0xff] }
 0x32d   : > { %10907 = vmatmul.mubr.msk.bf16.gmra.mrb[80].mxu0 %vm373_vm0, %v3796_v46  ;;  %10822 = vmatprep.mubr.msk.bf16.mxu1 %vm12096_vm1, %v15937_v43  ;;  %v3767_v35 = vld [vmem:[#allocation2 + $0xc2] sm:$0xff]  ;;  %v3766_v46 = vld [vmem:[#allocation2 + $0xba] sm:$0xff] }
 0x32e   : > { %10910 = vmatprep.mubr.msk.bf16.mxu0 %vm12096_vm1, %v15937_v43 }
 0x32f   : > { %v2793_v29 = vpop.f32.mrb[204].mxu1 }
 0x330   : > { %v3175_v31 = vpop.f32.mrb[232].mxu0  ;;  %v2947_v48 = vadd.f32 %v2793_v29, %v13142_v14  ;;  %v10624_v11 = vpop.f32.mrb[205].mxu1 }
 0x331   : > { %v10712_v62 = vpop.f32.mrb[233].mxu0  ;;  %v2796_v51 = vpop.f32.mrb[206].mxu1  ;;  %v3798_v11 = vpack.c.bf16 %v3767_v35, %v3766_v46 }
 0x332   : > { %v3178_v41 = vpop.f32.mrb[234].mxu0  ;;  %v13442_v1 = vadd.f32 %v3175_v31, %v2947_v48  ;;  %v2948_v23 = vadd.f32 %v2796_v51, %v15955_v55  ;;  %v10625_v42 = vpop.f32.mrb[207].mxu1 }
 0x333   : > { %v10713_v61 = vpop.f32.mrb[235].mxu0 }
 0x334   : > { %v13445_v17 = vadd.f32 %v3178_v41, %v2948_v23  ;;  %10823 = vmatmul.mubr.msk.bf16.gmra.mrb[56].mxu1 %vm373_vm0, %v13160_v27  ;;  %v15956_v27 = vld [vmem:[#allocation52_spill] sm:$0xff]  ;;  %v3769_v41 = vld [vmem:[#allocation2 + $0xd2] sm:$0xff] }
 0x335   : > { %10911 = vmatmul.mubr.msk.bf16.gmra.mrb[84].mxu0 %vm373_vm0, %v3797_v8  ;;  %10826 = vmatprep.mubr.msk.bf16.mxu1 %vm12096_vm1, %v15937_v43  ;;  %v3768_v8 = vld [vmem:[#allocation2 + $0xca] sm:$0xff] }
 0x336   : > { %10914 = vmatprep.mubr.msk.bf16.mxu0 %vm12096_vm1, %v15937_v43 }
 0x337   : > { %v2801_v14 = vpop.f32.mrb[208].mxu1 }
 0x338   : > { %v3183_v38 = vpop.f32.mrb[236].mxu0  ;;  %v2949_v34 = vadd.f32 %v2801_v14, %v13157_v50  ;;  %v10628_v22 = vpop.f32.mrb[209].mxu1 }
 0x339   : > { %v10716_v26 = vpop.f32.mrb[237].mxu0  ;;  %v2804_v45 = vpop.f32.mrb[210].mxu1  ;;  %v3799_v22 = vpack.c.bf16 %v3769_v41, %v3768_v8  ;;  %v3773_v8 = vld [vmem:[#allocation2 + $0xf2] sm:$0xff] }
 0x33a   : > { %v3186_v15 = vpop.f32.mrb[238].mxu0  ;;  %v13455_v29 = vadd.f32 %v3183_v38, %v2949_v34  ;;  %v2950_v31 = vadd.f32 %v2804_v45, %v15956_v27  ;;  %v10629_v20 = vpop.f32.mrb[211].mxu1 }
 0x33b   : > { %v10717_v48 = vpop.f32.mrb[239].mxu0 }
 0x33c   : > { %v13458_v62 = vadd.f32 %v3186_v15, %v2950_v31  ;;  %10827 = vmatmul.mubr.msk.bf16.gmra.mrb[60].mxu1 %vm373_vm0, %v13175_v24  ;;  %v15957_v24 = vld [vmem:[#allocation53_spill] sm:$0xff]  ;;  %v3771_v15 = vld [vmem:[#allocation2 + $0xe2] sm:$0xff] }
 0x33d   : > { %10915 = vmatmul.mubr.msk.bf16.gmra.mrb[88].mxu0 %vm373_vm0, %v3798_v11  ;;  %10830 = vmatprep.mubr.msk.bf16.mxu1 %vm12096_vm1, %v15937_v43  ;;  %v3770_v11 = vld [vmem:[#allocation2 + $0xda] sm:$0xff] }
 0x33e   : > { %10918 = vmatprep.mubr.msk.bf16.mxu0 %vm12096_vm1, %v15937_v43 }
 0x33f   : > { %v2809_v50 = vpop.f32.mrb[212].mxu1 }
 0x340   : > { %v3191_v51 = vpop.f32.mrb[240].mxu0  ;;  %v2951_v28 = vadd.f32 %v2809_v50, %v13172_v47  ;;  %v10632_v55 = vpop.f32.mrb[213].mxu1 }
 0x341   : > { %v10720_v23 = vpop.f32.mrb[241].mxu0  ;;  %v2812_v42 = vpop.f32.mrb[214].mxu1  ;;  %v3800_v55 = vpack.c.bf16 %v3771_v15, %v3770_v11 }
 0x342   : > { %v3194_v61 = vpop.f32.mrb[242].mxu0  ;;  %v13468_v14 = vadd.f32 %v3191_v51, %v2951_v28  ;;  %v2952_v38 = vadd.f32 %v2812_v42, %v15957_v24  ;;  %v10633_v35 = vpop.f32.mrb[215].mxu1 }
 0x343   : > { %v10721_v34 = vpop.f32.mrb[243].mxu0 }
 0x344   : > { %v13471_v26 = vadd.f32 %v3194_v61, %v2952_v38  ;;  %10831 = vmatmul.mubr.msk.bf16.gmra.mrb[64].mxu1 %vm373_vm0, %v13190_v30  ;;  %v15958_v30 = vld [vmem:[#allocation54_spill] sm:$0xff]  ;;  %v3772_v61 = vld [vmem:[#allocation2 + $0xea] sm:$0xff] }
 0x345   : > { %10919 = vmatmul.mubr.msk.bf16.gmra.mrb[92].mxu0 %vm373_vm0, %v3799_v22  ;;  %10834 = vmatprep.mubr.msk.bf16.mxu1 %vm12096_vm1, %v15937_v43 }
 0x346   : > { %10922 = vmatprep.mubr.msk.bf16.mxu0 %vm12096_vm1, %v15937_v43 }
 0x347   : > { %v2817_v47 = vpop.f32.mrb[216].mxu1 }
 0x348   : > { %v3199_v45 = vpop.f32.mrb[244].mxu0  ;;  %v2953_v46 = vadd.f32 %v2817_v47, %v13187_v16  ;;  %v10636_v27 = vpop.f32.mrb[217].mxu1 }
 0x349   : > { %v10724_v31 = vpop.f32.mrb[245].mxu0  ;;  %v2820_v20 = vpop.f32.mrb[218].mxu1  ;;  %v3801_v27 = vpack.c.bf16 %v3773_v8, %v3772_v61 }
 0x34a   : > { %v3202_v48 = vpop.f32.mrb[246].mxu0  ;;  %v13481_v50 = vadd.f32 %v3199_v45, %v2953_v46  ;;  %v2954_v51 = vadd.f32 %v2820_v20, %v15958_v30  ;;  %v10637_v41 = vpop.f32.mrb[219].mxu1 }
 0x34b   : > { %v10725_v28 = vpop.f32.mrb[247].mxu0 }
 0x34c   : > { %v13484_v23 = vadd.f32 %v3202_v48, %v2954_v51  ;;  %10835 = vmatmul.mubr.msk.bf16.gmra.mrb[68].mxu1 %vm373_vm0, %v13205_v57  ;;  %v15959_v57 = vld [vmem:[#allocation55_spill] sm:$0xff] }
 0x34d   : > { %10923 = vmatmul.mubr.msk.bf16.gmra.mrb[96].mxu0 %vm373_vm0, %v3800_v55  ;;  %10838 = vmatprep.mubr.msk.bf16.mxu1 %vm12096_vm1, %v15937_v43  ;;  %v3775_v48 = vld [vmem:[#allocation2 + $0x102] sm:$0xff]  ;;  %v3774_v55 = vld [vmem:[#allocation2 + $0xfa] sm:$0xff] }
 0x34e   : > { %10926 = vmatprep.mubr.msk.bf16.mxu0 %vm12096_vm1, %v15937_v43 }
 0x34f   : > { %v2825_v16 = vpop.f32.mrb[220].mxu1 }
 0x350   : > { %v3207_v42 = vpop.f32.mrb[248].mxu0  ;;  %v2955_v24 = vadd.f32 %v2825_v16, %v13202_v4  ;;  %v10640_v38 = vpop.f32.mrb[221].mxu1 }
 0x351   : > { %v10728_v35 = vpop.f32.mrb[249].mxu0  ;;  %v2828_v34 = vpop.f32.mrb[222].mxu1 }
 0x352   : > { %v3210_v22 = vpop.f32.mrb[250].mxu0  ;;  %v13494_v47 = vadd.f32 %v3207_v42, %v2955_v24  ;;  %v2956_v45 = vadd.f32 %v2828_v34, %v15959_v57  ;;  %v10641_v15 = vpop.f32.mrb[223].mxu1  ;;  %v3802_v24 = vpack.c.bf16 %v3775_v48, %v3774_v55  ;;  %v3777_v34 = vld [vmem:[#allocation2 + $0x112] sm:$0xff] }
 0x353   : > { %v10729_v46 = vpop.f32.mrb[251].mxu0 }
 0x354   : > { %v13497_v31 = vadd.f32 %v3210_v22, %v2956_v45  ;;  %10839 = vmatmul.mubr.msk.bf16.gmra.mrb[72].mxu1 %vm373_vm0, %v13220_v25  ;;  %v15960_v25 = vld [vmem:[#allocation56_spill] sm:$0xff] }
 0x355   : > { %10927 = vmatmul.mubr.msk.bf16.gmra.mrb[100].mxu0 %vm373_vm0, %v3801_v27  ;;  %10842 = vmatprep.mubr.msk.bf16.mxu1 %vm12096_vm1, %v15937_v43  ;;  %v3776_v27 = vld [vmem:[#allocation2 + $0x10a] sm:$0xff] }
 0x356   : > { %10930 = vmatprep.mubr.msk.bf16.mxu0 %vm12096_vm1, %v15937_v43 }
 0x357   : > { %v2833_v4 = vpop.f32.mrb[224].mxu1 }
 0x358   : > { %v3215_v20 = vpop.f32.mrb[252].mxu0  ;;  %v2957_v11 = vadd.f32 %v2833_v4, %v13217_v63  ;;  %v10644_v30 = vpop.f32.mrb[225].mxu1 }
 0x359   : > { %v10732_v51 = vpop.f32.mrb[253].mxu0  ;;  %v2836_v41 = vpop.f32.mrb[226].mxu1  ;;  %v3803_v30 = vpack.c.bf16 %v3777_v34, %v3776_v27 }
 0x35a   : > { %v3218_v28 = vpop.f32.mrb[254].mxu0  ;;  %v13507_v16 = vadd.f32 %v3215_v20, %v2957_v11  ;;  %v2958_v42 = vadd.f32 %v2836_v41, %v15960_v25  ;;  %v10645_v61 = vpop.f32.mrb[227].mxu1 }
 0x35b   : > { %v10733_v8 = vpop.f32.mrb[255].mxu0 }
 0x35c   : > { %v13510_v38 = vadd.f32 %v3218_v28, %v2958_v42  ;;  %10843 = vmatmul.mubr.msk.bf16.gmra.mrb[76].mxu1 %vm373_vm0, %v13235_v39  ;;  %v15961_v39 = vld [vmem:[#allocation57_spill] sm:$0xff]  ;;  %v3779_v28 = vld [vmem:[#allocation2 + $0x122] sm:$0xff] }
 0x35d   : > { %10931 = vmatmul.mubr.msk.bf16.gmra.mrb[104].mxu0 %vm373_vm0, %v3802_v24  ;;  %10846 = vmatprep.mubr.msk.bf16.mxu1 %vm12096_vm1, %v15937_v43  ;;  %v3778_v24 = vld [vmem:[#allocation2 + $0x11a] sm:$0xff] }
 0x35e   : > { %10934 = vmatprep.mubr.msk.bf16.mxu0 %vm12096_vm1, %v15937_v43 }
 0x35f   : > { %v2841_v63 = vpop.f32.mrb[228].mxu1 }
 0x360   : > { %v3223_v35 = vpop.f32.mrb[0].mxu0  ;;  %v2959_v22 = vadd.f32 %v2841_v63, %v13232_v54  ;;  %v10648_v57 = vpop.f32.mrb[229].mxu1 }
 0x361   : > { %v10736_v45 = vpop.f32.mrb[1].mxu0  ;;  %v2844_v15 = vpop.f32.mrb[230].mxu1  ;;  %v3804_v57 = vpack.c.bf16 %v3779_v28, %v3778_v24 }
 0x362   : > { %v3226_v46 = vpop.f32.mrb[2].mxu0  ;;  %v13520_v4 = vadd.f32 %v3223_v35, %v2959_v22  ;;  %v2960_v20 = vadd.f32 %v2844_v15, %v15961_v39  ;;  %v10649_v48 = vpop.f32.mrb[231].mxu1 }
 0x363   : > { %v10737_v11 = vpop.f32.mrb[3].mxu0 }
 0x364   : > { %v13523_v51 = vadd.f32 %v3226_v46, %v2960_v20  ;;  %10847 = vmatmul.mubr.msk.bf16.gmra.mrb[80].mxu1 %vm373_vm0, %v13250_v19  ;;  %v15962_v19 = vld [vmem:[#allocation58_spill] sm:$0xff] }
 0x365   : > { %10935 = vmatmul.mubr.msk.bf16.gmra.mrb[108].mxu0 %vm373_vm0, %v3803_v30  ;;  %10850 = vmatprep.mubr.msk.bf16.mxu1 %vm12096_vm1, %v15937_v43  ;;  %v3781_v46 = vld [vmem:[#allocation2 + $0x132] sm:$0xff]  ;;  %v3780_v30 = vld [vmem:[#allocation2 + $0x12a] sm:$0xff] }
 0x366   : > { %10938 = vmatprep.mubr.msk.bf16.mxu0 %vm12096_vm1, %v15937_v43 }
 0x367   : > { %v2849_v54 = vpop.f32.mrb[232].mxu1 }
 0x368   : > { %v3231_v41 = vpop.f32.mrb[4].mxu0  ;;  %v2961_v55 = vadd.f32 %v2849_v54, %v13247_v44  ;;  %v10652_v25 = vpop.f32.mrb[233].mxu1 }
 0x369   : > { %v10740_v42 = vpop.f32.mrb[5].mxu0  ;;  %v2852_v61 = vpop.f32.mrb[234].mxu1  ;;  %v3805_v25 = vpack.c.bf16 %v3781_v46, %v3780_v30 }
 0x36a   : > { %v3234_v8 = vpop.f32.mrb[6].mxu0  ;;  %v13533_v63 = vadd.f32 %v3231_v41, %v2961_v55  ;;  %v2962_v35 = vadd.f32 %v2852_v61, %v15962_v19  ;;  %v10653_v34 = vpop.f32.mrb[235].mxu1 }
 0x36b   : > { %v10741_v22 = vpop.f32.mrb[7].mxu0 }
 0x36c   : > { %v13536_v45 = vadd.f32 %v3234_v8, %v2962_v35  ;;  %10851 = vmatmul.mubr.msk.bf16.gmra.mrb[84].mxu1 %vm373_vm0, %v13265_v18  ;;  %v15963_v18 = vld [vmem:[#allocation59_spill] sm:$0xff] }
 0x36d   : > { %10939 = vmatmul.mubr.msk.bf16.gmra.mrb[112].mxu0 %vm373_vm0, %v3804_v57  ;;  %10854 = vmatprep.mubr.msk.bf16.mxu1 %vm12096_vm1, %v15937_v43  ;;  %v3783_v8 = vld [vmem:[#allocation2 + $0x142] sm:$0xff]  ;;  %v3782_v57 = vld [vmem:[#allocation2 + $0x13a] sm:$0xff] }
 0x36e   : > { %10942 = vmatprep.mubr.msk.bf16.mxu0 %vm12096_vm1, %v15937_v43 }
 0x36f   : > { %v2857_v44 = vpop.f32.mrb[236].mxu1 }
 0x370   : > { %v3239_v15 = vpop.f32.mrb[8].mxu0  ;;  %v2963_v27 = vadd.f32 %v2857_v44, %v13262_v53  ;;  %v10656_v39 = vpop.f32.mrb[237].mxu1 }
 0x371   : > { %v10744_v20 = vpop.f32.mrb[9].mxu0  ;;  %v2860_v48 = vpop.f32.mrb[238].mxu1  ;;  %v3806_v39 = vpack.c.bf16 %v3783_v8, %v3782_v57  ;;  %v3404_v57 = vld [vmem:[#allocation2 + $0x159] sm:$0xff] }
 0x372   : > { %v3242_v11 = vpop.f32.mrb[10].mxu0  ;;  %v13546_v54 = vadd.f32 %v3239_v15, %v2963_v27  ;;  %v2964_v41 = vadd.f32 %v2860_v48, %v15963_v18  ;;  %v10657_v28 = vpop.f32.mrb[239].mxu1 }
 0x373   : > { %v10745_v55 = vpop.f32.mrb[11].mxu0 }
 0x374   : > { %v13549_v42 = vadd.f32 %v3242_v11, %v2964_v41  ;;  %10855 = vmatmul.mubr.msk.bf16.gmra.mrb[88].mxu1 %vm373_vm0, %v13280_v0  ;;  %v15964_v0 = vld [vmem:[#allocation60_spill] sm:$0xff]  ;;  %v3785_v11 = vld [vmem:[#allocation2 + $0x152] sm:$0xff] }
 0x375   : > { %10943 = vmatmul.mubr.msk.bf16.gmra.mrb[116].mxu0 %vm373_vm0, %v3805_v25  ;;  %10858 = vmatprep.mubr.msk.bf16.mxu1 %vm12096_vm1, %v15937_v43  ;;  %v3784_v25 = vld [vmem:[#allocation2 + $0x14a] sm:$0xff] }
 0x376   : > { %10946 = vmatprep.mubr.msk.bf16.mxu0 %vm12096_vm1, %v15937_v43 }
 0x377   : > { %v2865_v53 = vpop.f32.mrb[240].mxu1 }
 0x378   : > { %v3247_v61 = vpop.f32.mrb[12].mxu0  ;;  %v2965_v24 = vadd.f32 %v2865_v53, %v13277_v3  ;;  %v10660_v19 = vpop.f32.mrb[241].mxu1 }
 0x379   : > { %v10748_v35 = vpop.f32.mrb[13].mxu0  ;;  %v2868_v34 = vpop.f32.mrb[242].mxu1  ;;  %v3807_v19 = vpack.c.bf16 %v3785_v11, %v3784_v25  ;;  %v3788_v25 = vld [vmem:[#allocation2 + $0x16a] sm:$0xf] }
 0x37a   : > { %v3250_v22 = vpop.f32.mrb[14].mxu0  ;;  %v13559_v44 = vadd.f32 %v3247_v61, %v2965_v24  ;;  %v2966_v15 = vadd.f32 %v2868_v34, %v15964_v0  ;;  %v10661_v46 = vpop.f32.mrb[243].mxu1  ;;  %v3786_v0 = vld [vmem:[#allocation2 + $0x15a] sm:$0xff] }
 0x37b   : > { %v10749_v27 = vpop.f32.mrb[15].mxu0 }
 0x37c   : > { %v13562_v20 = vadd.f32 %v3250_v22, %v2966_v15  ;;  %10859 = vmatmul.mubr.msk.bf16.gmra.mrb[92].mxu1 %vm373_vm0, %v13295_v52  ;;  %v15965_v52 = vld [vmem:[#allocation61_spill] sm:$0xff]  ;;  %v3787_v15 = vld [vmem:[#allocation2 + $0x162] sm:$0xff] }
 0x37d   : > { %10947 = vmatmul.mubr.msk.bf16.gmra.mrb[120].mxu0 %vm373_vm0, %v3806_v39  ;;  %10862 = vmatprep.mubr.msk.bf16.mxu1 %vm12096_vm1, %v15937_v43 }
 0x37e   : > { %10950 = vmatprep.mubr.msk.bf16.mxu0 %vm12096_vm1, %v15937_v43 }
 0x37f   : > { %v2873_v3 = vpop.f32.mrb[244].mxu1 }
 0x380   : > { %v3255_v48 = vpop.f32.mrb[16].mxu0  ;;  %v2967_v30 = vadd.f32 %v2873_v3, %v13292_v56  ;;  %v10664_v18 = vpop.f32.mrb[245].mxu1  ;;  %v3405_v56 = vld [vmem:[#allocation2 + $0x161] sm:$0xff] }
 0x381   : > { %v10752_v41 = vpop.f32.mrb[17].mxu0  ;;  %v2876_v28 = vpop.f32.mrb[246].mxu1 }
 0x382   : > { %v3258_v55 = vpop.f32.mrb[18].mxu0  ;;  %v13572_v53 = vadd.f32 %v3255_v48, %v2967_v30  ;;  %v2968_v61 = vadd.f32 %v2876_v28, %v15965_v52  ;;  %v10665_v8 = vpop.f32.mrb[247].mxu1  ;;  %v3426_v41 = vpack.c.bf16 %v3405_v56, %v3404_v57  ;;  %v3808_v28 = vpack.c.bf16 %v3787_v15, %v3786_v0  ;;  %v15967_v15 = vld [vmem:[#allocation63_spill] sm:$0xff] }
 0x383   : > { %v10753_v24 = vpop.f32.mrb[19].mxu0 }
 0x384   : > { %v13575_v35 = vadd.f32 %v3258_v55, %v2968_v61  ;;  %10863 = vmatmul.mubr.msk.bf16.gmra.mrb[96].mxu1 %vm373_vm0, %v13310_v9  ;;  %v15966_v61 = vld [vmem:[#allocation62_spill] sm:$0xff] }
 0x385   : > { %10951 = vmatmul.mubr.msk.bf16.gmra.mrb[124].mxu0 %vm373_vm0, %v3807_v19  ;;  %10866 = vmatprep.mubr.msk.bf16.mxu1 %vm12096_vm1, %v15937_v43 }
 0x386   : > { %10954 = vmatprep.mubr.msk.bf16.mxu0 %vm12096_vm1, %v15937_v43 }
 0x387   : > { %v2881_v34 = vpop.f32.mrb[248].mxu1 }
 0x388   : > { %v3263_v22 = vpop.f32.mrb[20].mxu0  ;;  %v2969_v46 = vadd.f32 %v2881_v34, %v13307_v7  ;;  %v10668_v27 = vpop.f32.mrb[249].mxu1  ;;  %v3406_v7 = vld [vmem:[#allocation2 + $0x169] sm:$0xf]  ;;  %v3809_v34 = vpack.c.bf16 %v3788_v25, %v3788_v25 }
 0x389   : > { %v10756_v39 = vpop.f32.mrb[21].mxu0  ;;  %v2884_v3 = vpop.f32.mrb[250].mxu1  ;;  %v3427_v56 = vpack.c.bf16 %v3406_v7, %v3406_v7  ;;  %v4130_v7 = vld [vmem:[#allocation2 + $0x2b] sm:$0xff] }
 0x38a   : > { %v3266_v9 = vpop.f32.mrb[22].mxu0  ;;  %v13585_v48 = vadd.f32 %v3263_v22, %v2969_v46  ;;  %v2970_v11 = vadd.f32 %v2884_v3, %v13312_v13  ;;  %v10669_v30 = vpop.f32.mrb[251].mxu1 }
 0x38b   : > { %v10757_v18 = vpop.f32.mrb[23].mxu0 }
 0x38c   : > { %v13588_v55 = vadd.f32 %v3266_v9, %v2970_v11  ;;  %10867 = vmatmul.mubr.msk.bf16.gmra.mrb[100].mxu1 %vm373_vm0, %v3426_v41  ;;  %v4131_v9 = vld [vmem:[#allocation2 + $0x33] sm:$0xff] }
 0x38d   : > { %10955 = vmatmul.mubr.msk.bf16.gmra.mrb[128].mxu0 %vm373_vm0, %v3808_v28  ;;  %10870 = vmatprep.mubr.msk.bf16.mxu1 %vm12096_vm1, %v15937_v43 }
 0x38e   : > { %10958 = vmatprep.mubr.msk.bf16.mxu0 %vm12096_vm1, %v15937_v43 }
 0x38f   : > { %v2889_v52 = vpop.f32.mrb[252].mxu1 }
 0x390   : > { %v3271_v13 = vpop.f32.mrb[24].mxu0  ;;  %v2971_v8 = vadd.f32 %v2889_v52, %v15966_v61  ;;  %v10672_v24 = vpop.f32.mrb[253].mxu1 }
 0x391   : > { %v10760_v19 = vpop.f32.mrb[25].mxu0  ;;  %v2892_v22 = vpop.f32.mrb[254].mxu1 }
 0x392   : > { %v3274_v57 = vpop.f32.mrb[26].mxu0  ;;  %v13597_v0 = vadd.f32 %v3271_v13, %v2971_v8  ;;  %v2972_v46 = vadd.f32 %v2892_v22, %v15967_v15  ;;  %v10673_v27 = vpop.f32.mrb[255].mxu1  ;;  %v4171_v13 = vpack.c.bf16 %v4131_v9, %v4130_v7  ;;  %v4133_v22 = vld [vmem:[#allocation2 + $0x43] sm:$0xff]  ;;  %v4132_v9 = vld [vmem:[#allocation2 + $0x3b] sm:$0xff] }
 0x393   : > { %v10761_v39 = vpop.f32.mrb[27].mxu0 }
 0x394   : > { %v13600_v3 = vadd.f32 %v3274_v57, %v2972_v46  ;;  %10871 = vmatmul.mubr.msk.bf16.gmra.mrb[104].mxu1 %vm373_vm0, %v3427_v56 }
 0x395   : > { %10959 = vmatmul.mubr.msk.bf16.gmra.mrb[132].mxu0 %vm373_vm0, %v3809_v34  ;;  %10966 = vmatprep.mubr.msk.bf16.mxu1 %vm12096_vm1, %v15937_v43 }
 0x396   : > { %11054 = vmatprep.mubr.msk.bf16.mxu0 %vm12096_vm1, %v15937_v43 }
 0x397   : > { %v2897_v11 = vpop.f32.mrb[0].mxu1 }
 0x398   : > { %v3279_v30 = vpop.f32.mrb[28].mxu0  ;;  %v2973_v18 = vadd.f32 %v2897_v11, %v13334_v37  ;;  %v10676_v41 = vpop.f32.mrb[1].mxu1 }
 0x399   : > { %v10764_v28 = vpop.f32.mrb[29].mxu0  ;;  %v2900_v25 = vpop.f32.mrb[2].mxu1  ;;  %v4172_v41 = vpack.c.bf16 %v4133_v22, %v4132_v9 }
 0x39a   : > { %v3282_v52 = vpop.f32.mrb[30].mxu0  ;;  %v13609_v61 = vadd.f32 %v3279_v30, %v2973_v18  ;;  %v2974_v8 = vadd.f32 %v2900_v25, %v13340_v60  ;;  %v10677_v24 = vpop.f32.mrb[3].mxu1  ;;  %v4135_v25 = vld [vmem:[#allocation2 + $0x53] sm:$0xff] }
 0x39b   : > { %v10765_v19 = vpop.f32.mrb[31].mxu0 }
 0x39c   : > { %v13612_v56 = vadd.f32 %v3282_v52, %v2974_v8  ;;  %10967 = vmatmul.mubr.msk.bf16.vlgmr.msra.gmra.mrb[108].mxu1 %vm373_vm0, %v4171_v13 }
 0x39d   : > { %10970 = vmatprep.mubr.msk.bf16.mxu1 %vm12096_vm1, %v15937_v43 }
 0x39f   : > { %v2905_v37 = vpop.f32.mrb[4].mxu1 }
 0x3a0   : > { %v3287_v34 = vpop.f32.mrb[32].mxu0  ;;  %v2975_v57 = vadd.f32 %v2905_v37, %v13350_v10  ;;  %v10680_v15 = vpop.f32.mrb[5].mxu1 }
 0x3a1   : > { %v10768_v46 = vpop.f32.mrb[33].mxu0  ;;  %v2908_v27 = vpop.f32.mrb[6].mxu1 }
 0x3a2   : > { %v3290_v39 = vpop.f32.mrb[34].mxu0  ;;  %v13618_v60 = vadd.f32 %v3287_v34, %v2975_v57  ;;  %v2976_v11 = vadd.f32 %v2908_v27, %v13353_v2  ;;  %v10681_v30 = vpop.f32.mrb[7].mxu1  ;;  %v4134_v2 = vld [vmem:[#allocation2 + $0x4b] sm:$0xff] }
 0x3a3   : > { %v10769_v18 = vpop.f32.mrb[35].mxu0  ;;  %v4173_v15 = vpack.c.bf16 %v4135_v25, %v4134_v2 }
 0x3a4   : > { %v13621_v28 = vadd.f32 %v3290_v39, %v2976_v11  ;;  %10971 = vmatmul.mubr.msk.bf16.gmra.mrb[112].mxu1 %vm373_vm0, %v4172_v41  ;;  %v4137_v39 = vld [vmem:[#allocation2 + $0x63] sm:$0xff] }
 0x3a5   : > { %10974 = vmatprep.mubr.msk.bf16.mxu1 %vm12096_vm1, %v15937_v43 }
 0x3a7   : > { %v2913_v10 = vpop.f32.mrb[8].mxu1 }
 0x3a8   : > { %v3295_v7 = vpop.f32.mrb[36].mxu0  ;;  %v2977_v52 = vadd.f32 %v2913_v10, %v13363_v5  ;;  %v10684_v13 = vpop.f32.mrb[9].mxu1 }
 0x3a9   : > { %v10772_v8 = vpop.f32.mrb[37].mxu0  ;;  %v2916_v24 = vpop.f32.mrb[10].mxu1 }
 0x3aa   : > { %v3298_v19 = vpop.f32.mrb[38].mxu0  ;;  %v13627_v37 = vadd.f32 %v3295_v7, %v2977_v52  ;;  %v2978_v34 = vadd.f32 %v2916_v24, %v13366_v12  ;;  %v10685_v22 = vpop.f32.mrb[11].mxu1  ;;  %v4136_v12 = vld [vmem:[#allocation2 + $0x5b] sm:$0xff] }
 0x3ab   : > { %v10773_v57 = vpop.f32.mrb[39].mxu0  ;;  %v4174_v13 = vpack.c.bf16 %v4137_v39, %v4136_v12 }
 0x3ac   : > { %v13630_v46 = vadd.f32 %v3298_v19, %v2978_v34  ;;  %10975 = vmatmul.mubr.msk.bf16.gmra.mrb[116].mxu1 %vm373_vm0, %v4173_v15  ;;  %v4139_v19 = vld [vmem:[#allocation2 + $0x73] sm:$0xff] }
 0x3ad   : > { %10978 = vmatprep.mubr.msk.bf16.mxu1 %vm12096_vm1, %v15937_v43 }
 0x3af   : > { %v2921_v5 = vpop.f32.mrb[12].mxu1 }
 0x3b0   : > { %v3303_v27 = vpop.f32.mrb[40].mxu0  ;;  %v2979_v9 = vadd.f32 %v2921_v5, %v13376_v6  ;;  %v10688_v11 = vpop.f32.mrb[13].mxu1 }
 0x3b1   : > { %v10776_v30 = vpop.f32.mrb[41].mxu0  ;;  %v2924_v18 = vpop.f32.mrb[14].mxu1 }
 0x3b2   : > { %v3306_v41 = vpop.f32.mrb[42].mxu0  ;;  %v13636_v10 = vadd.f32 %v3303_v27, %v2979_v9  ;;  %v2980_v7 = vadd.f32 %v2924_v18, %v13379_v33  ;;  %v10689_v25 = vpop.f32.mrb[15].mxu1  ;;  %v4138_v33 = vld [vmem:[#allocation2 + $0x6b] sm:$0xff] }
 0x3b3   : > { %v10777_v52 = vpop.f32.mrb[43].mxu0  ;;  %v4175_v11 = vpack.c.bf16 %v4139_v19, %v4138_v33 }
 0x3b4   : > { %v13639_v8 = vadd.f32 %v3306_v41, %v2980_v7  ;;  %10979 = vmatmul.mubr.msk.bf16.gmra.mrb[120].mxu1 %vm373_vm0, %v4174_v13  ;;  %v4141_v41 = vld [vmem:[#allocation2 + $0x83] sm:$0xff] }
 0x3b5   : > { %10982 = vmatprep.mubr.msk.bf16.mxu1 %vm12096_vm1, %v15937_v43 }
 0x3b7   : > { %v2929_v6 = vpop.f32.mrb[16].mxu1 }
 0x3b8   : > { %v3311_v24 = vpop.f32.mrb[44].mxu0  ;;  %v2981_v2 = vadd.f32 %v2929_v6, %v13389_v58  ;;  %v10692_v34 = vpop.f32.mrb[17].mxu1 }
 0x3b9   : > { %v10780_v22 = vpop.f32.mrb[45].mxu0  ;;  %v2932_v57 = vpop.f32.mrb[18].mxu1  ;;  %v12012_v34 = vld [vmem:[%s15804_s6 + $0x10] sm:$0xff]  }
 0x3ba   : > { %v3314_v15 = vpop.f32.mrb[46].mxu0  ;;  %v13645_v5 = vadd.f32 %v3311_v24, %v2981_v2  ;;  %v2982_v27 = vadd.f32 %v2932_v57, %v13392_v40  ;;  %v10693_v39 = vpop.f32.mrb[19].mxu1  ;;  %v4140_v40 = vld [vmem:[#allocation2 + $0x7b] sm:$0xff]  ;;  %11051 = vmatpush3.bf16.msra.mxu0 %v12012_v34  ;;  %v4143_v57 = vld [vmem:[#allocation2 + $0x93] sm:$0xff] }
 0x3bb   : > { %v10781_v9 = vpop.f32.mrb[47].mxu0  ;;  %v4176_v2 = vpack.c.bf16 %v4141_v41, %v4140_v40  ;;  %11052 = vmatprep.subr.bf16.mxu0 %v15937_v43 }
 0x3bc   : > { %v13648_v30 = vadd.f32 %v3314_v15, %v2982_v27  ;;  %10983 = vmatmul.mubr.msk.bf16.gmra.mrb[124].mxu1 %vm373_vm0, %v4175_v11  ;;  %v4142_v11 = vld [vmem:[#allocation2 + $0x8b] sm:$0xff] }
 0x3bd   : > { %10986 = vmatprep.mubr.msk.bf16.mxu1 %vm12096_vm1, %v15937_v43 }
 0x3bf   : > { %v2937_v58 = vpop.f32.mrb[20].mxu1 }
 0x3c0   : > { %v3319_v18 = vpop.f32.mrb[48].mxu0  ;;  %v2983_v12 = vadd.f32 %v2937_v58, %v13402_v32  ;;  %v10696_v7 = vpop.f32.mrb[21].mxu1 }
 0x3c1   : > { %v10784_v25 = vpop.f32.mrb[49].mxu0  ;;  %v2940_v52 = vpop.f32.mrb[22].mxu1  ;;  %v4177_v7 = vpack.c.bf16 %v4143_v57, %v4142_v11 }
 0x3c2   : > { %v3322_v13 = vpop.f32.mrb[50].mxu0  ;;  %v13654_v6 = vadd.f32 %v3319_v18, %v2983_v12  ;;  %v10697_v24 = vpop.f32.mrb[23].mxu1 }
 0x3c3   : > { %v10785_v19 = vpop.f32.mrb[51].mxu0  ;;  %v4145_v13 = vld [vmem:[#allocation2 + $0xa3] sm:$0xff] }
 0x3c4   : > { %10987 = vmatmul.mubr.msk.bf16.gmra.mrb[128].mxu1 %vm373_vm0, %v4176_v2 }
 0x3c5   : > { %10990 = vmatprep.mubr.msk.bf16.mxu1 %vm12096_vm1, %v15937_v43 }
 0x3c7   : > { %v3541_v32 = vpop.f32.mrb[24].mxu1 }
 0x3c8   : > { %v3923_v22 = vpop.f32.mrb[52].mxu0  ;;  %v3707_v15 = vadd.f32 %v3541_v32, %v13416_v36  ;;  %v10792_v33 = vpop.f32.mrb[25].mxu1 }
 0x3c9   : > { %v10880_v27 = vpop.f32.mrb[53].mxu0  ;;  %v3544_v39 = vpop.f32.mrb[26].mxu1 }
 0x3ca   : > { %v3926_v9 = vpop.f32.mrb[54].mxu0  ;;  %v13664_v58 = vadd.f32 %v3923_v22, %v3707_v15  ;;  %v3708_v18 = vadd.f32 %v3544_v39, %v13419_v59  ;;  %v10793_v41 = vpop.f32.mrb[27].mxu1  ;;  %v4144_v59 = vld [vmem:[#allocation2 + $0x9b] sm:$0xff] }
 0x3cb   : > { %v10881_v12 = vpop.f32.mrb[55].mxu0  ;;  %v4178_v33 = vpack.c.bf16 %v4145_v13, %v4144_v59 }
 0x3cc   : > { %v13667_v25 = vadd.f32 %v3926_v9, %v3708_v18  ;;  %10991 = vmatmul.mubr.msk.bf16.gmra.mrb[132].mxu1 %vm373_vm0, %v4177_v7  ;;  %v4147_v9 = vld [vmem:[#allocation2 + $0xb3] sm:$0xff] }
 0x3cd   : > { %10994 = vmatprep.mubr.msk.bf16.mxu1 %vm12096_vm1, %v15937_v43 }
 0x3cf   : > { %v3549_v36 = vpop.f32.mrb[28].mxu1 }
 0x3d0   : > { %v3931_v52 = vpop.f32.mrb[56].mxu0  ;;  %v3709_v40 = vadd.f32 %v3549_v36, %v13429_v21  ;;  %v10796_v24 = vpop.f32.mrb[29].mxu1 }
 0x3d1   : > { %v10884_v19 = vpop.f32.mrb[57].mxu0  ;;  %v3552_v2 = vpop.f32.mrb[30].mxu1 }
 0x3d2   : > { %v3934_v34 = vpop.f32.mrb[58].mxu0  ;;  %v13673_v32 = vadd.f32 %v3931_v52, %v3709_v40  ;;  %v3710_v22 = vadd.f32 %v3552_v2, %v13432_v49  ;;  %v10797_v57 = vpop.f32.mrb[31].mxu1  ;;  %v4146_v49 = vld [vmem:[#allocation2 + $0xab] sm:$0xff] }
 0x3d3   : > { %v10885_v15 = vpop.f32.mrb[59].mxu0  ;;  %v4179_v24 = vpack.c.bf16 %v4147_v9, %v4146_v49 }
 0x3d4   : > { %v13676_v27 = vadd.f32 %v3934_v34, %v3710_v22  ;;  %10995 = vmatmul.mubr.msk.bf16.gmra.mrb[136].mxu1 %vm373_vm0, %v4178_v33  ;;  %v4149_v34 = vld [vmem:[#allocation2 + $0xc3] sm:$0xff] }
 0x3d5   : > { %10998 = vmatprep.mubr.msk.bf16.mxu1 %vm12096_vm1, %v15937_v43 }
 0x3d7   : > { %v3557_v21 = vpop.f32.mrb[32].mxu1 }
 0x3d8   : > { %v3939_v39 = vpop.f32.mrb[60].mxu0  ;;  %v3711_v11 = vadd.f32 %v3557_v21, %v13442_v1  ;;  %v10800_v18 = vpop.f32.mrb[33].mxu1 }
 0x3d9   : > { %v10888_v41 = vpop.f32.mrb[61].mxu0  ;;  %v3560_v12 = vpop.f32.mrb[34].mxu1 }
 0x3da   : > { %v3942_v7 = vpop.f32.mrb[62].mxu0  ;;  %v13682_v36 = vadd.f32 %v3939_v39, %v3711_v11  ;;  %v3712_v52 = vadd.f32 %v3560_v12, %v13445_v17  ;;  %v10801_v13 = vpop.f32.mrb[35].mxu1  ;;  %v4148_v17 = vld [vmem:[#allocation2 + $0xbb] sm:$0xff] }
 0x3db   : > { %v10889_v40 = vpop.f32.mrb[63].mxu0  ;;  %v4180_v18 = vpack.c.bf16 %v4149_v34, %v4148_v17 }
 0x3dc   : > { %v13685_v19 = vadd.f32 %v3942_v7, %v3712_v52  ;;  %10999 = vmatmul.mubr.msk.bf16.gmra.mrb[140].mxu1 %vm373_vm0, %v4179_v24  ;;  %v4151_v7 = vld [vmem:[#allocation2 + $0xd3] sm:$0xff] }
 0x3dd   : > { %11002 = vmatprep.mubr.msk.bf16.mxu1 %vm12096_vm1, %v15937_v43 }
 0x3df   : > { %v3565_v1 = vpop.f32.mrb[36].mxu1 }
 0x3e0   : > { %v3947_v2 = vpop.f32.mrb[64].mxu0  ;;  %v3713_v59 = vadd.f32 %v3565_v1, %v13455_v29  ;;  %v10804_v22 = vpop.f32.mrb[37].mxu1 }
 0x3e1   : > { %v10892_v57 = vpop.f32.mrb[65].mxu0  ;;  %v3568_v15 = vpop.f32.mrb[38].mxu1 }
 0x3e2   : > { %v3950_v33 = vpop.f32.mrb[66].mxu0  ;;  %v13691_v21 = vadd.f32 %v3947_v2, %v3713_v59  ;;  %v3714_v39 = vadd.f32 %v3568_v15, %v13458_v62  ;;  %v10805_v9 = vpop.f32.mrb[39].mxu1  ;;  %v4150_v62 = vld [vmem:[#allocation2 + $0xcb] sm:$0xff] }
 0x3e3   : > { %v10893_v11 = vpop.f32.mrb[67].mxu0  ;;  %v4181_v22 = vpack.c.bf16 %v4151_v7, %v4150_v62  ;;  %v4155_v62 = vld [vmem:[#allocation2 + $0xf3] sm:$0xff] }
 0x3e4   : > { %v13694_v41 = vadd.f32 %v3950_v33, %v3714_v39  ;;  %11003 = vmatmul.mubr.msk.bf16.gmra.mrb[144].mxu1 %vm373_vm0, %v4180_v18  ;;  %v4153_v33 = vld [vmem:[#allocation2 + $0xe3] sm:$0xff] }
 0x3e5   : > { %11006 = vmatprep.mubr.msk.bf16.mxu1 %vm12096_vm1, %v15937_v43 }
 0x3e7   : > { %v3573_v29 = vpop.f32.mrb[40].mxu1 }
 0x3e8   : > { %v3955_v12 = vpop.f32.mrb[68].mxu0  ;;  %v3715_v49 = vadd.f32 %v3573_v29, %v13468_v14  ;;  %v10808_v52 = vpop.f32.mrb[41].mxu1 }
 0x3e9   : > { %v10896_v13 = vpop.f32.mrb[69].mxu0  ;;  %v3576_v40 = vpop.f32.mrb[42].mxu1 }
 0x3ea   : > { %v3958_v24 = vpop.f32.mrb[70].mxu0  ;;  %v13700_v1 = vadd.f32 %v3955_v12, %v3715_v49  ;;  %v3716_v2 = vadd.f32 %v3576_v40, %v13471_v26  ;;  %v10809_v34 = vpop.f32.mrb[43].mxu1  ;;  %v4152_v26 = vld [vmem:[#allocation2 + $0xdb] sm:$0xff] }
 0x3eb   : > { %v10897_v59 = vpop.f32.mrb[71].mxu0  ;;  %v4182_v52 = vpack.c.bf16 %v4153_v33, %v4152_v26 }
 0x3ec   : > { %v13703_v57 = vadd.f32 %v3958_v24, %v3716_v2  ;;  %11007 = vmatmul.mubr.msk.bf16.gmra.mrb[148].mxu1 %vm373_vm0, %v4181_v22  ;;  %v4154_v24 = vld [vmem:[#allocation2 + $0xeb] sm:$0xff] }
 0x3ed   : > { %11010 = vmatprep.mubr.msk.bf16.mxu1 %vm12096_vm1, %v15937_v43 }
 0x3ef   : > { %v3581_v14 = vpop.f32.mrb[44].mxu1 }
 0x3f0   : > { %v3963_v15 = vpop.f32.mrb[72].mxu0  ;;  %v3717_v17 = vadd.f32 %v3581_v14, %v13481_v50  ;;  %v10812_v39 = vpop.f32.mrb[45].mxu1 }
 0x3f1   : > { %v10900_v9 = vpop.f32.mrb[73].mxu0  ;;  %v3584_v11 = vpop.f32.mrb[46].mxu1  ;;  %v4183_v39 = vpack.c.bf16 %v4155_v62, %v4154_v24 }
 0x3f2   : > { %v3966_v18 = vpop.f32.mrb[74].mxu0  ;;  %v13709_v29 = vadd.f32 %v3963_v15, %v3717_v17  ;;  %v3718_v12 = vadd.f32 %v3584_v11, %v13484_v23  ;;  %v10813_v7 = vpop.f32.mrb[47].mxu1 }
 0x3f3   : > { %v10901_v49 = vpop.f32.mrb[75].mxu0 }
 0x3f4   : > { %v13712_v13 = vadd.f32 %v3966_v18, %v3718_v12  ;;  %11011 = vmatmul.mubr.msk.bf16.gmra.mrb[152].mxu1 %vm373_vm0, %v4182_v52  ;;  %v4157_v18 = vld [vmem:[#allocation2 + $0x103] sm:$0xff] }
 0x3f5   : > { %11014 = vmatprep.mubr.msk.bf16.mxu1 %vm12096_vm1, %v15937_v43 }
 0x3f7   : > { %v3589_v50 = vpop.f32.mrb[48].mxu1 }
 0x3f8   : > { %v3971_v40 = vpop.f32.mrb[76].mxu0  ;;  %v3719_v2 = vadd.f32 %v3589_v50, %v13494_v47  ;;  %v10816_v34 = vpop.f32.mrb[49].mxu1 }
 0x3f9   : > { %v10904_v59 = vpop.f32.mrb[77].mxu0  ;;  %v3592_v22 = vpop.f32.mrb[50].mxu1  ;;  %v12013_v34 = vld [vmem:[%s15804_s6] sm:$0xff]  }
 0x3fa   : > { %v3974_v23 = vpop.f32.mrb[78].mxu0  ;;  %v13718_v14 = vadd.f32 %v3971_v40, %v3719_v2  ;;  %v3720_v15 = vadd.f32 %v3592_v22, %v13497_v31  ;;  %v10817_v33 = vpop.f32.mrb[51].mxu1  ;;  %v4156_v31 = vld [vmem:[#allocation2 + $0xfb] sm:$0xff]  ;;  %11139 = vmatpush3.bf16.msra.mxu1 %v12013_v34 }
 0x3fb   : > { %v10905_v17 = vpop.f32.mrb[79].mxu0  ;;  %v4184_v2 = vpack.c.bf16 %v4157_v18, %v4156_v31  ;;  %11140 = vmatprep.subr.bf16.mxu1 %v15937_v43  ;;  %v4158_v18 = vld [vmem:[#allocation2 + $0x10b] sm:$0xff] }
 0x3fc   : > { %v13721_v9 = vadd.f32 %v3974_v23, %v3720_v15  ;;  %11015 = vmatmul.mubr.msk.bf16.gmra.mrb[156].mxu1 %vm373_vm0, %v4183_v39  ;;  %v4159_v23 = vld [vmem:[#allocation2 + $0x113] sm:$0xff]  ;;  %v12015_v39 = vld [vmem:[%s15804_s6 + $0x8] sm:$0xff]  }
 0x3fd   : > { %11018 = vmatprep.mubr.msk.bf16.mxu1 %vm12096_vm1, %v15937_v43 }
 0x3fe   : > { %11141 = vmatpush3.bf16.msra.mxu1 %v12015_v39 }
 0x3ff   : > { %v3597_v11 = vpop.f32.mrb[52].mxu1  ;;  %11314 = vmatprep.subr.bf16.mxu1 %v15937_v43 }
 0x400   : > { %v3979_v47 = vpop.f32.mrb[80].mxu0  ;;  %v3721_v26 = vadd.f32 %v3597_v11, %v13507_v16  ;;  %v10820_v12 = vpop.f32.mrb[53].mxu1  ;;  %v12014_v16 = vld [vmem:[%s15804_s6 + $0x18] sm:$0xff]  }
 0x401   : > { %v10908_v7 = vpop.f32.mrb[81].mxu0  ;;  %v3600_v49 = vpop.f32.mrb[54].mxu1  ;;  %11053 = vmatpush3.bf16.msra.mxu0 %v12014_v16  ;;  %v4750_v12 = vld [vmem:[#allocation3 + $0xe] sm:$0xff] }
 0x402   : > { %v3982_v52 = vpop.f32.mrb[82].mxu0  ;;  %v13727_v50 = vadd.f32 %v3979_v47, %v3721_v26  ;;  %v3722_v40 = vadd.f32 %v3600_v49, %v13510_v38  ;;  %v10821_v24 = vpop.f32.mrb[55].mxu1  ;;  %11226 = vmatprep.subr.bf16.mxu0 %v15937_v43  ;;  %v4749_v26 = vld [vmem:[#allocation3 + $0x6] sm:$0xff] }
 0x403   : > { %v10909_v62 = vpop.f32.mrb[83].mxu0 }
 0x404   : > { %v13736_v59 = vadd.f32 %v3982_v52, %v3722_v40  ;;  %11019 = vmatmul.mubr.msk.bf16.gmra.mrb[160].mxu1 %vm373_vm0, %v4184_v2  ;;  %v4185_v40 = vpack.c.bf16 %v4159_v23, %v4158_v18  ;;  %v4161_v2 = vld [vmem:[#allocation2 + $0x123] sm:$0xff] }
 0x405   : > { %11022 = vmatprep.mubr.msk.bf16.mxu1 %vm12096_vm1, %v15937_v43 }
 0x407   : > { %v3605_v38 = vpop.f32.mrb[56].mxu1 }
 0x408   : > { %v3987_v22 = vpop.f32.mrb[84].mxu0  ;;  %v3723_v15 = vadd.f32 %v3605_v38, %v13520_v4  ;;  %v10824_v33 = vpop.f32.mrb[57].mxu1  ;;  %v4790_v4 = vpack.c.bf16 %v4750_v12, %v4749_v26  ;;  %v4163_v12 = vld [vmem:[#allocation2 + $0x133] sm:$0xff] }
 0x409   : > { %v10912_v17 = vpop.f32.mrb[85].mxu0  ;;  %v3608_v11 = vpop.f32.mrb[58].mxu1 }
 0x40a   : > { %v3990_v47 = vpop.f32.mrb[86].mxu0  ;;  %v13747_v7 = vadd.f32 %v3987_v22, %v3723_v15  ;;  %v3724_v49 = vadd.f32 %v3608_v11, %v13523_v51  ;;  %v10825_v52 = vpop.f32.mrb[59].mxu1  ;;  %11055 = vmatmul.mubr.msk.bf16.vlgmr.msra.gmra.mrb[136].mxu0 %vm373_vm0, %v4790_v4  ;;  %v4160_v15 = vld [vmem:[#allocation2 + $0x11b] sm:$0xff] }
 0x40b   : > { %v10913_v31 = vpop.f32.mrb[87].mxu0  ;;  %11058 = vmatprep.mubr.msk.bf16.mxu0 %vm12096_vm1, %v15937_v43 }
 0x40c   : > { %v13751_v24 = vadd.f32 %v3990_v47, %v3724_v49  ;;  %11023 = vmatmul.mubr.msk.bf16.gmra.mrb[164].mxu1 %vm373_vm0, %v4185_v40  ;;  %v4186_v47 = vpack.c.bf16 %v4161_v2, %v4160_v15 }
 0x40d   : > { %11026 = vmatprep.mubr.msk.bf16.mxu1 %vm12096_vm1, %v15937_v43 }
 0x40f   : > { %v3613_v51 = vpop.f32.mrb[60].mxu1 }
 0x410   : > { %v3995_v62 = vpop.f32.mrb[88].mxu0  ;;  %v3725_v34 = vadd.f32 %v3613_v51, %v13533_v63  ;;  %v10828_v16 = vpop.f32.mrb[61].mxu1 }
 0x411   : > { %v10916_v38 = vpop.f32.mrb[89].mxu0  ;;  %v3616_v22 = vpop.f32.mrb[62].mxu1 }
 0x412   : > { %v3998_v23 = vpop.f32.mrb[90].mxu0  ;;  %v13760_v33 = vadd.f32 %v3995_v62, %v3725_v34  ;;  %v3726_v17 = vadd.f32 %v3616_v22, %v13536_v45  ;;  %v10829_v39 = vpop.f32.mrb[63].mxu1  ;;  %v4162_v45 = vld [vmem:[#allocation2 + $0x12b] sm:$0xff] }
 0x413   : > { %v10917_v11 = vpop.f32.mrb[91].mxu0  ;;  %v4187_v16 = vpack.c.bf16 %v4163_v12, %v4162_v45 }
 0x414   : > { %v13763_v18 = vadd.f32 %v3998_v23, %v3726_v17  ;;  %11027 = vmatmul.mubr.msk.bf16.gmra.mrb[168].mxu1 %vm373_vm0, %v4186_v47  ;;  %v4165_v23 = vld [vmem:[#allocation2 + $0x143] sm:$0xff] }
 0x415   : > { %11030 = vmatprep.mubr.msk.bf16.mxu1 %vm12096_vm1, %v15937_v43 }
 0x417   : > { %v3621_v63 = vpop.f32.mrb[64].mxu1 }
 0x418   : > { %v4003_v26 = vpop.f32.mrb[92].mxu0  ;;  %v3727_v49 = vadd.f32 %v3621_v63, %v13546_v54  ;;  %v10832_v52 = vpop.f32.mrb[65].mxu1 }
 0x419   : > { %v10920_v31 = vpop.f32.mrb[93].mxu0  ;;  %v3624_v40 = vpop.f32.mrb[66].mxu1 }
 0x41a   : > { %v4006_v4 = vpop.f32.mrb[94].mxu0  ;;  %v13769_v51 = vadd.f32 %v4003_v26, %v3727_v49  ;;  %v3728_v62 = vadd.f32 %v3624_v40, %v13549_v42  ;;  %v10833_v2 = vpop.f32.mrb[67].mxu1  ;;  %v4164_v42 = vld [vmem:[#allocation2 + $0x13b] sm:$0xff] }
 0x41b   : > { %v10921_v34 = vpop.f32.mrb[95].mxu0  ;;  %v4188_v52 = vpack.c.bf16 %v4165_v23, %v4164_v42  ;;  %v4169_v42 = vld [vmem:[#allocation2 + $0x163] sm:$0xff] }
 0x41c   : > { %v13772_v38 = vadd.f32 %v4006_v4, %v3728_v62  ;;  %11031 = vmatmul.mubr.msk.bf16.gmra.mrb[172].mxu1 %vm373_vm0, %v4187_v16  ;;  %v4167_v4 = vld [vmem:[#allocation2 + $0x153] sm:$0xff] }
 0x41d   : > { %11034 = vmatprep.mubr.msk.bf16.mxu1 %vm12096_vm1, %v15937_v43 }
 0x41f   : > { %v3629_v54 = vpop.f32.mrb[68].mxu1 }
 0x420   : > { %v4011_v22 = vpop.f32.mrb[96].mxu0  ;;  %v3729_v15 = vadd.f32 %v3629_v54, %v13559_v44  ;;  %v10836_v17 = vpop.f32.mrb[69].mxu1 }
 0x421   : > { %v10924_v39 = vpop.f32.mrb[97].mxu0  ;;  %v3632_v11 = vpop.f32.mrb[70].mxu1 }
 0x422   : > { %v4014_v47 = vpop.f32.mrb[98].mxu0  ;;  %v13778_v63 = vadd.f32 %v4011_v22, %v3729_v15  ;;  %v3730_v26 = vadd.f32 %v3632_v11, %v13562_v20  ;;  %v10837_v12 = vpop.f32.mrb[71].mxu1  ;;  %v4166_v20 = vld [vmem:[#allocation2 + $0x14b] sm:$0xff] }
 0x423   : > { %v10925_v49 = vpop.f32.mrb[99].mxu0  ;;  %v4189_v17 = vpack.c.bf16 %v4167_v4, %v4166_v20 }
 0x424   : > { %v13781_v31 = vadd.f32 %v4014_v47, %v3730_v26  ;;  %11035 = vmatmul.mubr.msk.bf16.gmra.mrb[176].mxu1 %vm373_vm0, %v4188_v52  ;;  %v4168_v47 = vld [vmem:[#allocation2 + $0x15b] sm:$0xff] }
 0x425   : > { %11038 = vmatprep.mubr.msk.bf16.mxu1 %vm12096_vm1, %v15937_v43 }
 0x427   : > { %v3637_v44 = vpop.f32.mrb[72].mxu1 }
 0x428   : > { %v4019_v40 = vpop.f32.mrb[100].mxu0  ;;  %v3731_v45 = vadd.f32 %v3637_v44, %v13572_v53  ;;  %v10840_v62 = vpop.f32.mrb[73].mxu1 }
 0x429   : > { %v10928_v2 = vpop.f32.mrb[101].mxu0  ;;  %v3640_v34 = vpop.f32.mrb[74].mxu1  ;;  %v4190_v62 = vpack.c.bf16 %v4169_v42, %v4168_v47 }
 0x42a   : > { %v4022_v16 = vpop.f32.mrb[102].mxu0  ;;  %v13787_v54 = vadd.f32 %v4019_v40, %v3731_v45  ;;  %v3732_v22 = vadd.f32 %v3640_v34, %v13575_v35  ;;  %v10841_v23 = vpop.f32.mrb[75].mxu1  ;;  %v4170_v34 = vld [vmem:[#allocation2 + $0x16b] sm:$0xf] }
 0x42b   : > { %v10929_v15 = vpop.f32.mrb[103].mxu0 }
 0x42c   : > { %v13790_v39 = vadd.f32 %v4022_v16, %v3732_v22  ;;  %11039 = vmatmul.mubr.msk.bf16.gmra.mrb[180].mxu1 %vm373_vm0, %v4189_v17  ;;  %v4191_v15 = vpack.c.bf16 %v4170_v34, %v4170_v34 }
 0x42d   : > { %11042 = vmatprep.mubr.msk.bf16.mxu1 %vm12096_vm1, %v15937_v43 }
 0x42f   : > { %v3645_v53 = vpop.f32.mrb[76].mxu1 }
 0x430   : > { %v4027_v11 = vpop.f32.mrb[104].mxu0  ;;  %v3733_v26 = vadd.f32 %v3645_v53, %v13585_v48  ;;  %v10844_v12 = vpop.f32.mrb[77].mxu1 }
 0x431   : > { %v10932_v49 = vpop.f32.mrb[105].mxu0  ;;  %v3648_v52 = vpop.f32.mrb[78].mxu1  ;;  %v4683_v12 = vld [vmem:[#allocation3 + $0x5] sm:$0xff] }
 0x432   : > { %v4030_v35 = vpop.f32.mrb[106].mxu0  ;;  %v13796_v44 = vadd.f32 %v4027_v11, %v3733_v26  ;;  %v3734_v40 = vadd.f32 %v3648_v52, %v13588_v55  ;;  %v10845_v4 = vpop.f32.mrb[79].mxu1 }
 0x433   : > { %v10933_v45 = vpop.f32.mrb[107].mxu0 }
 0x434   : > { %v13799_v2 = vadd.f32 %v4030_v35, %v3734_v40  ;;  %11043 = vmatmul.mubr.msk.bf16.gmra.mrb[184].mxu1 %vm373_vm0, %v4190_v62 }
 0x435   : > { %11046 = vmatprep.mubr.msk.bf16.mxu1 %vm12096_vm1, %v15937_v43 }
 0x437   : > { %v3653_v48 = vpop.f32.mrb[80].mxu1 }
 0x438   : > { %v4035_v16 = vpop.f32.mrb[108].mxu0  ;;  %v3735_v20 = vadd.f32 %v3653_v48, %v13597_v0  ;;  %v10848_v22 = vpop.f32.mrb[81].mxu1  ;;  %v4684_v0 = vld [vmem:[#allocation3 + $0xd] sm:$0xff] }
 0x439   : > { %v10936_v23 = vpop.f32.mrb[109].mxu0  ;;  %v3656_v17 = vpop.f32.mrb[82].mxu1  ;;  %v4724_v45 = vpack.c.bf16 %v4684_v0, %v4683_v12 }
 0x43a   : > { %v4038_v55 = vpop.f32.mrb[110].mxu0  ;;  %v13805_v53 = vadd.f32 %v4035_v16, %v3735_v20  ;;  %v3736_v11 = vadd.f32 %v3656_v17, %v13600_v3  ;;  %v10849_v47 = vpop.f32.mrb[83].mxu1 }
 0x43b   : > { %v10937_v42 = vpop.f32.mrb[111].mxu0 }
 0x43c   : > { %v13808_v26 = vadd.f32 %v4038_v55, %v3736_v11  ;;  %11047 = vmatmul.mubr.msk.bf16.gmra.mrb[188].mxu1 %vm373_vm0, %v4191_v15 }
 0x43d   : > { %11142 = vmatprep.mubr.msk.bf16.mxu1 %vm12096_vm1, %v15937_v43 }
 0x43f   : > { %v3661_v49 = vpop.f32.mrb[84].mxu1 }
 0x440   : > { %v4043_v52 = vpop.f32.mrb[112].mxu0  ;;  %v3737_v35 = vadd.f32 %v3661_v49, %v13609_v61  ;;  %v10852_v40 = vpop.f32.mrb[85].mxu1 }
 0x441   : > { %v10940_v4 = vpop.f32.mrb[113].mxu0  ;;  %v3664_v62 = vpop.f32.mrb[86].mxu1 }
 0x442   : > { %v4046_v3 = vpop.f32.mrb[114].mxu0  ;;  %v13814_v34 = vadd.f32 %v4043_v52, %v3737_v35  ;;  %v3738_v48 = vadd.f32 %v3664_v62, %v13612_v56  ;;  %v10853_v16 = vpop.f32.mrb[87].mxu1 }
 0x443   : > { %v10941_v20 = vpop.f32.mrb[115].mxu0 }
 0x444   : > { %v13817_v22 = vadd.f32 %v4046_v3, %v3738_v48  ;;  %11143 = vmatmul.mubr.msk.bf16.vlgmr.msra.gmra.mrb[192].mxu1 %vm373_vm0, %v4724_v45 }
 0x445   : > { %11146 = vmatprep.mubr.msk.bf16.mxu1 %vm12096_vm1, %v15937_v43 }
 0x447   : > { %v3669_v23 = vpop.f32.mrb[88].mxu1 }
 0x448   : > { %v4051_v61 = vpop.f32.mrb[116].mxu0  ;;  %v3739_v15 = vadd.f32 %v3669_v23, %v13618_v60  ;;  %v10856_v17 = vpop.f32.mrb[89].mxu1 }
 0x449   : > { %v10944_v55 = vpop.f32.mrb[117].mxu0  ;;  %v3672_v11 = vpop.f32.mrb[90].mxu1 }
 0x44a   : > { %v4054_v47 = vpop.f32.mrb[118].mxu0  ;;  %v13823_v42 = vadd.f32 %v4051_v61, %v3739_v15  ;;  %v3740_v56 = vadd.f32 %v3672_v11, %v13621_v28  ;;  %v10857_v12 = vpop.f32.mrb[91].mxu1 }
 0x44b   : > { %v10945_v0 = vpop.f32.mrb[119].mxu0 }
 0x44c   : > { %v13826_v49 = vadd.f32 %v4054_v47, %v3740_v56 }
 0x44f   : > { %v3677_v52 = vpop.f32.mrb[92].mxu1 }
 0x450   : > { %v4059_v35 = vpop.f32.mrb[120].mxu0  ;;  %v3741_v40 = vadd.f32 %v3677_v52, %v13627_v37  ;;  %v10860_v4 = vpop.f32.mrb[93].mxu1 }
 0x451   : > { %v10948_v45 = vpop.f32.mrb[121].mxu0  ;;  %v3680_v62 = vpop.f32.mrb[94].mxu1 }
 0x452   : > { %v4062_v60 = vpop.f32.mrb[122].mxu0  ;;  %v13829_v3 = vadd.f32 %v4059_v35, %v3741_v40  ;;  %v3742_v48 = vadd.f32 %v3680_v62, %v13630_v46  ;;  %v10861_v16 = vpop.f32.mrb[95].mxu1 }
 0x453   : > { %v10949_v20 = vpop.f32.mrb[123].mxu0 }
 0x454   : > { %v13832_v23 = vadd.f32 %v4062_v60, %v3742_v48 }
 0x457   : > { %v3685_v28 = vpop.f32.mrb[96].mxu1 }
 0x458   : > { %v4067_v61 = vpop.f32.mrb[124].mxu0  ;;  %v3743_v15 = vadd.f32 %v3685_v28, %v13636_v10  ;;  %v10864_v17 = vpop.f32.mrb[97].mxu1 }
 0x459   : > { %v10952_v55 = vpop.f32.mrb[125].mxu0  ;;  %v3688_v11 = vpop.f32.mrb[98].mxu1 }
 0x45a   : > { %v4070_v37 = vpop.f32.mrb[126].mxu0  ;;  %v13835_v47 = vadd.f32 %v4067_v61, %v3743_v15  ;;  %v3744_v56 = vadd.f32 %v3688_v11, %v13639_v8  ;;  %v10865_v12 = vpop.f32.mrb[99].mxu1 }
 0x45b   : > { %v10953_v0 = vpop.f32.mrb[127].mxu0 }
 0x45c   : > { %v13838_v52 = vadd.f32 %v4070_v37, %v3744_v56 }
 0x45f   : > { %v3693_v46 = vpop.f32.mrb[100].mxu1 }
 0x460   : > { %v4075_v35 = vpop.f32.mrb[128].mxu0  ;;  %v3745_v40 = vadd.f32 %v3693_v46, %v13645_v5  ;;  %v10868_v4 = vpop.f32.mrb[101].mxu1 }
 0x461   : > { %v10956_v45 = vpop.f32.mrb[129].mxu0  ;;  %v3696_v62 = vpop.f32.mrb[102].mxu1 }
 0x462   : > { %v4078_v10 = vpop.f32.mrb[130].mxu0  ;;  %v13841_v60 = vadd.f32 %v4075_v35, %v3745_v40  ;;  %v3746_v48 = vadd.f32 %v3696_v62, %v13648_v30  ;;  %v10869_v16 = vpop.f32.mrb[103].mxu1  ;;  %v13852_v30 = vld [vmem:[%s15803_s5] ss:$0 sm:$0xff] }
 0x463   : > { %v10957_v20 = vpop.f32.mrb[131].mxu0  ;;  %v12016_v62 = vld [vmem:[%s15804_s6 + $0x20] sm:$0xff]   ;;  %v15968_v16 = vld [vmem:[#allocation8_spill] sm:$0xff] }
 0x464   : > { %v13844_v28 = vadd.f32 %v4078_v10, %v3746_v48  ;;  %11227 = vmatpush3.bf16.msra.mxu0 %v12016_v62 }
 0x465   : > { %11228 = vmatprep.subr.bf16.mxu0 %v15937_v43 }
 0x467   : > { %v3701_v8 = vpop.f32.mrb[104].mxu1 }
 0x468   : > { %v4083_v61 = vpop.f32.mrb[132].mxu0  ;;  %v3747_v15 = vadd.f32 %v3701_v8, %v13654_v6  ;;  %v10872_v17 = vpop.f32.mrb[105].mxu1 }
 0x469   : > { %v10960_v55 = vpop.f32.mrb[133].mxu0  ;;  %v3704_v11 = vpop.f32.mrb[106].mxu1 }
 0x46a   : > { %v4086_v5 = vpop.f32.mrb[134].mxu0  ;;  %v13847_v37 = vadd.f32 %v4083_v61, %v3747_v15  ;;  %v10873_v56 = vpop.f32.mrb[107].mxu1  ;;  %v15969_v61 = vld [vmem:[#allocation10_spill] sm:$0xff] }
 0x46b   : > { %v10961_v12 = vpop.f32.mrb[135].mxu0 }
 0x46f   : > { %v4305_v0 = vpop.f32.mrb[108].mxu1 }
 0x470   : > { %v4471_v46 = vadd.f32 %v4305_v0, %v13664_v58  ;;  %v10968_v35 = vpop.f32.mrb[109].mxu1 }
 0x471   : > { %v4308_v40 = vpop.f32.mrb[110].mxu1 }
 0x472   : > { %v4519_v6 = vadd.f32 %v13852_v30, %v4471_v46  ;;  %v4472_v4 = vadd.f32 %v4308_v40, %v13667_v25  ;;  %v10969_v45 = vpop.f32.mrb[111].mxu1  ;;  %v15970_v46 = vld [vmem:[#allocation9_spill] sm:$0xff] }
 0x474   : > { %v4560_v10 = vmax.f32 %v4519_v6, 0.0  ;;  %v4520_v48 = vadd.f32 %v13852_v30, %v4472_v4  ;;  %v15971_v4 = vld [vmem:[#allocation11_spill] sm:$0xff] }
 0x476   : > { %v4601_v20 = vmul.f32 %v4560_v10, %v15968_v16  ;;  %v4561_v58 = vmax.f32 %v4520_v48, 0.0 }
 0x477   : > { %v4313_v8 = vpop.f32.mrb[112].mxu1 }
 0x478   : > { %4642 = vst.msk [vmem:[#allocation3 + $0x18] sm:$0xff] %vm373_vm0, %v4601_v20  ;;  %v4602_v15 = vmul.f32 %v4561_v58, %v15969_v61  ;;  %v4473_v25 = vadd.f32 %v4313_v8, %v13673_v32  ;;  %v10972_v17 = vpop.f32.mrb[113].mxu1 }
 0x479   : > { %v4316_v55 = vpop.f32.mrb[114].mxu1 }
 0x47a   : > { %4643 = vst.msk [vmem:[#allocation3 + $0x20] sm:$0xff] %vm373_vm0, %v4602_v15  ;;  %v4521_v11 = vadd.f32 %v13852_v30, %v4473_v25  ;;  %v4474_v5 = vadd.f32 %v4316_v55, %v13676_v27  ;;  %v10973_v56 = vpop.f32.mrb[115].mxu1 }
 0x47c   : > { %v4562_v12 = vmax.f32 %v4521_v11, 0.0  ;;  %v4522_v0 = vadd.f32 %v13852_v30, %v4474_v5 }
 0x47e   : > { %v4603_v35 = vmul.f32 %v4562_v12, %v15970_v46  ;;  %v4563_v40 = vmax.f32 %v4522_v0, 0.0  ;;  %v15973_v0 = vld [vmem:[#allocation13_spill] sm:$0xff] }
 0x47f   : > { %v4321_v6 = vpop.f32.mrb[116].mxu1  ;;  %v4751_v48 = vld [vmem:[#allocation3 + $0x16] sm:$0xff] }
 0x480   : > { %4644 = vst.msk [vmem:[#allocation3 + $0x28] sm:$0xff] %vm373_vm0, %v4603_v35  ;;  %v4604_v32 = vmul.f32 %v4563_v40, %v15971_v4  ;;  %v4475_v45 = vadd.f32 %v4321_v6, %v13682_v36  ;;  %v10976_v62 = vpop.f32.mrb[117].mxu1  ;;  %v4685_v15 = vld [vmem:[#allocation3 + $0x15] sm:$0xff] }
 0x481   : > { %v4324_v10 = vpop.f32.mrb[118].mxu1  ;;  %v4752_v8 = vld [vmem:[#allocation3 + $0x1e] sm:$0xff]  ;;  %v15972_v36 = vld [vmem:[#allocation12_spill] sm:$0xff] }
 0x482   : > { %4645 = vst.msk [vmem:[#allocation3 + $0x30] sm:$0xff] %vm373_vm0, %v4604_v32  ;;  %v4523_v27 = vadd.f32 %v13852_v30, %v4475_v45  ;;  %v4476_v20 = vadd.f32 %v4324_v10, %v13685_v19  ;;  %v10977_v58 = vpop.f32.mrb[119].mxu1  ;;  %v4686_v25 = vld [vmem:[#allocation3 + $0x1d] sm:$0xff]  ;;  %v4791_v17 = vpack.c.bf16 %v4752_v8, %v4751_v48 }
 0x483   : > { %v4725_v55 = vpack.c.bf16 %v4686_v25, %v4685_v15 }
 0x484   : > { %v4564_v11 = vmax.f32 %v4523_v27, 0.0  ;;  %v4524_v5 = vadd.f32 %v13852_v30, %v4476_v20  ;;  %11059 = vmatmul.mubr.msk.bf16.gmra.mrb[140].mxu0 %vm373_vm0, %v4791_v17 }
 0x485   : > { %11147 = vmatmul.mubr.msk.bf16.gmra.mrb[196].mxu1 %vm373_vm0, %v4725_v55  ;;  %11062 = vmatprep.mubr.msk.bf16.mxu0 %vm12096_vm1, %v15937_v43 }
 0x486   : > { %v4605_v56 = vmul.f32 %v4564_v11, %v15972_v36  ;;  %v4565_v12 = vmax.f32 %v4524_v5, 0.0  ;;  %11150 = vmatprep.mubr.msk.bf16.mxu1 %vm12096_vm1, %v15937_v43  ;;  %v15975_v5 = vld [vmem:[#allocation15_spill] sm:$0xff] }
 0x487   : > { %v4329_v19 = vpop.f32.mrb[120].mxu1  ;;  %v4753_v45 = vld [vmem:[#allocation3 + $0x26] sm:$0xff] }
 0x488   : > { %4646 = vst.msk [vmem:[#allocation3 + $0x38] sm:$0xff] %vm373_vm0, %v4605_v56  ;;  %v4606_v35 = vmul.f32 %v4565_v12, %v15973_v0  ;;  %v4477_v40 = vadd.f32 %v4329_v19, %v13691_v21  ;;  %v10980_v6 = vpop.f32.mrb[121].mxu1  ;;  %v4687_v20 = vld [vmem:[#allocation3 + $0x25] sm:$0xff] }
 0x489   : > { %v4332_v32 = vpop.f32.mrb[122].mxu1  ;;  %v4754_v27 = vld [vmem:[#allocation3 + $0x2e] sm:$0xff]  ;;  %v15974_v21 = vld [vmem:[#allocation14_spill] sm:$0xff] }
 0x48a   : > { %4647 = vst.msk [vmem:[#allocation3 + $0x40] sm:$0xff] %vm373_vm0, %v4606_v35  ;;  %v4525_v62 = vadd.f32 %v13852_v30, %v4477_v40  ;;  %v4478_v10 = vadd.f32 %v4332_v32, %v13694_v41  ;;  %v10981_v48 = vpop.f32.mrb[123].mxu1  ;;  %v4688_v58 = vld [vmem:[#allocation3 + $0x2d] sm:$0xff]  ;;  %v4792_v8 = vpack.c.bf16 %v4754_v27, %v4753_v45 }
 0x48b   : > { %v4726_v15 = vpack.c.bf16 %v4688_v58, %v4687_v20 }
 0x48c   : > { %v4566_v25 = vmax.f32 %v4525_v62, 0.0  ;;  %v4526_v17 = vadd.f32 %v13852_v30, %v4478_v10  ;;  %11063 = vmatmul.mubr.msk.bf16.gmra.mrb[144].mxu0 %vm373_vm0, %v4792_v8 }
 0x48d   : > { %11151 = vmatmul.mubr.msk.bf16.gmra.mrb[200].mxu1 %vm373_vm0, %v4726_v15  ;;  %11066 = vmatprep.mubr.msk.bf16.mxu0 %vm12096_vm1, %v15937_v43 }
 0x48e   : > { %v4607_v55 = vmul.f32 %v4566_v25, %v15974_v21  ;;  %v4567_v11 = vmax.f32 %v4526_v17, 0.0  ;;  %11154 = vmatprep.mubr.msk.bf16.mxu1 %vm12096_vm1, %v15937_v43  ;;  %v15977_v17 = vld [vmem:[#allocation17_spill] sm:$0xff] }
 0x48f   : > { %v4337_v41 = vpop.f32.mrb[124].mxu1  ;;  %v4755_v19 = vld [vmem:[#allocation3 + $0x36] sm:$0xff] }
 0x490   : > { %4648 = vst.msk [vmem:[#allocation3 + $0x48] sm:$0xff] %vm373_vm0, %v4607_v55  ;;  %v4608_v56 = vmul.f32 %v4567_v11, %v15975_v5  ;;  %v10984_v12 = vpop.f32.mrb[125].mxu1  ;;  %v4479_v35 = vadd.f32 %v4337_v41, %v13700_v1  ;;  %v4689_v32 = vld [vmem:[#allocation3 + $0x35] sm:$0xff] }
 0x491   : > { %v4340_v40 = vpop.f32.mrb[126].mxu1  ;;  %v4756_v6 = vld [vmem:[#allocation3 + $0x3e] sm:$0xff] }
 0x492   : > { %v4690_v45 = vld [vmem:[#allocation3 + $0x3d] sm:$0xff]  ;;  %4649 = vst.msk [vmem:[#allocation3 + $0x50] sm:$0xff] %vm373_vm0, %v4608_v56  ;;  %v4480_v62 = vadd.f32 %v4340_v40, %v13703_v57  ;;  %v10985_v10 = vpop.f32.mrb[127].mxu1  ;;  %v4793_v48 = vpack.c.bf16 %v4756_v6, %v4755_v19  ;;  %v4527_v20 = vadd.f32 %v13852_v30, %v4479_v35  ;;  %v15976_v57 = vld [vmem:[#allocation16_spill] sm:$0xff] }
 0x493   : > { %v4727_v27 = vpack.c.bf16 %v4690_v45, %v4689_v32 }
 0x494   : > { %v4528_v58 = vadd.f32 %v13852_v30, %v4480_v62  ;;  %v4568_v8 = vmax.f32 %v4527_v20, 0.0  ;;  %11067 = vmatmul.mubr.msk.bf16.gmra.mrb[148].mxu0 %vm373_vm0, %v4793_v48  ;;  %v12018_v20 = vld [vmem:[%s15804_s6 + $0x28] sm:$0xff]  }
 0x495   : > { %11155 = vmatmul.mubr.msk.bf16.gmra.mrb[204].mxu1 %vm373_vm0, %v4727_v27  ;;  %11070 = vmatprep.mubr.msk.bf16.mxu0 %vm12096_vm1, %v15937_v43  ;;  %v12017_v27 = vld [vmem:[%s15804_s6 + $0x30] sm:$0xff]  }
 0x496   : > { %v4569_v1 = vmax.f32 %v4528_v58, 0.0  ;;  %11158 = vmatprep.mubr.msk.bf16.mxu1 %vm12096_vm1, %v15937_v43  ;;  %v4609_v15 = vmul.f32 %v4568_v8, %v15976_v57  ;;  %v15978_v58 = vld [vmem:[#allocation18_spill] sm:$0xff]  ;;  %11315 = vmatpush3.bf16.msra.mxu1 %v12017_v27 }
 0x497   : > { %v4345_v25 = vpop.f32.mrb[128].mxu1  ;;  %v4757_v56 = vld [vmem:[#allocation3 + $0x46] sm:$0xff]  ;;  %11229 = vmatpush3.bf16.msra.mxu0 %v12018_v20  ;;  %11316 = vmatprep.subr.bf16.mxu1 %v15937_v43 }
 0x498   : > { %v4610_v55 = vmul.f32 %v4569_v1, %v15977_v17  ;;  %v4481_v11 = vadd.f32 %v4345_v25, %v13709_v29  ;;  %v10988_v41 = vpop.f32.mrb[129].mxu1  ;;  %4650 = vst.msk [vmem:[#allocation3 + $0x58] sm:$0xff] %vm373_vm0, %v4609_v15  ;;  %v4691_v35 = vld [vmem:[#allocation3 + $0x45] sm:$0xff]  ;;  %11402 = vmatprep.subr.bf16.mxu0 %v15937_v43 }
 0x499   : > { %v4348_v12 = vpop.f32.mrb[130].mxu1  ;;  %v4758_v19 = vld [vmem:[#allocation3 + $0x4e] sm:$0xff]  ;;  %v12019_v15 = vld [vmem:[%s15804_s6 + $0x38] sm:$0xff]  }
 0x49a   : > { %v4692_v40 = vld [vmem:[#allocation3 + $0x4d] sm:$0xff]  ;;  %4651 = vst.msk [vmem:[#allocation3 + $0x60] sm:$0xff] %vm373_vm0, %v4610_v55  ;;  %v4529_v6 = vadd.f32 %v13852_v30, %v4481_v11  ;;  %v4482_v32 = vadd.f32 %v4348_v12, %v13712_v13  ;;  %v10989_v45 = vpop.f32.mrb[131].mxu1  ;;  %v4794_v62 = vpack.c.bf16 %v4758_v19, %v4757_v56  ;;  %11317 = vmatpush3.bf16.msra.mxu1 %v12019_v15 }
 0x49b   : > { %v4728_v10 = vpack.c.bf16 %v4692_v40, %v4691_v35  ;;  %v15979_v25 = vld [vmem:[#allocation19_spill] sm:$0xff]  ;;  %11490 = vmatprep.subr.bf16.mxu1 %v15937_v43 }
 0x49c   : > { %v4570_v48 = vmax.f32 %v4529_v6, 0.0  ;;  %v4530_v29 = vadd.f32 %v13852_v30, %v4482_v32  ;;  %11071 = vmatmul.mubr.msk.bf16.gmra.mrb[152].mxu0 %vm373_vm0, %v4794_v62 }
 0x49d   : > { %11159 = vmatmul.mubr.msk.bf16.gmra.mrb[208].mxu1 %vm373_vm0, %v4728_v10  ;;  %11074 = vmatprep.mubr.msk.bf16.mxu0 %vm12096_vm1, %v15937_v43 }
 0x49e   : > { %v4611_v13 = vmul.f32 %v4570_v48, %v15978_v58  ;;  %v4571_v8 = vmax.f32 %v4530_v29, 0.0  ;;  %11162 = vmatprep.mubr.msk.bf16.mxu1 %vm12096_vm1, %v15937_v43  ;;  %v15980_v29 = vld [vmem:[#allocation20_spill] sm:$0xff] }
 0x49f   : > { %v4353_v1 = vpop.f32.mrb[132].mxu1  ;;  %v4759_v56 = vld [vmem:[#allocation3 + $0x56] sm:$0xff] }
 0x4a0   : > { %4652 = vst.msk [vmem:[#allocation3 + $0x68] sm:$0xff] %vm373_vm0, %v4611_v13  ;;  %v4612_v55 = vmul.f32 %v4571_v8, %v15979_v25  ;;  %v4483_v11 = vadd.f32 %v4353_v1, %v13718_v14  ;;  %v10992_v41 = vpop.f32.mrb[133].mxu1  ;;  %v4693_v35 = vld [vmem:[#allocation3 + $0x55] sm:$0xff] }
 0x4a1   : > { %v4356_v12 = vpop.f32.mrb[134].mxu1  ;;  %v4760_v19 = vld [vmem:[#allocation3 + $0x5e] sm:$0xff] }
 0x4a2   : > { %v4694_v40 = vld [vmem:[#allocation3 + $0x5d] sm:$0xff]  ;;  %4653 = vst.msk [vmem:[#allocation3 + $0x70] sm:$0xff] %vm373_vm0, %v4612_v55  ;;  %v4531_v6 = vadd.f32 %v13852_v30, %v4483_v11  ;;  %v4484_v32 = vadd.f32 %v4356_v12, %v13721_v9  ;;  %v10993_v45 = vpop.f32.mrb[135].mxu1  ;;  %v4795_v62 = vpack.c.bf16 %v4760_v19, %v4759_v56 }
 0x4a3   : > { %v4729_v10 = vpack.c.bf16 %v4694_v40, %v4693_v35  ;;  %v15981_v13 = vld [vmem:[#allocation21_spill] sm:$0xff] }
 0x4a4   : > { %v4572_v14 = vmax.f32 %v4531_v6, 0.0  ;;  %v4532_v48 = vadd.f32 %v13852_v30, %v4484_v32  ;;  %11075 = vmatmul.mubr.msk.bf16.gmra.mrb[156].mxu0 %vm373_vm0, %v4795_v62 }
 0x4a5   : > { %11163 = vmatmul.mubr.msk.bf16.gmra.mrb[212].mxu1 %vm373_vm0, %v4729_v10  ;;  %11078 = vmatprep.mubr.msk.bf16.mxu0 %vm12096_vm1, %v15937_v43 }
 0x4a6   : > { %v4613_v27 = vmul.f32 %v4572_v14, %v15980_v29  ;;  %v4573_v20 = vmax.f32 %v4532_v48, 0.0  ;;  %11166 = vmatprep.mubr.msk.bf16.mxu1 %vm12096_vm1, %v15937_v43  ;;  %v15983_v48 = vld [vmem:[#allocation23_spill] sm:$0xff] }
 0x4a7   : > { %v4361_v9 = vpop.f32.mrb[136].mxu1  ;;  %v4761_v55 = vld [vmem:[#allocation3 + $0x66] sm:$0xff] }
 0x4a8   : > { %4654 = vst.msk [vmem:[#allocation3 + $0x78] sm:$0xff] %vm373_vm0, %v4613_v27  ;;  %v4614_v8 = vmul.f32 %v4573_v20, %v15981_v13  ;;  %v4485_v1 = vadd.f32 %v4361_v9, %v13727_v50  ;;  %v10996_v15 = vpop.f32.mrb[137].mxu1  ;;  %v4695_v56 = vld [vmem:[#allocation3 + $0x65] sm:$0xff] }
 0x4a9   : > { %v4364_v11 = vpop.f32.mrb[138].mxu1  ;;  %v4762_v41 = vld [vmem:[#allocation3 + $0x6e] sm:$0xff]  ;;  %v15982_v50 = vld [vmem:[#allocation22_spill] sm:$0xff] }
 0x4aa   : > { %v4696_v12 = vld [vmem:[#allocation3 + $0x6d] sm:$0xff]  ;;  %4655 = vst.msk [vmem:[#allocation3 + $0x80] sm:$0xff] %vm373_vm0, %v4614_v8  ;;  %v4533_v19 = vadd.f32 %v13852_v30, %v4485_v1  ;;  %v4486_v35 = vadd.f32 %v4364_v11, %v13736_v59  ;;  %v10997_v40 = vpop.f32.mrb[139].mxu1  ;;  %v4796_v6 = vpack.c.bf16 %v4762_v41, %v4761_v55 }
 0x4ab   : > { %v4730_v32 = vpack.c.bf16 %v4696_v12, %v4695_v56 }
 0x4ac   : > { %v4574_v45 = vmax.f32 %v4533_v19, 0.0  ;;  %v4534_v62 = vadd.f32 %v13852_v30, %v4486_v35  ;;  %11079 = vmatmul.mubr.msk.bf16.gmra.mrb[160].mxu0 %vm373_vm0, %v4796_v6 }
 0x4ad   : > { %11167 = vmatmul.mubr.msk.bf16.gmra.mrb[216].mxu1 %vm373_vm0, %v4730_v32  ;;  %11082 = vmatprep.mubr.msk.bf16.mxu0 %vm12096_vm1, %v15937_v43 }
 0x4ae   : > { %v4615_v10 = vmul.f32 %v4574_v45, %v15982_v50  ;;  %v4575_v14 = vmax.f32 %v4534_v62, 0.0  ;;  %11170 = vmatprep.mubr.msk.bf16.mxu1 %vm12096_vm1, %v15937_v43  ;;  %v15985_v62 = vld [vmem:[#allocation25_spill] sm:$0xff] }
 0x4af   : > { %v4369_v59 = vpop.f32.mrb[140].mxu1  ;;  %v4763_v8 = vld [vmem:[#allocation3 + $0x76] sm:$0xff] }
 0x4b0   : > { %4656 = vst.msk [vmem:[#allocation3 + $0x88] sm:$0xff] %vm373_vm0, %v4615_v10  ;;  %v4616_v27 = vmul.f32 %v4575_v14, %v15983_v48  ;;  %v4487_v20 = vadd.f32 %v4369_v59, %v13747_v7  ;;  %v11000_v9 = vpop.f32.mrb[141].mxu1  ;;  %v4697_v55 = vld [vmem:[#allocation3 + $0x75] sm:$0xff] }
 0x4b1   : > { %v4372_v1 = vpop.f32.mrb[142].mxu1  ;;  %v4764_v15 = vld [vmem:[#allocation3 + $0x7e] sm:$0xff]  ;;  %v15984_v7 = vld [vmem:[#allocation24_spill] sm:$0xff] }
 0x4b2   : > { %v4698_v11 = vld [vmem:[#allocation3 + $0x7d] sm:$0xff]  ;;  %4657 = vst.msk [vmem:[#allocation3 + $0x90] sm:$0xff] %vm373_vm0, %v4616_v27  ;;  %v4535_v41 = vadd.f32 %v13852_v30, %v4487_v20  ;;  %v4488_v56 = vadd.f32 %v4372_v1, %v13751_v24  ;;  %v11001_v12 = vpop.f32.mrb[143].mxu1  ;;  %v4797_v19 = vpack.c.bf16 %v4764_v15, %v4763_v8 }
 0x4b3   : > { %v4731_v35 = vpack.c.bf16 %v4698_v11, %v4697_v55 }
 0x4b4   : > { %v4576_v40 = vmax.f32 %v4535_v41, 0.0  ;;  %v4536_v6 = vadd.f32 %v13852_v30, %v4488_v56  ;;  %11083 = vmatmul.mubr.msk.bf16.gmra.mrb[164].mxu0 %vm373_vm0, %v4797_v19 }
 0x4b5   : > { %11171 = vmatmul.mubr.msk.bf16.gmra.mrb[220].mxu1 %vm373_vm0, %v4731_v35  ;;  %11086 = vmatprep.mubr.msk.bf16.mxu0 %vm12096_vm1, %v15937_v43 }
 0x4b6   : > { %v4617_v32 = vmul.f32 %v4576_v40, %v15984_v7  ;;  %v4577_v45 = vmax.f32 %v4536_v6, 0.0  ;;  %11174 = vmatprep.mubr.msk.bf16.mxu1 %vm12096_vm1, %v15937_v43  ;;  %v15987_v6 = vld [vmem:[#allocation27_spill] sm:$0xff] }
 0x4b7   : > { %v4377_v24 = vpop.f32.mrb[144].mxu1  ;;  %v4765_v27 = vld [vmem:[#allocation3 + $0x86] sm:$0xff] }
 0x4b8   : > { %4658 = vst.msk [vmem:[#allocation3 + $0x98] sm:$0xff] %vm373_vm0, %v4617_v32  ;;  %v4618_v10 = vmul.f32 %v4577_v45, %v15985_v62  ;;  %v4489_v14 = vadd.f32 %v4377_v24, %v13760_v33  ;;  %v11004_v59 = vpop.f32.mrb[145].mxu1  ;;  %v4699_v8 = vld [vmem:[#allocation3 + $0x85] sm:$0xff] }
 0x4b9   : > { %v4380_v20 = vpop.f32.mrb[146].mxu1  ;;  %v4766_v9 = vld [vmem:[#allocation3 + $0x8e] sm:$0xff]  ;;  %v15986_v33 = vld [vmem:[#allocation26_spill] sm:$0xff] }
 0x4ba   : > { %v4700_v1 = vld [vmem:[#allocation3 + $0x8d] sm:$0xff]  ;;  %4659 = vst.msk [vmem:[#allocation3 + $0xa0] sm:$0xff] %vm373_vm0, %v4618_v10  ;;  %v4537_v15 = vadd.f32 %v13852_v30, %v4489_v14  ;;  %v4490_v55 = vadd.f32 %v4380_v20, %v13763_v18  ;;  %v11005_v11 = vpop.f32.mrb[147].mxu1  ;;  %v4798_v41 = vpack.c.bf16 %v4766_v9, %v4765_v27 }
 0x4bb   : > { %v4732_v56 = vpack.c.bf16 %v4700_v1, %v4699_v8  ;;  %v12024_v7 = vld [vmem:[%s15804_s6 + $0x60] sm:$0xff]  }
 0x4bc   : > { %v4578_v12 = vmax.f32 %v4537_v15, 0.0  ;;  %v4538_v19 = vadd.f32 %v13852_v30, %v4490_v55  ;;  %11087 = vmatmul.mubr.msk.bf16.gmra.mrb[168].mxu0 %vm373_vm0, %v4798_v41 }
 0x4bd   : > { %11175 = vmatmul.mubr.msk.bf16.gmra.mrb[224].mxu1 %vm373_vm0, %v4732_v56  ;;  %11090 = vmatprep.mubr.msk.bf16.mxu0 %vm12096_vm1, %v15937_v43 }
 0x4be   : > { %v4619_v35 = vmul.f32 %v4578_v12, %v15986_v33  ;;  %v4579_v40 = vmax.f32 %v4538_v19, 0.0  ;;  %11178 = vmatprep.mubr.msk.bf16.mxu1 %vm12096_vm1, %v15937_v43  ;;  %v15989_v19 = vld [vmem:[#allocation29_spill] sm:$0xff] }
 0x4bf   : > { %v4385_v18 = vpop.f32.mrb[148].mxu1  ;;  %v4767_v10 = vld [vmem:[#allocation3 + $0x96] sm:$0xff] }
 0x4c0   : > { %4660 = vst.msk [vmem:[#allocation3 + $0xa8] sm:$0xff] %vm373_vm0, %v4619_v35  ;;  %v4620_v32 = vmul.f32 %v4579_v40, %v15987_v6  ;;  %v4491_v45 = vadd.f32 %v4385_v18, %v13769_v51  ;;  %v11008_v24 = vpop.f32.mrb[149].mxu1  ;;  %v4701_v27 = vld [vmem:[#allocation3 + $0x95] sm:$0xff] }
 0x4c1   : > { %v4388_v14 = vpop.f32.mrb[150].mxu1  ;;  %v4768_v59 = vld [vmem:[#allocation3 + $0x9e] sm:$0xff]  ;;  %v15988_v51 = vld [vmem:[#allocation28_spill] sm:$0xff] }
 0x4c2   : > { %v4702_v20 = vld [vmem:[#allocation3 + $0x9d] sm:$0xff]  ;;  %4661 = vst.msk [vmem:[#allocation3 + $0xb0] sm:$0xff] %vm373_vm0, %v4620_v32  ;;  %v4539_v9 = vadd.f32 %v13852_v30, %v4491_v45  ;;  %v4492_v8 = vadd.f32 %v4388_v14, %v13772_v38  ;;  %v11009_v1 = vpop.f32.mrb[151].mxu1  ;;  %v4799_v15 = vpack.c.bf16 %v4768_v59, %v4767_v10 }
 0x4c3   : > { %v4733_v55 = vpack.c.bf16 %v4702_v20, %v4701_v27 }
 0x4c4   : > { %v4580_v11 = vmax.f32 %v4539_v9, 0.0  ;;  %v4540_v41 = vadd.f32 %v13852_v30, %v4492_v8  ;;  %11091 = vmatmul.mubr.msk.bf16.gmra.mrb[172].mxu0 %vm373_vm0, %v4799_v15 }
 0x4c5   : > { %11179 = vmatmul.mubr.msk.bf16.gmra.mrb[228].mxu1 %vm373_vm0, %v4733_v55  ;;  %11094 = vmatprep.mubr.msk.bf16.mxu0 %vm12096_vm1, %v15937_v43 }
 0x4c6   : > { %v4621_v56 = vmul.f32 %v4580_v11, %v15988_v51  ;;  %v4581_v12 = vmax.f32 %v4540_v41, 0.0  ;;  %11182 = vmatprep.mubr.msk.bf16.mxu1 %vm12096_vm1, %v15937_v43  ;;  %v15991_v41 = vld [vmem:[#allocation31_spill] sm:$0xff] }
 0x4c7   : > { %v4393_v38 = vpop.f32.mrb[152].mxu1  ;;  %v4769_v32 = vld [vmem:[#allocation3 + $0xa6] sm:$0xff] }
 0x4c8   : > { %4662 = vst.msk [vmem:[#allocation3 + $0xb8] sm:$0xff] %vm373_vm0, %v4621_v56  ;;  %v4622_v35 = vmul.f32 %v4581_v12, %v15989_v19  ;;  %v4493_v40 = vadd.f32 %v4393_v38, %v13778_v63  ;;  %v11012_v18 = vpop.f32.mrb[153].mxu1  ;;  %v4703_v10 = vld [vmem:[#allocation3 + $0xa5] sm:$0xff] }
 0x4c9   : > { %v4396_v45 = vpop.f32.mrb[154].mxu1  ;;  %v4770_v24 = vld [vmem:[#allocation3 + $0xae] sm:$0xff]  ;;  %v15990_v63 = vld [vmem:[#allocation30_spill] sm:$0xff] }
 0x4ca   : > { %v4704_v14 = vld [vmem:[#allocation3 + $0xad] sm:$0xff]  ;;  %4663 = vst.msk [vmem:[#allocation3 + $0xc0] sm:$0xff] %vm373_vm0, %v4622_v35  ;;  %v4541_v59 = vadd.f32 %v13852_v30, %v4493_v40  ;;  %v4494_v27 = vadd.f32 %v4396_v45, %v13781_v31  ;;  %v11013_v20 = vpop.f32.mrb[155].mxu1  ;;  %v4800_v9 = vpack.c.bf16 %v4770_v24, %v4769_v32 }
 0x4cb   : > { %v4734_v8 = vpack.c.bf16 %v4704_v14, %v4703_v10 }
 0x4cc   : > { %v4582_v1 = vmax.f32 %v4541_v59, 0.0  ;;  %v4542_v15 = vadd.f32 %v13852_v30, %v4494_v27  ;;  %11095 = vmatmul.mubr.msk.bf16.gmra.mrb[176].mxu0 %vm373_vm0, %v4800_v9 }
 0x4cd   : > { %11183 = vmatmul.mubr.msk.bf16.gmra.mrb[232].mxu1 %vm373_vm0, %v4734_v8  ;;  %11098 = vmatprep.mubr.msk.bf16.mxu0 %vm12096_vm1, %v15937_v43 }
 0x4ce   : > { %v4623_v55 = vmul.f32 %v4582_v1, %v15990_v63  ;;  %v4583_v11 = vmax.f32 %v4542_v15, 0.0  ;;  %11186 = vmatprep.mubr.msk.bf16.mxu1 %vm12096_vm1, %v15937_v43  ;;  %v15993_v15 = vld [vmem:[#allocation33_spill] sm:$0xff] }
 0x4cf   : > { %v4401_v31 = vpop.f32.mrb[156].mxu1  ;;  %v4771_v35 = vld [vmem:[#allocation3 + $0xb6] sm:$0xff] }
 0x4d0   : > { %4664 = vst.msk [vmem:[#allocation3 + $0xc8] sm:$0xff] %vm373_vm0, %v4623_v55  ;;  %v4624_v56 = vmul.f32 %v4583_v11, %v15991_v41  ;;  %v4495_v12 = vadd.f32 %v4401_v31, %v13787_v54  ;;  %v11016_v38 = vpop.f32.mrb[157].mxu1  ;;  %v4705_v32 = vld [vmem:[#allocation3 + $0xb5] sm:$0xff] }
 0x4d1   : > { %v4404_v40 = vpop.f32.mrb[158].mxu1  ;;  %v4772_v18 = vld [vmem:[#allocation3 + $0xbe] sm:$0xff]  ;;  %v15992_v54 = vld [vmem:[#allocation32_spill] sm:$0xff] }
 0x4d2   : > { %v4706_v45 = vld [vmem:[#allocation3 + $0xbd] sm:$0xff]  ;;  %4665 = vst.msk [vmem:[#allocation3 + $0xd0] sm:$0xff] %vm373_vm0, %v4624_v56  ;;  %v4543_v24 = vadd.f32 %v13852_v30, %v4495_v12  ;;  %v4496_v10 = vadd.f32 %v4404_v40, %v13790_v39  ;;  %v11017_v14 = vpop.f32.mrb[159].mxu1  ;;  %v4801_v59 = vpack.c.bf16 %v4772_v18, %v4771_v35 }
 0x4d3   : > { %v4735_v27 = vpack.c.bf16 %v4706_v45, %v4705_v32 }
 0x4d4   : > { %v4584_v20 = vmax.f32 %v4543_v24, 0.0  ;;  %v4544_v9 = vadd.f32 %v13852_v30, %v4496_v10  ;;  %11099 = vmatmul.mubr.msk.bf16.gmra.mrb[180].mxu0 %vm373_vm0, %v4801_v59 }
 0x4d5   : > { %11187 = vmatmul.mubr.msk.bf16.gmra.mrb[236].mxu1 %vm373_vm0, %v4735_v27  ;;  %11102 = vmatprep.mubr.msk.bf16.mxu0 %vm12096_vm1, %v15937_v43 }
 0x4d6   : > { %v4625_v8 = vmul.f32 %v4584_v20, %v15992_v54  ;;  %v4585_v1 = vmax.f32 %v4544_v9, 0.0  ;;  %11190 = vmatprep.mubr.msk.bf16.mxu1 %vm12096_vm1, %v15937_v43 }
 0x4d7   : > { %v4409_v39 = vpop.f32.mrb[160].mxu1  ;;  %v4773_v56 = vld [vmem:[#allocation3 + $0xc6] sm:$0xff] }
 0x4d8   : > { %4666 = vst.msk [vmem:[#allocation3 + $0xd8] sm:$0xff] %vm373_vm0, %v4625_v8  ;;  %v4626_v55 = vmul.f32 %v4585_v1, %v15993_v15  ;;  %v4497_v11 = vadd.f32 %v4409_v39, %v13796_v44  ;;  %v11020_v31 = vpop.f32.mrb[161].mxu1  ;;  %v4707_v35 = vld [vmem:[#allocation3 + $0xc5] sm:$0xff] }
 0x4d9   : > { %v4412_v12 = vpop.f32.mrb[162].mxu1  ;;  %v4774_v38 = vld [vmem:[#allocation3 + $0xce] sm:$0xff]  ;;  %v15994_v44 = vld [vmem:[#allocation34_spill] sm:$0xff] }
 0x4da   : > { %v4708_v40 = vld [vmem:[#allocation3 + $0xcd] sm:$0xff]  ;;  %4667 = vst.msk [vmem:[#allocation3 + $0xe0] sm:$0xff] %vm373_vm0, %v4626_v55  ;;  %v4545_v18 = vadd.f32 %v13852_v30, %v4497_v11  ;;  %v4498_v32 = vadd.f32 %v4412_v12, %v13799_v2  ;;  %v11021_v45 = vpop.f32.mrb[163].mxu1  ;;  %v4802_v24 = vpack.c.bf16 %v4774_v38, %v4773_v56 }
 0x4db   : > { %v4736_v10 = vpack.c.bf16 %v4708_v40, %v4707_v35  ;;  %v15995_v8 = vld [vmem:[#allocation35_spill] sm:$0xff] }
 0x4dc   : > { %v4586_v14 = vmax.f32 %v4545_v18, 0.0  ;;  %v4546_v59 = vadd.f32 %v13852_v30, %v4498_v32  ;;  %11103 = vmatmul.mubr.msk.bf16.gmra.mrb[184].mxu0 %vm373_vm0, %v4802_v24 }
 0x4dd   : > { %11191 = vmatmul.mubr.msk.bf16.gmra.mrb[240].mxu1 %vm373_vm0, %v4736_v10  ;;  %11106 = vmatprep.mubr.msk.bf16.mxu0 %vm12096_vm1, %v15937_v43  ;;  %v14051_v9 = vpop.f32.mrb[136].mxu0 }
 0x4de   : > { %v4627_v27 = vmul.f32 %v4586_v14, %v15994_v44  ;;  %v4587_v20 = vmax.f32 %v4546_v59, 0.0  ;;  %11194 = vmatprep.mubr.msk.bf16.mxu1 %vm12096_vm1, %v15937_v43  ;;  %v11056_v31 = vpop.f32.mrb[137].mxu0 }
 0x4df   : > { %v4417_v2 = vpop.f32.mrb[164].mxu1  ;;  %v4775_v11 = vld [vmem:[#allocation3 + $0xd6] sm:$0xff]  ;;  %v14056_v40 = vpop.f32.mrb[138].mxu0 }
 0x4e0   : > { %4668 = vst.msk [vmem:[#allocation3 + $0xe8] sm:$0xff] %vm373_vm0, %v4627_v27  ;;  %v4628_v1 = vmul.f32 %v4587_v20, %v15995_v8  ;;  %v4499_v39 = vadd.f32 %v4417_v2, %v13805_v53  ;;  %v11024_v55 = vpop.f32.mrb[165].mxu1  ;;  %v4709_v38 = vld [vmem:[#allocation3 + $0xd5] sm:$0xff]  ;;  %v11057_v14 = vpop.f32.mrb[139].mxu0 }
 0x4e1   : > { %v4420_v56 = vpop.f32.mrb[166].mxu1  ;;  %v4776_v12 = vld [vmem:[#allocation3 + $0xde] sm:$0xff]  ;;  %v15996_v27 = vld [vmem:[#allocation36_spill] sm:$0xff] }
 0x4e2   : > { %v4710_v35 = vld [vmem:[#allocation3 + $0xdd] sm:$0xff]  ;;  %4669 = vst.msk [vmem:[#allocation3 + $0xf0] sm:$0xff] %vm373_vm0, %v4628_v1  ;;  %v4547_v18 = vadd.f32 %v13852_v30, %v4499_v39  ;;  %v4500_v32 = vadd.f32 %v4420_v56, %v13808_v26  ;;  %v11025_v45 = vpop.f32.mrb[167].mxu1  ;;  %v4803_v24 = vpack.c.bf16 %v4776_v12, %v4775_v11 }
 0x4e3   : > { %v4737_v10 = vpack.c.bf16 %v4710_v35, %v4709_v38  ;;  %v15997_v1 = vld [vmem:[#allocation37_spill] sm:$0xff] }
 0x4e4   : > { %v4588_v53 = vmax.f32 %v4547_v18, 0.0  ;;  %v4548_v59 = vadd.f32 %v13852_v30, %v4500_v32  ;;  %11107 = vmatmul.mubr.msk.bf16.gmra.mrb[188].mxu0 %vm373_vm0, %v4803_v24 }
 0x4e5   : > { %11195 = vmatmul.mubr.msk.bf16.gmra.mrb[244].mxu1 %vm373_vm0, %v4737_v10  ;;  %11110 = vmatprep.mubr.msk.bf16.mxu0 %vm12096_vm1, %v15937_v43 }
 0x4e6   : > { %v4629_v20 = vmul.f32 %v4588_v53, %v15996_v27  ;;  %v4589_v2 = vmax.f32 %v4548_v59, 0.0  ;;  %11198 = vmatprep.mubr.msk.bf16.mxu1 %vm12096_vm1, %v15937_v43 }
 0x4e7   : > { %v4425_v26 = vpop.f32.mrb[168].mxu1  ;;  %v4777_v31 = vld [vmem:[#allocation3 + $0xe6] sm:$0xff] }
 0x4e8   : > { %4670 = vst.msk [vmem:[#allocation3 + $0xf8] sm:$0xff] %vm373_vm0, %v4629_v20  ;;  %v4630_v39 = vmul.f32 %v4589_v2, %v15997_v1  ;;  %v4501_v55 = vadd.f32 %v4425_v26, %v13814_v34  ;;  %v11028_v11 = vpop.f32.mrb[169].mxu1  ;;  %v4711_v38 = vld [vmem:[#allocation3 + $0xe5] sm:$0xff] }
 0x4e9   : > { %v4428_v56 = vpop.f32.mrb[170].mxu1  ;;  %v4778_v12 = vld [vmem:[#allocation3 + $0xee] sm:$0xff]  ;;  %v15998_v34 = vld [vmem:[#allocation38_spill] sm:$0xff] }
 0x4ea   : > { %v4712_v35 = vld [vmem:[#allocation3 + $0xed] sm:$0xff]  ;;  %4671 = vst.msk [vmem:[#allocation3 + $0x100] sm:$0xff] %vm373_vm0, %v4630_v39  ;;  %v4549_v18 = vadd.f32 %v13852_v30, %v4501_v55  ;;  %v4502_v32 = vadd.f32 %v4428_v56, %v13817_v22  ;;  %v11029_v45 = vpop.f32.mrb[171].mxu1  ;;  %v4804_v24 = vpack.c.bf16 %v4778_v12, %v4777_v31 }
 0x4eb   : > { %v4738_v10 = vpack.c.bf16 %v4712_v35, %v4711_v38  ;;  %v15999_v2 = vld [vmem:[#allocation39_spill] sm:$0xff] }
 0x4ec   : > { %v4590_v14 = vmax.f32 %v4549_v18, 0.0  ;;  %v4550_v53 = vadd.f32 %v13852_v30, %v4502_v32  ;;  %11111 = vmatmul.mubr.msk.bf16.gmra.mrb[192].mxu0 %vm373_vm0, %v4804_v24 }
 0x4ed   : > { %11199 = vmatmul.mubr.msk.bf16.gmra.mrb[248].mxu1 %vm373_vm0, %v4738_v10  ;;  %11114 = vmatprep.mubr.msk.bf16.mxu0 %vm12096_vm1, %v15937_v43 }
 0x4ee   : > { %v4631_v59 = vmul.f32 %v4590_v14, %v15998_v34  ;;  %v4591_v20 = vmax.f32 %v4550_v53, 0.0  ;;  %11202 = vmatprep.mubr.msk.bf16.mxu1 %vm12096_vm1, %v15937_v43 }
 0x4ef   : > { %v4433_v22 = vpop.f32.mrb[172].mxu1  ;;  %v4779_v11 = vld [vmem:[#allocation3 + $0xf6] sm:$0xff] }
 0x4f0   : > { %4672 = vst.msk [vmem:[#allocation3 + $0x108] sm:$0xff] %vm373_vm0, %v4631_v59  ;;  %v4632_v26 = vmul.f32 %v4591_v20, %v15999_v2  ;;  %v4503_v39 = vadd.f32 %v4433_v22, %v13823_v42  ;;  %v11032_v55 = vpop.f32.mrb[173].mxu1  ;;  %v4713_v12 = vld [vmem:[#allocation3 + $0xf5] sm:$0xff] }
 0x4f1   : > { %v4436_v31 = vpop.f32.mrb[174].mxu1  ;;  %v4780_v56 = vld [vmem:[#allocation3 + $0xfe] sm:$0xff]  ;;  %v16000_v42 = vld [vmem:[#allocation40_spill] sm:$0xff] }
 0x4f2   : > { %v4714_v38 = vld [vmem:[#allocation3 + $0xfd] sm:$0xff]  ;;  %4673 = vst.msk [vmem:[#allocation3 + $0x110] sm:$0xff] %vm373_vm0, %v4632_v26  ;;  %v4551_v35 = vadd.f32 %v13852_v30, %v4503_v39  ;;  %v4504_v18 = vadd.f32 %v4436_v31, %v13826_v49  ;;  %v11033_v32 = vpop.f32.mrb[175].mxu1  ;;  %v4805_v45 = vpack.c.bf16 %v4780_v56, %v4779_v11 }
 0x4f3   : > { %v4739_v24 = vpack.c.bf16 %v4714_v38, %v4713_v12  ;;  %v16001_v20 = vld [vmem:[#allocation41_spill] sm:$0xff] }
 0x4f4   : > { %v4592_v10 = vmax.f32 %v4551_v35, 0.0  ;;  %v4552_v14 = vadd.f32 %v13852_v30, %v4504_v18  ;;  %11115 = vmatmul.mubr.msk.bf16.gmra.mrb[196].mxu0 %vm373_vm0, %v4805_v45 }
 0x4f5   : > { %11203 = vmatmul.mubr.msk.bf16.gmra.mrb[252].mxu1 %vm373_vm0, %v4739_v24  ;;  %11118 = vmatprep.mubr.msk.bf16.mxu0 %vm12096_vm1, %v15937_v43 }
 0x4f6   : > { %v4633_v53 = vmul.f32 %v4592_v10, %v16000_v42  ;;  %v4593_v59 = vmax.f32 %v4552_v14, 0.0  ;;  %11206 = vmatprep.mubr.msk.bf16.mxu1 %vm12096_vm1, %v15937_v43 }
 0x4f7   : > { %v4441_v49 = vpop.f32.mrb[176].mxu1  ;;  %v4781_v55 = vld [vmem:[#allocation3 + $0x106] sm:$0xff] }
 0x4f8   : > { %4674 = vst.msk [vmem:[#allocation3 + $0x118] sm:$0xff] %vm373_vm0, %v4633_v53  ;;  %v4634_v22 = vmul.f32 %v4593_v59, %v16001_v20  ;;  %v4505_v26 = vadd.f32 %v4441_v49, %v13829_v3  ;;  %v11036_v39 = vpop.f32.mrb[177].mxu1  ;;  %v4715_v56 = vld [vmem:[#allocation3 + $0x105] sm:$0xff] }
 0x4f9   : > { %v4444_v11 = vpop.f32.mrb[178].mxu1  ;;  %v4782_v31 = vld [vmem:[#allocation3 + $0x10e] sm:$0xff]  ;;  %v16002_v3 = vld [vmem:[#allocation42_spill] sm:$0xff] }
 0x4fa   : > { %v4716_v12 = vld [vmem:[#allocation3 + $0x10d] sm:$0xff]  ;;  %4675 = vst.msk [vmem:[#allocation3 + $0x120] sm:$0xff] %vm373_vm0, %v4634_v22  ;;  %v4553_v38 = vadd.f32 %v13852_v30, %v4505_v26  ;;  %v4506_v35 = vadd.f32 %v4444_v11, %v13832_v23  ;;  %v11037_v18 = vpop.f32.mrb[179].mxu1  ;;  %v4806_v32 = vpack.c.bf16 %v4782_v31, %v4781_v55 }
 0x4fb   : > { %v4740_v45 = vpack.c.bf16 %v4716_v12, %v4715_v56  ;;  %v16003_v59 = vld [vmem:[#allocation43_spill] sm:$0xff] }
 0x4fc   : > { %v4594_v24 = vmax.f32 %v4553_v38, 0.0  ;;  %v4554_v10 = vadd.f32 %v13852_v30, %v4506_v35  ;;  %11119 = vmatmul.mubr.msk.bf16.gmra.mrb[200].mxu0 %vm373_vm0, %v4806_v32 }
 0x4fd   : > { %11207 = vmatmul.mubr.msk.bf16.gmra.mrb[0].mxu1 %vm373_vm0, %v4740_v45  ;;  %11122 = vmatprep.mubr.msk.bf16.mxu0 %vm12096_vm1, %v15937_v43 }
 0x4fe   : > { %v4635_v14 = vmul.f32 %v4594_v24, %v16002_v3  ;;  %v4595_v53 = vmax.f32 %v4554_v10, 0.0  ;;  %11210 = vmatprep.mubr.msk.bf16.mxu1 %vm12096_vm1, %v15937_v43 }
 0x4ff   : > { %v4449_v23 = vpop.f32.mrb[180].mxu1  ;;  %v4783_v39 = vld [vmem:[#allocation3 + $0x116] sm:$0xff] }
 0x500   : > { %4676 = vst.msk [vmem:[#allocation3 + $0x128] sm:$0xff] %vm373_vm0, %v4635_v14  ;;  %v4636_v49 = vmul.f32 %v4595_v53, %v16003_v59  ;;  %v4507_v22 = vadd.f32 %v4449_v23, %v13835_v47  ;;  %v11040_v26 = vpop.f32.mrb[181].mxu1  ;;  %v4717_v31 = vld [vmem:[#allocation3 + $0x115] sm:$0xff] }
 0x501   : > { %v4452_v55 = vpop.f32.mrb[182].mxu1  ;;  %v4784_v11 = vld [vmem:[#allocation3 + $0x11e] sm:$0xff]  ;;  %v16004_v47 = vld [vmem:[#allocation44_spill] sm:$0xff] }
 0x502   : > { %v4718_v56 = vld [vmem:[#allocation3 + $0x11d] sm:$0xff]  ;;  %4677 = vst.msk [vmem:[#allocation3 + $0x130] sm:$0xff] %vm373_vm0, %v4636_v49  ;;  %v4555_v12 = vadd.f32 %v13852_v30, %v4507_v22  ;;  %v4508_v38 = vadd.f32 %v4452_v55, %v13838_v52  ;;  %v11041_v35 = vpop.f32.mrb[183].mxu1  ;;  %v4807_v18 = vpack.c.bf16 %v4784_v11, %v4783_v39 }
 0x503   : > { %v4741_v32 = vpack.c.bf16 %v4718_v56, %v4717_v31  ;;  %v16005_v53 = vld [vmem:[#allocation45_spill] sm:$0xff] }
 0x504   : > { %v4596_v45 = vmax.f32 %v4555_v12, 0.0  ;;  %v4556_v24 = vadd.f32 %v13852_v30, %v4508_v38  ;;  %11123 = vmatmul.mubr.msk.bf16.gmra.mrb[204].mxu0 %vm373_vm0, %v4807_v18 }
 0x505   : > { %11211 = vmatmul.mubr.msk.bf16.gmra.mrb[4].mxu1 %vm373_vm0, %v4741_v32  ;;  %11126 = vmatprep.mubr.msk.bf16.mxu0 %vm12096_vm1, %v15937_v43 }
 0x506   : > { %v4637_v10 = vmul.f32 %v4596_v45, %v16004_v47  ;;  %v4597_v14 = vmax.f32 %v4556_v24, 0.0  ;;  %11214 = vmatprep.mubr.msk.bf16.mxu1 %vm12096_vm1, %v15937_v43 }
 0x507   : > { %v4457_v52 = vpop.f32.mrb[184].mxu1  ;;  %v4785_v26 = vld [vmem:[#allocation3 + $0x126] sm:$0xff] }
 0x508   : > { %4678 = vst.msk [vmem:[#allocation3 + $0x138] sm:$0xff] %vm373_vm0, %v4637_v10  ;;  %v4638_v23 = vmul.f32 %v4597_v14, %v16005_v53  ;;  %v4509_v49 = vadd.f32 %v4457_v52, %v13841_v60  ;;  %v11044_v22 = vpop.f32.mrb[185].mxu1  ;;  %v4719_v11 = vld [vmem:[#allocation3 + $0x125] sm:$0xff] }
 0x509   : > { %v4460_v39 = vpop.f32.mrb[186].mxu1  ;;  %v4786_v55 = vld [vmem:[#allocation3 + $0x12e] sm:$0xff]  ;;  %v16006_v60 = vld [vmem:[#allocation46_spill] sm:$0xff] }
 0x50a   : > { %v4720_v31 = vld [vmem:[#allocation3 + $0x12d] sm:$0xff]  ;;  %4679 = vst.msk [vmem:[#allocation3 + $0x140] sm:$0xff] %vm373_vm0, %v4638_v23  ;;  %v4557_v56 = vadd.f32 %v13852_v30, %v4509_v49  ;;  %v4510_v12 = vadd.f32 %v4460_v39, %v13844_v28  ;;  %v11045_v38 = vpop.f32.mrb[187].mxu1  ;;  %v4808_v35 = vpack.c.bf16 %v4786_v55, %v4785_v26 }
 0x50b   : > { %v4742_v18 = vpack.c.bf16 %v4720_v31, %v4719_v11  ;;  %v16007_v14 = vld [vmem:[#allocation47_spill] sm:$0xff] }
 0x50c   : > { %v4598_v32 = vmax.f32 %v4557_v56, 0.0  ;;  %v4558_v45 = vadd.f32 %v13852_v30, %v4510_v12  ;;  %11127 = vmatmul.mubr.msk.bf16.gmra.mrb[208].mxu0 %vm373_vm0, %v4808_v35 }
 0x50d   : > { %11215 = vmatmul.mubr.msk.bf16.gmra.mrb[8].mxu1 %vm373_vm0, %v4742_v18  ;;  %11130 = vmatprep.mubr.msk.bf16.mxu0 %vm12096_vm1, %v15937_v43  ;;  %v16008_v18 = vld [vmem:[#allocation48_spill] sm:$0xff] }
 0x50e   : > { %v4639_v24 = vmul.f32 %v4598_v32, %v16006_v60  ;;  %v4599_v10 = vmax.f32 %v4558_v45, 0.0  ;;  %11218 = vmatprep.mubr.msk.bf16.mxu1 %vm12096_vm1, %v15937_v43 }
 0x50f   : > { %v4465_v28 = vpop.f32.mrb[188].mxu1  ;;  %v4787_v49 = vld [vmem:[#allocation3 + $0x136] sm:$0xff] }
 0x510   : > { %4680 = vst.msk [vmem:[#allocation3 + $0x148] sm:$0xff] %vm373_vm0, %v4639_v24  ;;  %v4640_v52 = vmul.f32 %v4599_v10, %v16007_v14  ;;  %v4511_v23 = vadd.f32 %v4465_v28, %v13847_v37  ;;  %v11048_v22 = vpop.f32.mrb[189].mxu1  ;;  %v4721_v39 = vld [vmem:[#allocation3 + $0x135] sm:$0xff] }
 0x511   : > { %v4788_v26 = vld [vmem:[#allocation3 + $0x13e] sm:$0xff]  ;;  %v4468_v11 = vpop.f32.mrb[190].mxu1 }
 0x512   : > { %v4722_v55 = vld [vmem:[#allocation3 + $0x13d] sm:$0xff]  ;;  %4681 = vst.msk [vmem:[#allocation3 + $0x150] sm:$0xff] %vm373_vm0, %v4640_v52  ;;  %v4559_v31 = vadd.f32 %v13852_v30, %v4511_v23  ;;  %v4809_v56 = vpack.c.bf16 %v4788_v26, %v4787_v49  ;;  %v11049_v38 = vpop.f32.mrb[191].mxu1  ;;  %v5366_v26 = vld [vmem:[#allocation3 + $0xf] sm:$0xff] }
 0x513   : > { %v4743_v12 = vpack.c.bf16 %v4722_v55, %v4721_v39  ;;  %v5748_v39 = vld [vmem:[#allocation3 + $0x1f] sm:$0xff]  ;;  %v5747_v11 = vld [vmem:[#allocation3 + $0x17] sm:$0xff] }
 0x514   : > { %v4600_v35 = vmax.f32 %v4559_v31, 0.0  ;;  %11131 = vmatmul.mubr.msk.bf16.gmra.mrb[212].mxu0 %vm373_vm0, %v4809_v56  ;;  %v12020_v31 = vld [vmem:[%s15804_s6 + $0x40] sm:$0xff]   ;;  %v5368_v56 = vld [vmem:[#allocation3 + $0x1f] sm:$0xff]  ;;  %v5367_v38 = vld [vmem:[#allocation3 + $0x17] sm:$0xff] }
 0x515   : > { %11219 = vmatmul.mubr.msk.bf16.gmra.mrb[12].mxu1 %vm373_vm0, %v4743_v12  ;;  %11134 = vmatprep.mubr.msk.bf16.mxu0 %vm12096_vm1, %v15937_v43  ;;  %v5750_v12 = vld [vmem:[#allocation3 + $0x2f] sm:$0xff] }
 0x516   : > { %v4641_v37 = vmul.f32 %v4600_v35, %v16008_v18  ;;  %11222 = vmatprep.mubr.msk.bf16.mxu1 %vm12096_vm1, %v15937_v43  ;;  %v5749_v35 = vld [vmem:[#allocation3 + $0x27] sm:$0xff] }
 0x517   : > { %v5199_v32 = vpop.f32.mrb[192].mxu1  ;;  %v4789_v30 = vld [vmem:[#allocation3 + $0x146] sm:$0xf] }
 0x518   : > { %4682 = vst.msk [vmem:[#allocation3 + $0x158] sm:$0xf] %vm380_vm2, %v4641_v37  ;;  %v4723_v45 = vld [vmem:[#allocation3 + $0x145] sm:$0xf]  ;;  %v14153_v24 = vadd.f32 %v5199_v32, %v14051_v9  ;;  %v11144_v10 = vpop.f32.mrb[193].mxu1  ;;  %v4810_v49 = vpack.c.bf16 %v4789_v30, %v4789_v30  ;;  %v5407_v37 = vpack.c.bf16 %v5368_v56, %v5367_v38  ;;  %v5789_v32 = vpack.c.bf16 %v5750_v12, %v5749_v35  ;;  %v5759_v38 = vld [vmem:[#allocation3 + $0x77] sm:$0xff] }
 0x519   : > { %v5202_v28 = vpop.f32.mrb[194].mxu1  ;;  %v4744_v22 = vpack.c.bf16 %v4723_v45, %v4723_v45  ;;  %v5365_v9 = vld [vmem:[#allocation3 + $0x7] sm:$0xff]  ;;  %v5752_v30 = vld [vmem:[#allocation3 + $0x3f] sm:$0xff]  ;;  %v5751_v45 = vld [vmem:[#allocation3 + $0x37] sm:$0xff] }
 0x51a   : > { %v14156_v52 = vadd.f32 %v5202_v28, %v14056_v40  ;;  %v11145_v23 = vpop.f32.mrb[195].mxu1  ;;  %v5406_v55 = vpack.c.bf16 %v5366_v26, %v5365_v9  ;;  %v5788_v40 = vpack.c.bf16 %v5748_v39, %v5747_v11  ;;  %v5790_v10 = vpack.c.bf16 %v5752_v30, %v5751_v45  ;;  %v5754_v28 = vld [vmem:[#allocation3 + $0x4f] sm:$0xff]  ;;  %v5755_v9 = vld [vmem:[#allocation3 + $0x57] sm:$0xff]  ;;  %v5757_v11 = vld [vmem:[#allocation3 + $0x67] sm:$0xff] }
 0x51b   : > { %v5753_v23 = vld [vmem:[#allocation3 + $0x47] sm:$0xff]  ;;  %v12021_v39 = vld [vmem:[%s15804_s6 + $0x50] sm:$0xff]   ;;  %v5762_v30 = vld [vmem:[#allocation3 + $0x8f] sm:$0xff] }
 0x51c   : > { %11135 = vmatmul.mubr.msk.bf16.gmra.mrb[216].mxu0 %vm373_vm0, %v4810_v49  ;;  %v5791_v49 = vpack.c.bf16 %v5754_v28, %v5753_v23  ;;  %v12023_v56 = vld [vmem:[%s15804_s6 + $0x58] sm:$0xff]  }
 0x51d   : > { %11223 = vmatmul.mubr.msk.bf16.gmra.mrb[16].mxu1 %vm373_vm0, %v4744_v22  ;;  %11230 = vmatprep.mubr.msk.bf16.mxu0 %vm12096_vm1, %v15937_v43  ;;  %v5756_v22 = vld [vmem:[#allocation3 + $0x5f] sm:$0xff] }
 0x51e   : > { %11318 = vmatprep.mubr.msk.bf16.mxu1 %vm12096_vm1, %v15937_v43  ;;  %v5792_v26 = vpack.c.bf16 %v5756_v22, %v5755_v9  ;;  %v5760_v12 = vld [vmem:[#allocation3 + $0x7f] sm:$0xff]  ;;  %v5761_v22 = vld [vmem:[#allocation3 + $0x87] sm:$0xff] }
 0x51f   : > { %v5794_v35 = vpack.c.bf16 %v5760_v12, %v5759_v38 }
 0x524   : > { %11231 = vmatmul.mubr.msk.bf16.vlgmr.msra.gmra.mrb[220].mxu0 %vm373_vm0, %v5406_v55  ;;  %v5758_v55 = vld [vmem:[#allocation3 + $0x6f] sm:$0xff] }
 0x525   : > { %11319 = vmatmul.mubr.msk.bf16.vlgmr.msra.gmra.mrb[20].mxu1 %vm373_vm0, %v5788_v40  ;;  %11234 = vmatprep.mubr.msk.bf16.mxu0 %vm12096_vm1, %v15937_v43  ;;  %v5793_v40 = vpack.c.bf16 %v5758_v55, %v5757_v11  ;;  %v5795_v55 = vpack.c.bf16 %v5762_v30, %v5761_v22  ;;  %v5763_v30 = vld [vmem:[#allocation3 + $0x97] sm:$0xff] }
 0x526   : > { %11322 = vmatprep.mubr.msk.bf16.mxu1 %vm12096_vm1, %v15937_v43  ;;  %11403 = vmatpush3.bf16.msra.mxu0 %v12020_v31  ;;  %v12022_v31 = vld [vmem:[%s15804_s6 + $0x48] sm:$0xff]  }
 0x527   : > { %11404 = vmatprep.subr.bf16.mxu0 %v15937_v43  ;;  %11491 = vmatpush3.bf16.msra.mxu1 %v12021_v39 }
 0x528   : > { %11492 = vmatprep.subr.bf16.mxu1 %v15937_v43 }
 0x52a   : > { %11405 = vmatpush3.bf16.msra.mxu0 %v12022_v31  ;;  %v5764_v31 = vld [vmem:[#allocation3 + $0x9f] sm:$0xff] }
 0x52b   : > { %11493 = vmatpush3.bf16.msra.mxu1 %v12023_v56  ;;  %11578 = vmatprep.subr.bf16.mxu0 %v15937_v43 }
 0x52c   : > { %11235 = vmatmul.mubr.msk.bf16.gmra.mrb[224].mxu0 %vm373_vm0, %v5407_v37  ;;  %11666 = vmatprep.subr.bf16.mxu1 %v15937_v43 }
 0x52d   : > { %11323 = vmatmul.mubr.msk.bf16.gmra.mrb[24].mxu1 %vm373_vm0, %v5789_v32  ;;  %11238 = vmatprep.mubr.msk.bf16.mxu0 %vm12096_vm1, %v15937_v43 }
 0x52e   : > { %11326 = vmatprep.mubr.msk.bf16.mxu1 %vm12096_vm1, %v15937_v43 }
 0x534   : > { %11239 = vmatmul.mubr.msk.bf16.gmra.mrb[228].mxu0 %vm373_vm0, %v5789_v32 }
 0x535   : > { %11327 = vmatmul.mubr.msk.bf16.gmra.mrb[28].mxu1 %vm373_vm0, %v5790_v10  ;;  %11242 = vmatprep.mubr.msk.bf16.mxu0 %vm12096_vm1, %v15937_v43 }
 0x536   : > { %11330 = vmatprep.mubr.msk.bf16.mxu1 %vm12096_vm1, %v15937_v43 }
 0x53c   : > { %11243 = vmatmul.mubr.msk.bf16.gmra.mrb[232].mxu0 %vm373_vm0, %v5790_v10 }
 0x53d   : > { %11331 = vmatmul.mubr.msk.bf16.gmra.mrb[32].mxu1 %vm373_vm0, %v5791_v49  ;;  %11246 = vmatprep.mubr.msk.bf16.mxu0 %vm12096_vm1, %v15937_v43 }
 0x53e   : > { %11334 = vmatprep.mubr.msk.bf16.mxu1 %vm12096_vm1, %v15937_v43 }
 0x544   : > { %11247 = vmatmul.mubr.msk.bf16.gmra.mrb[236].mxu0 %vm373_vm0, %v5791_v49 }
 0x545   : > { %11335 = vmatmul.mubr.msk.bf16.gmra.mrb[36].mxu1 %vm373_vm0, %v5792_v26  ;;  %11250 = vmatprep.mubr.msk.bf16.mxu0 %vm12096_vm1, %v15937_v43 }
 0x546   : > { %11338 = vmatprep.mubr.msk.bf16.mxu1 %vm12096_vm1, %v15937_v43 }
 0x54c   : > { %11251 = vmatmul.mubr.msk.bf16.gmra.mrb[240].mxu0 %vm373_vm0, %v5792_v26 }
 0x54d   : > { %11339 = vmatmul.mubr.msk.bf16.gmra.mrb[40].mxu1 %vm373_vm0, %v5793_v40  ;;  %11254 = vmatprep.mubr.msk.bf16.mxu0 %vm12096_vm1, %v15937_v43 }
 0x54e   : > { %11342 = vmatprep.mubr.msk.bf16.mxu1 %vm12096_vm1, %v15937_v43 }
 0x554   : > { %11255 = vmatmul.mubr.msk.bf16.gmra.mrb[244].mxu0 %vm373_vm0, %v5793_v40 }
 0x555   : > { %11343 = vmatmul.mubr.msk.bf16.gmra.mrb[44].mxu1 %vm373_vm0, %v5794_v35  ;;  %11258 = vmatprep.mubr.msk.bf16.mxu0 %vm12096_vm1, %v15937_v43 }
 0x556   : > { %11346 = vmatprep.mubr.msk.bf16.mxu1 %vm12096_vm1, %v15937_v43 }
 0x557   : > { %v4932_v37 = vpop.f32.mrb[140].mxu0 }
 0x558   : > { %v5207_v32 = vpop.f32.mrb[196].mxu1  ;;  %v11060_v10 = vpop.f32.mrb[141].mxu0 }
 0x559   : > { %v14222_v45 = vadd.f32 %v5207_v32, %v4932_v37  ;;  %v11148_v28 = vpop.f32.mrb[197].mxu1  ;;  %v4935_v23 = vpop.f32.mrb[142].mxu0 }
 0x55a   : > { %v5210_v49 = vpop.f32.mrb[198].mxu1  ;;  %v11061_v26 = vpop.f32.mrb[143].mxu0 }
 0x55b   : > { %v14224_v9 = vadd.f32 %v5210_v49, %v4935_v23  ;;  %v11149_v39 = vpop.f32.mrb[199].mxu1  ;;  %v5796_v23 = vpack.c.bf16 %v5764_v31, %v5763_v30  ;;  %v5766_v26 = vld [vmem:[#allocation3 + $0xaf] sm:$0xff]  ;;  %v5765_v31 = vld [vmem:[#allocation3 + $0xa7] sm:$0xff] }
 0x55c   : > { %11259 = vmatmul.mubr.msk.bf16.gmra.mrb[248].mxu0 %vm373_vm0, %v5794_v35  ;;  %v5797_v30 = vpack.c.bf16 %v5766_v26, %v5765_v31  ;;  %v5767_v26 = vld [vmem:[#allocation3 + $0xb7] sm:$0xff] }
 0x55d   : > { %11347 = vmatmul.mubr.msk.bf16.gmra.mrb[48].mxu1 %vm373_vm0, %v5795_v55  ;;  %11262 = vmatprep.mubr.msk.bf16.mxu0 %vm12096_vm1, %v15937_v43 }
 0x55e   : > { %11350 = vmatprep.mubr.msk.bf16.mxu1 %vm12096_vm1, %v15937_v43 }
 0x55f   : > { %v4940_v11 = vpop.f32.mrb[144].mxu0 }
 0x560   : > { %v5215_v40 = vpop.f32.mrb[200].mxu1  ;;  %v11064_v12 = vpop.f32.mrb[145].mxu0 }
 0x561   : > { %v14232_v56 = vadd.f32 %v5215_v40, %v4940_v11  ;;  %v11152_v38 = vpop.f32.mrb[201].mxu1  ;;  %v4943_v37 = vpop.f32.mrb[146].mxu0 }
 0x562   : > { %v5218_v32 = vpop.f32.mrb[202].mxu1  ;;  %v11065_v35 = vpop.f32.mrb[147].mxu0 }
 0x563   : > { %v14234_v10 = vadd.f32 %v5218_v32, %v4943_v37  ;;  %v11153_v28 = vpop.f32.mrb[203].mxu1 }
 0x564   : > { %11263 = vmatmul.mubr.msk.bf16.gmra.mrb[252].mxu0 %vm373_vm0, %v5795_v55 }
 0x565   : > { %11351 = vmatmul.mubr.msk.bf16.gmra.mrb[52].mxu1 %vm373_vm0, %v5796_v23  ;;  %11266 = vmatprep.mubr.msk.bf16.mxu0 %vm12096_vm1, %v15937_v43 }
 0x566   : > { %11354 = vmatprep.mubr.msk.bf16.mxu1 %vm12096_vm1, %v15937_v43 }
 0x567   : > { %v4948_v49 = vpop.f32.mrb[148].mxu0 }
 0x568   : > { %v5223_v22 = vpop.f32.mrb[204].mxu1  ;;  %v11068_v11 = vpop.f32.mrb[149].mxu0 }
 0x569   : > { %v14242_v39 = vadd.f32 %v5223_v22, %v4948_v49  ;;  %v11156_v40 = vpop.f32.mrb[205].mxu1  ;;  %v4951_v12 = vpop.f32.mrb[150].mxu0  ;;  %v5768_v49 = vld [vmem:[#allocation3 + $0xbf] sm:$0xff] }
 0x56a   : > { %v5226_v38 = vpop.f32.mrb[206].mxu1  ;;  %v11069_v55 = vpop.f32.mrb[151].mxu0 }
 0x56b   : > { %v14244_v37 = vadd.f32 %v5226_v38, %v4951_v12  ;;  %v11157_v32 = vpop.f32.mrb[207].mxu1 }
 0x56c   : > { %11267 = vmatmul.mubr.msk.bf16.gmra.mrb[0].mxu0 %vm373_vm0, %v5796_v23  ;;  %v5798_v32 = vpack.c.bf16 %v5768_v49, %v5767_v26  ;;  %v5769_v49 = vld [vmem:[#allocation3 + $0xc7] sm:$0xff] }
 0x56d   : > { %11355 = vmatmul.mubr.msk.bf16.gmra.mrb[56].mxu1 %vm373_vm0, %v5797_v30  ;;  %11270 = vmatprep.mubr.msk.bf16.mxu0 %vm12096_vm1, %v15937_v43 }
 0x56e   : > { %11358 = vmatprep.mubr.msk.bf16.mxu1 %vm12096_vm1, %v15937_v43 }
 0x56f   : > { %v4956_v35 = vpop.f32.mrb[152].mxu0 }
 0x570   : > { %v5231_v28 = vpop.f32.mrb[208].mxu1  ;;  %v11072_v11 = vpop.f32.mrb[153].mxu0 }
 0x571   : > { %v14252_v22 = vadd.f32 %v5231_v28, %v4956_v35  ;;  %v11160_v40 = vpop.f32.mrb[209].mxu1  ;;  %v4959_v12 = vpop.f32.mrb[154].mxu0  ;;  %v5770_v11 = vld [vmem:[#allocation3 + $0xcf] sm:$0xff] }
 0x572   : > { %v5234_v38 = vpop.f32.mrb[210].mxu1  ;;  %v11073_v23 = vpop.f32.mrb[155].mxu0  ;;  %v5799_v14 = vpack.c.bf16 %v5770_v11, %v5769_v49  ;;  %v5771_v11 = vld [vmem:[#allocation3 + $0xd7] sm:$0xff] }
 0x573   : > { %v14254_v31 = vadd.f32 %v5234_v38, %v4959_v12  ;;  %v11161_v55 = vpop.f32.mrb[211].mxu1 }
 0x574   : > { %11271 = vmatmul.mubr.msk.bf16.gmra.mrb[4].mxu0 %vm373_vm0, %v5797_v30 }
 0x575   : > { %11359 = vmatmul.mubr.msk.bf16.gmra.mrb[60].mxu1 %vm373_vm0, %v5798_v32  ;;  %11274 = vmatprep.mubr.msk.bf16.mxu0 %vm12096_vm1, %v15937_v43 }
 0x576   : > { %11362 = vmatprep.mubr.msk.bf16.mxu1 %vm12096_vm1, %v15937_v43 }
 0x577   : > { %v4964_v35 = vpop.f32.mrb[156].mxu0 }
 0x578   : > { %v5239_v28 = vpop.f32.mrb[212].mxu1  ;;  %v11076_v12 = vpop.f32.mrb[157].mxu0 }
 0x579   : > { %v14262_v40 = vadd.f32 %v5239_v28, %v4964_v35  ;;  %v11164_v38 = vpop.f32.mrb[213].mxu1  ;;  %v4967_v23 = vpop.f32.mrb[158].mxu0  ;;  %v5772_v12 = vld [vmem:[#allocation3 + $0xdf] sm:$0xff] }
 0x57a   : > { %v5242_v55 = vpop.f32.mrb[214].mxu1  ;;  %v11077_v30 = vpop.f32.mrb[159].mxu0  ;;  %v5800_v53 = vpack.c.bf16 %v5772_v12, %v5771_v11  ;;  %v5773_v12 = vld [vmem:[#allocation3 + $0xe7] sm:$0xff] }
 0x57b   : > { %v14264_v26 = vadd.f32 %v5242_v55, %v4967_v23  ;;  %v11165_v18 = vpop.f32.mrb[215].mxu1 }
 0x57c   : > { %11275 = vmatmul.mubr.msk.bf16.gmra.mrb[8].mxu0 %vm373_vm0, %v5798_v32 }
 0x57d   : > { %11363 = vmatmul.mubr.msk.bf16.gmra.mrb[64].mxu1 %vm373_vm0, %v5799_v14  ;;  %11278 = vmatprep.mubr.msk.bf16.mxu0 %vm12096_vm1, %v15937_v43 }
 0x57e   : > { %11366 = vmatprep.mubr.msk.bf16.mxu1 %vm12096_vm1, %v15937_v43 }
 0x57f   : > { %v4972_v35 = vpop.f32.mrb[160].mxu0 }
 0x580   : > { %v5247_v28 = vpop.f32.mrb[216].mxu1  ;;  %v11080_v23 = vpop.f32.mrb[161].mxu0 }
 0x581   : > { %v14272_v38 = vadd.f32 %v5247_v28, %v4972_v35  ;;  %v11168_v55 = vpop.f32.mrb[217].mxu1  ;;  %v4975_v30 = vpop.f32.mrb[162].mxu0  ;;  %v5774_v23 = vld [vmem:[#allocation3 + $0xef] sm:$0xff] }
 0x582   : > { %v5250_v18 = vpop.f32.mrb[218].mxu1  ;;  %v11081_v32 = vpop.f32.mrb[163].mxu0  ;;  %v5801_v59 = vpack.c.bf16 %v5774_v23, %v5773_v12  ;;  %v5775_v23 = vld [vmem:[#allocation3 + $0xf7] sm:$0xff] }
 0x583   : > { %v14274_v49 = vadd.f32 %v5250_v18, %v4975_v30  ;;  %v11169_v60 = vpop.f32.mrb[219].mxu1 }
 0x584   : > { %11279 = vmatmul.mubr.msk.bf16.gmra.mrb[12].mxu0 %vm373_vm0, %v5799_v14 }
 0x585   : > { %11367 = vmatmul.mubr.msk.bf16.gmra.mrb[68].mxu1 %vm373_vm0, %v5800_v53  ;;  %11282 = vmatprep.mubr.msk.bf16.mxu0 %vm12096_vm1, %v15937_v43 }
 0x586   : > { %11370 = vmatprep.mubr.msk.bf16.mxu1 %vm12096_vm1, %v15937_v43 }
 0x587   : > { %v4980_v35 = vpop.f32.mrb[164].mxu0 }
 0x588   : > { %v5255_v28 = vpop.f32.mrb[220].mxu1  ;;  %v11084_v30 = vpop.f32.mrb[165].mxu0 }
 0x589   : > { %v14282_v55 = vadd.f32 %v5255_v28, %v4980_v35  ;;  %v11172_v18 = vpop.f32.mrb[221].mxu1  ;;  %v4983_v32 = vpop.f32.mrb[166].mxu0  ;;  %v5776_v30 = vld [vmem:[#allocation3 + $0xff] sm:$0xff] }
 0x58a   : > { %v5258_v60 = vpop.f32.mrb[222].mxu1  ;;  %v11085_v14 = vpop.f32.mrb[167].mxu0  ;;  %v5802_v20 = vpack.c.bf16 %v5776_v30, %v5775_v23  ;;  %v5777_v30 = vld [vmem:[#allocation3 + $0x107] sm:$0xff] }
 0x58b   : > { %v14284_v11 = vadd.f32 %v5258_v60, %v4983_v32  ;;  %v11173_v47 = vpop.f32.mrb[223].mxu1 }
 0x58c   : > { %11283 = vmatmul.mubr.msk.bf16.gmra.mrb[16].mxu0 %vm373_vm0, %v5800_v53 }
 0x58d   : > { %11371 = vmatmul.mubr.msk.bf16.gmra.mrb[72].mxu1 %vm373_vm0, %v5801_v59  ;;  %11286 = vmatprep.mubr.msk.bf16.mxu0 %vm12096_vm1, %v15937_v43 }
 0x58e   : > { %11374 = vmatprep.mubr.msk.bf16.mxu1 %vm12096_vm1, %v15937_v43 }
 0x58f   : > { %v4988_v35 = vpop.f32.mrb[168].mxu0 }
 0x590   : > { %v5263_v28 = vpop.f32.mrb[224].mxu1  ;;  %v11088_v32 = vpop.f32.mrb[169].mxu0 }
 0x591   : > { %v14292_v18 = vadd.f32 %v5263_v28, %v4988_v35  ;;  %v11176_v60 = vpop.f32.mrb[225].mxu1  ;;  %v4991_v14 = vpop.f32.mrb[170].mxu0  ;;  %v5778_v32 = vld [vmem:[#allocation3 + $0x10f] sm:$0xff] }
 0x592   : > { %v5266_v47 = vpop.f32.mrb[226].mxu1  ;;  %v11089_v53 = vpop.f32.mrb[171].mxu0  ;;  %v5803_v2 = vpack.c.bf16 %v5778_v32, %v5777_v30  ;;  %v5779_v32 = vld [vmem:[#allocation3 + $0x117] sm:$0xff] }
 0x593   : > { %v14294_v12 = vadd.f32 %v5266_v47, %v4991_v14  ;;  %v11177_v3 = vpop.f32.mrb[227].mxu1 }
 0x594   : > { %11287 = vmatmul.mubr.msk.bf16.gmra.mrb[20].mxu0 %vm373_vm0, %v5801_v59 }
 0x595   : > { %11375 = vmatmul.mubr.msk.bf16.gmra.mrb[76].mxu1 %vm373_vm0, %v5802_v20  ;;  %11290 = vmatprep.mubr.msk.bf16.mxu0 %vm12096_vm1, %v15937_v43 }
 0x596   : > { %11378 = vmatprep.mubr.msk.bf16.mxu1 %vm12096_vm1, %v15937_v43 }
 0x597   : > { %v4996_v35 = vpop.f32.mrb[172].mxu0 }
 0x598   : > { %v5271_v28 = vpop.f32.mrb[228].mxu1  ;;  %v11092_v14 = vpop.f32.mrb[173].mxu0 }
 0x599   : > { %v14302_v60 = vadd.f32 %v5271_v28, %v4996_v35  ;;  %v11180_v47 = vpop.f32.mrb[229].mxu1  ;;  %v4999_v53 = vpop.f32.mrb[174].mxu0  ;;  %v5780_v14 = vld [vmem:[#allocation3 + $0x11f] sm:$0xff] }
 0x59a   : > { %v5274_v3 = vpop.f32.mrb[230].mxu1  ;;  %v11093_v59 = vpop.f32.mrb[175].mxu0  ;;  %v5804_v1 = vpack.c.bf16 %v5780_v14, %v5779_v32  ;;  %v5781_v14 = vld [vmem:[#allocation3 + $0x127] sm:$0xff] }
 0x59b   : > { %v14304_v23 = vadd.f32 %v5274_v3, %v4999_v53  ;;  %v11181_v42 = vpop.f32.mrb[231].mxu1 }
 0x59c   : > { %11291 = vmatmul.mubr.msk.bf16.gmra.mrb[24].mxu0 %vm373_vm0, %v5802_v20 }
 0x59d   : > { %11379 = vmatmul.mubr.msk.bf16.gmra.mrb[80].mxu1 %vm373_vm0, %v5803_v2  ;;  %11294 = vmatprep.mubr.msk.bf16.mxu0 %vm12096_vm1, %v15937_v43 }
 0x59e   : > { %11382 = vmatprep.mubr.msk.bf16.mxu1 %vm12096_vm1, %v15937_v43 }
 0x59f   : > { %v5004_v35 = vpop.f32.mrb[176].mxu0 }
 0x5a0   : > { %v5279_v28 = vpop.f32.mrb[232].mxu1  ;;  %v11096_v53 = vpop.f32.mrb[177].mxu0 }
 0x5a1   : > { %v14312_v47 = vadd.f32 %v5279_v28, %v5004_v35  ;;  %v11184_v3 = vpop.f32.mrb[233].mxu1  ;;  %v5007_v59 = vpop.f32.mrb[178].mxu0  ;;  %v5782_v53 = vld [vmem:[#allocation3 + $0x12f] sm:$0xff] }
 0x5a2   : > { %v5282_v42 = vpop.f32.mrb[234].mxu1  ;;  %v11097_v20 = vpop.f32.mrb[179].mxu0  ;;  %v5805_v8 = vpack.c.bf16 %v5782_v53, %v5781_v14  ;;  %v5783_v53 = vld [vmem:[#allocation3 + $0x137] sm:$0xff] }
 0x5a3   : > { %v14314_v30 = vadd.f32 %v5282_v42, %v5007_v59  ;;  %v11185_v34 = vpop.f32.mrb[235].mxu1 }
 0x5a4   : > { %11295 = vmatmul.mubr.msk.bf16.gmra.mrb[28].mxu0 %vm373_vm0, %v5803_v2 }
 0x5a5   : > { %11383 = vmatmul.mubr.msk.bf16.gmra.mrb[84].mxu1 %vm373_vm0, %v5804_v1  ;;  %11298 = vmatprep.mubr.msk.bf16.mxu0 %vm12096_vm1, %v15937_v43 }
 0x5a6   : > { %11386 = vmatprep.mubr.msk.bf16.mxu1 %vm12096_vm1, %v15937_v43 }
 0x5a7   : > { %v5012_v35 = vpop.f32.mrb[180].mxu0 }
 0x5a8   : > { %v5287_v28 = vpop.f32.mrb[236].mxu1  ;;  %v11100_v59 = vpop.f32.mrb[181].mxu0 }
 0x5a9   : > { %v14322_v3 = vadd.f32 %v5287_v28, %v5012_v35  ;;  %v11188_v42 = vpop.f32.mrb[237].mxu1  ;;  %v5015_v20 = vpop.f32.mrb[182].mxu0  ;;  %v5784_v59 = vld [vmem:[#allocation3 + $0x13f] sm:$0xff] }
 0x5aa   : > { %v5290_v34 = vpop.f32.mrb[238].mxu1  ;;  %v11101_v2 = vpop.f32.mrb[183].mxu0  ;;  %v5806_v15 = vpack.c.bf16 %v5784_v59, %v5783_v53  ;;  %v5785_v59 = vld [vmem:[#allocation3 + $0x147] sm:$0xff] }
 0x5ab   : > { %v14324_v32 = vadd.f32 %v5290_v34, %v5015_v20  ;;  %v11189_v27 = vpop.f32.mrb[239].mxu1 }
 0x5ac   : > { %11299 = vmatmul.mubr.msk.bf16.gmra.mrb[32].mxu0 %vm373_vm0, %v5804_v1 }
 0x5ad   : > { %11387 = vmatmul.mubr.msk.bf16.gmra.mrb[88].mxu1 %vm373_vm0, %v5805_v8  ;;  %11302 = vmatprep.mubr.msk.bf16.mxu0 %vm12096_vm1, %v15937_v43 }
 0x5ae   : > { %11390 = vmatprep.mubr.msk.bf16.mxu1 %vm12096_vm1, %v15937_v43 }
 0x5af   : > { %v5020_v35 = vpop.f32.mrb[184].mxu0 }
 0x5b0   : > { %v5295_v28 = vpop.f32.mrb[240].mxu1  ;;  %v11104_v20 = vpop.f32.mrb[185].mxu0 }
 0x5b1   : > { %v14332_v42 = vadd.f32 %v5295_v28, %v5020_v35  ;;  %v11192_v34 = vpop.f32.mrb[241].mxu1  ;;  %v5023_v2 = vpop.f32.mrb[186].mxu0  ;;  %v5786_v20 = vld [vmem:[#allocation3 + $0x14f] sm:$0xff] }
 0x5b2   : > { %v5298_v27 = vpop.f32.mrb[242].mxu1  ;;  %v11105_v1 = vpop.f32.mrb[187].mxu0  ;;  %v5807_v41 = vpack.c.bf16 %v5786_v20, %v5785_v59 }
 0x5b3   : > { %v14334_v14 = vadd.f32 %v5298_v27, %v5023_v2  ;;  %v11193_v44 = vpop.f32.mrb[243].mxu1 }
 0x5b4   : > { %11303 = vmatmul.mubr.msk.bf16.gmra.mrb[36].mxu0 %vm373_vm0, %v5805_v8 }
 0x5b5   : > { %11391 = vmatmul.mubr.msk.bf16.gmra.mrb[92].mxu1 %vm373_vm0, %v5806_v15  ;;  %11306 = vmatprep.mubr.msk.bf16.mxu0 %vm12096_vm1, %v15937_v43 }
 0x5b6   : > { %11394 = vmatprep.mubr.msk.bf16.mxu1 %vm12096_vm1, %v15937_v43 }
 0x5b7   : > { %v5028_v35 = vpop.f32.mrb[188].mxu0 }
 0x5b8   : > { %v5303_v28 = vpop.f32.mrb[244].mxu1  ;;  %v11108_v2 = vpop.f32.mrb[189].mxu0 }
 0x5b9   : > { %v14342_v34 = vadd.f32 %v5303_v28, %v5028_v35  ;;  %v11196_v27 = vpop.f32.mrb[245].mxu1  ;;  %v5031_v1 = vpop.f32.mrb[190].mxu0  ;;  %v5405_v2 = vld [vmem:[#allocation3 + $0x147] sm:$0xf] }
 0x5ba   : > { %v5306_v44 = vpop.f32.mrb[246].mxu1  ;;  %v11109_v8 = vpop.f32.mrb[191].mxu0  ;;  %v5787_v27 = vld [vmem:[#allocation3 + $0x157] sm:$0xf] }
 0x5bb   : > { %v14344_v53 = vadd.f32 %v5306_v44, %v5031_v1  ;;  %v11197_v54 = vpop.f32.mrb[247].mxu1  ;;  %v5426_v8 = vpack.c.bf16 %v5405_v2, %v5405_v2  ;;  %v5808_v19 = vpack.c.bf16 %v5787_v27, %v5787_v27  ;;  %v6129_v2 = vld [vmem:[#allocation3 + $0x18] sm:$0xff] }
 0x5bc   : > { %11307 = vmatmul.mubr.msk.bf16.gmra.mrb[40].mxu0 %vm373_vm0, %v5806_v15  ;;  %v6511_v27 = vld [vmem:[#allocation3 + $0x19] sm:$0xff] }
 0x5bd   : > { %11395 = vmatmul.mubr.msk.bf16.gmra.mrb[96].mxu1 %vm373_vm0, %v5807_v41  ;;  %11310 = vmatprep.mubr.msk.bf16.mxu0 %vm12096_vm1, %v15937_v43 }
 0x5be   : > { %11398 = vmatprep.mubr.msk.bf16.mxu1 %vm12096_vm1, %v15937_v43 }
 0x5bf   : > { %v5036_v35 = vpop.f32.mrb[192].mxu0 }
 0x5c0   : > { %v5311_v28 = vpop.f32.mrb[248].mxu1  ;;  %v11112_v1 = vpop.f32.mrb[193].mxu0 }
 0x5c1   : > { %v14352_v63 = vadd.f32 %v5311_v28, %v5036_v35  ;;  %v11200_v44 = vpop.f32.mrb[249].mxu1  ;;  %v5039_v54 = vpop.f32.mrb[194].mxu0  ;;  %v6130_v35 = vld [vmem:[#allocation3 + $0x20] sm:$0xff] }
 0x5c2   : > { %v5314_v20 = vpop.f32.mrb[250].mxu1  ;;  %v11113_v15 = vpop.f32.mrb[195].mxu0  ;;  %v6512_v28 = vld [vmem:[#allocation3 + $0x21] sm:$0xff]  ;;  %v6170_v51 = vpack.c.bf16 %v6130_v35, %v6129_v2 }
 0x5c3   : > { %v14354_v59 = vadd.f32 %v5314_v20, %v5039_v54  ;;  %v11201_v41 = vpop.f32.mrb[251].mxu1  ;;  %v6131_v2 = vld [vmem:[#allocation3 + $0x28] sm:$0xff] }
 0x5c4   : > { %11311 = vmatmul.mubr.msk.bf16.gmra.mrb[44].mxu0 %vm373_vm0, %v5426_v8 }
 0x5c5   : > { %11399 = vmatmul.mubr.msk.bf16.gmra.mrb[100].mxu1 %vm373_vm0, %v5808_v19  ;;  %11406 = vmatprep.mubr.msk.bf16.mxu0 %vm12096_vm1, %v15937_v43  ;;  %v6552_v19 = vpack.c.bf16 %v6512_v28, %v6511_v27  ;;  %v6513_v27 = vld [vmem:[#allocation3 + $0x29] sm:$0xff] }
 0x5c6   : > { %11494 = vmatprep.mubr.msk.bf16.mxu1 %vm12096_vm1, %v15937_v43 }
 0x5c7   : > { %v5044_v1 = vpop.f32.mrb[196].mxu0 }
 0x5c8   : > { %v5319_v44 = vpop.f32.mrb[252].mxu1  ;;  %v11116_v20 = vpop.f32.mrb[197].mxu0 }
 0x5c9   : > { %v14362_v54 = vadd.f32 %v5319_v44, %v5044_v1  ;;  %v11204_v15 = vpop.f32.mrb[253].mxu1  ;;  %v5047_v41 = vpop.f32.mrb[198].mxu0  ;;  %v6132_v1 = vld [vmem:[#allocation3 + $0x30] sm:$0xff] }
 0x5ca   : > { %v5322_v8 = vpop.f32.mrb[254].mxu1  ;;  %v11117_v33 = vpop.f32.mrb[199].mxu0  ;;  %v6171_v48 = vpack.c.bf16 %v6132_v1, %v6131_v2  ;;  %v6133_v2 = vld [vmem:[#allocation3 + $0x38] sm:$0xff] }
 0x5cb   : > { %v14364_v6 = vadd.f32 %v5322_v8, %v5047_v41  ;;  %v11205_v62 = vpop.f32.mrb[255].mxu1  ;;  %v6514_v33 = vld [vmem:[#allocation3 + $0x31] sm:$0xff] }
 0x5cc   : > { %11407 = vmatmul.mubr.msk.bf16.vlgmr.msra.gmra.mrb[48].mxu0 %vm373_vm0, %v6170_v51 }
 0x5cd   : > { %11495 = vmatmul.mubr.msk.bf16.vlgmr.msra.gmra.mrb[104].mxu1 %vm373_vm0, %v6552_v19  ;;  %11410 = vmatprep.mubr.msk.bf16.mxu0 %vm12096_vm1, %v15937_v43 }
 0x5ce   : > { %11498 = vmatprep.mubr.msk.bf16.mxu1 %vm12096_vm1, %v15937_v43  ;;  %11579 = vmatpush3.bf16.msra.mxu0 %v12024_v7  ;;  %v6553_v7 = vpack.c.bf16 %v6514_v33, %v6513_v27 }
 0x5cf   : > { %v5052_v35 = vpop.f32.mrb[200].mxu0  ;;  %11580 = vmatprep.subr.bf16.mxu0 %v15937_v43 }
 0x5d0   : > { %v5327_v28 = vpop.f32.mrb[0].mxu1  ;;  %v11120_v44 = vpop.f32.mrb[201].mxu0 }
 0x5d1   : > { %v14376_v62 = vadd.f32 %v5327_v28, %v5052_v35  ;;  %v11208_v20 = vpop.f32.mrb[1].mxu1  ;;  %v5055_v51 = vpop.f32.mrb[202].mxu0  ;;  %v6134_v44 = vld [vmem:[#allocation3 + $0x40] sm:$0xff] }
 0x5d2   : > { %v5330_v15 = vpop.f32.mrb[2].mxu1  ;;  %v11121_v8 = vpop.f32.mrb[203].mxu0  ;;  %v6516_v20 = vld [vmem:[#allocation3 + $0x41] sm:$0xff]  ;;  %v6172_v50 = vpack.c.bf16 %v6134_v44, %v6133_v2 }
 0x5d3   : > { %v14378_v41 = vadd.f32 %v5330_v15, %v5055_v51  ;;  %v11209_v19 = vpop.f32.mrb[3].mxu1 }
 0x5d4   : > { %11411 = vmatmul.mubr.msk.bf16.gmra.mrb[52].mxu0 %vm373_vm0, %v6171_v48  ;;  %v6515_v48 = vld [vmem:[#allocation3 + $0x39] sm:$0xff] }
 0x5d5   : > { %11499 = vmatmul.mubr.msk.bf16.gmra.mrb[108].mxu1 %vm373_vm0, %v6553_v7  ;;  %11414 = vmatprep.mubr.msk.bf16.mxu0 %vm12096_vm1, %v15937_v43  ;;  %v14390_v13 = vpack.c.bf16 %v6516_v20, %v6515_v48  ;;  %v6517_v48 = vld [vmem:[#allocation3 + $0x49] sm:$0xff] }
 0x5d6   : > { %11502 = vmatprep.mubr.msk.bf16.mxu1 %vm12096_vm1, %v15937_v43 }
 0x5d7   : > { %v5060_v35 = vpop.f32.mrb[204].mxu0 }
 0x5d8   : > { %v5335_v28 = vpop.f32.mrb[4].mxu1  ;;  %v11124_v15 = vpop.f32.mrb[205].mxu0 }
 0x5d9   : > { %v14386_v51 = vadd.f32 %v5335_v28, %v5060_v35  ;;  %v11212_v8 = vpop.f32.mrb[5].mxu1  ;;  %v5063_v1 = vpop.f32.mrb[206].mxu0  ;;  %v6136_v15 = vld [vmem:[#allocation3 + $0x50] sm:$0xff] }
 0x5da   : > { %v5338_v33 = vpop.f32.mrb[6].mxu1  ;;  %v11125_v19 = vpop.f32.mrb[207].mxu0  ;;  %v6518_v8 = vld [vmem:[#allocation3 + $0x51] sm:$0xff] }
 0x5db   : > { %v14388_v27 = vadd.f32 %v5338_v33, %v5063_v1  ;;  %v11213_v7 = vpop.f32.mrb[7].mxu1  ;;  %v14403_v58 = vpack.c.bf16 %v6518_v8, %v6517_v48 }
 0x5dc   : > { %11415 = vmatmul.mubr.msk.bf16.gmra.mrb[56].mxu0 %vm373_vm0, %v6172_v50  ;;  %v6135_v50 = vld [vmem:[#allocation3 + $0x48] sm:$0xff] }
 0x5dd   : > { %11503 = vmatmul.mubr.msk.bf16.gmra.mrb[112].mxu1 %vm373_vm0, %v14390_v13  ;;  %11418 = vmatprep.mubr.msk.bf16.mxu0 %vm12096_vm1, %v15937_v43  ;;  %v6173_v25 = vpack.c.bf16 %v6136_v15, %v6135_v50  ;;  %v6519_v50 = vld [vmem:[#allocation3 + $0x59] sm:$0xff] }
 0x5de   : > { %11506 = vmatprep.mubr.msk.bf16.mxu1 %vm12096_vm1, %v15937_v43 }
 0x5df   : > { %v5068_v35 = vpop.f32.mrb[208].mxu0 }
 0x5e0   : > { %v5343_v28 = vpop.f32.mrb[8].mxu1  ;;  %v11128_v44 = vpop.f32.mrb[209].mxu0 }
 0x5e1   : > { %v14399_v1 = vadd.f32 %v5343_v28, %v5068_v35  ;;  %v11216_v20 = vpop.f32.mrb[9].mxu1  ;;  %v5071_v33 = vpop.f32.mrb[210].mxu0  ;;  %v6138_v44 = vld [vmem:[#allocation3 + $0x60] sm:$0xff] }
 0x5e2   : > { %v5346_v2 = vpop.f32.mrb[10].mxu1  ;;  %v11129_v7 = vpop.f32.mrb[211].mxu0  ;;  %v6520_v20 = vld [vmem:[#allocation3 + $0x61] sm:$0xff] }
 0x5e3   : > { %v14401_v19 = vadd.f32 %v5346_v2, %v5071_v33  ;;  %v11217_v29 = vpop.f32.mrb[11].mxu1  ;;  %v14416_v5 = vpack.c.bf16 %v6520_v20, %v6519_v50  ;;  %v6522_v20 = vld [vmem:[#allocation3 + $0x71] sm:$0xff]  ;;  %v6521_v50 = vld [vmem:[#allocation3 + $0x69] sm:$0xff] }
 0x5e4   : > { %11419 = vmatmul.mubr.msk.bf16.gmra.mrb[60].mxu0 %vm373_vm0, %v6173_v25  ;;  %v6137_v25 = vld [vmem:[#allocation3 + $0x58] sm:$0xff]  ;;  %v14431_v36 = vpack.c.bf16 %v6522_v20, %v6521_v50 }
 0x5e5   : > { %11507 = vmatmul.mubr.msk.bf16.gmra.mrb[116].mxu1 %vm373_vm0, %v14403_v58  ;;  %11422 = vmatprep.mubr.msk.bf16.mxu0 %vm12096_vm1, %v15937_v43  ;;  %v6174_v57 = vpack.c.bf16 %v6138_v44, %v6137_v25  ;;  %v6140_v44 = vld [vmem:[#allocation3 + $0x70] sm:$0xff]  ;;  %v6139_v25 = vld [vmem:[#allocation3 + $0x68] sm:$0xff]  ;;  %v6523_v50 = vld [vmem:[#allocation3 + $0x79] sm:$0xff] }
 0x5e6   : > { %11510 = vmatprep.mubr.msk.bf16.mxu1 %vm12096_vm1, %v15937_v43  ;;  %v6175_v0 = vpack.c.bf16 %v6140_v44, %v6139_v25  ;;  %v6524_v44 = vld [vmem:[#allocation3 + $0x81] sm:$0xff]  ;;  %v6141_v25 = vld [vmem:[#allocation3 + $0x78] sm:$0xff] }
 0x5e7   : > { %v5076_v35 = vpop.f32.mrb[212].mxu0 }
 0x5e8   : > { %v5351_v28 = vpop.f32.mrb[12].mxu1  ;;  %v11132_v29 = vpop.f32.mrb[213].mxu0 }
 0x5e9   : > { %v14412_v33 = vadd.f32 %v5351_v28, %v5076_v35  ;;  %v11220_v15 = vpop.f32.mrb[13].mxu1  ;;  %v5079_v8 = vpop.f32.mrb[214].mxu0  ;;  %v12025_v35 = vld [vmem:[%s15804_s6 + $0x70] sm:$0xff]  }
 0x5ea   : > { %v5354_v2 = vpop.f32.mrb[14].mxu1  ;;  %v11133_v7 = vpop.f32.mrb[215].mxu0  ;;  %11667 = vmatpush3.bf16.msra.mxu1 %v12025_v35  ;;  %v12026_v35 = vld [vmem:[%s15804_s6 + $0x68] sm:$0xff]  }
 0x5eb   : > { %v14414_v48 = vadd.f32 %v5354_v2, %v5079_v8  ;;  %v11221_v17 = vpop.f32.mrb[15].mxu1  ;;  %11668 = vmatprep.subr.bf16.mxu1 %v15937_v43  ;;  %11581 = vmatpush3.bf16.msra.mxu0 %v12026_v35 }
 0x5ec   : > { %11423 = vmatmul.mubr.msk.bf16.gmra.mrb[64].mxu0 %vm373_vm0, %v6174_v57  ;;  %11754 = vmatprep.subr.bf16.mxu0 %v15937_v43 }
 0x5ed   : > { %11511 = vmatmul.mubr.msk.bf16.gmra.mrb[120].mxu1 %vm373_vm0, %v14416_v5  ;;  %11426 = vmatprep.mubr.msk.bf16.mxu0 %vm12096_vm1, %v15937_v43 }
 0x5ee   : > { %11514 = vmatprep.mubr.msk.bf16.mxu1 %vm12096_vm1, %v15937_v43 }
 0x5ef   : > { %v5084_v17 = vpop.f32.mrb[216].mxu0 }
 0x5f0   : > { %v5359_v28 = vpop.f32.mrb[16].mxu1  ;;  %v11136_v57 = vpop.f32.mrb[217].mxu0 }
 0x5f1   : > { %v11224_v29 = vpop.f32.mrb[17].mxu1  ;;  %v14429_v15 = vadd.f32 %v5359_v28, %v5084_v17  ;;  %v5087_v8 = vpop.f32.mrb[218].mxu0  ;;  %v12027_v17 = vld [vmem:[%s15804_s6 + $0x78] sm:$0xff]  }
 0x5f2   : > { %v5362_v2 = vpop.f32.mrb[18].mxu1  ;;  %v11137_v7 = vpop.f32.mrb[219].mxu0  ;;  %11669 = vmatpush3.bf16.msra.mxu1 %v12027_v17  ;;  %v6142_v28 = vld [vmem:[#allocation3 + $0x80] sm:$0xff]  ;;  %v14449_v17 = vpack.c.bf16 %v6524_v44, %v6523_v50 }
 0x5f3   : > { %v11225_v21 = vpop.f32.mrb[19].mxu1  ;;  %v6176_v35 = vpack.c.bf16 %v6142_v28, %v6141_v25 }
 0x5f4   : > { %11427 = vmatmul.mubr.msk.bf16.gmra.mrb[68].mxu0 %vm373_vm0, %v6175_v0 }
 0x5f5   : > { %11515 = vmatmul.mubr.msk.bf16.gmra.mrb[124].mxu1 %vm373_vm0, %v14431_v36  ;;  %11430 = vmatprep.mubr.msk.bf16.mxu0 %vm12096_vm1, %v15937_v43 }
 0x5f6   : > { %11518 = vmatprep.mubr.msk.bf16.mxu1 %vm12096_vm1, %v15937_v43 }
 0x5f7   : > { %v5540_v0 = vpop.f32.mrb[220].mxu0 }
 0x5f8   : > { %v5922_v21 = vpop.f32.mrb[20].mxu1  ;;  %v5706_v20 = vadd.f32 %v5540_v0, %v14153_v24  ;;  %v11232_v57 = vpop.f32.mrb[221].mxu0  ;;  %v6526_v0 = vld [vmem:[#allocation3 + $0x91] sm:$0xff] }
 0x5f9   : > { %v11320_v29 = vpop.f32.mrb[21].mxu1  ;;  %v5543_v8 = vpop.f32.mrb[222].mxu0 }
 0x5fa   : > { %v5925_v2 = vpop.f32.mrb[22].mxu1  ;;  %v5707_v7 = vadd.f32 %v5543_v8, %v14156_v52  ;;  %v11233_v4 = vpop.f32.mrb[223].mxu0  ;;  %v14451_v61 = vadd.f32 %v5922_v21, %v5706_v20  ;;  %v6144_v52 = vld [vmem:[#allocation3 + $0x90] sm:$0xff]  ;;  %v6143_v29 = vld [vmem:[#allocation3 + $0x88] sm:$0xff] }
 0x5fb   : > { %v11321_v46 = vpop.f32.mrb[23].mxu1  ;;  %v6525_v8 = vld [vmem:[#allocation3 + $0x89] sm:$0xff] }
 0x5fc   : > { %11431 = vmatmul.mubr.msk.bf16.gmra.mrb[72].mxu0 %vm373_vm0, %v6176_v35  ;;  %v14456_v24 = vadd.f32 %v5925_v2, %v5707_v7  ;;  %v6177_v7 = vpack.c.bf16 %v6144_v52, %v6143_v29  ;;  %v14464_v35 = vpack.c.bf16 %v6526_v0, %v6525_v8  ;;  %v6146_v52 = vld [vmem:[#allocation3 + $0xa0] sm:$0xff]  ;;  %v6145_v29 = vld [vmem:[#allocation3 + $0x98] sm:$0xff] }
 0x5fd   : > { %11519 = vmatmul.mubr.msk.bf16.gmra.mrb[128].mxu1 %vm373_vm0, %v14449_v17  ;;  %11434 = vmatprep.mubr.msk.bf16.mxu0 %vm12096_vm1, %v15937_v43  ;;  %v6528_v0 = vld [vmem:[#allocation3 + $0xa1] sm:$0xff]  ;;  %v6527_v8 = vld [vmem:[#allocation3 + $0x99] sm:$0xff] }
 0x5fe   : > { %11522 = vmatprep.mubr.msk.bf16.mxu1 %vm12096_vm1, %v15937_v43 }
 0x5ff   : > { %v5548_v4 = vpop.f32.mrb[224].mxu0 }
 0x600   : > { %v5930_v46 = vpop.f32.mrb[24].mxu1  ;;  %v5708_v21 = vadd.f32 %v5548_v4, %v14222_v45  ;;  %v11236_v28 = vpop.f32.mrb[225].mxu0 }
 0x601   : > { %v11324_v44 = vpop.f32.mrb[25].mxu1  ;;  %v5551_v20 = vpop.f32.mrb[226].mxu0 }
 0x602   : > { %v5933_v57 = vpop.f32.mrb[26].mxu1  ;;  %v5709_v2 = vadd.f32 %v5551_v20, %v14224_v9  ;;  %v11237_v25 = vpop.f32.mrb[227].mxu0  ;;  %v14466_v16 = vadd.f32 %v5930_v46, %v5708_v21 }
 0x603   : > { %v11325_v50 = vpop.f32.mrb[27].mxu1 }
 0x604   : > { %11435 = vmatmul.mubr.msk.bf16.gmra.mrb[76].mxu0 %vm373_vm0, %v6177_v7  ;;  %v14471_v45 = vadd.f32 %v5933_v57, %v5709_v2  ;;  %v6178_v50 = vpack.c.bf16 %v6146_v52, %v6145_v29  ;;  %v14479_v7 = vpack.c.bf16 %v6528_v0, %v6527_v8  ;;  %v6148_v52 = vld [vmem:[#allocation3 + $0xb0] sm:$0xff]  ;;  %v6147_v29 = vld [vmem:[#allocation3 + $0xa8] sm:$0xff] }
 0x605   : > { %11523 = vmatmul.mubr.msk.bf16.gmra.mrb[132].mxu1 %vm373_vm0, %v14464_v35  ;;  %11438 = vmatprep.mubr.msk.bf16.mxu0 %vm12096_vm1, %v15937_v43  ;;  %v6530_v0 = vld [vmem:[#allocation3 + $0xb1] sm:$0xff]  ;;  %v6529_v8 = vld [vmem:[#allocation3 + $0xa9] sm:$0xff] }
 0x606   : > { %16009 = vst [vmem:[#allocation49_spill] sm:$0xff] %v14471_v45  ;;  %11526 = vmatprep.mubr.msk.bf16.mxu1 %vm12096_vm1, %v15937_v43 }
 0x607   : > { %v5556_v9 = vpop.f32.mrb[228].mxu0 }
 0x608   : > { %v5938_v4 = vpop.f32.mrb[28].mxu1  ;;  %v5710_v46 = vadd.f32 %v5556_v9, %v14232_v56  ;;  %v11240_v21 = vpop.f32.mrb[229].mxu0 }
 0x609   : > { %v11328_v28 = vpop.f32.mrb[29].mxu1  ;;  %v5559_v44 = vpop.f32.mrb[230].mxu0 }
 0x60a   : > { %v5941_v20 = vpop.f32.mrb[30].mxu1  ;;  %v5711_v57 = vadd.f32 %v5559_v44, %v14234_v10  ;;  %v11241_v2 = vpop.f32.mrb[231].mxu0  ;;  %v14481_v45 = vadd.f32 %v5938_v4, %v5710_v46 }
 0x60b   : > { %v11329_v25 = vpop.f32.mrb[31].mxu1 }
 0x60c   : > { %11439 = vmatmul.mubr.msk.bf16.gmra.mrb[80].mxu0 %vm373_vm0, %v6178_v50  ;;  %v14486_v56 = vadd.f32 %v5941_v20, %v5711_v57  ;;  %v6179_v25 = vpack.c.bf16 %v6148_v52, %v6147_v29  ;;  %v14494_v50 = vpack.c.bf16 %v6530_v0, %v6529_v8  ;;  %v6150_v52 = vld [vmem:[#allocation3 + $0xc0] sm:$0xff]  ;;  %v6149_v29 = vld [vmem:[#allocation3 + $0xb8] sm:$0xff] }
 0x60d   : > { %11527 = vmatmul.mubr.msk.bf16.gmra.mrb[136].mxu1 %vm373_vm0, %v14479_v7  ;;  %11442 = vmatprep.mubr.msk.bf16.mxu0 %vm12096_vm1, %v15937_v43  ;;  %v6532_v0 = vld [vmem:[#allocation3 + $0xc1] sm:$0xff]  ;;  %v6531_v8 = vld [vmem:[#allocation3 + $0xb9] sm:$0xff] }
 0x60e   : > { %16010 = vst [vmem:[#allocation50_spill] sm:$0xff] %v14486_v56  ;;  %11530 = vmatprep.mubr.msk.bf16.mxu1 %vm12096_vm1, %v15937_v43 }
 0x60f   : > { %v5564_v10 = vpop.f32.mrb[232].mxu0 }
 0x610   : > { %v5946_v9 = vpop.f32.mrb[32].mxu1  ;;  %v5712_v4 = vadd.f32 %v5564_v10, %v14242_v39  ;;  %v11244_v46 = vpop.f32.mrb[233].mxu0 }
 0x611   : > { %v11332_v21 = vpop.f32.mrb[33].mxu1  ;;  %v5567_v28 = vpop.f32.mrb[234].mxu0 }
 0x612   : > { %v5949_v44 = vpop.f32.mrb[34].mxu1  ;;  %v5713_v20 = vadd.f32 %v5567_v28, %v14244_v37  ;;  %v11245_v57 = vpop.f32.mrb[235].mxu0  ;;  %v14496_v56 = vadd.f32 %v5946_v9, %v5712_v4 }
 0x613   : > { %v11333_v2 = vpop.f32.mrb[35].mxu1 }
 0x614   : > { %11443 = vmatmul.mubr.msk.bf16.gmra.mrb[84].mxu0 %vm373_vm0, %v6179_v25  ;;  %v14501_v39 = vadd.f32 %v5949_v44, %v5713_v20  ;;  %v6180_v2 = vpack.c.bf16 %v6150_v52, %v6149_v29  ;;  %v14509_v25 = vpack.c.bf16 %v6532_v0, %v6531_v8  ;;  %v6152_v52 = vld [vmem:[#allocation3 + $0xd0] sm:$0xff]  ;;  %v6151_v29 = vld [vmem:[#allocation3 + $0xc8] sm:$0xff] }
 0x615   : > { %11531 = vmatmul.mubr.msk.bf16.gmra.mrb[140].mxu1 %vm373_vm0, %v14494_v50  ;;  %11446 = vmatprep.mubr.msk.bf16.mxu0 %vm12096_vm1, %v15937_v43  ;;  %v6534_v0 = vld [vmem:[#allocation3 + $0xd1] sm:$0xff]  ;;  %v6533_v8 = vld [vmem:[#allocation3 + $0xc9] sm:$0xff] }
 0x616   : > { %16011 = vst [vmem:[#allocation51_spill] sm:$0xff] %v14501_v39  ;;  %11534 = vmatprep.mubr.msk.bf16.mxu1 %vm12096_vm1, %v15937_v43 }
 0x617   : > { %v5572_v37 = vpop.f32.mrb[236].mxu0 }
 0x618   : > { %v5954_v10 = vpop.f32.mrb[36].mxu1  ;;  %v5714_v9 = vadd.f32 %v5572_v37, %v14252_v22  ;;  %v11248_v4 = vpop.f32.mrb[237].mxu0 }
 0x619   : > { %v11336_v46 = vpop.f32.mrb[37].mxu1  ;;  %v5575_v21 = vpop.f32.mrb[238].mxu0 }
 0x61a   : > { %v5957_v28 = vpop.f32.mrb[38].mxu1  ;;  %v5715_v44 = vadd.f32 %v5575_v21, %v14254_v31  ;;  %v11249_v20 = vpop.f32.mrb[239].mxu0  ;;  %v14511_v39 = vadd.f32 %v5954_v10, %v5714_v9 }
 0x61b   : > { %v11337_v57 = vpop.f32.mrb[39].mxu1 }
 0x61c   : > { %16012 = vst [vmem:[#allocation52_spill] sm:$0xff] %v14511_v39  ;;  %11447 = vmatmul.mubr.msk.bf16.gmra.mrb[88].mxu0 %vm373_vm0, %v6180_v2  ;;  %v14516_v22 = vadd.f32 %v5957_v28, %v5715_v44  ;;  %v6181_v2 = vpack.c.bf16 %v6152_v52, %v6151_v29 }
 0x61d   : > { %11535 = vmatmul.mubr.msk.bf16.gmra.mrb[144].mxu1 %vm373_vm0, %v14509_v25  ;;  %11450 = vmatprep.mubr.msk.bf16.mxu0 %vm12096_vm1, %v15937_v43 }
 0x61e   : > { %16013 = vst [vmem:[#allocation53_spill] sm:$0xff] %v14516_v22  ;;  %11538 = vmatprep.mubr.msk.bf16.mxu1 %vm12096_vm1, %v15937_v43  ;;  %v14526_v22 = vpack.c.bf16 %v6534_v0, %v6533_v8 }
 0x61f   : > { %v5580_v31 = vpop.f32.mrb[240].mxu0 }
 0x620   : > { %v5962_v37 = vpop.f32.mrb[40].mxu1  ;;  %v5716_v10 = vadd.f32 %v5580_v31, %v14262_v40  ;;  %v11252_v9 = vpop.f32.mrb[241].mxu0  ;;  %v6154_v31 = vld [vmem:[#allocation3 + $0xe0] sm:$0xff] }
 0x621   : > { %v11340_v4 = vpop.f32.mrb[41].mxu1  ;;  %v5583_v46 = vpop.f32.mrb[242].mxu0 }
 0x622   : > { %v5965_v21 = vpop.f32.mrb[42].mxu1  ;;  %v14523_v28 = vadd.f32 %v5962_v37, %v5716_v10  ;;  %v5717_v44 = vadd.f32 %v5583_v46, %v14264_v26  ;;  %v11253_v20 = vpop.f32.mrb[243].mxu0  ;;  %v6536_v37 = vld [vmem:[#allocation3 + $0xe1] sm:$0xff]  ;;  %v6153_v46 = vld [vmem:[#allocation3 + $0xd8] sm:$0xff] }
 0x623   : > { %v11341_v57 = vpop.f32.mrb[43].mxu1 }
 0x624   : > { %v14528_v39 = vadd.f32 %v5965_v21, %v5717_v44  ;;  %11451 = vmatmul.mubr.msk.bf16.gmra.mrb[92].mxu0 %vm373_vm0, %v6181_v2  ;;  %v6535_v21 = vld [vmem:[#allocation3 + $0xd9] sm:$0xff]  ;;  %v6182_v57 = vpack.c.bf16 %v6154_v31, %v6153_v46 }
 0x625   : > { %11539 = vmatmul.mubr.msk.bf16.gmra.mrb[148].mxu1 %vm373_vm0, %v14526_v22  ;;  %11454 = vmatprep.mubr.msk.bf16.mxu0 %vm12096_vm1, %v15937_v43  ;;  %v14541_v2 = vpack.c.bf16 %v6536_v37, %v6535_v21 }
 0x626   : > { %16014 = vst [vmem:[#allocation54_spill] sm:$0xff] %v14528_v39  ;;  %11542 = vmatprep.mubr.msk.bf16.mxu1 %vm12096_vm1, %v15937_v43 }
 0x627   : > { %v5588_v40 = vpop.f32.mrb[244].mxu0 }
 0x628   : > { %v5970_v26 = vpop.f32.mrb[44].mxu1  ;;  %v5718_v52 = vadd.f32 %v5588_v40, %v14272_v38  ;;  %v11256_v0 = vpop.f32.mrb[245].mxu0  ;;  %v6156_v40 = vld [vmem:[#allocation3 + $0xf0] sm:$0xff] }
 0x629   : > { %v11344_v10 = vpop.f32.mrb[45].mxu1  ;;  %v5591_v9 = vpop.f32.mrb[246].mxu0 }
 0x62a   : > { %v5973_v4 = vpop.f32.mrb[46].mxu1  ;;  %v14538_v29 = vadd.f32 %v5970_v26, %v5718_v52  ;;  %v5719_v8 = vadd.f32 %v5591_v9, %v14274_v49  ;;  %v11257_v44 = vpop.f32.mrb[247].mxu0  ;;  %v6538_v26 = vld [vmem:[#allocation3 + $0xf1] sm:$0xff]  ;;  %v6155_v9 = vld [vmem:[#allocation3 + $0xe8] sm:$0xff] }
 0x62b   : > { %v11345_v20 = vpop.f32.mrb[47].mxu1 }
 0x62c   : > { %v14543_v39 = vadd.f32 %v5973_v4, %v5719_v8  ;;  %11455 = vmatmul.mubr.msk.bf16.gmra.mrb[96].mxu0 %vm373_vm0, %v6182_v57  ;;  %v6537_v4 = vld [vmem:[#allocation3 + $0xe9] sm:$0xff]  ;;  %v6183_v20 = vpack.c.bf16 %v6156_v40, %v6155_v9 }
 0x62d   : > { %11543 = vmatmul.mubr.msk.bf16.gmra.mrb[152].mxu1 %vm373_vm0, %v14541_v2  ;;  %11458 = vmatprep.mubr.msk.bf16.mxu0 %vm12096_vm1, %v15937_v43  ;;  %v14556_v57 = vpack.c.bf16 %v6538_v26, %v6537_v4 }
 0x62e   : > { %16015 = vst [vmem:[#allocation55_spill] sm:$0xff] %v14543_v39  ;;  %11546 = vmatprep.mubr.msk.bf16.mxu1 %vm12096_vm1, %v15937_v43 }
 0x62f   : > { %v5596_v38 = vpop.f32.mrb[248].mxu0 }
 0x630   : > { %v5978_v49 = vpop.f32.mrb[48].mxu1  ;;  %v5720_v31 = vadd.f32 %v5596_v38, %v14282_v55  ;;  %v11260_v37 = vpop.f32.mrb[249].mxu0  ;;  %v6158_v38 = vld [vmem:[#allocation3 + $0x100] sm:$0xff] }
 0x631   : > { %v11348_v52 = vpop.f32.mrb[49].mxu1  ;;  %v5599_v0 = vpop.f32.mrb[250].mxu0 }
 0x632   : > { %v5981_v10 = vpop.f32.mrb[50].mxu1  ;;  %v14553_v46 = vadd.f32 %v5978_v49, %v5720_v31  ;;  %v5721_v21 = vadd.f32 %v5599_v0, %v14284_v11  ;;  %v11261_v8 = vpop.f32.mrb[251].mxu0  ;;  %v6540_v49 = vld [vmem:[#allocation3 + $0x101] sm:$0xff]  ;;  %v6157_v0 = vld [vmem:[#allocation3 + $0xf8] sm:$0xff] }
 0x633   : > { %v11349_v44 = vpop.f32.mrb[51].mxu1 }
 0x634   : > { %v14558_v39 = vadd.f32 %v5981_v10, %v5721_v21  ;;  %11459 = vmatmul.mubr.msk.bf16.gmra.mrb[100].mxu0 %vm373_vm0, %v6183_v20  ;;  %v6539_v10 = vld [vmem:[#allocation3 + $0xf9] sm:$0xff]  ;;  %v6184_v44 = vpack.c.bf16 %v6158_v38, %v6157_v0 }
 0x635   : > { %11547 = vmatmul.mubr.msk.bf16.gmra.mrb[156].mxu1 %vm373_vm0, %v14556_v57  ;;  %11462 = vmatprep.mubr.msk.bf16.mxu0 %vm12096_vm1, %v15937_v43  ;;  %v14571_v20 = vpack.c.bf16 %v6540_v49, %v6539_v10 }
 0x636   : > { %16016 = vst [vmem:[#allocation56_spill] sm:$0xff] %v14558_v39  ;;  %11550 = vmatprep.mubr.msk.bf16.mxu1 %vm12096_vm1, %v15937_v43 }
 0x637   : > { %v5604_v55 = vpop.f32.mrb[252].mxu0 }
 0x638   : > { %v5986_v11 = vpop.f32.mrb[52].mxu1  ;;  %v5722_v40 = vadd.f32 %v5604_v55, %v14292_v18  ;;  %v11264_v26 = vpop.f32.mrb[253].mxu0  ;;  %v6160_v55 = vld [vmem:[#allocation3 + $0x110] sm:$0xff] }
 0x639   : > { %v11352_v31 = vpop.f32.mrb[53].mxu1  ;;  %v5607_v37 = vpop.f32.mrb[254].mxu0 }
 0x63a   : > { %v5989_v52 = vpop.f32.mrb[54].mxu1  ;;  %v14568_v9 = vadd.f32 %v5986_v11, %v5722_v40  ;;  %v5723_v4 = vadd.f32 %v5607_v37, %v14294_v12  ;;  %v11265_v21 = vpop.f32.mrb[255].mxu0  ;;  %v6542_v11 = vld [vmem:[#allocation3 + $0x111] sm:$0xff]  ;;  %v6159_v37 = vld [vmem:[#allocation3 + $0x108] sm:$0xff] }
 0x63b   : > { %v11353_v8 = vpop.f32.mrb[55].mxu1 }
 0x63c   : > { %v14573_v39 = vadd.f32 %v5989_v52, %v5723_v4  ;;  %11463 = vmatmul.mubr.msk.bf16.gmra.mrb[104].mxu0 %vm373_vm0, %v6184_v44  ;;  %v6541_v52 = vld [vmem:[#allocation3 + $0x109] sm:$0xff]  ;;  %v6185_v8 = vpack.c.bf16 %v6160_v55, %v6159_v37 }
 0x63d   : > { %11551 = vmatmul.mubr.msk.bf16.gmra.mrb[160].mxu1 %vm373_vm0, %v14571_v20  ;;  %11466 = vmatprep.mubr.msk.bf16.mxu0 %vm12096_vm1, %v15937_v43  ;;  %v14586_v44 = vpack.c.bf16 %v6542_v11, %v6541_v52 }
 0x63e   : > { %16017 = vst [vmem:[#allocation57_spill] sm:$0xff] %v14573_v39  ;;  %11554 = vmatprep.mubr.msk.bf16.mxu1 %vm12096_vm1, %v15937_v43 }
 0x63f   : > { %v5612_v18 = vpop.f32.mrb[0].mxu0 }
 0x640   : > { %v5994_v12 = vpop.f32.mrb[56].mxu1  ;;  %v5724_v38 = vadd.f32 %v5612_v18, %v14302_v60  ;;  %v11268_v49 = vpop.f32.mrb[1].mxu0  ;;  %v6162_v18 = vld [vmem:[#allocation3 + $0x120] sm:$0xff] }
 0x641   : > { %v11356_v40 = vpop.f32.mrb[57].mxu1  ;;  %v5615_v26 = vpop.f32.mrb[2].mxu0 }
 0x642   : > { %v5997_v31 = vpop.f32.mrb[58].mxu1  ;;  %v14583_v0 = vadd.f32 %v5994_v12, %v5724_v38  ;;  %v5725_v10 = vadd.f32 %v5615_v26, %v14304_v23  ;;  %v11269_v4 = vpop.f32.mrb[3].mxu0  ;;  %v6544_v12 = vld [vmem:[#allocation3 + $0x121] sm:$0xff]  ;;  %v6161_v26 = vld [vmem:[#allocation3 + $0x118] sm:$0xff] }
 0x643   : > { %v11357_v21 = vpop.f32.mrb[59].mxu1 }
 0x644   : > { %v14588_v39 = vadd.f32 %v5997_v31, %v5725_v10  ;;  %11467 = vmatmul.mubr.msk.bf16.gmra.mrb[108].mxu0 %vm373_vm0, %v6185_v8  ;;  %v6543_v31 = vld [vmem:[#allocation3 + $0x119] sm:$0xff]  ;;  %v6186_v21 = vpack.c.bf16 %v6162_v18, %v6161_v26 }
 0x645   : > { %11555 = vmatmul.mubr.msk.bf16.gmra.mrb[164].mxu1 %vm373_vm0, %v14586_v44  ;;  %11470 = vmatprep.mubr.msk.bf16.mxu0 %vm12096_vm1, %v15937_v43  ;;  %v14601_v8 = vpack.c.bf16 %v6544_v12, %v6543_v31 }
 0x646   : > { %16018 = vst [vmem:[#allocation58_spill] sm:$0xff] %v14588_v39  ;;  %11558 = vmatprep.mubr.msk.bf16.mxu1 %vm12096_vm1, %v15937_v43 }
 0x647   : > { %v5620_v60 = vpop.f32.mrb[4].mxu0 }
 0x648   : > { %v6002_v23 = vpop.f32.mrb[60].mxu1  ;;  %v5726_v55 = vadd.f32 %v5620_v60, %v14312_v47  ;;  %v11272_v11 = vpop.f32.mrb[5].mxu0  ;;  %v6164_v60 = vld [vmem:[#allocation3 + $0x130] sm:$0xff] }
 0x649   : > { %v11360_v38 = vpop.f32.mrb[61].mxu1  ;;  %v5623_v49 = vpop.f32.mrb[6].mxu0 }
 0x64a   : > { %v6005_v40 = vpop.f32.mrb[62].mxu1  ;;  %v14598_v37 = vadd.f32 %v6002_v23, %v5726_v55  ;;  %v5727_v52 = vadd.f32 %v5623_v49, %v14314_v30  ;;  %v11273_v10 = vpop.f32.mrb[7].mxu0  ;;  %v6546_v23 = vld [vmem:[#allocation3 + $0x131] sm:$0xff]  ;;  %v6163_v49 = vld [vmem:[#allocation3 + $0x128] sm:$0xff] }
 0x64b   : > { %v11361_v4 = vpop.f32.mrb[63].mxu1 }
 0x64c   : > { %v14603_v39 = vadd.f32 %v6005_v40, %v5727_v52  ;;  %11471 = vmatmul.mubr.msk.bf16.gmra.mrb[112].mxu0 %vm373_vm0, %v6186_v21  ;;  %v6545_v40 = vld [vmem:[#allocation3 + $0x129] sm:$0xff]  ;;  %v6187_v4 = vpack.c.bf16 %v6164_v60, %v6163_v49 }
 0x64d   : > { %11559 = vmatmul.mubr.msk.bf16.gmra.mrb[168].mxu1 %vm373_vm0, %v14601_v8  ;;  %11474 = vmatprep.mubr.msk.bf16.mxu0 %vm12096_vm1, %v15937_v43  ;;  %v14616_v21 = vpack.c.bf16 %v6546_v23, %v6545_v40 }
 0x64e   : > { %16019 = vst [vmem:[#allocation59_spill] sm:$0xff] %v14603_v39  ;;  %11562 = vmatprep.mubr.msk.bf16.mxu1 %vm12096_vm1, %v15937_v43 }
 0x64f   : > { %v5628_v47 = vpop.f32.mrb[8].mxu0 }
 0x650   : > { %v6010_v30 = vpop.f32.mrb[64].mxu1  ;;  %v5728_v18 = vadd.f32 %v5628_v47, %v14322_v3  ;;  %v11276_v12 = vpop.f32.mrb[9].mxu0  ;;  %v6166_v47 = vld [vmem:[#allocation3 + $0x140] sm:$0xff] }
 0x651   : > { %v11364_v55 = vpop.f32.mrb[65].mxu1  ;;  %v5631_v11 = vpop.f32.mrb[10].mxu0 }
 0x652   : > { %v6013_v38 = vpop.f32.mrb[66].mxu1  ;;  %v14613_v26 = vadd.f32 %v6010_v30, %v5728_v18  ;;  %v5729_v31 = vadd.f32 %v5631_v11, %v14324_v32  ;;  %v11277_v52 = vpop.f32.mrb[11].mxu0  ;;  %v6548_v30 = vld [vmem:[#allocation3 + $0x141] sm:$0xff]  ;;  %v6165_v11 = vld [vmem:[#allocation3 + $0x138] sm:$0xff] }
 0x653   : > { %v11365_v10 = vpop.f32.mrb[67].mxu1 }
 0x654   : > { %v14618_v39 = vadd.f32 %v6013_v38, %v5729_v31  ;;  %11475 = vmatmul.mubr.msk.bf16.gmra.mrb[116].mxu0 %vm373_vm0, %v6187_v4  ;;  %v6547_v38 = vld [vmem:[#allocation3 + $0x139] sm:$0xff]  ;;  %v6188_v10 = vpack.c.bf16 %v6166_v47, %v6165_v11 }
 0x655   : > { %11563 = vmatmul.mubr.msk.bf16.gmra.mrb[172].mxu1 %vm373_vm0, %v14616_v21  ;;  %11478 = vmatprep.mubr.msk.bf16.mxu0 %vm12096_vm1, %v15937_v43  ;;  %v14631_v4 = vpack.c.bf16 %v6548_v30, %v6547_v38 }
 0x656   : > { %16020 = vst [vmem:[#allocation60_spill] sm:$0xff] %v14618_v39  ;;  %11566 = vmatprep.mubr.msk.bf16.mxu1 %vm12096_vm1, %v15937_v43 }
 0x657   : > { %v5636_v3 = vpop.f32.mrb[12].mxu0 }
 0x658   : > { %v6018_v32 = vpop.f32.mrb[68].mxu1  ;;  %v5730_v60 = vadd.f32 %v5636_v3, %v14332_v42  ;;  %v11280_v23 = vpop.f32.mrb[13].mxu0  ;;  %v6168_v3 = vld [vmem:[#allocation3 + $0x150] sm:$0xff] }
 0x659   : > { %v11368_v18 = vpop.f32.mrb[69].mxu1  ;;  %v5639_v12 = vpop.f32.mrb[14].mxu0 }
 0x65a   : > { %v6021_v55 = vpop.f32.mrb[70].mxu1  ;;  %v14628_v49 = vadd.f32 %v6018_v32, %v5730_v60  ;;  %v5731_v40 = vadd.f32 %v5639_v12, %v14334_v14  ;;  %v11281_v31 = vpop.f32.mrb[15].mxu0  ;;  %v6550_v32 = vld [vmem:[#allocation3 + $0x151] sm:$0xff]  ;;  %v6167_v12 = vld [vmem:[#allocation3 + $0x148] sm:$0xff] }
 0x65b   : > { %v11369_v52 = vpop.f32.mrb[71].mxu1 }
 0x65c   : > { %v14633_v39 = vadd.f32 %v6021_v55, %v5731_v40  ;;  %11479 = vmatmul.mubr.msk.bf16.gmra.mrb[120].mxu0 %vm373_vm0, %v6188_v10  ;;  %v6549_v55 = vld [vmem:[#allocation3 + $0x149] sm:$0xff]  ;;  %v6189_v52 = vpack.c.bf16 %v6168_v3, %v6167_v12 }
 0x65d   : > { %11567 = vmatmul.mubr.msk.bf16.gmra.mrb[176].mxu1 %vm373_vm0, %v14631_v4  ;;  %11482 = vmatprep.mubr.msk.bf16.mxu0 %vm12096_vm1, %v15937_v43  ;;  %v14646_v10 = vpack.c.bf16 %v6550_v32, %v6549_v55 }
 0x65e   : > { %16021 = vst [vmem:[#allocation61_spill] sm:$0xff] %v14633_v39  ;;  %11570 = vmatprep.mubr.msk.bf16.mxu1 %vm12096_vm1, %v15937_v43 }
 0x65f   : > { %v5644_v42 = vpop.f32.mrb[16].mxu0 }
 0x660   : > { %v6026_v14 = vpop.f32.mrb[72].mxu1  ;;  %v5732_v47 = vadd.f32 %v5644_v42, %v14342_v34  ;;  %v11284_v30 = vpop.f32.mrb[17].mxu0  ;;  %v6169_v42 = vld [vmem:[#allocation3 + $0x158] sm:$0xf] }
 0x661   : > { %v11372_v60 = vpop.f32.mrb[73].mxu1  ;;  %v5647_v23 = vpop.f32.mrb[18].mxu0 }
 0x662   : > { %v6029_v18 = vpop.f32.mrb[74].mxu1  ;;  %v14643_v11 = vadd.f32 %v6026_v14, %v5732_v47  ;;  %v5733_v38 = vadd.f32 %v5647_v23, %v14344_v53  ;;  %v11285_v40 = vpop.f32.mrb[19].mxu0  ;;  %v6551_v14 = vld [vmem:[#allocation3 + $0x159] sm:$0xf] }
 0x663   : > { %v11373_v31 = vpop.f32.mrb[75].mxu1  ;;  %v6572_v40 = vpack.c.bf16 %v6551_v14, %v6551_v14 }
 0x664   : > { %v14648_v39 = vadd.f32 %v6029_v18, %v5733_v38  ;;  %11483 = vmatmul.mubr.msk.bf16.gmra.mrb[124].mxu0 %vm373_vm0, %v6189_v52  ;;  %v6190_v38 = vpack.c.bf16 %v6169_v42, %v6169_v42  ;;  %v7276_v52 = vld [vmem:[#allocation3 + $0x32] sm:$0xff] }
 0x665   : > { %11571 = vmatmul.mubr.msk.bf16.gmra.mrb[180].mxu1 %vm373_vm0, %v14646_v10  ;;  %11486 = vmatprep.mubr.msk.bf16.mxu0 %vm12096_vm1, %v15937_v43 }
 0x666   : > { %11574 = vmatprep.mubr.msk.bf16.mxu1 %vm12096_vm1, %v15937_v43 }
 0x667   : > { %v5652_v34 = vpop.f32.mrb[20].mxu0 }
 0x668   : > { %v6034_v53 = vpop.f32.mrb[76].mxu1  ;;  %v5734_v3 = vadd.f32 %v5652_v34, %v14352_v63  ;;  %v11288_v32 = vpop.f32.mrb[21].mxu0  ;;  %v6894_v63 = vld [vmem:[#allocation3 + $0x31] sm:$0xff] }
 0x669   : > { %v11376_v47 = vpop.f32.mrb[77].mxu1  ;;  %v5655_v30 = vpop.f32.mrb[22].mxu0  ;;  %v7275_v32 = vld [vmem:[#allocation3 + $0x2a] sm:$0xff] }
 0x66a   : > { %v6037_v60 = vpop.f32.mrb[78].mxu1  ;;  %v14658_v23 = vadd.f32 %v6034_v53, %v5734_v3  ;;  %v5735_v18 = vadd.f32 %v5655_v30, %v14354_v59  ;;  %v11289_v12 = vpop.f32.mrb[23].mxu0  ;;  %v6893_v3 = vld [vmem:[#allocation3 + $0x29] sm:$0xff] }
 0x66b   : > { %v11377_v55 = vpop.f32.mrb[79].mxu1 }
 0x66c   : > { %16022 = vst [vmem:[#allocation62_spill] sm:$0xff] %v14658_v23  ;;  %v14661_v31 = vadd.f32 %v6037_v60, %v5735_v18  ;;  %11487 = vmatmul.mubr.msk.bf16.gmra.mrb[128].mxu0 %vm373_vm0, %v6190_v38  ;;  %v6934_v60 = vpack.c.bf16 %v6894_v63, %v6893_v3  ;;  %v7316_v18 = vpack.c.bf16 %v7276_v52, %v7275_v32  ;;  %v7278_v63 = vld [vmem:[#allocation3 + $0x42] sm:$0xff] }
 0x66d   : > { %11575 = vmatmul.mubr.msk.bf16.gmra.mrb[184].mxu1 %vm373_vm0, %v6572_v40  ;;  %11582 = vmatprep.mubr.msk.bf16.mxu0 %vm12096_vm1, %v15937_v43 }
 0x66e   : > { %16023 = vst [vmem:[#allocation63_spill] sm:$0xff] %v14661_v31  ;;  %11670 = vmatprep.mubr.msk.bf16.mxu1 %vm12096_vm1, %v15937_v43  ;;  %v12028_v31 = vld [vmem:[%s15804_s6 + $0x80] sm:$0xff]  }
 0x66f   : > { %v5660_v34 = vpop.f32.mrb[24].mxu0 }
 0x670   : > { %v6042_v59 = vpop.f32.mrb[80].mxu1  ;;  %v5736_v53 = vadd.f32 %v5660_v34, %v14362_v54  ;;  %v11292_v42 = vpop.f32.mrb[25].mxu0 }
 0x671   : > { %v11380_v14 = vpop.f32.mrb[81].mxu1  ;;  %v5663_v47 = vpop.f32.mrb[26].mxu0 }
 0x672   : > { %v6045_v30 = vpop.f32.mrb[82].mxu1  ;;  %v14670_v12 = vadd.f32 %v6042_v59, %v5736_v53  ;;  %v5737_v55 = vadd.f32 %v5663_v47, %v14364_v6  ;;  %v11293_v38 = vpop.f32.mrb[27].mxu0  ;;  %v7277_v14 = vld [vmem:[#allocation3 + $0x3a] sm:$0xff] }
 0x673   : > { %v11381_v40 = vpop.f32.mrb[83].mxu1 }
 0x674   : > { %v14676_v23 = vadd.f32 %v6045_v30, %v5737_v55  ;;  %11583 = vmatmul.mubr.msk.bf16.vlgmr.msra.gmra.mrb[132].mxu0 %vm373_vm0, %v6934_v60  ;;  %v7317_v60 = vpack.c.bf16 %v7278_v63, %v7277_v14  ;;  %v7280_v55 = vld [vmem:[#allocation3 + $0x52] sm:$0xff]  ;;  %v7279_v63 = vld [vmem:[#allocation3 + $0x4a] sm:$0xff] }
 0x675   : > { %11671 = vmatmul.mubr.msk.bf16.vlgmr.msra.gmra.mrb[188].mxu1 %vm373_vm0, %v7316_v18  ;;  %11586 = vmatprep.mubr.msk.bf16.mxu0 %vm12096_vm1, %v15937_v43 }
 0x676   : > { %11674 = vmatprep.mubr.msk.bf16.mxu1 %vm12096_vm1, %v15937_v43  ;;  %11755 = vmatpush3.bf16.msra.mxu0 %v12028_v31 }
 0x677   : > { %v5668_v6 = vpop.f32.mrb[28].mxu0  ;;  %11756 = vmatprep.subr.bf16.mxu0 %v15937_v43 }
 0x678   : > { %v6050_v54 = vpop.f32.mrb[84].mxu1  ;;  %v5738_v52 = vadd.f32 %v5668_v6, %v14376_v62  ;;  %v11296_v34 = vpop.f32.mrb[29].mxu0 }
 0x679   : > { %v11384_v59 = vpop.f32.mrb[85].mxu1  ;;  %v5671_v53 = vpop.f32.mrb[30].mxu0 }
 0x67a   : > { %v6053_v42 = vpop.f32.mrb[86].mxu1  ;;  %v14686_v3 = vadd.f32 %v6050_v54, %v5738_v52  ;;  %v5739_v32 = vadd.f32 %v5671_v53, %v14378_v41  ;;  %v11297_v47 = vpop.f32.mrb[31].mxu0  ;;  %v7318_v53 = vpack.c.bf16 %v7280_v55, %v7279_v63  ;;  %v7284_v63 = vld [vmem:[#allocation3 + $0x72] sm:$0xff] }
 0x67b   : > { %v11385_v30 = vpop.f32.mrb[87].mxu1 }
 0x67c   : > { %v14689_v31 = vadd.f32 %v6053_v42, %v5739_v32  ;;  %11587 = vmatmul.mubr.msk.bf16.gmra.mrb[136].mxu0 %vm373_vm0, %v14390_v13  ;;  %v7282_v32 = vld [vmem:[#allocation3 + $0x62] sm:$0xff] }
 0x67d   : > { %11675 = vmatmul.mubr.msk.bf16.gmra.mrb[192].mxu1 %vm373_vm0, %v7317_v60  ;;  %11590 = vmatprep.mubr.msk.bf16.mxu0 %vm12096_vm1, %v15937_v43 }
 0x67e   : > { %11678 = vmatprep.mubr.msk.bf16.mxu1 %vm12096_vm1, %v15937_v43 }
 0x67f   : > { %v5676_v62 = vpop.f32.mrb[32].mxu0 }
 0x680   : > { %v6058_v18 = vpop.f32.mrb[88].mxu1  ;;  %v5740_v41 = vadd.f32 %v5676_v62, %v14386_v51  ;;  %v11300_v38 = vpop.f32.mrb[33].mxu0 }
 0x681   : > { %v11388_v40 = vpop.f32.mrb[89].mxu1  ;;  %v5679_v6 = vpop.f32.mrb[34].mxu0 }
 0x682   : > { %v6061_v54 = vpop.f32.mrb[90].mxu1  ;;  %v14699_v52 = vadd.f32 %v6058_v18, %v5740_v41  ;;  %v5741_v13 = vadd.f32 %v5679_v6, %v14388_v27  ;;  %v11301_v34 = vpop.f32.mrb[35].mxu0  ;;  %v7281_v18 = vld [vmem:[#allocation3 + $0x5a] sm:$0xff] }
 0x683   : > { %v11389_v59 = vpop.f32.mrb[91].mxu1  ;;  %v7319_v40 = vpack.c.bf16 %v7282_v32, %v7281_v18 }
 0x684   : > { %v14702_v42 = vadd.f32 %v6061_v54, %v5741_v13  ;;  %11591 = vmatmul.mubr.msk.bf16.gmra.mrb[140].mxu0 %vm373_vm0, %v14403_v58 }
 0x685   : > { %11679 = vmatmul.mubr.msk.bf16.gmra.mrb[196].mxu1 %vm373_vm0, %v7318_v53  ;;  %11594 = vmatprep.mubr.msk.bf16.mxu0 %vm12096_vm1, %v15937_v43 }
 0x686   : > { %11682 = vmatprep.mubr.msk.bf16.mxu1 %vm12096_vm1, %v15937_v43 }
 0x687   : > { %v5684_v51 = vpop.f32.mrb[36].mxu0 }
 0x688   : > { %v6066_v14 = vpop.f32.mrb[92].mxu1  ;;  %v5742_v27 = vadd.f32 %v5684_v51, %v14399_v1  ;;  %v11304_v47 = vpop.f32.mrb[37].mxu0  ;;  %v7283_v51 = vld [vmem:[#allocation3 + $0x6a] sm:$0xff] }
 0x689   : > { %v11392_v30 = vpop.f32.mrb[93].mxu1  ;;  %v5687_v60 = vpop.f32.mrb[38].mxu0  ;;  %v7320_v47 = vpack.c.bf16 %v7284_v63, %v7283_v51 }
 0x68a   : > { %v6069_v62 = vpop.f32.mrb[94].mxu1  ;;  %v14712_v55 = vadd.f32 %v6066_v14, %v5742_v27  ;;  %v5743_v58 = vadd.f32 %v5687_v60, %v14401_v19  ;;  %v11305_v41 = vpop.f32.mrb[39].mxu0 }
 0x68b   : > { %v11393_v38 = vpop.f32.mrb[95].mxu1 }
 0x68c   : > { %v14715_v6 = vadd.f32 %v6069_v62, %v5743_v58  ;;  %11595 = vmatmul.mubr.msk.bf16.gmra.mrb[144].mxu0 %vm373_vm0, %v14416_v5  ;;  %v7286_v62 = vld [vmem:[#allocation3 + $0x82] sm:$0xff] }
 0x68d   : > { %11683 = vmatmul.mubr.msk.bf16.gmra.mrb[200].mxu1 %vm373_vm0, %v7319_v40  ;;  %11598 = vmatprep.mubr.msk.bf16.mxu0 %vm12096_vm1, %v15937_v43  ;;  %v7285_v40 = vld [vmem:[#allocation3 + $0x7a] sm:$0xff] }
 0x68e   : > { %11686 = vmatprep.mubr.msk.bf16.mxu1 %vm12096_vm1, %v15937_v43  ;;  %v7321_v63 = vpack.c.bf16 %v7286_v62, %v7285_v40 }
 0x68f   : > { %v5692_v1 = vpop.f32.mrb[40].mxu0 }
 0x690   : > { %v6074_v54 = vpop.f32.mrb[96].mxu1  ;;  %v5744_v19 = vadd.f32 %v5692_v1, %v14412_v33  ;;  %v11308_v13 = vpop.f32.mrb[41].mxu0 }
 0x691   : > { %v11396_v34 = vpop.f32.mrb[97].mxu1  ;;  %v5695_v59 = vpop.f32.mrb[42].mxu0 }
 0x692   : > { %v6077_v53 = vpop.f32.mrb[98].mxu1  ;;  %v14725_v14 = vadd.f32 %v6074_v54, %v5744_v19  ;;  %v5745_v5 = vadd.f32 %v5695_v59, %v14414_v48  ;;  %v11309_v32 = vpop.f32.mrb[43].mxu0  ;;  %v12029_v19 = vld [vmem:[%s15804_s6 + $0x88] sm:$0xff]  }
 0x693   : > { %v11397_v27 = vpop.f32.mrb[99].mxu1  ;;  %11757 = vmatpush3.bf16.msra.mxu0 %v12029_v19  ;;  %v7288_v34 = vld [vmem:[#allocation3 + $0x92] sm:$0xff]  ;;  %v7287_v32 = vld [vmem:[#allocation3 + $0x8a] sm:$0xff] }
 0x694   : > { %v14728_v30 = vadd.f32 %v6077_v53, %v5745_v5  ;;  %11599 = vmatmul.mubr.msk.bf16.gmra.mrb[148].mxu0 %vm373_vm0, %v14431_v36  ;;  %v7322_v62 = vpack.c.bf16 %v7288_v34, %v7287_v32 }
 0x695   : > { %11687 = vmatmul.mubr.msk.bf16.gmra.mrb[204].mxu1 %vm373_vm0, %v7320_v47  ;;  %11602 = vmatprep.mubr.msk.bf16.mxu0 %vm12096_vm1, %v15937_v43 }
 0x696   : > { %11690 = vmatprep.mubr.msk.bf16.mxu1 %vm12096_vm1, %v15937_v43 }
 0x697   : > { %v5700_v33 = vpop.f32.mrb[44].mxu0 }
 0x698   : > { %v6082_v60 = vpop.f32.mrb[100].mxu1  ;;  %v5746_v48 = vadd.f32 %v5700_v33, %v14429_v15  ;;  %v11312_v18 = vpop.f32.mrb[45].mxu0 }
 0x699   : > { %v11400_v58 = vpop.f32.mrb[101].mxu1  ;;  %v5703_v41 = vpop.f32.mrb[46].mxu0 }
 0x69a   : > { %v6085_v38 = vpop.f32.mrb[102].mxu1  ;;  %v14738_v1 = vadd.f32 %v6082_v60, %v5746_v48  ;;  %v11313_v36 = vpop.f32.mrb[47].mxu0  ;;  %v7290_v58 = vld [vmem:[#allocation3 + $0xa2] sm:$0xff] }
 0x69b   : > { %v11401_v54 = vpop.f32.mrb[103].mxu1 }
 0x69c   : > { %11603 = vmatmul.mubr.msk.bf16.gmra.mrb[152].mxu0 %vm373_vm0, %v14449_v17  ;;  %v7289_v54 = vld [vmem:[#allocation3 + $0x9a] sm:$0xff] }
 0x69d   : > { %11691 = vmatmul.mubr.msk.bf16.gmra.mrb[208].mxu1 %vm373_vm0, %v7321_v63  ;;  %11606 = vmatprep.mubr.msk.bf16.mxu0 %vm12096_vm1, %v15937_v43  ;;  %v7323_v34 = vpack.c.bf16 %v7290_v58, %v7289_v54 }
 0x69e   : > { %11694 = vmatprep.mubr.msk.bf16.mxu1 %vm12096_vm1, %v15937_v43 }
 0x69f   : > { %v6304_v15 = vpop.f32.mrb[48].mxu0 }
 0x6a0   : > { %v6686_v13 = vpop.f32.mrb[104].mxu1  ;;  %v6470_v59 = vadd.f32 %v6304_v15, %v14451_v61  ;;  %v11408_v53 = vpop.f32.mrb[49].mxu0 }
 0x6a1   : > { %v11496_v17 = vpop.f32.mrb[105].mxu1  ;;  %v6307_v51 = vpop.f32.mrb[50].mxu0 }
 0x6a2   : > { %v6689_v5 = vpop.f32.mrb[106].mxu1  ;;  %v14751_v27 = vadd.f32 %v6686_v13, %v6470_v59  ;;  %v6471_v47 = vadd.f32 %v6307_v51, %v14456_v24  ;;  %v11409_v33 = vpop.f32.mrb[51].mxu0  ;;  %v7292_v17 = vld [vmem:[#allocation3 + $0xb2] sm:$0xff] }
 0x6a3   : > { %v11497_v60 = vpop.f32.mrb[107].mxu1 }
 0x6a4   : > { %v14754_v48 = vadd.f32 %v6689_v5, %v6471_v47  ;;  %11607 = vmatmul.mubr.msk.bf16.gmra.mrb[156].mxu0 %vm373_vm0, %v14464_v35  ;;  %v16024_v35 = vld [vmem:[#allocation49_spill] sm:$0xff]  ;;  %v7291_v60 = vld [vmem:[#allocation3 + $0xaa] sm:$0xff] }
 0x6a5   : > { %11695 = vmatmul.mubr.msk.bf16.gmra.mrb[212].mxu1 %vm373_vm0, %v7322_v62  ;;  %11610 = vmatprep.mubr.msk.bf16.mxu0 %vm12096_vm1, %v15937_v43 }
 0x6a6   : > { %11698 = vmatprep.mubr.msk.bf16.mxu1 %vm12096_vm1, %v15937_v43 }
 0x6a7   : > { %v6312_v61 = vpop.f32.mrb[52].mxu0 }
 0x6a8   : > { %v6694_v18 = vpop.f32.mrb[108].mxu1  ;;  %v6472_v24 = vadd.f32 %v6312_v61, %v14466_v16  ;;  %v11412_v41 = vpop.f32.mrb[53].mxu0 }
 0x6a9   : > { %v11500_v38 = vpop.f32.mrb[109].mxu1  ;;  %v6315_v40 = vpop.f32.mrb[54].mxu0 }
 0x6aa   : > { %v6697_v36 = vpop.f32.mrb[110].mxu1  ;;  %v14764_v63 = vadd.f32 %v6694_v18, %v6472_v24  ;;  %v6473_v19 = vadd.f32 %v6315_v40, %v16024_v35  ;;  %v11413_v15 = vpop.f32.mrb[55].mxu0  ;;  %v7324_v24 = vpack.c.bf16 %v7292_v17, %v7291_v60  ;;  %v7294_v40 = vld [vmem:[#allocation3 + $0xc2] sm:$0xff] }
 0x6ab   : > { %v11501_v13 = vpop.f32.mrb[111].mxu1 }
 0x6ac   : > { %v14767_v59 = vadd.f32 %v6697_v36, %v6473_v19  ;;  %11611 = vmatmul.mubr.msk.bf16.gmra.mrb[160].mxu0 %vm373_vm0, %v14479_v7  ;;  %v16025_v7 = vld [vmem:[#allocation50_spill] sm:$0xff] }
 0x6ad   : > { %11699 = vmatmul.mubr.msk.bf16.gmra.mrb[216].mxu1 %vm373_vm0, %v7323_v34  ;;  %11614 = vmatprep.mubr.msk.bf16.mxu0 %vm12096_vm1, %v15937_v43  ;;  %v7293_v13 = vld [vmem:[#allocation3 + $0xba] sm:$0xff] }
 0x6ae   : > { %11702 = vmatprep.mubr.msk.bf16.mxu1 %vm12096_vm1, %v15937_v43 }
 0x6af   : > { %v6320_v16 = vpop.f32.mrb[56].mxu0 }
 0x6b0   : > { %v6702_v53 = vpop.f32.mrb[112].mxu1  ;;  %v6474_v51 = vadd.f32 %v6320_v16, %v14481_v45  ;;  %v11416_v5 = vpop.f32.mrb[57].mxu0 }
 0x6b1   : > { %v11504_v32 = vpop.f32.mrb[113].mxu1  ;;  %v6323_v47 = vpop.f32.mrb[58].mxu0 }
 0x6b2   : > { %v6705_v33 = vpop.f32.mrb[114].mxu1  ;;  %v14777_v62 = vadd.f32 %v6702_v53, %v6474_v51  ;;  %v6475_v61 = vadd.f32 %v6323_v47, %v16025_v7  ;;  %v11417_v18 = vpop.f32.mrb[59].mxu0  ;;  %v7325_v51 = vpack.c.bf16 %v7294_v40, %v7293_v13  ;;  %v7296_v47 = vld [vmem:[#allocation3 + $0xd2] sm:$0xff]  ;;  %v7298_v13 = vld [vmem:[#allocation3 + $0xe2] sm:$0xff] }
 0x6b3   : > { %v11505_v58 = vpop.f32.mrb[115].mxu1 }
 0x6b4   : > { %v14780_v41 = vadd.f32 %v6705_v33, %v6475_v61  ;;  %11615 = vmatmul.mubr.msk.bf16.gmra.mrb[164].mxu0 %vm373_vm0, %v14494_v50  ;;  %v16026_v50 = vld [vmem:[#allocation51_spill] sm:$0xff]  ;;  %v16027_v33 = vld [vmem:[#allocation52_spill] sm:$0xff] }
 0x6b5   : > { %11703 = vmatmul.mubr.msk.bf16.gmra.mrb[220].mxu1 %vm373_vm0, %v7324_v24  ;;  %11618 = vmatprep.mubr.msk.bf16.mxu0 %vm12096_vm1, %v15937_v43  ;;  %v7295_v24 = vld [vmem:[#allocation3 + $0xca] sm:$0xff] }
 0x6b6   : > { %11706 = vmatprep.mubr.msk.bf16.mxu1 %vm12096_vm1, %v15937_v43 }
 0x6b7   : > { %v6328_v45 = vpop.f32.mrb[60].mxu0 }
 0x6b8   : > { %v6710_v38 = vpop.f32.mrb[116].mxu1  ;;  %v6476_v36 = vadd.f32 %v6328_v45, %v14496_v56  ;;  %v11420_v54 = vpop.f32.mrb[61].mxu0 }
 0x6b9   : > { %v11508_v35 = vpop.f32.mrb[117].mxu1  ;;  %v6331_v19 = vpop.f32.mrb[62].mxu0  ;;  %v7326_v54 = vpack.c.bf16 %v7296_v47, %v7295_v24 }
 0x6ba   : > { %v6713_v15 = vpop.f32.mrb[118].mxu1  ;;  %v14790_v34 = vadd.f32 %v6710_v38, %v6476_v36  ;;  %v6477_v16 = vadd.f32 %v6331_v19, %v16026_v50  ;;  %v11421_v53 = vpop.f32.mrb[63].mxu0 }
 0x6bb   : > { %v11509_v17 = vpop.f32.mrb[119].mxu1 }
 0x6bc   : > { %v14793_v5 = vadd.f32 %v6713_v15, %v6477_v16  ;;  %11619 = vmatmul.mubr.msk.bf16.gmra.mrb[168].mxu0 %vm373_vm0, %v14509_v25  ;;  %v16028_v25 = vld [vmem:[#allocation53_spill] sm:$0xff] }
 0x6bd   : > { %11707 = vmatmul.mubr.msk.bf16.gmra.mrb[224].mxu1 %vm373_vm0, %v7325_v51  ;;  %11622 = vmatprep.mubr.msk.bf16.mxu0 %vm12096_vm1, %v15937_v43 }
 0x6be   : > { %11710 = vmatprep.mubr.msk.bf16.mxu1 %vm12096_vm1, %v15937_v43 }
 0x6bf   : > { %v6336_v56 = vpop.f32.mrb[64].mxu0 }
 0x6c0   : > { %v6718_v32 = vpop.f32.mrb[120].mxu1  ;;  %v6478_v60 = vadd.f32 %v6336_v56, %v16027_v33  ;;  %v11424_v7 = vpop.f32.mrb[65].mxu0  ;;  %v7297_v56 = vld [vmem:[#allocation3 + $0xda] sm:$0xff] }
 0x6c1   : > { %v11512_v61 = vpop.f32.mrb[121].mxu1  ;;  %v6339_v18 = vpop.f32.mrb[66].mxu0  ;;  %v7327_v7 = vpack.c.bf16 %v7298_v13, %v7297_v56 }
 0x6c2   : > { %v6721_v58 = vpop.f32.mrb[122].mxu1  ;;  %v14803_v45 = vadd.f32 %v6718_v32, %v6478_v60  ;;  %v6479_v38 = vadd.f32 %v6339_v18, %v16028_v25  ;;  %v11425_v40 = vpop.f32.mrb[67].mxu0 }
 0x6c3   : > { %v11513_v36 = vpop.f32.mrb[123].mxu1 }
 0x6c4   : > { %v14806_v35 = vadd.f32 %v6721_v58, %v6479_v38  ;;  %11623 = vmatmul.mubr.msk.bf16.gmra.mrb[172].mxu0 %vm373_vm0, %v14526_v22  ;;  %v16029_v22 = vld [vmem:[#allocation54_spill] sm:$0xff]  ;;  %v7300_v58 = vld [vmem:[#allocation3 + $0xf2] sm:$0xff] }
 0x6c5   : > { %11711 = vmatmul.mubr.msk.bf16.gmra.mrb[228].mxu1 %vm373_vm0, %v7326_v54  ;;  %11626 = vmatprep.mubr.msk.bf16.mxu0 %vm12096_vm1, %v15937_v43  ;;  %v7299_v54 = vld [vmem:[#allocation3 + $0xea] sm:$0xff] }
 0x6c6   : > { %11714 = vmatprep.mubr.msk.bf16.mxu1 %vm12096_vm1, %v15937_v43 }
 0x6c7   : > { %v6344_v19 = vpop.f32.mrb[68].mxu0 }
 0x6c8   : > { %v6726_v15 = vpop.f32.mrb[124].mxu1  ;;  %v6480_v50 = vadd.f32 %v6344_v19, %v14523_v28  ;;  %v11428_v16 = vpop.f32.mrb[69].mxu0 }
 0x6c9   : > { %v11516_v53 = vpop.f32.mrb[125].mxu1  ;;  %v6347_v17 = vpop.f32.mrb[70].mxu0  ;;  %v7328_v16 = vpack.c.bf16 %v7300_v58, %v7299_v54 }
 0x6ca   : > { %v6729_v51 = vpop.f32.mrb[126].mxu1  ;;  %v14816_v32 = vadd.f32 %v6726_v15, %v6480_v50  ;;  %v6481_v47 = vadd.f32 %v6347_v17, %v16029_v22  ;;  %v11429_v33 = vpop.f32.mrb[71].mxu0 }
 0x6cb   : > { %v11517_v60 = vpop.f32.mrb[127].mxu1 }
 0x6cc   : > { %v14819_v61 = vadd.f32 %v6729_v51, %v6481_v47  ;;  %11627 = vmatmul.mubr.msk.bf16.gmra.mrb[176].mxu0 %vm373_vm0, %v14541_v2  ;;  %v16030_v2 = vld [vmem:[#allocation55_spill] sm:$0xff] }
 0x6cd   : > { %11715 = vmatmul.mubr.msk.bf16.gmra.mrb[232].mxu1 %vm373_vm0, %v7327_v7  ;;  %11630 = vmatprep.mubr.msk.bf16.mxu0 %vm12096_vm1, %v15937_v43  ;;  %v7302_v51 = vld [vmem:[#allocation3 + $0x102] sm:$0xff]  ;;  %v7301_v7 = vld [vmem:[#allocation3 + $0xfa] sm:$0xff] }
 0x6ce   : > { %11718 = vmatprep.mubr.msk.bf16.mxu1 %vm12096_vm1, %v15937_v43 }
 0x6cf   : > { %v6352_v28 = vpop.f32.mrb[72].mxu0 }
 0x6d0   : > { %v6734_v18 = vpop.f32.mrb[128].mxu1  ;;  %v6482_v24 = vadd.f32 %v6352_v28, %v14538_v29  ;;  %v11432_v25 = vpop.f32.mrb[73].mxu0 }
 0x6d1   : > { %v11520_v38 = vpop.f32.mrb[129].mxu1  ;;  %v6355_v40 = vpop.f32.mrb[74].mxu0  ;;  %v7329_v25 = vpack.c.bf16 %v7302_v51, %v7301_v7 }
 0x6d2   : > { %v6737_v36 = vpop.f32.mrb[130].mxu1  ;;  %v14829_v19 = vadd.f32 %v6734_v18, %v6482_v24  ;;  %v6483_v15 = vadd.f32 %v6355_v40, %v16030_v2  ;;  %v11433_v13 = vpop.f32.mrb[75].mxu0 }
 0x6d3   : > { %v11521_v50 = vpop.f32.mrb[131].mxu1 }
 0x6d4   : > { %v14832_v53 = vadd.f32 %v6737_v36, %v6483_v15  ;;  %11631 = vmatmul.mubr.msk.bf16.gmra.mrb[180].mxu0 %vm373_vm0, %v14556_v57  ;;  %v16031_v57 = vld [vmem:[#allocation56_spill] sm:$0xff] }
 0x6d5   : > { %11719 = vmatmul.mubr.msk.bf16.gmra.mrb[236].mxu1 %vm373_vm0, %v7328_v16  ;;  %11634 = vmatprep.mubr.msk.bf16.mxu0 %vm12096_vm1, %v15937_v43  ;;  %v7304_v36 = vld [vmem:[#allocation3 + $0x112] sm:$0xff]  ;;  %v7303_v16 = vld [vmem:[#allocation3 + $0x10a] sm:$0xff] }
 0x6d6   : > { %11722 = vmatprep.mubr.msk.bf16.mxu1 %vm12096_vm1, %v15937_v43 }
 0x6d7   : > { %v6360_v29 = vpop.f32.mrb[76].mxu0 }
 0x6d8   : > { %v6742_v17 = vpop.f32.mrb[132].mxu1  ;;  %v6484_v56 = vadd.f32 %v6360_v29, %v14553_v46  ;;  %v11436_v22 = vpop.f32.mrb[77].mxu0 }
 0x6d9   : > { %v11524_v47 = vpop.f32.mrb[133].mxu1  ;;  %v6363_v33 = vpop.f32.mrb[78].mxu0  ;;  %v7330_v22 = vpack.c.bf16 %v7304_v36, %v7303_v16 }
 0x6da   : > { %v6745_v60 = vpop.f32.mrb[134].mxu1  ;;  %v14842_v28 = vadd.f32 %v6742_v17, %v6484_v56  ;;  %v6485_v18 = vadd.f32 %v6363_v33, %v16031_v57  ;;  %v11437_v58 = vpop.f32.mrb[79].mxu0 }
 0x6db   : > { %v11525_v24 = vpop.f32.mrb[135].mxu1 }
 0x6dc   : > { %v14845_v38 = vadd.f32 %v6745_v60, %v6485_v18  ;;  %11635 = vmatmul.mubr.msk.bf16.gmra.mrb[184].mxu0 %vm373_vm0, %v14571_v20  ;;  %v16032_v20 = vld [vmem:[#allocation57_spill] sm:$0xff]  ;;  %v7306_v60 = vld [vmem:[#allocation3 + $0x122] sm:$0xff] }
 0x6dd   : > { %11723 = vmatmul.mubr.msk.bf16.gmra.mrb[240].mxu1 %vm373_vm0, %v7329_v25  ;;  %11638 = vmatprep.mubr.msk.bf16.mxu0 %vm12096_vm1, %v15937_v43  ;;  %v7305_v25 = vld [vmem:[#allocation3 + $0x11a] sm:$0xff] }
 0x6de   : > { %11726 = vmatprep.mubr.msk.bf16.mxu1 %vm12096_vm1, %v15937_v43 }
 0x6df   : > { %v6368_v46 = vpop.f32.mrb[80].mxu0 }
 0x6e0   : > { %v6750_v40 = vpop.f32.mrb[136].mxu1  ;;  %v6486_v54 = vadd.f32 %v6368_v46, %v14568_v9  ;;  %v11440_v2 = vpop.f32.mrb[81].mxu0 }
 0x6e1   : > { %v11528_v15 = vpop.f32.mrb[137].mxu1  ;;  %v6371_v13 = vpop.f32.mrb[82].mxu0  ;;  %v7331_v2 = vpack.c.bf16 %v7306_v60, %v7305_v25 }
 0x6e2   : > { %v6753_v50 = vpop.f32.mrb[138].mxu1  ;;  %v14855_v29 = vadd.f32 %v6750_v40, %v6486_v54  ;;  %v6487_v17 = vadd.f32 %v6371_v13, %v16032_v20  ;;  %v11441_v51 = vpop.f32.mrb[83].mxu0 }
 0x6e3   : > { %v11529_v56 = vpop.f32.mrb[139].mxu1 }
 0x6e4   : > { %v14858_v47 = vadd.f32 %v6753_v50, %v6487_v17  ;;  %11639 = vmatmul.mubr.msk.bf16.gmra.mrb[188].mxu0 %vm373_vm0, %v14586_v44  ;;  %v16033_v44 = vld [vmem:[#allocation58_spill] sm:$0xff]  ;;  %v7308_v50 = vld [vmem:[#allocation3 + $0x132] sm:$0xff] }
 0x6e5   : > { %11727 = vmatmul.mubr.msk.bf16.gmra.mrb[244].mxu1 %vm373_vm0, %v7330_v22  ;;  %11642 = vmatprep.mubr.msk.bf16.mxu0 %vm12096_vm1, %v15937_v43  ;;  %v7307_v22 = vld [vmem:[#allocation3 + $0x12a] sm:$0xff] }
 0x6e6   : > { %11730 = vmatprep.mubr.msk.bf16.mxu1 %vm12096_vm1, %v15937_v43 }
 0x6e7   : > { %v6376_v9 = vpop.f32.mrb[84].mxu0 }
 0x6e8   : > { %v6758_v33 = vpop.f32.mrb[140].mxu1  ;;  %v6488_v7 = vadd.f32 %v6376_v9, %v14583_v0  ;;  %v11444_v57 = vpop.f32.mrb[85].mxu0 }
 0x6e9   : > { %v11532_v18 = vpop.f32.mrb[141].mxu1  ;;  %v6379_v58 = vpop.f32.mrb[86].mxu0  ;;  %v7332_v57 = vpack.c.bf16 %v7308_v50, %v7307_v22 }
 0x6ea   : > { %v6761_v24 = vpop.f32.mrb[142].mxu1  ;;  %v14868_v46 = vadd.f32 %v6758_v33, %v6488_v7  ;;  %v6489_v40 = vadd.f32 %v6379_v58, %v16033_v44  ;;  %v11445_v36 = vpop.f32.mrb[87].mxu0 }
 0x6eb   : > { %v11533_v54 = vpop.f32.mrb[143].mxu1 }
 0x6ec   : > { %v14871_v15 = vadd.f32 %v6761_v24, %v6489_v40  ;;  %11643 = vmatmul.mubr.msk.bf16.gmra.mrb[192].mxu0 %vm373_vm0, %v14601_v8  ;;  %v16034_v8 = vld [vmem:[#allocation59_spill] sm:$0xff] }
 0x6ed   : > { %11731 = vmatmul.mubr.msk.bf16.gmra.mrb[248].mxu1 %vm373_vm0, %v7331_v2  ;;  %11646 = vmatprep.mubr.msk.bf16.mxu0 %vm12096_vm1, %v15937_v43  ;;  %v7310_v24 = vld [vmem:[#allocation3 + $0x142] sm:$0xff]  ;;  %v7309_v2 = vld [vmem:[#allocation3 + $0x13a] sm:$0xff] }
 0x6ee   : > { %11734 = vmatprep.mubr.msk.bf16.mxu1 %vm12096_vm1, %v15937_v43 }
 0x6ef   : > { %v6384_v0 = vpop.f32.mrb[88].mxu0 }
 0x6f0   : > { %v6766_v13 = vpop.f32.mrb[144].mxu1  ;;  %v6490_v16 = vadd.f32 %v6384_v0, %v14598_v37  ;;  %v11448_v20 = vpop.f32.mrb[89].mxu0 }
 0x6f1   : > { %v11536_v17 = vpop.f32.mrb[145].mxu1  ;;  %v6387_v51 = vpop.f32.mrb[90].mxu0  ;;  %v7333_v20 = vpack.c.bf16 %v7310_v24, %v7309_v2  ;;  %v6931_v2 = vld [vmem:[#allocation3 + $0x159] sm:$0xff] }
 0x6f2   : > { %v6769_v56 = vpop.f32.mrb[146].mxu1  ;;  %v14881_v9 = vadd.f32 %v6766_v13, %v6490_v16  ;;  %v6491_v33 = vadd.f32 %v6387_v51, %v16034_v8  ;;  %v11449_v60 = vpop.f32.mrb[91].mxu0 }
 0x6f3   : > { %v11537_v7 = vpop.f32.mrb[147].mxu1 }
 0x6f4   : > { %v14884_v18 = vadd.f32 %v6769_v56, %v6491_v33  ;;  %11647 = vmatmul.mubr.msk.bf16.gmra.mrb[196].mxu0 %vm373_vm0, %v14616_v21  ;;  %v16035_v21 = vld [vmem:[#allocation60_spill] sm:$0xff] }
 0x6f5   : > { %11735 = vmatmul.mubr.msk.bf16.gmra.mrb[252].mxu1 %vm373_vm0, %v7332_v57  ;;  %11650 = vmatprep.mubr.msk.bf16.mxu0 %vm12096_vm1, %v15937_v43  ;;  %v7312_v56 = vld [vmem:[#allocation3 + $0x152] sm:$0xff]  ;;  %v7311_v57 = vld [vmem:[#allocation3 + $0x14a] sm:$0xff] }
 0x6f6   : > { %11738 = vmatprep.mubr.msk.bf16.mxu1 %vm12096_vm1, %v15937_v43 }
 0x6f7   : > { %v6392_v37 = vpop.f32.mrb[92].mxu0 }
 0x6f8   : > { %v6774_v58 = vpop.f32.mrb[148].mxu1  ;;  %v6492_v25 = vadd.f32 %v6392_v37, %v14613_v26  ;;  %v11452_v44 = vpop.f32.mrb[93].mxu0 }
 0x6f9   : > { %v11540_v40 = vpop.f32.mrb[149].mxu1  ;;  %v6395_v36 = vpop.f32.mrb[94].mxu0  ;;  %v7334_v44 = vpack.c.bf16 %v7312_v56, %v7311_v57  ;;  %v7315_v57 = vld [vmem:[#allocation3 + $0x16a] sm:$0xf] }
 0x6fa   : > { %v6777_v54 = vpop.f32.mrb[150].mxu1  ;;  %v14894_v0 = vadd.f32 %v6774_v58, %v6492_v25  ;;  %v6493_v13 = vadd.f32 %v6395_v36, %v16035_v21  ;;  %v11453_v50 = vpop.f32.mrb[95].mxu0  ;;  %v7313_v21 = vld [vmem:[#allocation3 + $0x15a] sm:$0xff] }
 0x6fb   : > { %v11541_v16 = vpop.f32.mrb[151].mxu1 }
 0x6fc   : > { %v14897_v17 = vadd.f32 %v6777_v54, %v6493_v13  ;;  %11651 = vmatmul.mubr.msk.bf16.gmra.mrb[200].mxu0 %vm373_vm0, %v14631_v4  ;;  %v16036_v4 = vld [vmem:[#allocation61_spill] sm:$0xff]  ;;  %v7314_v13 = vld [vmem:[#allocation3 + $0x162] sm:$0xff] }
 0x6fd   : > { %11739 = vmatmul.mubr.msk.bf16.gmra.mrb[0].mxu1 %vm373_vm0, %v7333_v20  ;;  %11654 = vmatprep.mubr.msk.bf16.mxu0 %vm12096_vm1, %v15937_v43 }
 0x6fe   : > { %11742 = vmatprep.mubr.msk.bf16.mxu1 %vm12096_vm1, %v15937_v43 }
 0x6ff   : > { %v6400_v26 = vpop.f32.mrb[96].mxu0 }
 0x700   : > { %v6782_v51 = vpop.f32.mrb[152].mxu1  ;;  %v6494_v22 = vadd.f32 %v6400_v26, %v14628_v49  ;;  %v11456_v8 = vpop.f32.mrb[97].mxu0  ;;  %v6932_v49 = vld [vmem:[#allocation3 + $0x161] sm:$0xff] }
 0x701   : > { %v11544_v33 = vpop.f32.mrb[153].mxu1  ;;  %v6403_v60 = vpop.f32.mrb[98].mxu0 }
 0x702   : > { %v6785_v7 = vpop.f32.mrb[154].mxu1  ;;  %v14907_v37 = vadd.f32 %v6782_v51, %v6494_v22  ;;  %v6495_v58 = vadd.f32 %v6403_v60, %v16036_v4  ;;  %v11457_v24 = vpop.f32.mrb[99].mxu0  ;;  %v6953_v33 = vpack.c.bf16 %v6932_v49, %v6931_v2  ;;  %v7335_v60 = vpack.c.bf16 %v7314_v13, %v7313_v21  ;;  %v16038_v13 = vld [vmem:[#allocation63_spill] sm:$0xff] }
 0x703   : > { %v11545_v25 = vpop.f32.mrb[155].mxu1 }
 0x704   : > { %v14910_v40 = vadd.f32 %v6785_v7, %v6495_v58  ;;  %11655 = vmatmul.mubr.msk.bf16.gmra.mrb[204].mxu0 %vm373_vm0, %v14646_v10  ;;  %v16037_v58 = vld [vmem:[#allocation62_spill] sm:$0xff] }
 0x705   : > { %11743 = vmatmul.mubr.msk.bf16.gmra.mrb[4].mxu1 %vm373_vm0, %v7334_v44  ;;  %11658 = vmatprep.mubr.msk.bf16.mxu0 %vm12096_vm1, %v15937_v43 }
 0x706   : > { %11746 = vmatprep.mubr.msk.bf16.mxu1 %vm12096_vm1, %v15937_v43 }
 0x707   : > { %v6408_v36 = vpop.f32.mrb[100].mxu0 }
 0x708   : > { %v6790_v54 = vpop.f32.mrb[156].mxu1  ;;  %v6496_v50 = vadd.f32 %v6408_v36, %v14643_v11  ;;  %v11460_v16 = vpop.f32.mrb[101].mxu0  ;;  %v6933_v11 = vld [vmem:[#allocation3 + $0x169] sm:$0xf]  ;;  %v7336_v36 = vpack.c.bf16 %v7315_v57, %v7315_v57 }
 0x709   : > { %v11548_v20 = vpop.f32.mrb[157].mxu1  ;;  %v6411_v26 = vpop.f32.mrb[102].mxu0  ;;  %v6954_v49 = vpack.c.bf16 %v6933_v11, %v6933_v11  ;;  %v7657_v11 = vld [vmem:[#allocation3 + $0x2b] sm:$0xff] }
 0x70a   : > { %v6793_v10 = vpop.f32.mrb[158].mxu1  ;;  %v14920_v51 = vadd.f32 %v6790_v54, %v6496_v50  ;;  %v6497_v56 = vadd.f32 %v6411_v26, %v14648_v39  ;;  %v11461_v22 = vpop.f32.mrb[103].mxu0 }
 0x70b   : > { %v11549_v8 = vpop.f32.mrb[159].mxu1 }
 0x70c   : > { %v14923_v7 = vadd.f32 %v6793_v10, %v6497_v56  ;;  %11659 = vmatmul.mubr.msk.bf16.gmra.mrb[208].mxu0 %vm373_vm0, %v6953_v33  ;;  %v7658_v10 = vld [vmem:[#allocation3 + $0x33] sm:$0xff] }
 0x70d   : > { %11747 = vmatmul.mubr.msk.bf16.gmra.mrb[8].mxu1 %vm373_vm0, %v7335_v60  ;;  %11662 = vmatprep.mubr.msk.bf16.mxu0 %vm12096_vm1, %v15937_v43 }
 0x70e   : > { %11750 = vmatprep.mubr.msk.bf16.mxu1 %vm12096_vm1, %v15937_v43 }
 0x70f   : > { %v6416_v4 = vpop.f32.mrb[104].mxu0 }
 0x710   : > { %v6798_v39 = vpop.f32.mrb[160].mxu1  ;;  %v6498_v24 = vadd.f32 %v6416_v4, %v16037_v58  ;;  %v11464_v25 = vpop.f32.mrb[105].mxu0 }
 0x711   : > { %v11552_v44 = vpop.f32.mrb[161].mxu1  ;;  %v6419_v54 = vpop.f32.mrb[106].mxu0 }
 0x712   : > { %v6801_v2 = vpop.f32.mrb[162].mxu1  ;;  %v14932_v21 = vadd.f32 %v6798_v39, %v6498_v24  ;;  %v6499_v50 = vadd.f32 %v6419_v54, %v16038_v13  ;;  %v11465_v16 = vpop.f32.mrb[107].mxu0  ;;  %v7698_v39 = vpack.c.bf16 %v7658_v10, %v7657_v11  ;;  %v7660_v54 = vld [vmem:[#allocation3 + $0x43] sm:$0xff]  ;;  %v7659_v10 = vld [vmem:[#allocation3 + $0x3b] sm:$0xff] }
 0x713   : > { %v11553_v20 = vpop.f32.mrb[163].mxu1 }
 0x714   : > { %v14935_v26 = vadd.f32 %v6801_v2, %v6499_v50  ;;  %11663 = vmatmul.mubr.msk.bf16.gmra.mrb[212].mxu0 %vm373_vm0, %v6954_v49 }
 0x715   : > { %11751 = vmatmul.mubr.msk.bf16.gmra.mrb[12].mxu1 %vm373_vm0, %v7336_v36  ;;  %11758 = vmatprep.mubr.msk.bf16.mxu0 %vm12096_vm1, %v15937_v43 }
 0x717   : > { %v6424_v56 = vpop.f32.mrb[108].mxu0 }
 0x718   : > { %v6806_v22 = vpop.f32.mrb[164].mxu1  ;;  %v6500_v8 = vadd.f32 %v6424_v56, %v14670_v12  ;;  %v11468_v33 = vpop.f32.mrb[109].mxu0 }
 0x719   : > { %v11556_v60 = vpop.f32.mrb[165].mxu1  ;;  %v6427_v57 = vpop.f32.mrb[110].mxu0  ;;  %v7699_v33 = vpack.c.bf16 %v7660_v54, %v7659_v10 }
 0x71a   : > { %v6809_v4 = vpop.f32.mrb[166].mxu1  ;;  %v14942_v58 = vadd.f32 %v6806_v22, %v6500_v8  ;;  %v6501_v24 = vadd.f32 %v6427_v57, %v14676_v23  ;;  %v11469_v25 = vpop.f32.mrb[111].mxu0  ;;  %v7662_v57 = vld [vmem:[#allocation3 + $0x53] sm:$0xff] }
 0x71b   : > { %v11557_v44 = vpop.f32.mrb[167].mxu1 }
 0x71c   : > { %v14945_v49 = vadd.f32 %v6809_v4, %v6501_v24  ;;  %11759 = vmatmul.mubr.msk.bf16.vlgmr.msra.gmra.mrb[216].mxu0 %vm373_vm0, %v7698_v39 }
 0x71d   : > { %11762 = vmatprep.mubr.msk.bf16.mxu0 %vm12096_vm1, %v15937_v43 }
 0x71f   : > { %v6432_v12 = vpop.f32.mrb[112].mxu0 }
 0x720   : > { %v6814_v36 = vpop.f32.mrb[168].mxu1  ;;  %v6502_v2 = vadd.f32 %v6432_v12, %v14686_v3  ;;  %v11472_v13 = vpop.f32.mrb[113].mxu0 }
 0x721   : > { %v11560_v50 = vpop.f32.mrb[169].mxu1  ;;  %v6435_v16 = vpop.f32.mrb[114].mxu0 }
 0x722   : > { %v6817_v20 = vpop.f32.mrb[170].mxu1  ;;  %v14951_v23 = vadd.f32 %v6814_v36, %v6502_v2  ;;  %v6503_v56 = vadd.f32 %v6435_v16, %v14689_v31  ;;  %v11473_v22 = vpop.f32.mrb[115].mxu0  ;;  %v7661_v31 = vld [vmem:[#allocation3 + $0x4b] sm:$0xff] }
 0x723   : > { %v11561_v8 = vpop.f32.mrb[171].mxu1  ;;  %v7700_v13 = vpack.c.bf16 %v7662_v57, %v7661_v31 }
 0x724   : > { %v14954_v60 = vadd.f32 %v6817_v20, %v6503_v56  ;;  %11763 = vmatmul.mubr.msk.bf16.gmra.mrb[220].mxu0 %vm373_vm0, %v7699_v33  ;;  %v7664_v20 = vld [vmem:[#allocation3 + $0x63] sm:$0xff] }
 0x725   : > { %11766 = vmatprep.mubr.msk.bf16.mxu0 %vm12096_vm1, %v15937_v43 }
 0x727   : > { %v6440_v3 = vpop.f32.mrb[116].mxu0 }
 0x728   : > { %v6822_v11 = vpop.f32.mrb[172].mxu1  ;;  %v6504_v4 = vadd.f32 %v6440_v3, %v14699_v52  ;;  %v11476_v39 = vpop.f32.mrb[117].mxu0 }
 0x729   : > { %v11564_v24 = vpop.f32.mrb[173].mxu1  ;;  %v6443_v25 = vpop.f32.mrb[118].mxu0 }
 0x72a   : > { %v6825_v44 = vpop.f32.mrb[174].mxu1  ;;  %v14960_v12 = vadd.f32 %v6822_v11, %v6504_v4  ;;  %v6505_v36 = vadd.f32 %v6443_v25, %v14702_v42  ;;  %v11477_v54 = vpop.f32.mrb[119].mxu0  ;;  %v7663_v42 = vld [vmem:[#allocation3 + $0x5b] sm:$0xff] }
 0x72b   : > { %v11565_v2 = vpop.f32.mrb[175].mxu1  ;;  %v7701_v39 = vpack.c.bf16 %v7664_v20, %v7663_v42 }
 0x72c   : > { %v14963_v50 = vadd.f32 %v6825_v44, %v6505_v36  ;;  %11767 = vmatmul.mubr.msk.bf16.gmra.mrb[224].mxu0 %vm373_vm0, %v7700_v13  ;;  %v7666_v44 = vld [vmem:[#allocation3 + $0x73] sm:$0xff] }
 0x72d   : > { %11770 = vmatprep.mubr.msk.bf16.mxu0 %vm12096_vm1, %v15937_v43 }
 0x72f   : > { %v6448_v52 = vpop.f32.mrb[120].mxu0 }
 0x730   : > { %v6830_v16 = vpop.f32.mrb[176].mxu1  ;;  %v6506_v10 = vadd.f32 %v6448_v52, %v14712_v55  ;;  %v11480_v56 = vpop.f32.mrb[121].mxu0 }
 0x731   : > { %v11568_v22 = vpop.f32.mrb[177].mxu1  ;;  %v6451_v8 = vpop.f32.mrb[122].mxu0 }
 0x732   : > { %v6833_v33 = vpop.f32.mrb[178].mxu1  ;;  %v14969_v3 = vadd.f32 %v6830_v16, %v6506_v10  ;;  %v6507_v11 = vadd.f32 %v6451_v8, %v14715_v6  ;;  %v11481_v57 = vpop.f32.mrb[123].mxu0  ;;  %v7665_v6 = vld [vmem:[#allocation3 + $0x6b] sm:$0xff] }
 0x733   : > { %v11569_v4 = vpop.f32.mrb[179].mxu1  ;;  %v7702_v56 = vpack.c.bf16 %v7666_v44, %v7665_v6 }
 0x734   : > { %v14972_v24 = vadd.f32 %v6833_v33, %v6507_v11  ;;  %11771 = vmatmul.mubr.msk.bf16.gmra.mrb[228].mxu0 %vm373_vm0, %v7701_v39  ;;  %v7668_v33 = vld [vmem:[#allocation3 + $0x83] sm:$0xff] }
 0x735   : > { %11774 = vmatprep.mubr.msk.bf16.mxu0 %vm12096_vm1, %v15937_v43 }
 0x737   : > { %v6456_v55 = vpop.f32.mrb[124].mxu0 }
 0x738   : > { %v6838_v25 = vpop.f32.mrb[180].mxu1  ;;  %v6508_v31 = vadd.f32 %v6456_v55, %v14725_v14  ;;  %v11484_v36 = vpop.f32.mrb[125].mxu0 }
 0x739   : > { %v11572_v54 = vpop.f32.mrb[181].mxu1  ;;  %v6459_v2 = vpop.f32.mrb[126].mxu0 }
 0x73a   : > { %v6841_v13 = vpop.f32.mrb[182].mxu1  ;;  %v14978_v52 = vadd.f32 %v6838_v25, %v6508_v31  ;;  %v6509_v16 = vadd.f32 %v6459_v2, %v14728_v30  ;;  %v11485_v20 = vpop.f32.mrb[127].mxu0  ;;  %v7667_v30 = vld [vmem:[#allocation3 + $0x7b] sm:$0xff]  ;;  %v7670_v2 = vld [vmem:[#allocation3 + $0x93] sm:$0xff] }
 0x73b   : > { %v11573_v10 = vpop.f32.mrb[183].mxu1  ;;  %v7703_v31 = vpack.c.bf16 %v7668_v33, %v7667_v30 }
 0x73c   : > { %v14981_v22 = vadd.f32 %v6841_v13, %v6509_v16  ;;  %11775 = vmatmul.mubr.msk.bf16.gmra.mrb[232].mxu0 %vm373_vm0, %v7702_v56  ;;  %v7669_v10 = vld [vmem:[#allocation3 + $0x8b] sm:$0xff] }
 0x73d   : > { %11778 = vmatprep.mubr.msk.bf16.mxu0 %vm12096_vm1, %v15937_v43 }
 0x73f   : > { %v6464_v14 = vpop.f32.mrb[128].mxu0 }
 0x740   : > { %v6846_v8 = vpop.f32.mrb[184].mxu1  ;;  %v6510_v42 = vadd.f32 %v6464_v14, %v14738_v1  ;;  %v11488_v11 = vpop.f32.mrb[129].mxu0 }
 0x741   : > { %v11576_v57 = vpop.f32.mrb[185].mxu1  ;;  %v6467_v4 = vpop.f32.mrb[130].mxu0 }
 0x742   : > { %v6849_v39 = vpop.f32.mrb[186].mxu1  ;;  %v14987_v55 = vadd.f32 %v6846_v8, %v6510_v42  ;;  %v11489_v25 = vpop.f32.mrb[131].mxu0  ;;  %v7704_v42 = vpack.c.bf16 %v7670_v2, %v7669_v10  ;;  %v7672_v4 = vld [vmem:[#allocation3 + $0xa3] sm:$0xff] }
 0x743   : > { %v11577_v44 = vpop.f32.mrb[187].mxu1 }
 0x744   : > { %11779 = vmatmul.mubr.msk.bf16.gmra.mrb[236].mxu0 %vm373_vm0, %v7703_v31 }
 0x745   : > { %11782 = vmatprep.mubr.msk.bf16.mxu0 %vm12096_vm1, %v15937_v43 }
 0x747   : > { %v7068_v36 = vpop.f32.mrb[132].mxu0 }
 0x748   : > { %v7450_v54 = vpop.f32.mrb[188].mxu1  ;;  %v7234_v1 = vadd.f32 %v7068_v36, %v14751_v27  ;;  %v11584_v13 = vpop.f32.mrb[133].mxu0 }
 0x749   : > { %v11672_v6 = vpop.f32.mrb[189].mxu1  ;;  %v7071_v16 = vpop.f32.mrb[134].mxu0 }
 0x74a   : > { %v7453_v20 = vpop.f32.mrb[190].mxu1  ;;  %v14993_v56 = vadd.f32 %v7450_v54, %v7234_v1  ;;  %v7235_v14 = vadd.f32 %v7071_v16, %v14754_v48  ;;  %v11585_v8 = vpop.f32.mrb[135].mxu0  ;;  %v7671_v48 = vld [vmem:[#allocation3 + $0x9b] sm:$0xff] }
 0x74b   : > { %v11673_v33 = vpop.f32.mrb[191].mxu1  ;;  %v7705_v13 = vpack.c.bf16 %v7672_v4, %v7671_v48 }
 0x74c   : > { %v14996_v11 = vadd.f32 %v7453_v20, %v7235_v14  ;;  %11783 = vmatmul.mubr.msk.bf16.gmra.mrb[240].mxu0 %vm373_vm0, %v7704_v42  ;;  %v7674_v20 = vld [vmem:[#allocation3 + $0xb3] sm:$0xff] }
 0x74d   : > { %11786 = vmatprep.mubr.msk.bf16.mxu0 %vm12096_vm1, %v15937_v43 }
 0x74f   : > { %v7076_v27 = vpop.f32.mrb[136].mxu0 }
 0x750   : > { %v7458_v57 = vpop.f32.mrb[192].mxu1  ;;  %v7236_v39 = vadd.f32 %v7076_v27, %v14764_v63  ;;  %v11588_v30 = vpop.f32.mrb[137].mxu0 }
 0x751   : > { %v11676_v25 = vpop.f32.mrb[193].mxu1  ;;  %v7079_v44 = vpop.f32.mrb[138].mxu0 }
 0x752   : > { %v7461_v31 = vpop.f32.mrb[194].mxu1  ;;  %v15002_v36 = vadd.f32 %v7458_v57, %v7236_v39  ;;  %v7237_v54 = vadd.f32 %v7079_v44, %v14767_v59  ;;  %v11589_v2 = vpop.f32.mrb[139].mxu0  ;;  %v7673_v59 = vld [vmem:[#allocation3 + $0xab] sm:$0xff] }
 0x753   : > { %v11677_v1 = vpop.f32.mrb[195].mxu1  ;;  %v7706_v30 = vpack.c.bf16 %v7674_v20, %v7673_v59 }
 0x754   : > { %v15005_v6 = vadd.f32 %v7461_v31, %v7237_v54  ;;  %11787 = vmatmul.mubr.msk.bf16.gmra.mrb[244].mxu0 %vm373_vm0, %v7705_v13  ;;  %v7676_v31 = vld [vmem:[#allocation3 + $0xc3] sm:$0xff] }
 0x755   : > { %11790 = vmatprep.mubr.msk.bf16.mxu0 %vm12096_vm1, %v15937_v43 }
 0x757   : > { %v7084_v63 = vpop.f32.mrb[140].mxu0 }
 0x758   : > { %v7466_v16 = vpop.f32.mrb[196].mxu1  ;;  %v7238_v10 = vadd.f32 %v7084_v63, %v14777_v62  ;;  %v11592_v14 = vpop.f32.mrb[141].mxu0 }
 0x759   : > { %v11680_v8 = vpop.f32.mrb[197].mxu1  ;;  %v7087_v33 = vpop.f32.mrb[142].mxu0 }
 0x75a   : > { %v7469_v42 = vpop.f32.mrb[198].mxu1  ;;  %v15011_v27 = vadd.f32 %v7466_v16, %v7238_v10  ;;  %v7239_v57 = vadd.f32 %v7087_v33, %v14780_v41  ;;  %v11593_v4 = vpop.f32.mrb[143].mxu0  ;;  %v7675_v41 = vld [vmem:[#allocation3 + $0xbb] sm:$0xff] }
 0x75b   : > { %v11681_v39 = vpop.f32.mrb[199].mxu1  ;;  %v7707_v14 = vpack.c.bf16 %v7676_v31, %v7675_v41 }
 0x75c   : > { %v15014_v25 = vadd.f32 %v7469_v42, %v7239_v57  ;;  %11791 = vmatmul.mubr.msk.bf16.gmra.mrb[248].mxu0 %vm373_vm0, %v7706_v30  ;;  %v7678_v42 = vld [vmem:[#allocation3 + $0xd3] sm:$0xff] }
 0x75d   : > { %11794 = vmatprep.mubr.msk.bf16.mxu0 %vm12096_vm1, %v15937_v43 }
 0x75f   : > { %v7092_v62 = vpop.f32.mrb[144].mxu0 }
 0x760   : > { %v7474_v44 = vpop.f32.mrb[200].mxu1  ;;  %v7240_v48 = vadd.f32 %v7092_v62, %v14790_v34  ;;  %v11596_v54 = vpop.f32.mrb[145].mxu0 }
 0x761   : > { %v11684_v2 = vpop.f32.mrb[201].mxu1  ;;  %v7095_v1 = vpop.f32.mrb[146].mxu0 }
 0x762   : > { %v7477_v13 = vpop.f32.mrb[202].mxu1  ;;  %v15020_v63 = vadd.f32 %v7474_v44, %v7240_v48  ;;  %v7241_v16 = vadd.f32 %v7095_v1, %v14793_v5  ;;  %v11597_v20 = vpop.f32.mrb[147].mxu0  ;;  %v7677_v5 = vld [vmem:[#allocation3 + $0xcb] sm:$0xff]  ;;  %v7680_v1 = vld [vmem:[#allocation3 + $0xe3] sm:$0xff] }
 0x763   : > { %v11685_v10 = vpop.f32.mrb[203].mxu1  ;;  %v7708_v54 = vpack.c.bf16 %v7678_v42, %v7677_v5 }
 0x764   : > { %v15023_v8 = vadd.f32 %v7477_v13, %v7241_v16  ;;  %11795 = vmatmul.mubr.msk.bf16.gmra.mrb[252].mxu0 %vm373_vm0, %v7707_v14  ;;  %v7679_v14 = vld [vmem:[#allocation3 + $0xdb] sm:$0xff] }
 0x765   : > { %11798 = vmatprep.mubr.msk.bf16.mxu0 %vm12096_vm1, %v15937_v43 }
 0x767   : > { %v7100_v34 = vpop.f32.mrb[148].mxu0 }
 0x768   : > { %v7482_v33 = vpop.f32.mrb[204].mxu1  ;;  %v7242_v59 = vadd.f32 %v7100_v34, %v14803_v45  ;;  %v11600_v57 = vpop.f32.mrb[149].mxu0 }
 0x769   : > { %v11688_v4 = vpop.f32.mrb[205].mxu1  ;;  %v7103_v39 = vpop.f32.mrb[150].mxu0  ;;  %v7709_v57 = vpack.c.bf16 %v7680_v1, %v7679_v14 }
 0x76a   : > { %v7485_v30 = vpop.f32.mrb[206].mxu1  ;;  %v15029_v62 = vadd.f32 %v7482_v33, %v7242_v59  ;;  %v7243_v44 = vadd.f32 %v7103_v39, %v14806_v35  ;;  %v11601_v31 = vpop.f32.mrb[151].mxu0 }
 0x76b   : > { %v11689_v48 = vpop.f32.mrb[207].mxu1 }
 0x76c   : > { %v15044_v45 = vadd.f32 %v7485_v30, %v7243_v44  ;;  %11799 = vmatmul.mubr.msk.bf16.gmra.mrb[0].mxu0 %vm373_vm0, %v7708_v54  ;;  %v7682_v30 = vld [vmem:[#allocation3 + $0xf3] sm:$0xff] }
 0x76d   : > { %11802 = vmatprep.mubr.msk.bf16.mxu0 %vm12096_vm1, %v15937_v43 }
 0x76f   : > { %v7108_v35 = vpop.f32.mrb[152].mxu0 }
 0x770   : > { %v7490_v2 = vpop.f32.mrb[208].mxu1  ;;  %v7244_v13 = vadd.f32 %v7108_v35, %v14816_v32  ;;  %v11604_v41 = vpop.f32.mrb[153].mxu0 }
 0x771   : > { %v11692_v16 = vpop.f32.mrb[209].mxu1  ;;  %v7111_v20 = vpop.f32.mrb[154].mxu0 }
 0x772   : > { %v7493_v10 = vpop.f32.mrb[210].mxu1  ;;  %v15050_v34 = vadd.f32 %v7490_v2, %v7244_v13  ;;  %v7245_v33 = vadd.f32 %v7111_v20, %v14819_v61  ;;  %v11605_v42 = vpop.f32.mrb[155].mxu0  ;;  %v7681_v61 = vld [vmem:[#allocation3 + $0xeb] sm:$0xff] }
 0x773   : > { %v11693_v59 = vpop.f32.mrb[211].mxu1  ;;  %v7710_v41 = vpack.c.bf16 %v7682_v30, %v7681_v61 }
 0x774   : > { %v15053_v4 = vadd.f32 %v7493_v10, %v7245_v33  ;;  %11803 = vmatmul.mubr.msk.bf16.gmra.mrb[4].mxu0 %vm373_vm0, %v7709_v57  ;;  %v7684_v10 = vld [vmem:[#allocation3 + $0x103] sm:$0xff] }
 0x775   : > { %11806 = vmatprep.mubr.msk.bf16.mxu0 %vm12096_vm1, %v15937_v43 }
 0x777   : > { %v7116_v32 = vpop.f32.mrb[156].mxu0 }
 0x778   : > { %v7498_v39 = vpop.f32.mrb[212].mxu1  ;;  %v7246_v5 = vadd.f32 %v7116_v32, %v14829_v19  ;;  %v11608_v44 = vpop.f32.mrb[157].mxu0 }
 0x779   : > { %v11696_v31 = vpop.f32.mrb[213].mxu1  ;;  %v7119_v48 = vpop.f32.mrb[158].mxu0 }
 0x77a   : > { %v7501_v54 = vpop.f32.mrb[214].mxu1  ;;  %v15059_v35 = vadd.f32 %v7498_v39, %v7246_v5  ;;  %v7247_v2 = vadd.f32 %v7119_v48, %v14832_v53  ;;  %v11609_v1 = vpop.f32.mrb[159].mxu0  ;;  %v7683_v53 = vld [vmem:[#allocation3 + $0xfb] sm:$0xff] }
 0x77b   : > { %v11697_v13 = vpop.f32.mrb[215].mxu1  ;;  %v7711_v44 = vpack.c.bf16 %v7684_v10, %v7683_v53 }
 0x77c   : > { %v15062_v16 = vadd.f32 %v7501_v54, %v7247_v2  ;;  %11807 = vmatmul.mubr.msk.bf16.gmra.mrb[8].mxu0 %vm373_vm0, %v7710_v41  ;;  %v7686_v54 = vld [vmem:[#allocation3 + $0x113] sm:$0xff] }
 0x77d   : > { %11810 = vmatprep.mubr.msk.bf16.mxu0 %vm12096_vm1, %v15937_v43 }
 0x77f   : > { %v7124_v19 = vpop.f32.mrb[160].mxu0 }
 0x780   : > { %v7506_v20 = vpop.f32.mrb[216].mxu1  ;;  %v7248_v14 = vadd.f32 %v7124_v19, %v14842_v28  ;;  %v11612_v33 = vpop.f32.mrb[161].mxu0 }
 0x781   : > { %v11700_v42 = vpop.f32.mrb[217].mxu1  ;;  %v7127_v59 = vpop.f32.mrb[162].mxu0 }
 0x782   : > { %v7509_v57 = vpop.f32.mrb[218].mxu1  ;;  %v15068_v32 = vadd.f32 %v7506_v20, %v7248_v14  ;;  %v7249_v39 = vadd.f32 %v7127_v59, %v14845_v38  ;;  %v11613_v30 = vpop.f32.mrb[163].mxu0  ;;  %v7685_v38 = vld [vmem:[#allocation3 + $0x10b] sm:$0xff] }
 0x783   : > { %v11701_v5 = vpop.f32.mrb[219].mxu1  ;;  %v7712_v33 = vpack.c.bf16 %v7686_v54, %v7685_v38 }
 0x784   : > { %v15071_v31 = vadd.f32 %v7509_v57, %v7249_v39  ;;  %11811 = vmatmul.mubr.msk.bf16.gmra.mrb[12].mxu0 %vm373_vm0, %v7711_v44  ;;  %v7688_v57 = vld [vmem:[#allocation3 + $0x123] sm:$0xff] }
 0x785   : > { %11814 = vmatprep.mubr.msk.bf16.mxu0 %vm12096_vm1, %v15937_v43 }
 0x787   : > { %v7132_v28 = vpop.f32.mrb[164].mxu0 }
 0x788   : > { %v7514_v48 = vpop.f32.mrb[220].mxu1  ;;  %v7250_v61 = vadd.f32 %v7132_v28, %v14855_v29  ;;  %v11616_v2 = vpop.f32.mrb[165].mxu0 }
 0x789   : > { %v11704_v1 = vpop.f32.mrb[221].mxu1  ;;  %v7135_v13 = vpop.f32.mrb[166].mxu0 }
 0x78a   : > { %v7517_v41 = vpop.f32.mrb[222].mxu1  ;;  %v15077_v19 = vadd.f32 %v7514_v48, %v7250_v61  ;;  %v7251_v20 = vadd.f32 %v7135_v13, %v14858_v47  ;;  %v11617_v10 = vpop.f32.mrb[167].mxu0  ;;  %v7687_v47 = vld [vmem:[#allocation3 + $0x11b] sm:$0xff] }
 0x78b   : > { %v11705_v14 = vpop.f32.mrb[223].mxu1  ;;  %v7713_v2 = vpack.c.bf16 %v7688_v57, %v7687_v47 }
 0x78c   : > { %v15080_v42 = vadd.f32 %v7517_v41, %v7251_v20  ;;  %11815 = vmatmul.mubr.msk.bf16.gmra.mrb[16].mxu0 %vm373_vm0, %v7712_v33  ;;  %v7690_v41 = vld [vmem:[#allocation3 + $0x133] sm:$0xff] }
 0x78d   : > { %11818 = vmatprep.mubr.msk.bf16.mxu0 %vm12096_vm1, %v15937_v43 }
 0x78f   : > { %v7140_v29 = vpop.f32.mrb[168].mxu0 }
 0x790   : > { %v7522_v59 = vpop.f32.mrb[224].mxu1  ;;  %v7252_v53 = vadd.f32 %v7140_v29, %v14868_v46  ;;  %v11620_v39 = vpop.f32.mrb[169].mxu0 }
 0x791   : > { %v11708_v30 = vpop.f32.mrb[225].mxu1  ;;  %v7143_v5 = vpop.f32.mrb[170].mxu0 }
 0x792   : > { %v7525_v44 = vpop.f32.mrb[226].mxu1  ;;  %v15086_v28 = vadd.f32 %v7522_v59, %v7252_v53  ;;  %v7253_v48 = vadd.f32 %v7143_v5, %v14871_v15  ;;  %v11621_v54 = vpop.f32.mrb[171].mxu0  ;;  %v7689_v15 = vld [vmem:[#allocation3 + $0x12b] sm:$0xff] }
 0x793   : > { %v11709_v61 = vpop.f32.mrb[227].mxu1  ;;  %v7714_v39 = vpack.c.bf16 %v7690_v41, %v7689_v15 }
 0x794   : > { %v15089_v1 = vadd.f32 %v7525_v44, %v7253_v48  ;;  %11819 = vmatmul.mubr.msk.bf16.gmra.mrb[20].mxu0 %vm373_vm0, %v7713_v2  ;;  %v7692_v44 = vld [vmem:[#allocation3 + $0x143] sm:$0xff] }
 0x795   : > { %11822 = vmatprep.mubr.msk.bf16.mxu0 %vm12096_vm1, %v15937_v43 }
 0x797   : > { %v7148_v46 = vpop.f32.mrb[172].mxu0 }
 0x798   : > { %v7530_v13 = vpop.f32.mrb[228].mxu1  ;;  %v7254_v38 = vadd.f32 %v7148_v46, %v14881_v9  ;;  %v11624_v20 = vpop.f32.mrb[173].mxu0 }
 0x799   : > { %v11712_v10 = vpop.f32.mrb[229].mxu1  ;;  %v7151_v14 = vpop.f32.mrb[174].mxu0 }
 0x79a   : > { %v7533_v33 = vpop.f32.mrb[230].mxu1  ;;  %v15095_v29 = vadd.f32 %v7530_v13, %v7254_v38  ;;  %v7255_v59 = vadd.f32 %v7151_v14, %v14884_v18  ;;  %v11625_v57 = vpop.f32.mrb[175].mxu0  ;;  %v7691_v18 = vld [vmem:[#allocation3 + $0x13b] sm:$0xff] }
 0x79b   : > { %v11713_v53 = vpop.f32.mrb[231].mxu1  ;;  %v7715_v20 = vpack.c.bf16 %v7692_v44, %v7691_v18  ;;  %v7696_v18 = vld [vmem:[#allocation3 + $0x163] sm:$0xff] }
 0x79c   : > { %v15098_v30 = vadd.f32 %v7533_v33, %v7255_v59  ;;  %11823 = vmatmul.mubr.msk.bf16.gmra.mrb[24].mxu0 %vm373_vm0, %v7714_v39  ;;  %v7694_v33 = vld [vmem:[#allocation3 + $0x153] sm:$0xff] }
 0x79d   : > { %11826 = vmatprep.mubr.msk.bf16.mxu0 %vm12096_vm1, %v15937_v43 }
 0x79f   : > { %v7156_v9 = vpop.f32.mrb[176].mxu0 }
 0x7a0   : > { %v7538_v5 = vpop.f32.mrb[232].mxu1  ;;  %v7256_v47 = vadd.f32 %v7156_v9, %v14894_v0  ;;  %v11628_v48 = vpop.f32.mrb[177].mxu0 }
 0x7a1   : > { %v11716_v54 = vpop.f32.mrb[233].mxu1  ;;  %v7159_v61 = vpop.f32.mrb[178].mxu0 }
 0x7a2   : > { %v7541_v2 = vpop.f32.mrb[234].mxu1  ;;  %v15104_v46 = vadd.f32 %v7538_v5, %v7256_v47  ;;  %v7257_v13 = vadd.f32 %v7159_v61, %v14897_v17  ;;  %v11629_v41 = vpop.f32.mrb[179].mxu0  ;;  %v7693_v17 = vld [vmem:[#allocation3 + $0x14b] sm:$0xff] }
 0x7a3   : > { %v11717_v38 = vpop.f32.mrb[235].mxu1  ;;  %v7716_v48 = vpack.c.bf16 %v7694_v33, %v7693_v17 }
 0x7a4   : > { %v15107_v10 = vadd.f32 %v7541_v2, %v7257_v13  ;;  %11827 = vmatmul.mubr.msk.bf16.gmra.mrb[28].mxu0 %vm373_vm0, %v7715_v20  ;;  %v7695_v2 = vld [vmem:[#allocation3 + $0x15b] sm:$0xff] }
 0x7a5   : > { %11830 = vmatprep.mubr.msk.bf16.mxu0 %vm12096_vm1, %v15937_v43 }
 0x7a7   : > { %v7164_v0 = vpop.f32.mrb[180].mxu0 }
 0x7a8   : > { %v7546_v14 = vpop.f32.mrb[236].mxu1  ;;  %v7258_v15 = vadd.f32 %v7164_v0, %v14907_v37  ;;  %v11632_v59 = vpop.f32.mrb[181].mxu0 }
 0x7a9   : > { %v11720_v57 = vpop.f32.mrb[237].mxu1  ;;  %v7167_v53 = vpop.f32.mrb[182].mxu0  ;;  %v7717_v59 = vpack.c.bf16 %v7696_v18, %v7695_v2 }
 0x7aa   : > { %v7549_v39 = vpop.f32.mrb[238].mxu1  ;;  %v15113_v9 = vadd.f32 %v7546_v14, %v7258_v15  ;;  %v7259_v5 = vadd.f32 %v7167_v53, %v14910_v40  ;;  %v11633_v44 = vpop.f32.mrb[183].mxu0  ;;  %v7697_v53 = vld [vmem:[#allocation3 + $0x16b] sm:$0xf] }
 0x7ab   : > { %v11721_v47 = vpop.f32.mrb[239].mxu1 }
 0x7ac   : > { %v15116_v54 = vadd.f32 %v7549_v39, %v7259_v5  ;;  %11831 = vmatmul.mubr.msk.bf16.gmra.mrb[32].mxu0 %vm373_vm0, %v7716_v48  ;;  %v7718_v47 = vpack.c.bf16 %v7697_v53, %v7697_v53 }
 0x7ad   : > { %11834 = vmatprep.mubr.msk.bf16.mxu0 %vm12096_vm1, %v15937_v43 }
 0x7af   : > { %v7172_v37 = vpop.f32.mrb[184].mxu0 }
 0x7b0   : > { %v7554_v61 = vpop.f32.mrb[240].mxu1  ;;  %v7260_v13 = vadd.f32 %v7172_v37, %v14920_v51  ;;  %v11636_v41 = vpop.f32.mrb[185].mxu0 }
 0x7b1   : > { %v11724_v38 = vpop.f32.mrb[241].mxu1  ;;  %v7175_v20 = vpop.f32.mrb[186].mxu0 }
 0x7b2   : > { %v7557_v40 = vpop.f32.mrb[242].mxu1  ;;  %v15122_v0 = vadd.f32 %v7554_v61, %v7260_v13  ;;  %v7261_v14 = vadd.f32 %v7175_v20, %v14923_v7  ;;  %v11637_v33 = vpop.f32.mrb[187].mxu0 }
 0x7b3   : > { %v11725_v15 = vpop.f32.mrb[243].mxu1 }
 0x7b4   : > { %v15125_v57 = vadd.f32 %v7557_v40, %v7261_v14  ;;  %11835 = vmatmul.mubr.msk.bf16.gmra.mrb[36].mxu0 %vm373_vm0, %v7717_v59 }
 0x7b5   : > { %11838 = vmatprep.mubr.msk.bf16.mxu0 %vm12096_vm1, %v15937_v43 }
 0x7b7   : > { %v7180_v51 = vpop.f32.mrb[188].mxu0 }
 0x7b8   : > { %v7562_v39 = vpop.f32.mrb[244].mxu1  ;;  %v7262_v17 = vadd.f32 %v7180_v51, %v14932_v21  ;;  %v11640_v5 = vpop.f32.mrb[189].mxu0 }
 0x7b9   : > { %v11728_v44 = vpop.f32.mrb[245].mxu1  ;;  %v7183_v48 = vpop.f32.mrb[190].mxu0 }
 0x7ba   : > { %v7565_v7 = vpop.f32.mrb[246].mxu1  ;;  %v15131_v37 = vadd.f32 %v7562_v39, %v7262_v17  ;;  %v7263_v61 = vadd.f32 %v7183_v48, %v14935_v26  ;;  %v11641_v2 = vpop.f32.mrb[191].mxu0 }
 0x7bb   : > { %v11729_v18 = vpop.f32.mrb[247].mxu1 }
 0x7bc   : > { %v15134_v13 = vadd.f32 %v7565_v7, %v7263_v61  ;;  %11839 = vmatmul.mubr.msk.bf16.gmra.mrb[40].mxu0 %vm373_vm0, %v7718_v47 }
 0x7bf   : > { %v7188_v43 = vpop.f32.mrb[192].mxu0 }
 0x7c0   : > { %v7570_v41 = vpop.f32.mrb[248].mxu1  ;;  %v7264_v38 = vadd.f32 %v7188_v43, %v14942_v58  ;;  %v11644_v21 = vpop.f32.mrb[193].mxu0 }
 0x7c1   : > { %v11732_v20 = vpop.f32.mrb[249].mxu1  ;;  %v7191_v40 = vpop.f32.mrb[194].mxu0 }
 0x7c2   : > { %v7573_v14 = vpop.f32.mrb[250].mxu1  ;;  %v15138_v33 = vadd.f32 %v7570_v41, %v7264_v38  ;;  %v7265_v15 = vadd.f32 %v7191_v40, %v14945_v49  ;;  %v11645_v59 = vpop.f32.mrb[195].mxu0 }
 0x7c3   : > { %v11733_v26 = vpop.f32.mrb[251].mxu1 }
 0x7c4   : > { %v15141_v53 = vadd.f32 %v7573_v14, %v7265_v15 }
 0x7c7   : > { %v7196_v51 = vpop.f32.mrb[196].mxu0 }
 0x7c8   : > { %v7578_v39 = vpop.f32.mrb[252].mxu1  ;;  %v7266_v17 = vadd.f32 %v7196_v51, %v14951_v23  ;;  %v11648_v5 = vpop.f32.mrb[197].mxu0 }
 0x7c9   : > { %v11736_v44 = vpop.f32.mrb[253].mxu1  ;;  %v7199_v47 = vpop.f32.mrb[198].mxu0 }
 0x7ca   : > { %v7581_v58 = vpop.f32.mrb[254].mxu1  ;;  %v15144_v48 = vadd.f32 %v7578_v39, %v7266_v17  ;;  %v7267_v7 = vadd.f32 %v7199_v47, %v14954_v60  ;;  %v11649_v61 = vpop.f32.mrb[199].mxu0 }
 0x7cb   : > { %v11737_v2 = vpop.f32.mrb[255].mxu1 }
 0x7cc   : > { %v15147_v18 = vadd.f32 %v7581_v58, %v7267_v7 }
 0x7cf   : > { %v7204_v49 = vpop.f32.mrb[200].mxu0 }
 0x7d0   : > { %v7586_v43 = vpop.f32.mrb[0].mxu1  ;;  %v7268_v41 = vadd.f32 %v7204_v49, %v14960_v12  ;;  %v11652_v38 = vpop.f32.mrb[201].mxu0 }
 0x7d1   : > { %v11740_v21 = vpop.f32.mrb[1].mxu1  ;;  %v7207_v20 = vpop.f32.mrb[202].mxu0 }
 0x7d2   : > { %v7589_v23 = vpop.f32.mrb[2].mxu1  ;;  %v15150_v40 = vadd.f32 %v7586_v43, %v7268_v41  ;;  %v7269_v14 = vadd.f32 %v7207_v20, %v14963_v50  ;;  %v11653_v15 = vpop.f32.mrb[203].mxu0 }
 0x7d3   : > { %v11741_v59 = vpop.f32.mrb[3].mxu1 }
 0x7d4   : > { %v15153_v26 = vadd.f32 %v7589_v23, %v7269_v14 }
 0x7d6   : > { %16039 = vst [vmem:[#allocation49_spill] sm:$0xff] %v15153_v26 }
 0x7d7   : > { %v7212_v60 = vpop.f32.mrb[204].mxu0 }
 0x7d8   : > { %v7594_v51 = vpop.f32.mrb[4].mxu1  ;;  %v7270_v39 = vadd.f32 %v7212_v60, %v14969_v3  ;;  %v11656_v17 = vpop.f32.mrb[205].mxu0 }
 0x7d9   : > { %v11744_v5 = vpop.f32.mrb[5].mxu1  ;;  %v7215_v44 = vpop.f32.mrb[206].mxu0 }
 0x7da   : > { %v7597_v12 = vpop.f32.mrb[6].mxu1  ;;  %v15156_v47 = vadd.f32 %v7594_v51, %v7270_v39  ;;  %v7271_v58 = vadd.f32 %v7215_v44, %v14972_v24  ;;  %v11657_v7 = vpop.f32.mrb[207].mxu0 }
 0x7db   : > { %v11745_v61 = vpop.f32.mrb[7].mxu1 }
 0x7dc   : > { %16040 = vst [vmem:[#allocation50_spill] sm:$0xff] %v15156_v47  ;;  %v15159_v2 = vadd.f32 %v7597_v12, %v7271_v58  ;;  %v16071_v47 = vld [vmem:[#allocation32_spill] sm:$0xff] }
 0x7de   : > { %16041 = vst [vmem:[#allocation51_spill] sm:$0xff] %v15159_v2 }
 0x7df   : > { %v7220_v50 = vpop.f32.mrb[208].mxu0 }
 0x7e0   : > { %v7602_v49 = vpop.f32.mrb[8].mxu1  ;;  %v7272_v43 = vadd.f32 %v7220_v50, %v14978_v52  ;;  %v11660_v41 = vpop.f32.mrb[209].mxu0 }
 0x7e1   : > { %v11748_v38 = vpop.f32.mrb[9].mxu1  ;;  %v7223_v21 = vpop.f32.mrb[210].mxu0 }
 0x7e2   : > { %v7605_v3 = vpop.f32.mrb[10].mxu1  ;;  %v15162_v20 = vadd.f32 %v7602_v49, %v7272_v43  ;;  %v7273_v23 = vadd.f32 %v7223_v21, %v14981_v22  ;;  %v11661_v14 = vpop.f32.mrb[211].mxu0  ;;  %v15173_v22 = vld [vmem:[%s15805_s7] ss:$0 sm:$0xff] }
 0x7e3   : > { %v11749_v15 = vpop.f32.mrb[11].mxu1 }
 0x7e4   : > { %16042 = vst [vmem:[#allocation52_spill] sm:$0xff] %v15162_v20  ;;  %v15165_v59 = vadd.f32 %v7605_v3, %v7273_v23  ;;  %v16045_v3 = vld [vmem:[#allocation8_spill] sm:$0xff] }
 0x7e6   : > { %16043 = vst [vmem:[#allocation53_spill] sm:$0xff] %v15165_v59 }
 0x7e7   : > { %v7228_v24 = vpop.f32.mrb[212].mxu0 }
 0x7e8   : > { %v7610_v60 = vpop.f32.mrb[12].mxu1  ;;  %v7274_v51 = vadd.f32 %v7228_v24, %v14987_v55  ;;  %v11664_v39 = vpop.f32.mrb[213].mxu0  ;;  %v16046_v24 = vld [vmem:[#allocation10_spill] sm:$0xff] }
 0x7e9   : > { %v11752_v17 = vpop.f32.mrb[13].mxu1  ;;  %v7231_v5 = vpop.f32.mrb[214].mxu0 }
 0x7ea   : > { %v7613_v52 = vpop.f32.mrb[14].mxu1  ;;  %v15168_v44 = vadd.f32 %v7610_v60, %v7274_v51  ;;  %v11665_v12 = vpop.f32.mrb[215].mxu0 }
 0x7eb   : > { %v11753_v58 = vpop.f32.mrb[15].mxu1 }
 0x7ec   : > { %16044 = vst [vmem:[#allocation54_spill] sm:$0xff] %v15168_v44  ;;  %v16047_v58 = vld [vmem:[#allocation9_spill] sm:$0xff] }
 0x7ef   : > { %v7832_v7 = vpop.f32.mrb[216].mxu0 }
 0x7f0   : > { %v7998_v61 = vadd.f32 %v7832_v7, %v14993_v56  ;;  %v11760_v50 = vpop.f32.mrb[217].mxu0 }
 0x7f1   : > { %v7835_v49 = vpop.f32.mrb[218].mxu0 }
 0x7f2   : > { %v8046_v55 = vadd.f32 %v15173_v22, %v7998_v61  ;;  %v7999_v43 = vadd.f32 %v7835_v49, %v14996_v11  ;;  %v11761_v41 = vpop.f32.mrb[219].mxu0  ;;  %v16048_v49 = vld [vmem:[#allocation11_spill] sm:$0xff] }
 0x7f4   : > { %v8087_v38 = vmax.f32 %v8046_v55, 0.0  ;;  %v8047_v21 = vadd.f32 %v15173_v22, %v7999_v43 }
 0x7f6   : > { %v8128_v23 = vmul.f32 %v8087_v38, %v16045_v3  ;;  %v8088_v14 = vmax.f32 %v8047_v21, 0.0 }
 0x7f7   : > { %v7840_v15 = vpop.f32.mrb[220].mxu0 }
 0x7f8   : > { %8169 = vst.msk [vmem:[#allocation4 + $0x18] sm:$0xff] %vm389_vm3, %v8128_v23  ;;  %v8129_v60 = vmul.f32 %v8088_v14, %v16046_v24  ;;  %v8000_v56 = vadd.f32 %v7840_v15, %v15002_v36  ;;  %v11764_v51 = vpop.f32.mrb[221].mxu0  ;;  %v16049_v14 = vld [vmem:[#allocation12_spill] sm:$0xff] }
 0x7f9   : > { %v7843_v39 = vpop.f32.mrb[222].mxu0 }
 0x7fa   : > { %8170 = vst.msk [vmem:[#allocation4 + $0x20] sm:$0xff] %vm389_vm3, %v8129_v60  ;;  %v8048_v11 = vadd.f32 %v15173_v22, %v8000_v56  ;;  %v8001_v17 = vadd.f32 %v7843_v39, %v15005_v6  ;;  %v11765_v5 = vpop.f32.mrb[223].mxu0  ;;  %v16050_v56 = vld [vmem:[#allocation13_spill] sm:$0xff] }
 0x7fc   : > { %v8089_v52 = vmax.f32 %v8048_v11, 0.0  ;;  %v8049_v12 = vadd.f32 %v15173_v22, %v8001_v17 }
 0x7fe   : > { %v8130_v7 = vmul.f32 %v8089_v52, %v16047_v58  ;;  %v8090_v61 = vmax.f32 %v8049_v12, 0.0  ;;  %v16051_v58 = vld [vmem:[#allocation14_spill] sm:$0xff] }
 0x7ff   : > { %v7848_v50 = vpop.f32.mrb[224].mxu0 }
 0x800   : > { %8171 = vst.msk [vmem:[#allocation4 + $0x28] sm:$0xff] %vm389_vm3, %v8130_v7  ;;  %v8131_v36 = vmul.f32 %v8090_v61, %v16048_v49  ;;  %v8002_v55 = vadd.f32 %v7848_v50, %v15011_v27  ;;  %v11768_v43 = vpop.f32.mrb[225].mxu0  ;;  %v16052_v49 = vld [vmem:[#allocation15_spill] sm:$0xff] }
 0x801   : > { %v7851_v41 = vpop.f32.mrb[226].mxu0 }
 0x802   : > { %8172 = vst.msk [vmem:[#allocation4 + $0x30] sm:$0xff] %vm389_vm3, %v8131_v36  ;;  %v8050_v6 = vadd.f32 %v15173_v22, %v8002_v55  ;;  %v8003_v38 = vadd.f32 %v7851_v41, %v15014_v25  ;;  %v11769_v21 = vpop.f32.mrb[227].mxu0 }
 0x804   : > { %v8091_v3 = vmax.f32 %v8050_v6, 0.0  ;;  %v8051_v23 = vadd.f32 %v15173_v22, %v8003_v38 }
 0x806   : > { %v8132_v15 = vmul.f32 %v8091_v3, %v16049_v14  ;;  %v8092_v24 = vmax.f32 %v8051_v23, 0.0  ;;  %v16053_v3 = vld [vmem:[#allocation16_spill] sm:$0xff] }
 0x807   : > { %v7856_v60 = vpop.f32.mrb[228].mxu0 }
 0x808   : > { %8173 = vst.msk [vmem:[#allocation4 + $0x38] sm:$0xff] %vm389_vm3, %v8132_v15  ;;  %v8133_v27 = vmul.f32 %v8092_v24, %v16050_v56  ;;  %v8004_v51 = vadd.f32 %v7856_v60, %v15020_v63  ;;  %v11772_v39 = vpop.f32.mrb[229].mxu0 }
 0x809   : > { %v7859_v11 = vpop.f32.mrb[230].mxu0 }
 0x80a   : > { %8174 = vst.msk [vmem:[#allocation4 + $0x40] sm:$0xff] %vm389_vm3, %v8133_v27  ;;  %v8052_v25 = vadd.f32 %v15173_v22, %v8004_v51  ;;  %v8005_v17 = vadd.f32 %v7859_v11, %v15023_v8  ;;  %v11773_v5 = vpop.f32.mrb[231].mxu0  ;;  %v8832_v11 = vld [vmem:[%s15806_s8 + $0x8] sm:$0xff] }
 0x80b   : > { %8948 = vmatprep.mubr.f32.mxu1 %v8832_v11  ;;  %v16055_v5 = vld [vmem:[#allocation18_spill] sm:$0xff] }
 0x80c   : > { %v8093_v52 = vmax.f32 %v8052_v25, 0.0  ;;  %v8053_v12 = vadd.f32 %v15173_v22, %v8005_v17 }
 0x80e   : > { %v8134_v7 = vmul.f32 %v8093_v52, %v16051_v58  ;;  %v8094_v61 = vmax.f32 %v8053_v12, 0.0  ;;  %v16056_v58 = vld [vmem:[#allocation19_spill] sm:$0xff] }
 0x80f   : > { %v7864_v50 = vpop.f32.mrb[232].mxu0 }
 0x810   : > { %8175 = vst.msk [vmem:[#allocation4 + $0x48] sm:$0xff] %vm389_vm3, %v8134_v7  ;;  %v8135_v63 = vmul.f32 %v8094_v61, %v16052_v49  ;;  %v8006_v36 = vadd.f32 %v7864_v50, %v15029_v62  ;;  %v11776_v55 = vpop.f32.mrb[233].mxu0  ;;  %v16054_v62 = vld [vmem:[#allocation17_spill] sm:$0xff] }
 0x811   : > { %v7867_v43 = vpop.f32.mrb[234].mxu0  ;;  %v8210_v50 = vld [vmem:[#allocation4 + $0x5] sm:$0xff] }
 0x812   : > { %8176 = vst.msk [vmem:[#allocation4 + $0x50] sm:$0xff] %vm389_vm3, %v8135_v63  ;;  %v8054_v8 = vadd.f32 %v15173_v22, %v8006_v36  ;;  %v8007_v41 = vadd.f32 %v7867_v43, %v15044_v45  ;;  %v11777_v6 = vpop.f32.mrb[235].mxu0  ;;  %v8251_v49 = vld [vmem:[#allocation4 + $0x6] sm:$0xff] }
 0x813   : > { %v8292_v6 = vmax.f32 %v8210_v50, %v8251_v49  ;;  %v8337_v49 = vld [vmem:[#allocation4 + $0x27] sm:$0xff] }
 0x814   : > { %v8095_v38 = vmax.f32 %v8054_v8, 0.0  ;;  %v8055_v21 = vadd.f32 %v15173_v22, %v8007_v41  ;;  %v8211_v8 = vld [vmem:[#allocation4 + $0xd] sm:$0xff] }
 0x815   : > { %v8252_v41 = vld [vmem:[#allocation4 + $0xe] sm:$0xff] }
 0x816   : > { %v8136_v23 = vmul.f32 %v8095_v38, %v16053_v3  ;;  %v8096_v14 = vmax.f32 %v8055_v21, 0.0  ;;  %v8333_v3 = vld [vmem:[#allocation4 + $0x7] sm:$0xff] }
 0x817   : > { %v7872_v15 = vpop.f32.mrb[236].mxu0 }
 0x818   : > { %8177 = vst.msk [vmem:[#allocation4 + $0x58] sm:$0xff] %vm389_vm3, %v8136_v23  ;;  %v8137_v24 = vmul.f32 %v8096_v14, %v16054_v62  ;;  %v8008_v60 = vadd.f32 %v7872_v15, %v15050_v34  ;;  %v11780_v56 = vpop.f32.mrb[237].mxu0  ;;  %v8212_v23 = vld [vmem:[#allocation4 + $0x15] sm:$0xff] }
 0x819   : > { %v7875_v27 = vpop.f32.mrb[238].mxu0  ;;  %v16057_v14 = vld [vmem:[#allocation20_spill] sm:$0xff] }
 0x81a   : > { %8178 = vst.msk [vmem:[#allocation4 + $0x60] sm:$0xff] %vm389_vm3, %v8137_v24  ;;  %v8056_v45 = vadd.f32 %v15173_v22, %v8008_v60  ;;  %v8009_v51 = vadd.f32 %v7875_v27, %v15053_v4  ;;  %v11781_v39 = vpop.f32.mrb[239].mxu0  ;;  %v8293_v24 = vmax.f32 %v8211_v8, %v8252_v41  ;;  %v8213_v60 = vld [vmem:[#allocation4 + $0x1d] sm:$0xff]  ;;  %v8338_v8 = vld [vmem:[#allocation4 + $0x2f] sm:$0xff] }
 0x81b   : > { %v8254_v56 = vld [vmem:[#allocation4 + $0x1e] sm:$0xff]  ;;  %v8215_v41 = vld [vmem:[#allocation4 + $0x2d] sm:$0xff] }
 0x81c   : > { %v8097_v25 = vmax.f32 %v8056_v45, 0.0  ;;  %v8057_v17 = vadd.f32 %v15173_v22, %v8009_v51  ;;  %v8334_v45 = vld [vmem:[#allocation4 + $0xf] sm:$0xff]  ;;  %v8374_v51 = vmax.f32 %v8292_v6, %v8333_v3  ;;  %v16058_v39 = vld [vmem:[#allocation21_spill] sm:$0xff] }
 0x81d   : > { %v8375_v50 = vmax.f32 %v8293_v24, %v8334_v45  ;;  %v8256_v6 = vld [vmem:[#allocation4 + $0x2e] sm:$0xff]  ;;  %v8460_v24 = vld [vmem:[#allocation4 + $0x20] sm:$0xff]  ;;  %v8339_v45 = vld [vmem:[#allocation4 + $0x37] sm:$0xff] }
 0x81e   : > { %v8138_v52 = vmul.f32 %v8097_v25, %v16055_v5  ;;  %v8098_v34 = vmax.f32 %v8057_v17, 0.0  ;;  %v8335_v5 = vld [vmem:[#allocation4 + $0x17] sm:$0xff] }
 0x81f   : > { %v7880_v12 = vpop.f32.mrb[240].mxu0 }
 0x820   : > { %8179 = vst.msk [vmem:[#allocation4 + $0x68] sm:$0xff] %vm389_vm3, %v8138_v52  ;;  %v8139_v7 = vmul.f32 %v8098_v34, %v16056_v58  ;;  %v8010_v61 = vadd.f32 %v7880_v12, %v15059_v35  ;;  %v11784_v4 = vpop.f32.mrb[241].mxu0  ;;  %v8253_v35 = vld [vmem:[#allocation4 + $0x16] sm:$0xff]  ;;  %v8295_v34 = vmax.f32 %v8213_v60, %v8254_v56  ;;  %v8214_v12 = vld [vmem:[#allocation4 + $0x25] sm:$0xff] }
 0x821   : > { %v7883_v63 = vpop.f32.mrb[242].mxu0  ;;  %v8255_v58 = vld [vmem:[#allocation4 + $0x26] sm:$0xff] }
 0x822   : > { %8180 = vst.msk [vmem:[#allocation4 + $0x70] sm:$0xff] %vm389_vm3, %v8139_v7  ;;  %v8058_v36 = vadd.f32 %v15173_v22, %v8010_v61  ;;  %v8011_v55 = vadd.f32 %v7883_v63, %v15062_v16  ;;  %v11785_v43 = vpop.f32.mrb[243].mxu0  ;;  %v8294_v16 = vmax.f32 %v8212_v23, %v8253_v35  ;;  %v8336_v63 = vld [vmem:[#allocation4 + $0x1f] sm:$0xff]  ;;  %v16059_v23 = vld [vmem:[#allocation22_spill] sm:$0xff] }
 0x824   : > { %v8099_v38 = vmax.f32 %v8058_v36, 0.0  ;;  %v8059_v21 = vadd.f32 %v15173_v22, %v8011_v55  ;;  %v8418_v36 = vmax.f32 %v8374_v51, %v8335_v5  ;;  %v8376_v55 = vmax.f32 %v8294_v16, %v8335_v5  ;;  %v16060_v51 = vld [vmem:[#allocation23_spill] sm:$0xff] }
 0x825   : > { %v8216_v5 = vld [vmem:[#allocation4 + $0x35] sm:$0xff] }
 0x826   : > { %v8140_v15 = vmul.f32 %v8099_v38, %v16057_v14  ;;  %v8100_v62 = vmax.f32 %v8059_v21, 0.0  ;;  %v8296_v38 = vmax.f32 %v8214_v12, %v8255_v58  ;;  %v8377_v21 = vmax.f32 %v8295_v34, %v8336_v63  ;;  %v8541_v12 = vld [vmem:[#allocation4 + $0x19] sm:$0xff]  ;;  %v8542_v58 = vld [vmem:[#allocation4 + $0x21] sm:$0xff] }
 0x827   : > { %v7888_v27 = vpop.f32.mrb[244].mxu0  ;;  %v8420_v3 = vmax.f32 %v8376_v55, %v8337_v49  ;;  %v8544_v55 = vld [vmem:[#allocation4 + $0x31] sm:$0xff] }
 0x828   : > { %8181 = vst.msk [vmem:[#allocation4 + $0x78] sm:$0xff] %vm389_vm3, %v8140_v15  ;;  %v8141_v11 = vmul.f32 %v8100_v62, %v16058_v39  ;;  %v8012_v25 = vadd.f32 %v7888_v27, %v15068_v32  ;;  %v11788_v17 = vpop.f32.mrb[245].mxu0  ;;  %v8419_v15 = vmax.f32 %v8375_v50, %v8336_v63  ;;  %v8421_v56 = vmax.f32 %v8377_v21, %v8338_v8 }
 0x829   : > { %v7891_v52 = vpop.f32.mrb[246].mxu0  ;;  %v8297_v27 = vmax.f32 %v8215_v41, %v8256_v6  ;;  %v8378_v17 = vmax.f32 %v8296_v38, %v8337_v49 }
 0x82a   : > { %8182 = vst.msk [vmem:[#allocation4 + $0x80] sm:$0xff] %vm389_vm3, %v8141_v11  ;;  %v8060_v7 = vadd.f32 %v15173_v22, %v8012_v25  ;;  %v8013_v61 = vadd.f32 %v7891_v52, %v15071_v31  ;;  %v11789_v4 = vpop.f32.mrb[247].mxu0  ;;  %v8459_v31 = vld [vmem:[#allocation4 + $0x18] sm:$0xff]  ;;  %v8461_v25 = vld [vmem:[#allocation4 + $0x28] sm:$0xff] }
 0x82b   : > { %v8500_v60 = vmax.f32 %v8418_v36, %v8459_v31  ;;  %v8257_v52 = vld [vmem:[#allocation4 + $0x36] sm:$0xff]  ;;  %v8501_v36 = vmax.f32 %v8419_v15, %v8460_v24  ;;  %v8422_v49 = vmax.f32 %v8378_v17, %v8339_v45  ;;  %v8379_v6 = vmax.f32 %v8297_v27, %v8338_v8  ;;  %v8258_v27 = vld [vmem:[#allocation4 + $0x3e] sm:$0xff]  ;;  %v8667_v17 = vld [vmem:[#allocation4 + $0x2a] sm:$0xff] }
 0x82c   : > { %v8101_v43 = vmax.f32 %v8060_v7, 0.0  ;;  %v8061_v32 = vadd.f32 %v15173_v22, %v8013_v61  ;;  %v8543_v7 = vld [vmem:[#allocation4 + $0x29] sm:$0xff]  ;;  %v8502_v61 = vmax.f32 %v8420_v3, %v8461_v25  ;;  %v8298_v38 = vmax.f32 %v8216_v5, %v8257_v52  ;;  %v8463_v24 = vld [vmem:[#allocation4 + $0x38] sm:$0xff] }
 0x82d   : > { %v8217_v8 = vld [vmem:[#allocation4 + $0x3d] sm:$0xff]  ;;  %v8668_v5 = vld [vmem:[#allocation4 + $0x32] sm:$0xff] }
 0x82e   : > { %v8142_v35 = vmul.f32 %v8101_v43, %v16059_v23  ;;  %v8102_v14 = vmax.f32 %v8061_v32, 0.0  ;;  %v15245_v43 = vld [vmem:[#allocation4 + $0x3f] sm:$0xff]  ;;  %v8582_v32 = vmax.f32 %v8500_v60, %v8541_v12  ;;  %v8583_v23 = vmax.f32 %v8501_v36, %v8542_v58 }
 0x82f   : > { %v7896_v62 = vpop.f32.mrb[248].mxu0  ;;  %v8423_v15 = vmax.f32 %v8379_v6, %v15245_v43  ;;  %v8464_v12 = vld [vmem:[#allocation4 + $0x40] sm:$0xff]  ;;  %v8380_v58 = vmax.f32 %v8298_v38, %v8339_v45  ;;  %v8299_v45 = vmax.f32 %v8217_v8, %v8258_v27 }
 0x830   : > { %8183 = vst.msk [vmem:[#allocation4 + $0x88] sm:$0xff] %vm389_vm3, %v8142_v35  ;;  %v8143_v16 = vmul.f32 %v8102_v14, %v16060_v51  ;;  %v8014_v39 = vadd.f32 %v7896_v62, %v15077_v19  ;;  %v11792_v11 = vpop.f32.mrb[249].mxu0  ;;  %v8462_v19 = vld [vmem:[#allocation4 + $0x30] sm:$0xff]  ;;  %v8545_v35 = vld [vmem:[#allocation4 + $0x39] sm:$0xff]  ;;  %v8546_v14 = vld [vmem:[#allocation4 + $0x41] sm:$0xff]  ;;  %v15248_v31 = vmax.f32 %v8582_v32, %v8543_v7  ;;  %v8627_v60 = vmax.f32 %v8583_v23, %v8544_v55 }
 0x831   : > { %v7899_v34 = vpop.f32.mrb[250].mxu0  ;;  %v8503_v41 = vmax.f32 %v8421_v56, %v8462_v19  ;;  %v16061_v51 = vld [vmem:[#allocation24_spill] sm:$0xff]  ;;  %v8504_v56 = vmax.f32 %v8422_v49, %v8463_v24  ;;  %v15252_v11 = vld [vmem:[#allocation4 + $0x47] sm:$0xff] }
 0x832   : > { %8184 = vst.msk [vmem:[#allocation4 + $0x90] sm:$0xff] %vm389_vm3, %v8143_v16  ;;  %v8062_v4 = vadd.f32 %v15173_v22, %v8014_v39  ;;  %v8015_v50 = vadd.f32 %v7899_v34, %v15080_v42  ;;  %v11793_v63 = vpop.f32.mrb[251].mxu0  ;;  %v8584_v42 = vmax.f32 %v8502_v61, %v8543_v7  ;;  %v16062_v7 = vld [vmem:[#allocation25_spill] sm:$0xff]  ;;  %v8708_v6 = vmax.f32 %v15248_v31, %v8667_v17  ;;  %v15264_v24 = vld [vmem:[#allocation4 + $0x51] sm:$0xff] }
 0x833   : > { %v8585_v62 = vmax.f32 %v8503_v41, %v8544_v55  ;;  %v8669_v63 = vld [vmem:[#allocation4 + $0x3a] sm:$0xff]  ;;  %v8670_v36 = vld [vmem:[#allocation4 + $0x42] sm:$0xff]  ;;  %v8424_v38 = vmax.f32 %v8380_v58, %v15252_v11  ;;  %v8749_v31 = vld [vmem:[#allocation4 + $0x2b] sm:$0xff] }
 0x834   : > { %v8103_v21 = vmax.f32 %v8062_v4, 0.0  ;;  %v8063_v3 = vadd.f32 %v15173_v22, %v8015_v50  ;;  %v8628_v52 = vmax.f32 %v8584_v42, %v8545_v35  ;;  %v8218_v55 = vld [vmem:[#allocation4 + $0x45] sm:$0xff] }
 0x835   : > { %v8629_v34 = vmax.f32 %v8585_v62, %v8546_v14  ;;  %v8259_v19 = vld [vmem:[#allocation4 + $0x46] sm:$0xff]  ;;  %v8709_v62 = vmax.f32 %v8627_v60, %v8668_v5  ;;  %v8751_v5 = vld [vmem:[#allocation4 + $0x3b] sm:$0xff] }
 0x836   : > { %v8144_v16 = vmul.f32 %v8103_v21, %v16061_v51  ;;  %v8104_v39 = vmax.f32 %v8063_v3, 0.0  ;;  %v8505_v21 = vmax.f32 %v8423_v15, %v8464_v12  ;;  %v15258_v3 = vld [vmem:[#allocation4 + $0x49] sm:$0xff]  ;;  %v8586_v51 = vmax.f32 %v8504_v56, %v8545_v35 }
 0x837   : > { %v7904_v25 = vpop.f32.mrb[252].mxu0  ;;  %v8226_v32 = vld [vmem:[#allocation4 + $0x85] sm:$0xff]  ;;  %v8710_v15 = vmax.f32 %v8628_v52, %v8669_v63  ;;  %v8300_v8 = vmax.f32 %v8218_v55, %v8259_v19  ;;  %v8381_v52 = vmax.f32 %v8299_v45, %v15245_v43  ;;  %v15275_v19 = vmax.f32 %v8708_v6, %v8749_v31  ;;  %v16064_v6 = vld [vmem:[#allocation27_spill] sm:$0xff] }
 0x838   : > { %8185 = vst.msk [vmem:[#allocation4 + $0x98] sm:$0xff] %vm389_vm3, %v8144_v16  ;;  %v8145_v61 = vmul.f32 %v8104_v39, %v16062_v7  ;;  %v8016_v4 = vadd.f32 %v7904_v25, %v15086_v28  ;;  %v11796_v50 = vpop.f32.mrb[253].mxu0  ;;  %v8267_v41 = vld [vmem:[#allocation4 + $0x86] sm:$0xff]  ;;  %v8260_v39 = vld [vmem:[#allocation4 + $0x4e] sm:$0xff]  ;;  %v8711_v25 = vmax.f32 %v8629_v34, %v8670_v36  ;;  %v8587_v17 = vmax.f32 %v8505_v21, %v8546_v14 }
 0x839   : > { %v7907_v49 = vpop.f32.mrb[254].mxu0  ;;  %v8219_v16 = vld [vmem:[#allocation4 + $0x4d] sm:$0xff]  ;;  %v8308_v58 = vmax.f32 %v8226_v32, %v8267_v41  ;;  %v15279_v41 = vld [vmem:[#allocation4 + $0x57] sm:$0xff] }
 0x83a   : > { %8186 = vst.msk [vmem:[#allocation4 + $0xa0] sm:$0xff] %vm389_vm3, %v8145_v61  ;;  %v8064_v28 = vadd.f32 %v15173_v22, %v8016_v4  ;;  %v8017_v23 = vadd.f32 %v7907_v49, %v15089_v1  ;;  %v11797_v42 = vpop.f32.mrb[255].mxu0  ;;  %v8750_v7 = vld [vmem:[#allocation4 + $0x33] sm:$0xff]  ;;  %v15268_v61 = vmax.f32 %v8586_v51, %v15258_v3  ;;  %v8465_v60 = vld [vmem:[#allocation4 + $0x48] sm:$0xff]  ;;  %v8631_v35 = vmax.f32 %v8587_v17, %v15264_v24 }
 0x83b   : > { %v8342_v1 = vld [vmem:[#allocation4 + $0x4f] sm:$0xff]  ;;  %v8752_v4 = vld [vmem:[#allocation4 + $0x43] sm:$0xff]  ;;  %v8506_v34 = vmax.f32 %v8424_v38, %v8465_v60  ;;  %v8301_v14 = vmax.f32 %v8219_v16, %v8260_v39  ;;  %v15277_v49 = vmax.f32 %v8709_v62, %v8750_v7  ;;  %v15281_v51 = vmax.f32 %v8710_v15, %v8751_v5  ;;  %v15291_v15 = vld [vmem:[#allocation4 + $0x59] sm:$0xff] }
 0x83c   : > { %v8105_v27 = vmax.f32 %v8064_v28, 0.0  ;;  %v8065_v12 = vadd.f32 %v15173_v22, %v8017_v23  ;;  %v8671_v56 = vld [vmem:[#allocation4 + $0x4a] sm:$0xff]  ;;  %v8672_v32 = vld [vmem:[#allocation4 + $0x52] sm:$0xff]  ;;  %v15283_v43 = vmax.f32 %v8711_v25, %v8752_v4  ;;  %v8425_v45 = vmax.f32 %v8381_v52, %v8342_v1 }
 0x83d   : > { %v16063_v50 = vld [vmem:[#allocation26_spill] sm:$0xff]  ;;  %v8382_v38 = vmax.f32 %v8300_v8, %v15252_v11  ;;  %v8713_v7 = vmax.f32 %v8631_v35, %v8672_v32  ;;  %v8588_v60 = vmax.f32 %v8506_v34, %v15258_v3  ;;  %v15294_v11 = vld [vmem:[#allocation4 + $0x5f] sm:$0xff]  ;;  %v8383_v8 = vmax.f32 %v8301_v14, %v8342_v1  ;;  %v8754_v34 = vld [vmem:[#allocation4 + $0x53] sm:$0xff] }
 0x83e   : > { %v8146_v63 = vmul.f32 %v8105_v27, %v16063_v50  ;;  %v8106_v36 = vmax.f32 %v8065_v12, 0.0  ;;  %v15273_v55 = vld [vmem:[#allocation4 + $0x87] sm:$0xff]  ;;  %v8712_v12 = vmax.f32 %v15268_v61, %v8671_v56  ;;  %v8466_v50 = vld [vmem:[#allocation4 + $0x50] sm:$0xff]  ;;  %v8467_v14 = vld [vmem:[#allocation4 + $0x58] sm:$0xff] }
 0x83f   : > { %v7912_v21 = vpop.f32.mrb[0].mxu0  ;;  %v8227_v28 = vld [vmem:[#allocation4 + $0x8d] sm:$0xff]  ;;  %v8351_v42 = vld [vmem:[#allocation4 + $0x97] sm:$0xff]  ;;  %v8390_v31 = vmax.f32 %v8308_v58, %v15273_v55  ;;  %v8426_v5 = vmax.f32 %v8382_v38, %v15279_v41  ;;  %v8632_v1 = vmax.f32 %v8588_v60, %v15291_v15 }
 0x840   : > { %v8268_v23 = vld [vmem:[#allocation4 + $0x8e] sm:$0xff]  ;;  %8187 = vst.msk [vmem:[#allocation4 + $0xa8] sm:$0xff] %vm389_vm3, %v8146_v63  ;;  %v8147_v16 = vmul.f32 %v8106_v36, %v16064_v6  ;;  %v8018_v62 = vadd.f32 %v7912_v21, %v15095_v29  ;;  %v11800_v39 = vpop.f32.mrb[1].mxu0  ;;  %v8269_v27 = vld [vmem:[#allocation4 + $0x96] sm:$0xff]  ;;  %v8507_v63 = vmax.f32 %v8425_v45, %v8466_v50  ;;  %v8262_v6 = vld [vmem:[#allocation4 + $0x5e] sm:$0xff] }
 0x841   : > { %v8228_v17 = vld [vmem:[#allocation4 + $0x95] sm:$0xff]  ;;  %v7915_v25 = vpop.f32.mrb[2].mxu0  ;;  %v8309_v52 = vmax.f32 %v8227_v28, %v8268_v23  ;;  %v8434_v61 = vmax.f32 %v8390_v31, %v8351_v42  ;;  %v8753_v56 = vld [vmem:[#allocation4 + $0x4b] sm:$0xff]  ;;  %v8427_v28 = vmax.f32 %v8383_v8, %v15294_v11  ;;  %v8221_v23 = vld [vmem:[#allocation4 + $0x5d] sm:$0xff]  ;;  %v15311_v31 = vmax.f32 %v8713_v7, %v8754_v34 }
 0x842   : > { %8188 = vst.msk [vmem:[#allocation4 + $0xb0] sm:$0xff] %vm389_vm3, %v8147_v16  ;;  %v8066_v29 = vadd.f32 %v15173_v22, %v8018_v62  ;;  %v8019_v58 = vadd.f32 %v7915_v25, %v15098_v30  ;;  %v11801_v4 = vpop.f32.mrb[3].mxu0  ;;  %v8310_v3 = vmax.f32 %v8228_v17, %v8269_v27  ;;  %v8220_v36 = vld [vmem:[#allocation4 + $0x55] sm:$0xff]  ;;  %v8352_v62 = vld [vmem:[#allocation4 + $0x9f] sm:$0xff]  ;;  %v15309_v45 = vmax.f32 %v8712_v12, %v8753_v56 }
 0x843   : > { %v8261_v38 = vld [vmem:[#allocation4 + $0x56] sm:$0xff]  ;;  %v8589_v17 = vmax.f32 %v8507_v63, %v15264_v24  ;;  %v15314_v27 = vmax.f32 %v8426_v5, %v8467_v14  ;;  %v8270_v50 = vld [vmem:[#allocation4 + $0x9e] sm:$0xff]  ;;  %v8303_v24 = vmax.f32 %v8221_v23, %v8262_v6 }
 0x844   : > { %v8107_v32 = vmax.f32 %v8066_v29, 0.0  ;;  %v8067_v21 = vadd.f32 %v15173_v22, %v8019_v58  ;;  %v15307_v16 = vld [vmem:[#allocation4 + $0x8f] sm:$0xff]  ;;  %v8475_v39 = vld [vmem:[#allocation4 + $0x98] sm:$0xff]  ;;  %v8392_v59 = vmax.f32 %v8310_v3, %v8351_v42  ;;  %v15318_v12 = vld [vmem:[#allocation4 + $0x61] sm:$0xff]  ;;  %v8302_v34 = vmax.f32 %v8220_v36, %v8261_v38 }
 0x845   : > { %v16065_v25 = vld [vmem:[#allocation28_spill] sm:$0xff]  ;;  %v8391_v8 = vmax.f32 %v8309_v52, %v15307_v16  ;;  %v8516_v58 = vmax.f32 %v8434_v61, %v8475_v39  ;;  %v8468_v56 = vld [vmem:[#allocation4 + $0x60] sm:$0xff]  ;;  %v8590_v23 = vmax.f32 %v15314_v27, %v15291_v15  ;;  %v8633_v6 = vmax.f32 %v8589_v17, %v15318_v12  ;;  %v15344_v15 = vld [vmem:[#allocation4 + $0x69] sm:$0xff] }
 0x846   : > { %v8148_v60 = vmul.f32 %v8107_v32, %v16065_v25  ;;  %v8108_v29 = vmax.f32 %v8067_v21, 0.0  ;;  %v8229_v4 = vld [vmem:[#allocation4 + $0x9d] sm:$0xff]  ;;  %v15323_v39 = vmax.f32 %v8427_v28, %v8468_v56  ;;  %v8384_v27 = vmax.f32 %v8302_v34, %v15279_v41 }
 0x847   : > { %v8673_v30 = vld [vmem:[#allocation4 + $0x5a] sm:$0xff]  ;;  %v7920_v35 = vpop.f32.mrb[4].mxu0  ;;  %v8353_v44 = vld [vmem:[#allocation4 + $0xa7] sm:$0xff]  ;;  %v8435_v61 = vmax.f32 %v8391_v8, %v8352_v62 }
 0x848   : > { %v8714_v7 = vmax.f32 %v8632_v1, %v8673_v30  ;;  %8189 = vst.msk [vmem:[#allocation4 + $0xb8] sm:$0xff] %vm389_vm3, %v8148_v60  ;;  %v16066_v5 = vld [vmem:[#allocation29_spill] sm:$0xff]  ;;  %v8020_v14 = vadd.f32 %v7920_v35, %v15104_v46  ;;  %v11804_v52 = vpop.f32.mrb[5].mxu0  ;;  %v8311_v1 = vmax.f32 %v8229_v4, %v8270_v50  ;;  %v8436_v36 = vmax.f32 %v8392_v59, %v8353_v44 }
 0x849   : > { %v8149_v63 = vmul.f32 %v8108_v29, %v16066_v5  ;;  %v8230_v32 = vld [vmem:[#allocation4 + $0xa5] sm:$0xff]  ;;  %v7923_v25 = vpop.f32.mrb[6].mxu0  ;;  %v15325_v42 = vld [vmem:[#allocation4 + $0x99] sm:$0xff]  ;;  %v15352_v52 = vld [vmem:[#allocation4 + $0x6f] sm:$0xff] }
 0x84a   : > { %v8271_v21 = vld [vmem:[#allocation4 + $0xa6] sm:$0xff]  ;;  %16067 = vst [vmem:[#allocation55_spill] sm:$0xff] %v15325_v42  ;;  %v8068_v46 = vadd.f32 %v15173_v22, %v8020_v14  ;;  %v8021_v35 = vadd.f32 %v7923_v25, %v15107_v10  ;;  %v11805_v28 = vpop.f32.mrb[7].mxu0  ;;  %v8598_v38 = vmax.f32 %v8516_v58, %v15325_v42  ;;  %v8755_v60 = vld [vmem:[#allocation4 + $0x5b] sm:$0xff]  ;;  %v8385_v10 = vmax.f32 %v8303_v24, %v15294_v11  ;;  %v8470_v42 = vld [vmem:[#allocation4 + $0x70] sm:$0xff] }
 0x84b   : > { %v15327_v3 = vld [vmem:[#allocation4 + $0xa9] sm:$0xff]  ;;  %8190 = vst.msk [vmem:[#allocation4 + $0xc0] sm:$0xff] %vm389_vm3, %v8149_v63  ;;  %v8476_v59 = vld [vmem:[#allocation4 + $0xa0] sm:$0xff]  ;;  %v8312_v4 = vmax.f32 %v8230_v32, %v8271_v21  ;;  %v15342_v50 = vmax.f32 %v8714_v7, %v8755_v60  ;;  %v8393_v32 = vmax.f32 %v8311_v1, %v8352_v62 }
 0x84c   : > { %v15338_v29 = vld [vmem:[#allocation4 + $0x67] sm:$0xff]  ;;  %v8109_v56 = vmax.f32 %v8068_v46, 0.0  ;;  %v8069_v58 = vadd.f32 %v15173_v22, %v8021_v35  ;;  %v8517_v5 = vmax.f32 %v8435_v61, %v8476_v59  ;;  %v8642_v17 = vmax.f32 %v8598_v38, %v15327_v3  ;;  %v15350_v63 = vld [vmem:[#allocation4 + $0xaf] sm:$0xff] }
 0x84d   : > { %v15340_v8 = vld [vmem:[#allocation4 + $0xa1] sm:$0xff]  ;;  %v8428_v41 = vmax.f32 %v8384_v27, %v15338_v29  ;;  %v8231_v46 = vld [vmem:[#allocation4 + $0xad] sm:$0xff]  ;;  %v8437_v62 = vmax.f32 %v8393_v32, %v15350_v63  ;;  %v8394_v1 = vmax.f32 %v8312_v4, %v8353_v44  ;;  %v8429_v27 = vmax.f32 %v8385_v10, %v15352_v52 }
 0x84e   : > { %16068 = vst [vmem:[#allocation56_spill] sm:$0xff] %v15340_v8  ;;  %v8477_v14 = vld [vmem:[#allocation4 + $0xa8] sm:$0xff]  ;;  %v8110_v24 = vmax.f32 %v8069_v58, 0.0  ;;  %v8599_v61 = vmax.f32 %v8517_v5, %v15340_v8 }
 0x84f   : > { %v8518_v7 = vmax.f32 %v8436_v36, %v8477_v14  ;;  %v8674_v21 = vld [vmem:[#allocation4 + $0x62] sm:$0xff]  ;;  %v8272_v35 = vld [vmem:[#allocation4 + $0xae] sm:$0xff]  ;;  %v7928_v38 = vpop.f32.mrb[8].mxu0  ;;  %v15363_v14 = vmax.f32 %v8590_v23, %v15344_v15  ;;  %v8355_v30 = vld [vmem:[#allocation4 + $0xb7] sm:$0xff] }
 0x850   : > { %v16069_v11 = vld [vmem:[#allocation30_spill] sm:$0xff]  ;;  %v8715_v28 = vmax.f32 %v8633_v6, %v8674_v21  ;;  %v15359_v60 = vld [vmem:[#allocation4 + $0xb1] sm:$0xff]  ;;  %v8022_v5 = vadd.f32 %v7928_v38, %v15113_v9  ;;  %v11808_v6 = vpop.f32.mrb[9].mxu0  ;;  %v8313_v20 = vmax.f32 %v8231_v46, %v8272_v35 }
 0x851   : > { %v8150_v34 = vmul.f32 %v8109_v56, %v16069_v11  ;;  %v8683_v59 = vld [vmem:[#allocation4 + $0xaa] sm:$0xff]  ;;  %v8643_v21 = vmax.f32 %v8599_v61, %v15359_v60  ;;  %v7931_v4 = vpop.f32.mrb[10].mxu0  ;;  %v8684_v32 = vld [vmem:[#allocation4 + $0xb2] sm:$0xff]  ;;  %v8600_v10 = vmax.f32 %v8518_v7, %v15327_v3 }
 0x852   : > { %v8756_v36 = vld [vmem:[#allocation4 + $0x63] sm:$0xff]  ;;  %v16070_v56 = vld [vmem:[#allocation31_spill] sm:$0xff]  ;;  %v8724_v11 = vmax.f32 %v8642_v17, %v8683_v59  ;;  %v15372_v23 = vld [vmem:[#allocation4 + $0xb9] sm:$0xff]  ;;  %v8070_v9 = vadd.f32 %v15173_v22, %v8022_v5  ;;  %v8023_v17 = vadd.f32 %v7931_v4, %v15116_v54  ;;  %v11809_v61 = vpop.f32.mrb[11].mxu0  ;;  %v15393_v5 = vmax.f32 %v8429_v27, %v8470_v42 }
 0x853   : > { %8191 = vst.msk [vmem:[#allocation4 + $0xc8] sm:$0xff] %vm389_vm3, %v8150_v34  ;;  %v8151_v58 = vmul.f32 %v8110_v24, %v16070_v56  ;;  %v15370_v25 = vld [vmem:[#allocation4 + $0x6a] sm:$0xff]  ;;  %v8438_v34 = vmax.f32 %v8394_v1, %v8355_v30  ;;  %v8725_v38 = vmax.f32 %v8643_v21, %v8684_v32  ;;  %v8232_v56 = vld [vmem:[#allocation4 + $0xb5] sm:$0xff]  ;;  %v15380_v6 = vmax.f32 %v8715_v28, %v8756_v36  ;;  %v8356_v4 = vld [vmem:[#allocation4 + $0xbf] sm:$0xff] }
 0x854   : > { %v8469_v44 = vld [vmem:[#allocation4 + $0x68] sm:$0xff]  ;;  %v8478_v59 = vld [vmem:[#allocation4 + $0xb0] sm:$0xff]  ;;  %v15389_v1 = vmax.f32 %v8600_v10, %v15372_v23  ;;  %v8716_v54 = vmax.f32 %v15363_v14, %v15370_v25  ;;  %v8111_v28 = vmax.f32 %v8070_v9, 0.0  ;;  %v8071_v36 = vadd.f32 %v15173_v22, %v8023_v17  ;;  %v8479_v32 = vld [vmem:[#allocation4 + $0xb8] sm:$0xff] }
 0x855   : > { %v15375_v24 = vmax.f32 %v8428_v41, %v8469_v44  ;;  %8192 = vst.msk [vmem:[#allocation4 + $0xd0] sm:$0xff] %vm389_vm3, %v8151_v58  ;;  %v15382_v8 = vld [vmem:[#allocation4 + $0x65] sm:$0xff]  ;;  %v15384_v3 = vld [vmem:[#allocation4 + $0x6d] sm:$0xff]  ;;  %v8519_v35 = vmax.f32 %v8437_v62, %v8478_v59  ;;  %v8273_v58 = vld [vmem:[#allocation4 + $0xb6] sm:$0xff]  ;;  %v8395_v2 = vmax.f32 %v8313_v20, %v15350_v63  ;;  %v8520_v62 = vmax.f32 %v8438_v34, %v8479_v32 }
 0x856   : > { %v15386_v7 = vld [vmem:[#allocation4 + $0x66] sm:$0xff]  ;;  %v8766_v46 = vld [vmem:[#allocation4 + $0xb3] sm:$0xff]  ;;  %v8314_v59 = vmax.f32 %v8232_v56, %v8273_v58  ;;  %v8152_v26 = vmul.f32 %v8111_v28, %v16071_v47  ;;  %v8112_v25 = vmax.f32 %v8071_v36, 0.0  ;;  %v8233_v9 = vld [vmem:[#allocation4 + $0xbd] sm:$0xff] }
 0x857   : > { %v8765_v41 = vld [vmem:[#allocation4 + $0xab] sm:$0xff]  ;;  %v8807_v44 = vmax.f32 %v8725_v38, %v8766_v46  ;;  %v8592_v10 = vmax.f32 %v15375_v24, %v15344_v15  ;;  %v8601_v14 = vmax.f32 %v8519_v35, %v15359_v60  ;;  %v8685_v27 = vld [vmem:[#allocation4 + $0xba] sm:$0xff]  ;;  %v7936_v17 = vpop.f32.mrb[12].mxu0  ;;  %v8439_v20 = vmax.f32 %v8395_v2, %v8356_v4 }
 0x858   : > { %v8806_v21 = vmax.f32 %v8724_v11, %v8765_v41  ;;  %v8264_v61 = vld [vmem:[#allocation4 + $0x6e] sm:$0xff]  ;;  %v8274_v11 = vld [vmem:[#allocation4 + $0xbe] sm:$0xff]  ;;  %v8726_v41 = vmax.f32 %v15389_v1, %v8685_v27  ;;  %v8304_v63 = vmax.f32 %v15382_v8, %v15386_v7  ;;  %8193 = vst.msk [vmem:[#allocation4 + $0xd8] sm:$0xff] %vm389_vm3, %v8152_v26  ;;  %v8024_v60 = vadd.f32 %v7936_v17, %v15122_v0  ;;  %v11812_v46 = vpop.f32.mrb[13].mxu0 }
 0x859   : > { %v8305_v34 = vmax.f32 %v15384_v3, %v8264_v61  ;;  %v16072_v47 = vld [vmem:[#allocation33_spill] sm:$0xff]  ;;  %v8396_v28 = vmax.f32 %v8314_v59, %v8355_v30  ;;  %v8757_v36 = vld [vmem:[#allocation4 + $0x6b] sm:$0xff]  ;;  %v7939_v1 = vpop.f32.mrb[14].mxu0  ;;  %v16073_v2 = vpack.c.bf16 %v15277_v49, %v15275_v19  ;;  %v8602_v26 = vmax.f32 %v8520_v62, %v15372_v23 }
 0x85a   : > { %v11872_v42 = vpack.c.bf16 %v8807_v44, %v8806_v21  ;;  %v15401_v38 = vld [vmem:[#allocation4 + $0xc1] sm:$0xff]  ;;  %v8153_v56 = vmul.f32 %v8112_v25, %v16072_v47  ;;  %v8315_v7 = vmax.f32 %v8233_v9, %v8274_v11  ;;  %v11886_v0 = vpack.c.bf16 %v15380_v6, %v15342_v50  ;;  %v11813_v32 = vpop.f32.mrb[15].mxu0  ;;  %v15424_v25 = vld [vmem:[#allocation4 + $0x71] sm:$0xff] }
 0x85b   : > { %v8645_v35 = vmax.f32 %v8601_v14, %v15401_v38  ;;  %v8357_v58 = vld [vmem:[#allocation4 + $0xc7] sm:$0xff]  ;;  %v15419_v21 = vmax.f32 %v8716_v54, %v8757_v36  ;;  %v8072_v30 = vadd.f32 %v15173_v22, %v8024_v60  ;;  %v8025_v44 = vadd.f32 %v7939_v1, %v15125_v57  ;;  %v8767_v23 = vld [vmem:[#allocation4 + $0xbb] sm:$0xff] }
 0x85c   : > { %11873 = vmatprep.subr.bf16.mxu1 %v11872_v42  ;;  %v8686_v8 = vld [vmem:[#allocation4 + $0xc2] sm:$0xff]  ;;  %8194 = vst.msk [vmem:[#allocation4 + $0xe0] sm:$0xff] %vm389_vm3, %v8153_v56  ;;  %v8440_v61 = vmax.f32 %v8396_v28, %v8357_v58  ;;  %v8386_v27 = vmax.f32 %v8304_v63, %v15338_v29  ;;  %v15429_v9 = vmax.f32 %v8305_v34, %v15352_v52  ;;  %v15432_v56 = vld [vmem:[#allocation4 + $0xcf] sm:$0xff]  ;;  %v15434_v60 = vld [vmem:[#allocation4 + $0x77] sm:$0xff] }
 0x85d   : > { %11875 = vmatpush3.bf16.msra.mxu1 %v16073_v2  ;;  %v15414_v3 = vld [vmem:[#allocation4 + $0xc9] sm:$0xff]  ;;  %v8727_v19 = vmax.f32 %v8645_v35, %v8686_v8  ;;  %v8480_v49 = vld [vmem:[#allocation4 + $0xc0] sm:$0xff]  ;;  %v8113_v11 = vmax.f32 %v8072_v30, 0.0  ;;  %v8073_v57 = vadd.f32 %v15173_v22, %v8025_v44  ;;  %v8808_v17 = vmax.f32 %v8726_v41, %v8767_v23 }
 0x85e   : > { %v8234_v59 = vld [vmem:[#allocation4 + $0xc5] sm:$0xff]  ;;  %v8521_v42 = vmax.f32 %v8439_v20, %v8480_v49  ;;  %v8646_v14 = vmax.f32 %v8602_v26, %v15414_v3  ;;  %v8397_v20 = vmax.f32 %v8315_v7, %v8356_v4  ;;  %v16074_v29 = vmax.f32 %v15323_v39, %v15318_v12  ;;  %v15441_v63 = vld [vmem:[#allocation4 + $0x79] sm:$0xff]  ;;  %v8235_v26 = vld [vmem:[#allocation4 + $0xcd] sm:$0xff] }
 0x85f   : > { %v8768_v62 = vld [vmem:[#allocation4 + $0xc3] sm:$0xff]  ;;  %v8114_v41 = vmax.f32 %v8073_v57, 0.0  ;;  %v8276_v30 = vld [vmem:[#allocation4 + $0xce] sm:$0xff]  ;;  %v7944_v44 = vpop.f32.mrb[16].mxu0  ;;  %v8430_v12 = vmax.f32 %v8386_v27, %v15434_v60  ;;  %v8359_v23 = vld [vmem:[#allocation4 + $0xd7] sm:$0xff] }
 0x860   : > { %v8275_v54 = vld [vmem:[#allocation4 + $0xc6] sm:$0xff]  ;;  %v8809_v47 = vmax.f32 %v8727_v19, %v8768_v62  ;;  %v8603_v46 = vmax.f32 %v8521_v42, %v15401_v38  ;;  %v8635_v52 = vmax.f32 %v16074_v29, %v15424_v25  ;;  %v15444_v38 = vld [vmem:[#allocation4 + $0xd1] sm:$0xff]  ;;  %v8441_v7 = vmax.f32 %v8397_v20, %v15432_v56 }
 0x861   : > { %v8481_v35 = vld [vmem:[#allocation4 + $0xc8] sm:$0xff]  ;;  %v8316_v28 = vmax.f32 %v8234_v59, %v8275_v54  ;;  %v16076_v39 = vld [vmem:[#allocation35_spill] sm:$0xff]  ;;  %v8026_v49 = vadd.f32 %v7944_v44, %v15131_v37  ;;  %v11816_v59 = vpop.f32.mrb[17].mxu0  ;;  %v8593_v42 = vmax.f32 %v15393_v5, %v15424_v25  ;;  %v16077_v54 = vpack.c.bf16 %v15283_v43, %v15281_v51 }
 0x862   : > { %v16075_v34 = vld [vmem:[#allocation34_spill] sm:$0xff]  ;;  %v11876_v1 = vpack.c.bf16 %v8809_v47, %v8808_v17  ;;  %v8522_v8 = vmax.f32 %v8440_v61, %v8481_v35  ;;  %v8155_v19 = vmul.f32 %v8114_v41, %v16076_v39  ;;  %v8647_v61 = vmax.f32 %v8603_v46, %v15444_v38  ;;  %v8676_v62 = vld [vmem:[#allocation4 + $0x72] sm:$0xff] }
 0x863   : > { %v8154_v36 = vmul.f32 %v8113_v11, %v16075_v34  ;;  %v8687_v2 = vld [vmem:[#allocation4 + $0xca] sm:$0xff]  ;;  %v8398_v32 = vmax.f32 %v8316_v28, %v8357_v58  ;;  %v7947_v58 = vpop.f32.mrb[18].mxu0  ;;  %v8688_v27 = vld [vmem:[#allocation4 + $0xd2] sm:$0xff]  ;;  %v8317_v37 = vmax.f32 %v8235_v26, %v8276_v30  ;;  %v8717_v17 = vmax.f32 %v8635_v52, %v8676_v62 }
 0x864   : > { %v8728_v4 = vmax.f32 %v8646_v14, %v8687_v2  ;;  %11877 = vmatprep.subr.bf16.mxu1 %v11876_v1  ;;  %v15454_v14 = vld [vmem:[#allocation4 + $0x7f] sm:$0xff]  ;;  %v15465_v47 = vmax.f32 %v8592_v10, %v15441_v63  ;;  %8196 = vst.msk [vmem:[#allocation4 + $0xf0] sm:$0xff] %vm389_vm3, %v8155_v19  ;;  %v8074_v20 = vadd.f32 %v15173_v22, %v8026_v49  ;;  %v11817_v43 = vpop.f32.mrb[19].mxu0  ;;  %v8769_v28 = vld [vmem:[#allocation4 + $0xcb] sm:$0xff]  ;;  %v8236_v52 = vld [vmem:[#allocation4 + $0xd5] sm:$0xff] }
 0x865   : > { %8195 = vst.msk [vmem:[#allocation4 + $0xe8] sm:$0xff] %vm389_vm3, %v8154_v36  ;;  %11879 = vmatpush3.bf16.msra.mxu1 %v16077_v54  ;;  %v15459_v11 = vld [vmem:[#allocation4 + $0xd9] sm:$0xff]  ;;  %v8442_v57 = vmax.f32 %v8398_v32, %v8359_v23  ;;  %v8027_v51 = vadd.f32 %v7947_v58, %v15134_v13  ;;  %v8729_v35 = vmax.f32 %v8647_v61, %v8688_v27  ;;  %v8482_v29 = vld [vmem:[#allocation4 + $0xd0] sm:$0xff] }
 0x866   : > { %v8471_v46 = vld [vmem:[#allocation4 + $0x78] sm:$0xff]  ;;  %v8604_v34 = vmax.f32 %v8522_v8, %v15414_v3  ;;  %v8810_v41 = vmax.f32 %v8728_v4, %v8769_v28  ;;  %v8523_v1 = vmax.f32 %v8441_v7, %v8482_v29  ;;  %v8431_v24 = vmax.f32 %v15429_v9, %v15454_v14  ;;  %v15478_v13 = vld [vmem:[%s15805_s7] ss:$0 sm:$0xff]  ;;  %v8472_v27 = vld [vmem:[#allocation4 + $0x80] sm:$0xff] }
 0x867   : > { %v8770_v36 = vld [vmem:[#allocation4 + $0xd3] sm:$0xff]  ;;  %v15473_v10 = vmax.f32 %v8430_v12, %v8471_v46  ;;  %v8115_v2 = vmax.f32 %v8074_v20, 0.0  ;;  %v8075_v22 = vadd.f32 %v15478_v13, %v8027_v51  ;;  %v15482_v8 = vld [vmem:[#allocation4 + $0xdf] sm:$0xff]  ;;  %v8399_v4 = vmax.f32 %v8317_v37, %v15432_v56  ;;  %v7952_v46 = vpop.f32.mrb[20].mxu0 }
 0x868   : > { %v8277_v15 = vld [vmem:[#allocation4 + $0xd6] sm:$0xff]  ;;  %v8811_v26 = vmax.f32 %v8729_v35, %v8770_v36  ;;  %v8648_v3 = vmax.f32 %v8604_v34, %v15459_v11  ;;  %v8605_v62 = vmax.f32 %v8523_v1, %v15444_v38  ;;  %v8278_v54 = vld [vmem:[#allocation4 + $0xde] sm:$0xff]  ;;  %v15495_v51 = vmax.f32 %v8431_v24, %v8472_v27  ;;  %v11820_v29 = vpop.f32.mrb[21].mxu0 }
 0x869   : > { %v8483_v30 = vld [vmem:[#allocation4 + $0xd8] sm:$0xff]  ;;  %v8318_v32 = vmax.f32 %v8236_v52, %v8277_v15  ;;  %v8116_v59 = vmax.f32 %v8075_v22, 0.0  ;;  %v8443_v37 = vmax.f32 %v8399_v4, %v15482_v8  ;;  %v16079_v35 = vld [vmem:[#allocation37_spill] sm:$0xff]  ;;  %v8028_v38 = vadd.f32 %v7952_v46, %v15138_v33 }
 0x86a   : > { %v8758_v44 = vld [vmem:[#allocation4 + $0x73] sm:$0xff]  ;;  %v8524_v9 = vmax.f32 %v8442_v57, %v8483_v30  ;;  %v11880_v61 = vpack.c.bf16 %v8811_v26, %v8810_v41  ;;  %v8237_v58 = vld [vmem:[#allocation4 + $0xdd] sm:$0xff]  ;;  %v16080_v1 = vpack.c.bf16 %v15311_v31, %v15309_v45  ;;  %v8594_v26 = vmax.f32 %v15473_v10, %v15441_v63  ;;  %v8473_v10 = vld [vmem:[#allocation4 + $0x88] sm:$0xff] }
 0x86b   : > { %v15485_v7 = vmax.f32 %v8717_v17, %v8758_v44  ;;  %v8677_v12 = vld [vmem:[#allocation4 + $0x7a] sm:$0xff]  ;;  %v8400_v57 = vmax.f32 %v8318_v32, %v8359_v23  ;;  %v8157_v28 = vmul.f32 %v8116_v59, %v16079_v35 }
 0x86c   : > { %v15487_v39 = vld [vmem:[#allocation4 + $0x75] sm:$0xff]  ;;  %v15491_v20 = vld [vmem:[#allocation4 + $0xe1] sm:$0xff]  ;;  %v8718_v17 = vmax.f32 %v15465_v47, %v8677_v12  ;;  %11881 = vmatprep.subr.bf16.mxu1 %v11880_v61  ;;  %v7955_v47 = vpop.f32.mrb[22].mxu0  ;;  %v15508_v24 = vld [vmem:[#allocation4 + $0xe9] sm:$0xff]  ;;  %v8606_v33 = vmax.f32 %v8524_v9, %v15459_v11 }
 0x86d   : > { %v16078_v19 = vld [vmem:[#allocation36_spill] sm:$0xff]  ;;  %v8649_v34 = vmax.f32 %v8605_v62, %v15491_v20  ;;  %v8361_v36 = vld [vmem:[#allocation4 + $0xe7] sm:$0xff]  ;;  %11883 = vmatpush3.bf16.msra.mxu1 %v16080_v1  ;;  %8198 = vst.msk [vmem:[#allocation4 + $0x100] sm:$0xff] %vm389_vm3, %v8157_v28  ;;  %v8029_v30 = vadd.f32 %v7955_v47, %v15141_v53  ;;  %v11821_v44 = vpop.f32.mrb[23].mxu0  ;;  %v11890_v59 = vpack.c.bf16 %v15485_v7, %v15419_v21  ;;  %v8362_v46 = vld [vmem:[#allocation4 + $0xef] sm:$0xff] }
 0x86e   : > { %v8156_v49 = vmul.f32 %v8115_v2, %v16078_v19  ;;  %v8689_v56 = vld [vmem:[#allocation4 + $0xda] sm:$0xff]  ;;  %v8690_v15 = vld [vmem:[#allocation4 + $0xe2] sm:$0xff]  ;;  %v8319_v2 = vmax.f32 %v8237_v58, %v8278_v54  ;;  %v8444_v22 = vmax.f32 %v8400_v57, %v8361_v36  ;;  %v8239_v47 = vld [vmem:[#allocation4 + $0xed] sm:$0xff] }
 0x86f   : > { %v8265_v43 = vld [vmem:[#allocation4 + $0x76] sm:$0xff]  ;;  %v8730_v52 = vmax.f32 %v8648_v3, %v8689_v56  ;;  %v15503_v23 = vld [vmem:[#allocation4 + $0x7e] sm:$0xff]  ;;  %v8076_v3 = vadd.f32 %v15478_v13, %v8028_v38  ;;  %v8731_v4 = vmax.f32 %v8649_v34, %v8690_v15  ;;  %v8279_v61 = vld [vmem:[#allocation4 + $0xe6] sm:$0xff]  ;;  %v8077_v58 = vadd.f32 %v15478_v13, %v8029_v30  ;;  %v7960_v1 = vpop.f32.mrb[24].mxu0 }
 0x870   : > { %8197 = vst.msk [vmem:[#allocation4 + $0xf8] sm:$0xff] %vm389_vm3, %v8156_v49  ;;  %v15501_v41 = vld [vmem:[#allocation4 + $0x7d] sm:$0xff]  ;;  %v8238_v32 = vld [vmem:[#allocation4 + $0xe5] sm:$0xff]  ;;  %v8306_v12 = vmax.f32 %v15487_v39, %v8265_v43  ;;  %v15518_v49 = vmax.f32 %v8606_v33, %v15508_v24  ;;  %v11824_v30 = vpop.f32.mrb[25].mxu0 }
 0x871   : > { %v8484_v45 = vld [vmem:[#allocation4 + $0xe0] sm:$0xff]  ;;  %v8307_v53 = vmax.f32 %v15501_v41, %v15503_v23  ;;  %v8117_v62 = vmax.f32 %v8076_v3, 0.0  ;;  %v8485_v39 = vld [vmem:[#allocation4 + $0xe8] sm:$0xff]  ;;  %v8320_v35 = vmax.f32 %v8238_v32, %v8279_v61  ;;  %v8118_v29 = vmax.f32 %v8077_v58, 0.0 }
 0x872   : > { %v8759_v31 = vld [vmem:[#allocation4 + $0x7b] sm:$0xff]  ;;  %v8772_v11 = vld [vmem:[#allocation4 + $0xe3] sm:$0xff]  ;;  %v8525_v9 = vmax.f32 %v8443_v37, %v8484_v45  ;;  %v8401_v37 = vmax.f32 %v8319_v2, %v15482_v8  ;;  %v8526_v57 = vmax.f32 %v8444_v22, %v8485_v39  ;;  %v8030_v22 = vadd.f32 %v7960_v1, %v15144_v48 }
 0x873   : > { %v8771_v19 = vld [vmem:[#allocation4 + $0xdb] sm:$0xff]  ;;  %v8813_v27 = vmax.f32 %v8731_v4, %v8772_v11  ;;  %v15528_v43 = vmax.f32 %v8718_v17, %v8759_v31  ;;  %v16081_v28 = vld [vmem:[#allocation38_spill] sm:$0xff]  ;;  %v15542_v17 = vmax.f32 %v8306_v12, %v15434_v60  ;;  %v8402_v45 = vmax.f32 %v8320_v35, %v8361_v36  ;;  %v7963_v31 = vpop.f32.mrb[26].mxu0 }
 0x874   : > { %v8812_v54 = vmax.f32 %v8730_v52, %v8771_v19  ;;  %v15525_v56 = vld [vmem:[#allocation4 + $0x81] sm:$0xff]  ;;  %v8158_v38 = vmul.f32 %v8117_v62, %v16081_v28  ;;  %v8607_v41 = vmax.f32 %v8525_v9, %v15491_v20  ;;  %v8691_v23 = vld [vmem:[#allocation4 + $0xea] sm:$0xff]  ;;  %v8445_v3 = vmax.f32 %v8401_v37, %v8362_v46  ;;  %v11825_v6 = vpop.f32.mrb[27].mxu0 }
 0x875   : > { %v8280_v52 = vld [vmem:[#allocation4 + $0xee] sm:$0xff]  ;;  %v8732_v33 = vmax.f32 %v15518_v49, %v8691_v23  ;;  %v15539_v8 = vmax.f32 %v8593_v42, %v15525_v56  ;;  %v8608_v60 = vmax.f32 %v8526_v57, %v15508_v24  ;;  %v8678_v42 = vld [vmem:[#allocation4 + $0x82] sm:$0xff]  ;;  %v8595_v48 = vmax.f32 %v15495_v51, %v15525_v56 }
 0x876   : > { %v11884_v34 = vpack.c.bf16 %v8813_v27, %v8812_v54  ;;  %8199 = vst.msk [vmem:[#allocation4 + $0x108] sm:$0xff] %vm389_vm3, %v8158_v38  ;;  %v16082_v20 = vld [vmem:[#allocation39_spill] sm:$0xff]  ;;  %v8321_v32 = vmax.f32 %v8239_v47, %v8280_v52  ;;  %v15557_v12 = vmax.f32 %v8307_v53, %v15454_v14  ;;  %v8078_v36 = vadd.f32 %v15478_v13, %v8030_v22  ;;  %v8488_v7 = vld [vmem:[#allocation4 + $0x100] sm:$0xff] }
 0x877   : > { %v15532_v15 = vld [vmem:[#allocation4 + $0xf1] sm:$0xff]  ;;  %v8159_v2 = vmul.f32 %v8118_v29, %v16082_v20  ;;  %v15551_v25 = vld [vmem:[#allocation4 + $0xf9] sm:$0xff]  ;;  %v8031_v50 = vadd.f32 %v7963_v31, %v15147_v18  ;;  %v15562_v9 = vld [vmem:[#allocation4 + $0x89] sm:$0xff]  ;;  %v8719_v14 = vmax.f32 %v15539_v8, %v8678_v42  ;;  %v8432_v54 = vmax.f32 %v15542_v17, %v15273_v55  ;;  %v7968_v8 = vpop.f32.mrb[28].mxu0 }
 0x878   : > { %11885 = vmatprep.subr.bf16.mxu1 %v11884_v34  ;;  %v8651_v44 = vmax.f32 %v8607_v41, %v15532_v15  ;;  %v8363_v4 = vld [vmem:[#allocation4 + $0xf7] sm:$0xff]  ;;  %v8773_v49 = vld [vmem:[#allocation4 + $0xeb] sm:$0xff]  ;;  %v8652_v58 = vmax.f32 %v8608_v60, %v15551_v25  ;;  %v8119_v27 = vmax.f32 %v8078_v36, 0.0  ;;  %v8364_v57 = vld [vmem:[#allocation4 + $0xff] sm:$0xff]  ;;  %v8403_v28 = vmax.f32 %v8321_v32, %v8362_v46 }
 0x879   : > { %11887 = vmatpush3.bf16.msra.mxu1 %v11886_v0  ;;  %v8692_v5 = vld [vmem:[#allocation4 + $0xf2] sm:$0xff]  ;;  %8200 = vst.msk [vmem:[#allocation4 + $0x110] sm:$0xff] %vm389_vm3, %v8159_v2  ;;  %v8446_v11 = vmax.f32 %v8402_v45, %v8363_v4  ;;  %v8079_v18 = vadd.f32 %v15478_v13, %v8031_v50  ;;  %v8814_v39 = vmax.f32 %v8732_v33, %v8773_v49  ;;  %v8693_v52 = vld [vmem:[#allocation4 + $0xfa] sm:$0xff] }
 0x87a   : > { %v8733_v0 = vmax.f32 %v8651_v44, %v8692_v5  ;;  %v8486_v19 = vld [vmem:[#allocation4 + $0xf0] sm:$0xff]  ;;  %v8487_v38 = vld [vmem:[#allocation4 + $0xf8] sm:$0xff]  ;;  %v15574_v29 = vmax.f32 %v8594_v26, %v15562_v9  ;;  %v8734_v46 = vmax.f32 %v8652_v58, %v8693_v52  ;;  %v8447_v20 = vmax.f32 %v8403_v28, %v8364_v57  ;;  %v16084_v26 = vld [vmem:[#allocation41_spill] sm:$0xff]  ;;  %v11828_v44 = vpop.f32.mrb[29].mxu0 }
 0x87b   : > { %v8240_v24 = vld [vmem:[#allocation4 + $0xf5] sm:$0xff]  ;;  %v8527_v62 = vmax.f32 %v8445_v3, %v8486_v19  ;;  %v8120_v55 = vmax.f32 %v8079_v18, 0.0  ;;  %v8528_v1 = vmax.f32 %v8446_v11, %v8487_v38  ;;  %v8241_v33 = vld [vmem:[#allocation4 + $0xfd] sm:$0xff]  ;;  %v8433_v63 = vmax.f32 %v15557_v12, %v15307_v16  ;;  %v15587_v5 = vld [vmem:[#allocation4 + $0x8a] sm:$0xff]  ;;  %v7971_v42 = vpop.f32.mrb[30].mxu0 }
 0x87c   : > { %v8774_v61 = vld [vmem:[#allocation4 + $0xf3] sm:$0xff]  ;;  %v8282_v3 = vld [vmem:[#allocation4 + $0xfe] sm:$0xff]  ;;  %v8032_v30 = vadd.f32 %v7968_v8, %v15150_v40  ;;  %v8720_v40 = vmax.f32 %v15574_v29, %v15587_v5 }
 0x87d   : > { %v8281_v53 = vld [vmem:[#allocation4 + $0xf6] sm:$0xff]  ;;  %v8815_v37 = vmax.f32 %v8733_v0, %v8774_v61  ;;  %v8609_v35 = vmax.f32 %v8527_v62, %v15532_v15  ;;  %v15577_v17 = vld [vmem:[#allocation4 + $0x101] sm:$0xff]  ;;  %v8161_v22 = vmul.f32 %v8120_v55, %v16084_v26  ;;  %v8323_v36 = vmax.f32 %v8241_v33, %v8282_v3 }
 0x87e   : > { %v8322_v34 = vmax.f32 %v8240_v24, %v8281_v53  ;;  %v16083_v41 = vld [vmem:[#allocation40_spill] sm:$0xff]  ;;  %v8760_v15 = vld [vmem:[#allocation4 + $0x83] sm:$0xff]  ;;  %v8474_v6 = vld [vmem:[#allocation4 + $0x90] sm:$0xff]  ;;  %v8080_v0 = vadd.f32 %v15478_v13, %v8032_v30  ;;  %v11829_v24 = vpop.f32.mrb[31].mxu0 }
 0x87f   : > { %v8160_v23 = vmul.f32 %v8119_v27, %v16083_v41  ;;  %v11888_v47 = vpack.c.bf16 %v8815_v37, %v8814_v39  ;;  %v8653_v45 = vmax.f32 %v8609_v35, %v15577_v17  ;;  %v15585_v31 = vld [vmem:[#allocation4 + $0x91] sm:$0xff]  ;;  %v8365_v60 = vld [vmem:[#allocation4 + $0x107] sm:$0xff]  ;;  %v8801_v32 = vmax.f32 %v8719_v14, %v8760_v15  ;;  %8202 = vst.msk [vmem:[#allocation4 + $0x120] sm:$0xff] %vm389_vm3, %v8161_v22  ;;  %v8775_v21 = vld [vmem:[#allocation4 + $0xfb] sm:$0xff]  ;;  %v7976_v3 = vpop.f32.mrb[32].mxu0 }
 0x880   : > { %v8404_v2 = vmax.f32 %v8322_v34, %v8363_v4  ;;  %v15589_v4 = vmax.f32 %v8432_v54, %v8473_v10  ;;  %v8694_v16 = vld [vmem:[#allocation4 + $0x102] sm:$0xff]  ;;  %v8816_v58 = vmax.f32 %v8734_v46, %v8775_v21  ;;  %v8529_v14 = vmax.f32 %v8447_v20, %v8488_v7  ;;  %v8366_v28 = vld [vmem:[#allocation4 + $0x10f] sm:$0xff]  ;;  %v11832_v22 = vpop.f32.mrb[33].mxu0 }
 0x881   : > { %8201 = vst.msk [vmem:[#allocation4 + $0x118] sm:$0xff] %vm389_vm3, %v8160_v23  ;;  %11889 = vmatprep.subr.bf16.mxu1 %v11888_v47  ;;  %v15594_v12 = vld [vmem:[#allocation4 + $0x109] sm:$0xff]  ;;  %v16085_v19 = vld [vmem:[#allocation49_spill] sm:$0xff]  ;;  %v8735_v49 = vmax.f32 %v8653_v45, %v8694_v16  ;;  %v8639_v53 = vmax.f32 %v8595_v48, %v15585_v31  ;;  %v8515_v54 = vmax.f32 %v8433_v63, %v8474_v6  ;;  %v8121_v18 = vmax.f32 %v8080_v0, 0.0  ;;  %v8680_v52 = vld [vmem:[#allocation4 + $0x92] sm:$0xff]  ;;  %v7979_v45 = vpop.f32.mrb[34].mxu0 }
 0x882   : > { %11891 = vmatpush3.bf16.msra.mxu1 %v11890_v59  ;;  %v8448_v50 = vmax.f32 %v8404_v2, %v8365_v60  ;;  %v8033_v11 = vadd.f32 %v7971_v42, %v16085_v19  ;;  %v8610_v59 = vmax.f32 %v8528_v1, %v15551_v25  ;;  %v8242_v61 = vld [vmem:[#allocation4 + $0x105] sm:$0xff]  ;;  %v8405_v25 = vmax.f32 %v8323_v36, %v8364_v57  ;;  %v8243_v1 = vld [vmem:[#allocation4 + $0x10d] sm:$0xff]  ;;  %v11833_v19 = vpop.f32.mrb[35].mxu0 }
 0x883   : > { %v8776_v62 = vld [vmem:[#allocation4 + $0x103] sm:$0xff]  ;;  %v8596_v41 = vmax.f32 %v15589_v4, %v15562_v9  ;;  %v8611_v48 = vmax.f32 %v8529_v14, %v15577_v17  ;;  %v8284_v33 = vld [vmem:[#allocation4 + $0x10e] sm:$0xff]  ;;  %v11894_v8 = vpack.c.bf16 %v8801_v32, %v15528_v43  ;;  %v8721_v15 = vmax.f32 %v8639_v53, %v8680_v52 }
 0x884   : > { %v8283_v27 = vld [vmem:[#allocation4 + $0x106] sm:$0xff]  ;;  %v8081_v39 = vadd.f32 %v15478_v13, %v8033_v11  ;;  %v8817_v37 = vmax.f32 %v8735_v49, %v8776_v62  ;;  %v8654_v35 = vmax.f32 %v8610_v59, %v15594_v12  ;;  %v8449_v20 = vmax.f32 %v8405_v25, %v8366_v28  ;;  %v16087_v9 = vld [vmem:[#allocation43_spill] sm:$0xff] }
 0x885   : > { %v8489_v38 = vld [vmem:[#allocation4 + $0x108] sm:$0xff]  ;;  %v8324_v23 = vmax.f32 %v8242_v61, %v8283_v27  ;;  %v8597_v16 = vmax.f32 %v8515_v54, %v15585_v31  ;;  %v8325_v32 = vmax.f32 %v8243_v1, %v8284_v33  ;;  %v16089_v6 = vld [vmem:[#allocation51_spill] sm:$0xff] }
 0x886   : > { %v8530_v34 = vmax.f32 %v8448_v50, %v8489_v38  ;;  %v16086_v55 = vld [vmem:[#allocation42_spill] sm:$0xff]  ;;  %v8122_v51 = vmax.f32 %v8081_v39, 0.0  ;;  %v11892_v56 = vpack.c.bf16 %v8817_v37, %v8816_v58  ;;  %v8035_v0 = vadd.f32 %v7979_v45, %v16089_v6  ;;  %v8762_v24 = vld [vmem:[#allocation4 + $0x93] sm:$0xff]  ;;  %v8492_v19 = vld [vmem:[#allocation4 + $0x120] sm:$0xff] }
 0x887   : > { %v8162_v47 = vmul.f32 %v8121_v18, %v16086_v55  ;;  %v8695_v57 = vld [vmem:[#allocation4 + $0x10a] sm:$0xff]  ;;  %v8406_v2 = vmax.f32 %v8324_v23, %v8365_v60  ;;  %v8803_v31 = vmax.f32 %v8721_v15, %v8762_v24  ;;  %v16090_v58 = vld [vmem:[#allocation56_spill] sm:$0xff]  ;;  %v8407_v38 = vmax.f32 %v8325_v32, %v8366_v28  ;;  %v7984_v33 = vpop.f32.mrb[36].mxu0  ;;  %v16093_v28 = vld [vmem:[#allocation45_spill] sm:$0xff] }
 0x888   : > { %v15613_v46 = vld [vmem:[#allocation4 + $0x111] sm:$0xff]  ;;  %v8163_v63 = vmul.f32 %v8122_v51, %v16087_v9  ;;  %v16088_v10 = vld [vmem:[#allocation50_spill] sm:$0xff]  ;;  %11893 = vmatprep.subr.bf16.mxu1 %v11892_v56  ;;  %v8736_v30 = vmax.f32 %v8654_v35, %v8695_v57  ;;  %v15619_v42 = vld [vmem:[#allocation4 + $0x119] sm:$0xff]  ;;  %v8612_v60 = vmax.f32 %v8530_v34, %v15594_v12  ;;  %v8641_v14 = vmax.f32 %v8597_v16, %v16090_v58 }
 0x889   : > { %8203 = vst.msk [vmem:[#allocation4 + $0x128] sm:$0xff] %vm389_vm3, %v8162_v47  ;;  %v8034_v26 = vadd.f32 %v7976_v3, %v16088_v10  ;;  %v8655_v17 = vmax.f32 %v8611_v48, %v15613_v46  ;;  %v8367_v44 = vld [vmem:[#allocation4 + $0x117] sm:$0xff]  ;;  %11895 = vmatpush3.bf16.msra.mxu1 %v11894_v8  ;;  %v8761_v4 = vld [vmem:[#allocation4 + $0x8b] sm:$0xff]  ;;  %v8083_v27 = vadd.f32 %v15478_v13, %v8035_v0  ;;  %v8368_v37 = vld [vmem:[#allocation4 + $0x11f] sm:$0xff] }
 0x88a   : > { %v8696_v43 = vld [vmem:[#allocation4 + $0x112] sm:$0xff]  ;;  %v8450_v36 = vmax.f32 %v8406_v2, %v8367_v44  ;;  %8204 = vst.msk [vmem:[#allocation4 + $0x130] sm:$0xff] %vm389_vm3, %v8163_v63  ;;  %v8802_v49 = vmax.f32 %v8720_v40, %v8761_v4  ;;  %v8656_v62 = vmax.f32 %v8612_v60, %v15619_v42  ;;  %v8682_v40 = vld [vmem:[#allocation4 + $0xa2] sm:$0xff]  ;;  %v8697_v48 = vld [vmem:[#allocation4 + $0x11a] sm:$0xff]  ;;  %v11836_v63 = vpop.f32.mrb[37].mxu0 }
 0x88b   : > { %v8082_v50 = vadd.f32 %v15478_v13, %v8034_v26  ;;  %v8737_v11 = vmax.f32 %v8655_v17, %v8696_v43  ;;  %v8490_v21 = vld [vmem:[#allocation4 + $0x110] sm:$0xff]  ;;  %v8491_v35 = vld [vmem:[#allocation4 + $0x118] sm:$0xff]  ;;  %v8124_v47 = vmax.f32 %v8083_v27, 0.0  ;;  %v8723_v15 = vmax.f32 %v8641_v14, %v8682_v40  ;;  %v7987_v17 = vpop.f32.mrb[38].mxu0  ;;  %v16095_v32 = vld [vmem:[#allocation53_spill] sm:$0xff] }
 0x88c   : > { %v8244_v7 = vld [vmem:[#allocation4 + $0x115] sm:$0xff]  ;;  %v8777_v12 = vld [vmem:[#allocation4 + $0x10b] sm:$0xff]  ;;  %v8531_v61 = vmax.f32 %v8449_v20, %v8490_v21  ;;  %v8532_v25 = vmax.f32 %v8450_v36, %v8491_v35  ;;  %v8245_v52 = vld [vmem:[#allocation4 + $0x11d] sm:$0xff]  ;;  %v11898_v3 = vpack.c.bf16 %v8803_v31, %v8802_v49  ;;  %v8738_v57 = vmax.f32 %v8656_v62, %v8697_v48 }
 0x88d   : > { %v8778_v59 = vld [vmem:[#allocation4 + $0x113] sm:$0xff]  ;;  %v8123_v54 = vmax.f32 %v8082_v50, 0.0  ;;  %v8818_v18 = vmax.f32 %v8736_v30, %v8777_v12  ;;  %v8286_v1 = vld [vmem:[#allocation4 + $0x11e] sm:$0xff]  ;;  %v8165_v20 = vmul.f32 %v8124_v47, %v16093_v28  ;;  %v8037_v36 = vadd.f32 %v7987_v17, %v16095_v32  ;;  %v11837_v50 = vpop.f32.mrb[39].mxu0  ;;  %v16096_v35 = vld [vmem:[#allocation46_spill] sm:$0xff] }
 0x88e   : > { %v8285_v53 = vld [vmem:[#allocation4 + $0x116] sm:$0xff]  ;;  %v8819_v39 = vmax.f32 %v8737_v11, %v8778_v59  ;;  %v8613_v56 = vmax.f32 %v8531_v61, %v15613_v46  ;;  %v8614_v4 = vmax.f32 %v8532_v25, %v15619_v42  ;;  %v8327_v60 = vmax.f32 %v8245_v52, %v8286_v1  ;;  %v8764_v0 = vld [vmem:[#allocation4 + $0xa3] sm:$0xff] }
 0x88f   : > { %v16091_v29 = vld [vmem:[#allocation55_spill] sm:$0xff]  ;;  %v8326_v34 = vmax.f32 %v8244_v7, %v8285_v53  ;;  %v16092_v23 = vld [vmem:[#allocation44_spill] sm:$0xff]  ;;  %8206 = vst.msk [vmem:[#allocation4 + $0x140] sm:$0xff] %vm389_vm3, %v8165_v20  ;;  %v8805_v21 = vmax.f32 %v8723_v15, %v8764_v0  ;;  %v8085_v31 = vadd.f32 %v15478_v13, %v8037_v36 }
 0x890   : > { %v8640_v5 = vmax.f32 %v8596_v41, %v16091_v29  ;;  %v8164_v55 = vmul.f32 %v8123_v54, %v16092_v23  ;;  %v11896_v51 = vpack.c.bf16 %v8819_v39, %v8818_v18  ;;  %v15635_v8 = vld [vmem:[#allocation4 + $0x121] sm:$0xff]  ;;  %v8451_v41 = vmax.f32 %v8407_v38, %v8368_v37  ;;  %v16094_v2 = vld [vmem:[#allocation52_spill] sm:$0xff]  ;;  %v16097_v1 = vld [vmem:[#allocation47_spill] sm:$0xff] }
 0x891   : > { %v8036_v9 = vadd.f32 %v7984_v33, %v16094_v2  ;;  %v8657_v46 = vmax.f32 %v8613_v56, %v15635_v8  ;;  %v8681_v10 = vld [vmem:[#allocation4 + $0x9a] sm:$0xff]  ;;  %v8369_v26 = vld [vmem:[#allocation4 + $0x127] sm:$0xff]  ;;  %v8408_v22 = vmax.f32 %v8326_v34, %v8367_v44  ;;  %v8370_v14 = vld [vmem:[#allocation4 + $0x12f] sm:$0xff]  ;;  %v8409_v27 = vmax.f32 %v8327_v60, %v8368_v37  ;;  %v7992_v34 = vpop.f32.mrb[40].mxu0 }
 0x892   : > { %8205 = vst.msk [vmem:[#allocation4 + $0x138] sm:$0xff] %vm389_vm3, %v8164_v55  ;;  %11897 = vmatprep.subr.bf16.mxu1 %v11896_v51  ;;  %v8698_v30 = vld [vmem:[#allocation4 + $0x122] sm:$0xff]  ;;  %v8722_v45 = vmax.f32 %v8640_v5, %v8681_v10  ;;  %v8533_v7 = vmax.f32 %v8451_v41, %v8492_v19  ;;  %v8126_v5 = vmax.f32 %v8085_v31, 0.0  ;;  %v8699_v38 = vld [vmem:[#allocation4 + $0x12a] sm:$0xff]  ;;  %v11840_v28 = vpop.f32.mrb[41].mxu0 }
 0x893   : > { %11899 = vmatpush3.bf16.msra.mxu1 %v11898_v3  ;;  %v15641_v43 = vld [vmem:[#allocation4 + $0x129] sm:$0xff]  ;;  %v8084_v16 = vadd.f32 %v15478_v13, %v8036_v9  ;;  %v8739_v6 = vmax.f32 %v8657_v46, %v8698_v30  ;;  %v8452_v44 = vmax.f32 %v8408_v22, %v8369_v26  ;;  %v8779_v24 = vld [vmem:[#allocation4 + $0x11b] sm:$0xff]  ;;  %v8453_v51 = vmax.f32 %v8409_v27, %v8370_v14  ;;  %v7995_v46 = vpop.f32.mrb[42].mxu0 }
 0x894   : > { %v8246_v11 = vld [vmem:[#allocation4 + $0x125] sm:$0xff]  ;;  %v8658_v12 = vmax.f32 %v8614_v4, %v15641_v43  ;;  %v8820_v61 = vmax.f32 %v8738_v57, %v8779_v24  ;;  %v8763_v58 = vld [vmem:[#allocation4 + $0x9b] sm:$0xff]  ;;  %v8615_v54 = vmax.f32 %v8533_v7, %v15635_v8  ;;  %v8247_v56 = vld [vmem:[#allocation4 + $0x12d] sm:$0xff]  ;;  %v8167_v37 = vmul.f32 %v8126_v5, %v16097_v1  ;;  %v11841_v60 = vpop.f32.mrb[43].mxu0 }
 0x895   : > { %v8780_v49 = vld [vmem:[#allocation4 + $0x123] sm:$0xff]  ;;  %v8125_v59 = vmax.f32 %v8084_v16, 0.0  ;;  %v8804_v53 = vmax.f32 %v8722_v45, %v8763_v58  ;;  %v8288_v48 = vld [vmem:[#allocation4 + $0x12e] sm:$0xff]  ;;  %v16099_v7 = vld [vmem:[#allocation48_spill] sm:$0xff] }
 0x896   : > { %v8287_v42 = vld [vmem:[#allocation4 + $0x126] sm:$0xff]  ;;  %v8821_v62 = vmax.f32 %v8739_v6, %v8780_v49  ;;  %v8740_v47 = vmax.f32 %v8658_v12, %v8699_v38  ;;  %v8831_v57 = vld [vmem:[%s15806_s8] sm:$0xff]  ;;  %8208 = vst.msk [vmem:[#allocation4 + $0x150] sm:$0xff] %vm389_vm3, %v8167_v37  ;;  %v8329_v45 = vmax.f32 %v8247_v56, %v8288_v48  ;;  %v8840_v28 = vld [vmem:[%s15806_s8 + $0x48] sm:$0xff] }
 0x897   : > { %v8493_v18 = vld [vmem:[#allocation4 + $0x128] sm:$0xff]  ;;  %v8328_v39 = vmax.f32 %v8246_v11, %v8287_v42  ;;  %v8166_v29 = vmul.f32 %v8125_v59, %v16096_v35  ;;  %v11902_v23 = vpack.c.bf16 %v8805_v21, %v8804_v53  ;;  %v8835_v41 = vld [vmem:[%s15806_s8 + $0x20] sm:$0xff]  ;;  %v8837_v35 = vld [vmem:[%s15806_s8 + $0x30] sm:$0xff] }
 0x898   : > { %v11900_v40 = vpack.c.bf16 %v8821_v62, %v8820_v61  ;;  %v8534_v25 = vmax.f32 %v8452_v44, %v8493_v18  ;;  %v16098_v33 = vld [vmem:[#allocation54_spill] sm:$0xff]  ;;  %v8494_v17 = vld [vmem:[#allocation4 + $0x130] sm:$0xff]  ;;  %v8411_v31 = vmax.f32 %v8329_v45, %v8370_v14  ;;  %v8841_v14 = vld [vmem:[%s15806_s8 + $0x50] sm:$0xff] }
 0x899   : > { %v8576_v55 = vld [vmem:[#allocation4 + $0x131] sm:$0xff]  ;;  %v8410_v52 = vmax.f32 %v8328_v39, %v8369_v26  ;;  %8207 = vst.msk [vmem:[#allocation4 + $0x148] sm:$0xff] %vm389_vm3, %v8166_v29  ;;  %v8038_v3 = vadd.f32 %v7992_v34, %v16098_v33  ;;  %v8577_v2 = vld [vmem:[#allocation4 + $0x139] sm:$0xff]  ;;  %v8535_v36 = vmax.f32 %v8453_v51, %v8494_v17  ;;  %v8838_v61 = vld [vmem:[%s15806_s8 + $0x38] sm:$0xff] }
 0x89a   : > { %11901 = vmatprep.subr.bf16.mxu1 %v11900_v40  ;;  %v8659_v8 = vmax.f32 %v8615_v54, %v8576_v55  ;;  %v8371_v15 = vld [vmem:[#allocation4 + $0x137] sm:$0xff]  ;;  %v8781_v22 = vld [vmem:[#allocation4 + $0x12b] sm:$0xff]  ;;  %v8616_v30 = vmax.f32 %v8534_v25, %v15641_v43  ;;  %v8624_v17 = vld [vmem:[#allocation4 + $0x161] sm:$0xff] }
 0x89b   : > { %11903 = vmatpush3.bf16.msra.mxu1 %v11902_v23  ;;  %v8700_v20 = vld [vmem:[#allocation4 + $0x132] sm:$0xff]  ;;  %v8454_v9 = vmax.f32 %v8410_v52, %v8371_v15  ;;  %v8086_v10 = vadd.f32 %v15478_v13, %v8038_v3  ;;  %v8249_v4 = vld [vmem:[#allocation4 + $0x13d] sm:$0xff]  ;;  %v8822_v32 = vmax.f32 %v8740_v47, %v8781_v22  ;;  %v8834_v43 = vld [vmem:[%s15806_s8 + $0x18] sm:$0xff]  ;;  %v8617_v59 = vmax.f32 %v8535_v36, %v8576_v55 }
 0x89c   : > { %v8248_v63 = vld [vmem:[#allocation4 + $0x135] sm:$0xff]  ;;  %v8741_v26 = vmax.f32 %v8659_v8, %v8700_v20  ;;  %v8290_v6 = vld [vmem:[#allocation4 + $0x13e] sm:$0xff]  ;;  %v8660_v44 = vmax.f32 %v8616_v30, %v8577_v2 }
 0x89d   : > { %v8782_v16 = vld [vmem:[#allocation4 + $0x133] sm:$0xff]  ;;  %v8127_v0 = vmax.f32 %v8086_v10, 0.0  ;;  %v8372_v13 = vld [vmem:[#allocation4 + $0x13f] sm:$0xff]  ;;  %v8331_v21 = vmax.f32 %v8249_v4, %v8290_v6 }
 0x89e   : > { %v8289_v50 = vld [vmem:[#allocation4 + $0x136] sm:$0xff]  ;;  %v8823_v19 = vmax.f32 %v8741_v26, %v8782_v16  ;;  %8949 = vmatmul.mubr.f32.vlgmr.msra.gmra.mrb[16].mxu1 %v8831_v57  ;;  %v8455_v18 = vmax.f32 %v8411_v31, %v8372_v13  ;;  %v8496_v52 = vld [vmem:[#allocation4 + $0x140] sm:$0xff] }
 0x89f   : > { %v8495_v11 = vld [vmem:[#allocation4 + $0x138] sm:$0xff]  ;;  %v8330_v24 = vmax.f32 %v8248_v63, %v8289_v50  ;;  %8953 = vmatprep.mubr.f32.mxu1 %v8835_v41  ;;  %v8168_v12 = vmul.f32 %v8127_v0, %v16099_v7  ;;  %v8413_v38 = vmax.f32 %v8331_v21, %v8372_v13  ;;  %v8498_v41 = vld [vmem:[#allocation4 + $0x150] sm:$0xff]  ;;  %v8706_v16 = vld [vmem:[#allocation4 + $0x162] sm:$0xff] }
 0x8a0   : > { %v8536_v49 = vmax.f32 %v8454_v9, %v8495_v11  ;;  %v11904_v42 = vpack.c.bf16 %v8823_v19, %v8822_v32  ;;  %v8578_v62 = vld [vmem:[#allocation4 + $0x141] sm:$0xff]  ;;  %v8579_v5 = vld [vmem:[#allocation4 + $0x149] sm:$0xff]  ;;  %v8537_v57 = vmax.f32 %v8455_v18, %v8496_v52  ;;  %v8844_v46 = vld [vmem:[%s15806_s8 + $0x68] sm:$0xff] }
 0x8a1   : > { %v8701_v58 = vld [vmem:[#allocation4 + $0x13a] sm:$0xff]  ;;  %v8412_v53 = vmax.f32 %v8330_v24, %v8371_v15  ;;  %8209 = vst.msk [vmem:[#allocation4 + $0x158] sm:$0xf] %vm396_vm4, %v8168_v12  ;;  %v8661_v54 = vmax.f32 %v8617_v59, %v8578_v62  ;;  %v8415_v39 = vld [vmem:[#allocation4 + $0x147] sm:$0xff]  ;;  %v8416_v55 = vld [vmem:[#allocation4 + $0x14f] sm:$0xff] }
 0x8a2   : > { %11905 = vmatprep.subr.bf16.mxu1 %v11904_v42  ;;  %v8742_v27 = vmax.f32 %v8660_v44, %v8701_v58  ;;  %8954 = vmatmul.mubr.f32.gmra.mrb[18].mxu1 %v8834_v43  ;;  %v8702_v29 = vld [vmem:[#allocation4 + $0x142] sm:$0xff]  ;;  %v8618_v40 = vmax.f32 %v8536_v49, %v8577_v2  ;;  %v8457_v37 = vmax.f32 %v8413_v38, %v8416_v55  ;;  %v8703_v9 = vld [vmem:[#allocation4 + $0x14a] sm:$0xff] }
 0x8a3   : > { %11907 = vmatpush3.bf16.msra.mxu1 %v11904_v42  ;;  %v8456_v25 = vmax.f32 %v8412_v53, %v8415_v39  ;;  %v8250_v34 = vld [vmem:[#allocation4 + $0x145] sm:$0xf]  ;;  %8958 = vmatprep.mubr.f32.mxu1 %v8838_v61  ;;  %v8743_v23 = vmax.f32 %v8661_v54, %v8702_v29  ;;  %v8783_v56 = vld [vmem:[#allocation4 + $0x13b] sm:$0xff]  ;;  %v8619_v2 = vmax.f32 %v8537_v57, %v8578_v62  ;;  %v8843_v0 = vld [vmem:[%s15806_s8 + $0x60] sm:$0xff] }
 0x8a4   : > { %v8497_v47 = vld [vmem:[#allocation4 + $0x148] sm:$0xff]  ;;  %v8662_v1 = vmax.f32 %v8618_v40, %v8579_v5  ;;  %v8824_v3 = vmax.f32 %v8742_v27, %v8783_v56  ;;  %v8539_v63 = vmax.f32 %v8457_v37, %v8498_v41  ;;  %v8847_v49 = vld [vmem:[%s15806_s8 + $0x80] sm:$0xff]  ;;  %v8836_v56 = vld [vmem:[%s15806_s8 + $0x28] sm:$0xff] }
 0x8a5   : > { %v8291_v51 = vld [vmem:[#allocation4 + $0x146] sm:$0xf]  ;;  %v8538_v33 = vmax.f32 %v8456_v25, %v8497_v47  ;;  %v8785_v21 = vld [vmem:[#allocation4 + $0x14b] sm:$0xff]  ;;  %v8852_v47 = vld [vmem:[%s15806_s8 + $0xa8] sm:$0xff] }
 0x8a6   : > { %v8784_v48 = vld [vmem:[#allocation4 + $0x143] sm:$0xff]  ;;  %v8332_v15 = vmax.f32 %v8250_v34, %v8291_v51  ;;  %8959 = vmatmul.mubr.f32.gmra.mrb[20].mxu1 %v8837_v35  ;;  %v8744_v26 = vmax.f32 %v8662_v1, %v8703_v9  ;;  %v8789_v38 = vld [vmem:[#allocation4 + $0x16b] sm:$0xf]  ;;  %v8848_v37 = vld [vmem:[%s15806_s8 + $0x88] sm:$0xff] }
 0x8a7   : > { %v8825_v8 = vmax.f32 %v8743_v23, %v8784_v48  ;;  %8963 = vmatprep.mubr.f32.mxu1 %v8841_v14  ;;  %v8620_v22 = vmax.f32 %v8538_v33, %v8579_v5  ;;  %v8373_v30 = vld [vmem:[#allocation4 + $0x147] sm:$0xf]  ;;  %v8839_v48 = vld [vmem:[%s15806_s8 + $0x40] sm:$0xff] }
 0x8a8   : > { %v8580_v10 = vld [vmem:[#allocation4 + $0x151] sm:$0xff]  ;;  %v8623_v60 = vld [vmem:[#allocation4 + $0x159] sm:$0xff]  ;;  %v8414_v32 = vmax.f32 %v8332_v15, %v8373_v30  ;;  %v8788_v24 = vld [vmem:[#allocation4 + $0x163] sm:$0xff]  ;;  %v8826_v42 = vmax.f32 %v8744_v26, %v8785_v21 }
 0x8a9   : > { %v11908_v20 = vpack.c.bf16 %v8825_v8, %v8824_v3  ;;  %v8663_v45 = vmax.f32 %v8619_v2, %v8580_v10  ;;  %v8621_v4 = vmax.f32 %v8539_v63, %v8580_v10  ;;  %v8704_v36 = vld [vmem:[#allocation4 + $0x152] sm:$0xff]  ;;  %v8664_v50 = vmax.f32 %v8620_v22, %v8623_v60  ;;  %v8705_v11 = vld [vmem:[#allocation4 + $0x15a] sm:$0xff]  ;;  %v8625_v62 = vld [vmem:[#allocation4 + $0x169] sm:$0xf] }
 0x8aa   : > { %8964 = vmatmul.mubr.f32.gmra.mrb[22].mxu1 %v8840_v28  ;;  %v8417_v6 = vld [vmem:[#allocation4 + $0x157] sm:$0xf]  ;;  %v8787_v58 = vld [vmem:[#allocation4 + $0x15b] sm:$0xff]  ;;  %v8846_v54 = vld [vmem:[%s15806_s8 + $0x78] sm:$0xff] }
 0x8ab   : > { %11909 = vmatprep.subr.bf16.mxu1 %v11908_v20  ;;  %8968 = vmatprep.mubr.f32.mxu1 %v8844_v46  ;;  %v8745_v19 = vmax.f32 %v8663_v45, %v8704_v36  ;;  %v8665_v44 = vmax.f32 %v8621_v4, %v8624_v17  ;;  %v8458_v13 = vmax.f32 %v8414_v32, %v8417_v6  ;;  %v8786_v43 = vld [vmem:[#allocation4 + $0x153] sm:$0xff]  ;;  %v8850_v14 = vld [vmem:[%s15806_s8 + $0x98] sm:$0xff]  ;;  %v8849_v25 = vld [vmem:[%s15806_s8 + $0x90] sm:$0xff] }
 0x8ac   : > { %11911 = vmatpush3.bf16.msra.mxu1 %v11908_v20  ;;  %v8746_v7 = vmax.f32 %v8664_v50, %v8705_v11  ;;  %v8499_v12 = vld [vmem:[#allocation4 + $0x158] sm:$0xf]  ;;  %v8707_v29 = vld [vmem:[#allocation4 + $0x16a] sm:$0xf]  ;;  %v8853_v23 = vld [vmem:[%s15806_s8 + $0xb0] sm:$0xff] }
 0x8ad   : > { %v8827_v59 = vmax.f32 %v8745_v19, %v8786_v43  ;;  %v8747_v31 = vmax.f32 %v8665_v44, %v8706_v16  ;;  %v8540_v61 = vmax.f32 %v8458_v13, %v8499_v12  ;;  %v8581_v53 = vld [vmem:[#allocation4 + $0x159] sm:$0xf]  ;;  %v8833_v51 = vld [vmem:[%s15806_s8 + $0x10] sm:$0xff]  ;;  %v8842_v52 = vld [vmem:[%s15806_s8 + $0x58] sm:$0xff] }
 0x8ae   : > { %8969 = vmatmul.mubr.f32.gmra.mrb[24].mxu1 %v8843_v0  ;;  %v8828_v18 = vmax.f32 %v8746_v7, %v8787_v58  ;;  %v8845_v1 = vld [vmem:[%s15806_s8 + $0x70] sm:$0xff]  ;;  %v8851_v33 = vld [vmem:[%s15806_s8 + $0xa0] sm:$0xff]  ;;  %v8854_v3 = vld [vmem:[%s15806_s8 + $0xb8] sm:$0xff] }
 0x8af   : > { %8973 = vmatprep.mubr.f32.mxu1 %v8847_v49  ;;  %v11912_v27 = vpack.c.bf16 %v8827_v59, %v8826_v42  ;;  %v8829_v39 = vmax.f32 %v8747_v31, %v8788_v24  ;;  %v8622_v35 = vmax.f32 %v8540_v61, %v8581_v53 }
 0x8b1   : > { %11913 = vmatprep.subr.bf16.mxu1 %v11912_v27  ;;  %v11916_v5 = vpack.c.bf16 %v8829_v39, %v8828_v18  ;;  %v8666_v40 = vmax.f32 %v8622_v35, %v8625_v62 }
 0x8b2   : > { %8974 = vmatmul.mubr.f32.gmra.mrb[26].mxu1 %v8846_v54 }
 0x8b3   : > { %11915 = vmatpush3.bf16.msra.mxu1 %v11912_v27  ;;  %8978 = vmatprep.mubr.f32.mxu1 %v8850_v14  ;;  %v8748_v34 = vmax.f32 %v8666_v40, %v8707_v29 }
 0x8b4   : > { %11917 = vmatprep.subr.bf16.mxu1 %v11916_v5 }
 0x8b5   : > { %v8830_v55 = vmax.f32 %v8748_v34, %v8789_v38 }
 0x8b6   : > { %8979 = vmatmul.mubr.f32.gmra.mrb[28].mxu1 %v8849_v25 }
 0x8b7   : > { %11919 = vmatpush3.bf16.msra.mxu1 %v11916_v5  ;;  %8983 = vmatprep.mubr.f32.mxu1 %v8853_v23 }
 0x8b8   : > { %11858 = vmatprep.subr.msk.mxu1 %vm8880_vm5, %v8830_v55 }
 0x8ba   : > { %8984 = vmatmul.mubr.f32.gmra.mrb[30].mxu1 %v8852_v47 }
 0x8bb   : > { %11859 = vmatpush3.msk.msra.mxu1 %vm8880_vm5, %v8830_v55  ;;  %11860 = vmatprep.mubr.msk.f32.mxu1 %vm8855_vm6, %v8833_v51 }
 0x8be   : > { %11861 = vmatmul.mubr.msk.f32.vlgmr.msra.gmra.mrb[32].mxu1 %vm8855_vm6, %v8836_v56 }
 0x8bf   : > { %11863 = vmatprep.mubr.msk.f32.mxu1 %vm8855_vm6, %v8839_v48 }
 0x8c2   : > { %11864 = vmatmul.mubr.msk.f32.gmra.mrb[34].mxu1 %vm8855_vm6, %v8842_v52 }
 0x8c3   : > { %11866 = vmatprep.mubr.msk.f32.mxu1 %vm8855_vm6, %v8845_v1 }
 0x8c6   : > { %11867 = vmatmul.mubr.msk.f32.gmra.mrb[36].mxu1 %vm8855_vm6, %v8848_v37 }
 0x8c7   : > { %11869 = vmatprep.mubr.msk.f32.mxu1 %vm8855_vm6, %v8851_v33 }
 0x8ca   : > { %11870 = vmatmul.mubr.msk.f32.gmra.mrb[38].mxu1 %vm8855_vm6, %v8854_v3 }
 0x971   : > { %v10129_v8 = vpop.f32.mrb[16].mxu1 }
 0x972   : > { %v10130_v57 = vpop.f32.mrb[17].mxu1 }
 0x973   : > { %v10131_v15 = vadd.f32 %v10130_v57, %v10129_v8 }
 0x975   : > { %v10132_v41 = vpop.f32.mrb[18].mxu1 }
 0x976   : > { %v10133_v28 = vpop.f32.mrb[19].mxu1 }
 0x977   : > { %v10134_v20 = vadd.f32 %v10133_v28, %v10132_v41 }
 0x979   : > { %v10135_v2 = vpop.f32.mrb[20].mxu1 }
 0x97a   : > { %v10136_v9 = vpop.f32.mrb[21].mxu1 }
 0x97b   : > { %v10137_v63 = vadd.f32 %v10136_v9, %v10135_v2 }
 0x97d   : > { %v10138_v46 = vpop.f32.mrb[22].mxu1 }
 0x97e   : > { %v10139_v10 = vpop.f32.mrb[23].mxu1 }
 0x97f   : > { %v10140_v26 = vadd.f32 %v10139_v10, %v10138_v46 }
 0x981   : > { %v10141_v22 = vpop.f32.mrb[24].mxu1 }
 0x982   : > { %v10142_v17 = vpop.f32.mrb[25].mxu1 }
 0x983   : > { %v10143_v30 = vadd.f32 %v10142_v17, %v10141_v22 }
 0x985   : > { %v10144_v45 = vpop.f32.mrb[26].mxu1 }
 0x986   : > { %v10145_v4 = vpop.f32.mrb[27].mxu1 }
 0x987   : > { %v10146_v60 = vadd.f32 %v10145_v4, %v10144_v45 }
 0x989   : > { %v10147_v16 = vpop.f32.mrb[28].mxu1 }
 0x98a   : > { %v10148_v32 = vpop.f32.mrb[29].mxu1 }
 0x98b   : > { %v10149_v36 = vadd.f32 %v10148_v32, %v10147_v16 }
 0x98d   : > { %v10150_v50 = vpop.f32.mrb[30].mxu1 }
 0x98e   : > { %v10151_v6 = vpop.f32.mrb[31].mxu1 }
 0x98f   : > { %v10152_v0 = vadd.f32 %v10151_v6, %v10150_v50 }
 0x991   : > { %v11862_v19 = vpop.f32.mrb[32].mxu1 }
 0x992   : > { %v9061_v44 = vadd.f32 %v11862_v19, %v10134_v20  ;;  %v9055_v11 = vpop.f32.mrb[33].mxu1 }
 0x993   : > { %v9056_v24 = vadd.f32 %v10131_v15, %v9055_v11 }
 0x994   : > { %9095 = vst.msk [vmem:[%s325_s17 + $0x8] sm:$0xff] %vm389_vm3, %v9061_v44 }
 0x995   : > { %9094 = vst.msk [vmem:[%s325_s17] sm:$0xff] %vm389_vm3, %v9056_v24  ;;  %v11865_v13 = vpop.f32.mrb[34].mxu1 }
 0x996   : > { %v9071_v49 = vadd.f32 %v11865_v13, %v10140_v26  ;;  %v9065_v21 = vpop.f32.mrb[35].mxu1 }
 0x997   : > { %v9066_v43 = vadd.f32 %v10137_v63, %v9065_v21 }
 0x998   : > { %9097 = vst.msk [vmem:[%s325_s17 + $0x18] sm:$0xff] %vm389_vm3, %v9071_v49 }
 0x999   : > { %9096 = vst.msk [vmem:[%s325_s17 + $0x10] sm:$0xff] %vm389_vm3, %v9066_v43  ;;  %v11868_v7 = vpop.f32.mrb[36].mxu1 }
 0x99a   : > { %v9081_v12 = vadd.f32 %v11868_v7, %v10146_v60  ;;  %v9075_v42 = vpop.f32.mrb[37].mxu1 }
 0x99b   : > { %v9076_v59 = vadd.f32 %v10143_v30, %v9075_v42 }
 0x99c   : > { %9099 = vst.msk [vmem:[%s325_s17 + $0x28] sm:$0xff] %vm389_vm3, %v9081_v12 }
 0x99d   : > { %9098 = vst.msk [vmem:[%s325_s17 + $0x20] sm:$0xff] %vm389_vm3, %v9076_v59  ;;  %v11871_v31 = vpop.f32.mrb[38].mxu1 }
 0x99e   : > { %v9091_v61 = vadd.f32 %v11871_v31, %v10152_v0  ;;  %v9085_v62 = vpop.f32.mrb[39].mxu1 }
 0x99f   : > { %v9086_v58 = vadd.f32 %v10149_v36, %v9085_v62 }
 0x9a0   : > { %9101 = vst.msk [vmem:[%s325_s17 + $0x38] sm:$0xff] %vm389_vm3, %v9091_v61 }
 0x9a1   : > { %9100 = vst.msk [vmem:[%s325_s17 + $0x30] sm:$0xff] %vm389_vm3, %v9086_v58 }
 0x9a2   : > { %12044 = shalt.err (!%p12041_p3)
}
 0x9a3   : > { %s12045_s21 = scalar_lea.hbm %s15749_s25, 1024  ;;  %s12049_s22 = scalar_lea.hbm %s15807_s9, 2048 }
 0x9a4   : > { %p12046_p4 = scmp.ne.s32.totalorder %s15749_s25, %s12045_s21  ;;  %p12050_p9 = scmp.lt.u32.totalorder %s15749_s25, %s15807_s9 }
 0x9a5   : > { %p12051_p10 = scmp.lt.u32.totalorder %s12049_s22, %s12045_s21  ;;  %p12053_p12 = scmp.lt.u32.totalorder %s12045_s21, %s15749_s25 }
 0x9a6   : > { %p12047_p7 = pnand %p12046_p4, %p12189_p5 }
 0x9a7   : > { %p12052_p11 = por %p12051_p10, %p12050_p9 }
 0x9a8   : > { %p12048_p8 = pneg %p12047_p7 }
 0x9a9   : > { %p12054_p13 = por %p12053_p12, %p12052_p11 }
 0x9ab   : > { %p12055_p0 = pnand %p12054_p13, %p12048_p8 }
 0x9ad   : > { %12058 = shalt.err (!%p12055_p0)
}
 0x9ae   : > { %s12099_s27 = smov 128   ;;  %s12100_s28 = smov 8  }
 0x9af   : > { %11925 = dma.vmem_to_hbm [thread:$0]  (%p12189_p5), %s15751_s23, 1024, %s15749_s25, %s15757_s13, %s12099_s27, %s12099_s27, %s12100_s28  }
 0x9b0 PF: > { %p11931_p1 = scmp.ge.s32.totalorder %s12093_s12, 2  ;;  %s9131_s29 = sand.u32 1, %s12081_s30  }
 0x9b1   : > { %s9132_s14 = scalar_lea.sflag [#allocation6], %s9131_s29 }
 0x9b2   : > { %p11928_p2 = pnand %p11931_p1, %p12193_p6 }
 0x9b4   : > { %12076 = dma.done.wait (!%p11928_p2), %s9132_s14, 1024  }
 0x9b5   : > { %12078 = vsyncadd (!%p11928_p2), %s9132_s14, 4294966272  ;;  %p19_p3 = scmp.ge.s32.totalorder %s12176_s15, 4   ;;  %s16100_s30 = smov %s12085_s10 }
 0x9b6   : > { %s16101_s10 = smov %s12089_s11  ;;  %s16102_s11 = smov %s12187_s18 }
 0x9b7   : > { %s16103_s12 = smov %s12176_s15  ;;  %21 = sbr.rel (!%p19_p3) target bundleno = 3 (0x3), region = 91 }
 0x9be   :  { %9137 = vsyncpa [#allocation6], 1 }
 0x9bf   :  { %9139 = vsyncpa [#allocation6 + $0x1], 1 }

</bundles_post_ra>
